<compile_context>
chip_gen: v7x
topology: tpu7x:2x2x1
jax: 0.10.0
libtpu: 0.0.40
codegen_flags: <defaults>
</compile_context>

<pallas_src>
import functools

import jax
import jax.numpy as jnp
from jax.experimental import pallas as pl
from jax.experimental.pallas import tpu as pltpu


# ----------------------------------------------------------------------------
# Config (synthetic, small)
# ----------------------------------------------------------------------------
CFG = dict(
    hidden_size=32,
    num_attn_heads=4,       # attention head dim = 8
    num_lact_heads=2,       # lact head dim = 16
    inter_multi=1.0,        # fast-weight inner dim = 16
    window_size=4,
    lact_chunk_size=4,
    num_hidden_layers=2,
    mlp_inter=64,
    vocab_size=64,
    fw_init_gain=0.5,
)

# Per-layer stacked parameter order (leading dim = layer index L).
STACK_FIELDS = (
    "ln1_g", "ln1_b", "aqkv_w", "aqkv_b", "ao_w", "ao_b",
    "ln2_g", "ln2_b", "tqkvlr_w", "tqkvlr_b", "to_w", "to_b",
    "fw0", "fw1", "fw2",
    "ln3_g", "ln3_b", "mgu_w", "mgu_b", "md_w", "md_b",
)
_NS = len(STACK_FIELDS)
# Dense weights fed to the MXU are pre-cast to bf16 host-side.
BF16_FIELDS = {"aqkv_w", "ao_w", "tqkvlr_w", "to_w", "mgu_w", "md_w"}


# ----------------------------------------------------------------------------
# Small in-kernel helpers (all f32 elementwise; bf16 only as MXU operands)
# ----------------------------------------------------------------------------
def _layernorm(x, g, b, eps=1e-5):
    mu = jnp.mean(x, axis=-1, keepdims=True)
    var = jnp.mean((x - mu) * (x - mu), axis=-1, keepdims=True)
    return (x - mu) * jax.lax.rsqrt(var + eps) * g + b


def _mm(a, w, bias=None):
    # bf16 operands into the MXU, f32 accumulation.  `w` is already bf16
    # (pre-cast host-side); activations are cast here.
    y = jnp.dot(a.astype(jnp.bfloat16), w.astype(jnp.bfloat16),
                preferred_element_type=jnp.float32)
    if bias is not None:
        y = y + bias
    return y


def _softplus(x):
    return jnp.maximum(x, 0.0) + jnp.log(1.0 + jnp.exp(-jnp.abs(x)))


def _window_mask(S, window):
    ii = jax.lax.broadcasted_iota(jnp.int32, (S, S), 0)
    jj = jax.lax.broadcasted_iota(jnp.int32, (S, S), 1)
    return (jj <= ii) & (jj > ii - window)        # causal sliding window


# ----------------------------------------------------------------------------
# One LaCTSWIGLU layer, operating on a (S, D) value slab (one batch element)
# ----------------------------------------------------------------------------
def _lact_layer(x, prm, *, H, Hl, chunk, win_mask):
    (ln1_g, ln1_b, aqkv_w, aqkv_b, ao_w, ao_b,
     ln2_g, ln2_b, tqkvlr_w, tqkvlr_b, to_w, to_b,
     fw0, fw1, fw2,
     ln3_g, ln3_b, mgu_w, mgu_b, md_w, md_b) = prm
    S, D = x.shape
    Dh = D // H
    dl = D // Hl

    # ------------- sub-layer 1: residual sliding-window attention -----------
    h = _layernorm(x, ln1_g, ln1_b)
    qkv = _mm(h, aqkv_w, aqkv_b)                                  # (S, 3D) f32
    scale = Dh ** -0.5
    # TODO(synk): RoPE (rope_theta) and padding attention_mask not applied.
    head_outs = []
    for hh in range(H):                                           # H=4 static
        c0 = hh * Dh
        qh = qkv[:, c0:c0 + Dh]
        kh = qkv[:, D + c0:D + c0 + Dh]
        vh = qkv[:, 2 * D + c0:2 * D + c0 + Dh]
        s = jnp.einsum('qd,kd->qk', qh, kh,
                       preferred_element_type=jnp.float32) * scale   # NT, no .T
        s = jnp.where(win_mask, s, -1e30)
        m = jnp.max(s, axis=-1, keepdims=True)
        e = jnp.exp(s - m)
        p = e * pl.reciprocal(jnp.sum(e, axis=-1, keepdims=True), approx=True)
        head_outs.append(jnp.einsum('qk,kd->qd', p, vh,
                                    preferred_element_type=jnp.float32))
    attn = jnp.concatenate(head_outs, axis=-1)                    # (S, D) lane-dense
    x = x + _mm(attn, ao_w, ao_b)

    # -------- sub-layer 2: residual LaCT chunked fast-weight SwiGLU ----------
    h2 = _layernorm(x, ln2_g, ln2_b)
    proj = _mm(h2, tqkvlr_w, tqkvlr_b)                            # (S, 3D+Hl) fused qkv+lr
    lr = _softplus(proj[:, 3 * D:3 * D + Hl]) * 0.01              # (S, Hl)
    n_chunks = S // chunk
    ttt_outs = []
    for hh in range(Hl):                                          # Hl=2 static
        c0 = hh * dl
        q = jax.nn.silu(proj[:, c0:c0 + dl])
        k = jax.nn.silu(proj[:, D + c0:D + c0 + dl])
        v = jax.nn.silu(proj[:, 2 * D + c0:2 * D + c0 + dl])
        # l2-normalize q / k (attn_qk_norm)
        q = q * jax.lax.rsqrt(jnp.sum(q * q, axis=-1, keepdims=True) + 1e-6)
        k = k * jax.lax.rsqrt(jnp.sum(k * k, axis=-1, keepdims=True) + 1e-6)
        dout = v * lr[:, hh:hh + 1]        # per-token lr folded into grad signal
        w0 = fw0[hh].astype(jnp.float32)                          # (dl, di)
        w1 = fw1[hh].astype(jnp.float32)                          # (di, dl)
        w2 = fw2[hh].astype(jnp.float32)                          # (dl, di)
        chunk_outs = []
        for c in range(n_chunks):          # block-causal large chunks (serial)
            lo = c * chunk
            qc = q[lo:lo + chunk]
            kc = k[lo:lo + chunk]
            dc = dout[lo:lo + chunk]
            # apply current fast weights to this chunk's queries
            g0q = jnp.dot(qc, w0, preferred_element_type=jnp.float32)
            g2q = jnp.dot(qc, w2, preferred_element_type=jnp.float32)
            chunk_outs.append(jnp.dot(jax.nn.silu(g0q) * g2q, w1,
                                      preferred_element_type=jnp.float32))
            # one SGD step on  L = -sum(f(k) * v)  (lr pre-folded into dc)
            g0 = jnp.dot(kc, w0, preferred_element_type=jnp.float32)
            g2 = jnp.dot(kc, w2, preferred_element_type=jnp.float32)
            sig0 = jax.nn.sigmoid(g0)                 # shared by silu & grad
            sg0 = g0 * sig0                           # silu(g0)
            hidden = sg0 * g2
            dhid = jnp.einsum('cd,ed->ce', dc, w1,    # dc @ w1^T, NT, no .T
                              preferred_element_type=jnp.float32)
            dg0 = dhid * g2 * (sig0 + sg0 * (1.0 - sig0))
            dg2 = dhid * sg0
            kcT = jnp.transpose(kc)                   # tiny (dl, chunk) transpose
            dw1 = jnp.dot(jnp.transpose(hidden), dc,
                          preferred_element_type=jnp.float32)
            dw0 = jnp.dot(kcT, dg0, preferred_element_type=jnp.float32)
            dw2 = jnp.dot(kcT, dg2, preferred_element_type=jnp.float32)
            # TODO(synk): plain per-chunk SGD; no Muon orthogonalization /
            # momentum (use_muon / use_momentum reference options unknown).
            w0 = w0 + dw0
            w1 = w1 + dw1
            w2 = w2 + dw2
        ttt_outs.append(jnp.concatenate(chunk_outs, axis=0))      # (S, dl)
    ttt = jnp.concatenate(ttt_outs, axis=-1)                      # (S, D) lane-dense
    x = x + _mm(ttt, to_w, to_b)

    # ------------- sub-layer 3: residual SwiGLU MLP (fused gate+up) ----------
    h3 = _layernorm(x, ln3_g, ln3_b)
    Mi = mgu_w.shape[-1] // 2
    gu = _mm(h3, mgu_w, mgu_b)                                    # (S, 2*Mi)
    x = x + _mm(jax.nn.silu(gu[:, :Mi]) * gu[:, Mi:], md_w, md_b)
    return x


def _run_stack(x, stack, *, L, H, Hl, chunk, window):
    S = x.shape[0]
    win_mask = _window_mask(S, window)
    for l in range(L):                                            # L=2 static
        prm = tuple(r[l] for r in stack)                          # per-layer loads
        x = _lact_layer(x, prm, H=H, Hl=Hl, chunk=chunk, win_mask=win_mask)
    return x


# ----------------------------------------------------------------------------
# Single whole-model kernel (encoder + decoder), one grid step per batch elem
# ----------------------------------------------------------------------------
def _model_kernel(*refs, L, H, Hl, chunk, window):
    i = 0
    audio_ref, decx_ref = refs[0], refs[1]
    i = 2
    enc_stack = refs[i:i + _NS]; i += _NS
    enc_ln_g, enc_ln_b = refs[i], refs[i + 1]; i += 2
    dec_stack = refs[i:i + _NS]; i += _NS
    dec_ln_g, dec_ln_b = refs[i], refs[i + 1]; i += 2
    head_w, head_b = refs[i], refs[i + 1]; i += 2
    enc_out_ref, logits_ref = refs[i], refs[i + 1]

    # ----- encoder: layers + final LayerNorm --------------------------------
    x = audio_ref[0].astype(jnp.float32)                          # (Se, D)
    x = _run_stack(x, enc_stack, L=L, H=H, Hl=Hl, chunk=chunk, window=window)
    enc_out_ref[0] = _layernorm(x, enc_ln_g[...], enc_ln_b[...]).astype(
        enc_out_ref.dtype)

    # ----- decoder: layers + final LayerNorm + lm_head ----------------------
    y = decx_ref[0].astype(jnp.float32)                           # (Sd, D)
    y = _run_stack(y, dec_stack, L=L, H=H, Hl=Hl, chunk=chunk, window=window)
    y = _layernorm(y, dec_ln_g[...], dec_ln_b[...])
    logits_ref[0] = _mm(y, head_w[...], head_b[...]).astype(logits_ref.dtype)


def _whole_spec(a):
    # Whole-array VMEM block with a constant index map (no re-fetch across the
    # batch grid).  Last two block dims equal the full array dims -> valid.
    nd = a.ndim
    return pl.BlockSpec(a.shape, lambda b, _nd=nd: (0,) * _nd)


def lact_asr_model(audio_features, decoder_input_ids, params, cfg):
    B, Se, D = audio_features.shape
    Sd = decoder_input_ids.shape[1]
    V = params["lm_head_b"].shape[-1]
    chunk = cfg["lact_chunk_size"]
    assert Se % chunk == 0 and Sd % chunk == 0, "seq len must be multiple of chunk"

    # Token embedding gather stays in XLA (plain indexing); everything after
    # the embedding runs inside one fused Pallas kernel.
    dec_x = params["emb"][decoder_input_ids]                      # (B, Sd, D) f32

    flat_params = (list(params["enc_stack"])
                   + [params["enc_ln_g"], params["enc_ln_b"]]
                   + list(params["dec_stack"])
                   + [params["dec_ln_g"], params["dec_ln_b"],
                      params["lm_head_w"], params["lm_head_b"]])

    in_specs = ([pl.BlockSpec((1, Se, D), lambda b: (b, 0, 0)),
                 pl.BlockSpec((1, Sd, D), lambda b: (b, 0, 0))]
                + [_whole_spec(a) for a in flat_params])

    kern = functools.partial(
        _model_kernel,
        L=cfg["num_hidden_layers"], H=cfg["num_attn_heads"],
        Hl=cfg["num_lact_heads"], chunk=chunk, window=cfg["window_size"])

    enc_out, logits = pl.pallas_call(
        kern,
        grid=(B,),
        in_specs=in_specs,
        out_specs=(pl.BlockSpec((1, Se, D), lambda b: (b, 0, 0)),
                   pl.BlockSpec((1, Sd, V), lambda b: (b, 0, 0))),
        out_shape=(jax.ShapeDtypeStruct((B, Se, D), jnp.float32),
                   jax.ShapeDtypeStruct((B, Sd, V), jnp.float32)),
        compiler_params=pltpu.CompilerParams(
            dimension_semantics=("parallel",)),
    )(audio_features, dec_x, *flat_params)

    # Reference forward computes encoder_out but logits do not depend on it.
    del enc_out
    return logits


# ----------------------------------------------------------------------------
# Deterministic parameter init (stacked per stack, dense weights pre-cast bf16)
# ----------------------------------------------------------------------------
def _dense(key, shape, scale=0.02):
    return scale * jax.random.normal(key, shape, dtype=jnp.float32)


def init_layer_params(key, cfg):
    D = cfg["hidden_size"]
    Hl = cfg["num_lact_heads"]
    dl = D // Hl
    di = int(dl * cfg["inter_multi"])
    Mi = cfg["mlp_inter"]
    gain = cfg["fw_init_gain"]
    ks = jax.random.split(key, 11)
    # fused TTT qkv + lr projection: columns [q(D) | k(D) | v(D) | lr(Hl)]
    tqkvlr_w = jnp.concatenate([_dense(ks[2], (D, 3 * D)), _dense(ks[4], (D, Hl))],
                               axis=1)
    tqkvlr_b = jnp.concatenate([jnp.zeros((1, 3 * D), jnp.float32),
                                jnp.full((1, Hl), -2.0, jnp.float32)], axis=1)
    # fused MLP gate + up projection: columns [gate(Mi) | up(Mi)]
    mgu_w = jnp.concatenate([_dense(ks[8], (D, Mi)), _dense(ks[9], (D, Mi))], axis=1)
    return {
        "ln1_g": jnp.ones((1, D), jnp.float32), "ln1_b": jnp.zeros((1, D), jnp.float32),
        "ln2_g": jnp.ones((1, D), jnp.float32), "ln2_b": jnp.zeros((1, D), jnp.float32),
        "ln3_g": jnp.ones((1, D), jnp.float32), "ln3_b": jnp.zeros((1, D), jnp.float32),
        "aqkv_w": _dense(ks[0], (D, 3 * D)), "aqkv_b": jnp.zeros((1, 3 * D), jnp.float32),
        "ao_w": _dense(ks[1], (D, D)), "ao_b": jnp.zeros((1, D), jnp.float32),
        "tqkvlr_w": tqkvlr_w, "tqkvlr_b": tqkvlr_b,
        "to_w": _dense(ks[3], (D, D)), "to_b": jnp.zeros((1, D), jnp.float32),
        "fw0": gain * jax.random.normal(ks[5], (Hl, dl, di), jnp.float32) / jnp.sqrt(dl),
        "fw1": gain * jax.random.normal(ks[6], (Hl, di, dl), jnp.float32) / jnp.sqrt(di),
        "fw2": gain * jax.random.normal(ks[7], (Hl, dl, di), jnp.float32) / jnp.sqrt(dl),
        "mgu_w": mgu_w, "mgu_b": jnp.zeros((1, 2 * Mi), jnp.float32),
        "md_w": _dense(ks[10], (Mi, D)), "md_b": jnp.zeros((1, D), jnp.float32),
    }


def stack_layer_params(layer_list):
    stacked = []
    for f in STACK_FIELDS:
        arr = jnp.stack([lp[f] for lp in layer_list], axis=0)     # (L, ...)
        if f in BF16_FIELDS:
            arr = arr.astype(jnp.bfloat16)                        # MXU operands
        stacked.append(arr)
    return stacked


def init_params(key, cfg):
    D = cfg["hidden_size"]
    V = cfg["vocab_size"]
    L = cfg["num_hidden_layers"]
    keys = jax.random.split(key, 2 * L + 2)
    enc_layers = [init_layer_params(k, cfg) for k in keys[:L]]
    dec_layers = [init_layer_params(k, cfg) for k in keys[L:2 * L]]
    return {
        "enc_stack": stack_layer_params(enc_layers),
        "dec_stack": stack_layer_params(dec_layers),
        "enc_ln_g": jnp.ones((1, D), jnp.float32),
        "enc_ln_b": jnp.zeros((1, D), jnp.float32),
        "dec_ln_g": jnp.ones((1, D), jnp.float32),
        "dec_ln_b": jnp.zeros((1, D), jnp.float32),
        "emb": _dense(keys[2 * L], (V, D)),
        "lm_head_w": _dense(keys[2 * L + 1], (D, V)).astype(jnp.bfloat16),
        "lm_head_b": jnp.zeros((1, V), jnp.float32),
    }


# ----------------------------------------------------------------------------
# Example run
# ----------------------------------------------------------------------------
if __name__ == "__main__":
    cfg = CFG
    key = jax.random.PRNGKey(0)
    k_param, k_audio, k_ids = jax.random.split(key, 3)

    params = init_params(k_param, cfg)

    B, S_enc, S_dec = 2, 8, 8
    audio_features = jax.random.normal(
        k_audio, (B, S_enc, cfg["hidden_size"]), dtype=jnp.float32)
    decoder_input_ids = jax.random.randint(
        k_ids, (B, S_dec), 0, cfg["vocab_size"], dtype=jnp.int32)

    model = jax.jit(functools.partial(lact_asr_model, cfg=cfg))
    logits = model(audio_features, decoder_input_ids, params)
    jax.block_until_ready(logits)

    assert logits.shape == (B, S_dec, cfg["vocab_size"]), logits.shape
    assert bool(jnp.all(jnp.isfinite(logits)))
    print("KERNEL_OK")
</pallas_src>

<mosaic_0001>
module attributes {stable_mosaic.version = 11 : i64} {
  func.func @_model_kernel(%arg0: i32, %arg1: memref<1x8x32xf32, #tpu.memory_space<vmem>>, %arg2: memref<1x8x32xf32, #tpu.memory_space<vmem>>, %arg3: memref<2x1x32xf32, #tpu.memory_space<vmem>>, %arg4: memref<2x1x32xf32, #tpu.memory_space<vmem>>, %arg5: memref<2x32x96xbf16, #tpu.memory_space<vmem>>, %arg6: memref<2x1x96xf32, #tpu.memory_space<vmem>>, %arg7: memref<2x32x32xbf16, #tpu.memory_space<vmem>>, %arg8: memref<2x1x32xf32, #tpu.memory_space<vmem>>, %arg9: memref<2x1x32xf32, #tpu.memory_space<vmem>>, %arg10: memref<2x1x32xf32, #tpu.memory_space<vmem>>, %arg11: memref<2x32x98xbf16, #tpu.memory_space<vmem>>, %arg12: memref<2x1x98xf32, #tpu.memory_space<vmem>>, %arg13: memref<2x32x32xbf16, #tpu.memory_space<vmem>>, %arg14: memref<2x1x32xf32, #tpu.memory_space<vmem>>, %arg15: memref<2x2x16x16xf32, #tpu.memory_space<vmem>>, %arg16: memref<2x2x16x16xf32, #tpu.memory_space<vmem>>, %arg17: memref<2x2x16x16xf32, #tpu.memory_space<vmem>>, %arg18: memref<2x1x32xf32, #tpu.memory_space<vmem>>, %arg19: memref<2x1x32xf32, #tpu.memory_space<vmem>>, %arg20: memref<2x32x128xbf16, #tpu.memory_space<vmem>>, %arg21: memref<2x1x128xf32, #tpu.memory_space<vmem>>, %arg22: memref<2x64x32xbf16, #tpu.memory_space<vmem>>, %arg23: memref<2x1x32xf32, #tpu.memory_space<vmem>>, %arg24: memref<1x32xf32, #tpu.memory_space<vmem>>, %arg25: memref<1x32xf32, #tpu.memory_space<vmem>>, %arg26: memref<2x1x32xf32, #tpu.memory_space<vmem>>, %arg27: memref<2x1x32xf32, #tpu.memory_space<vmem>>, %arg28: memref<2x32x96xbf16, #tpu.memory_space<vmem>>, %arg29: memref<2x1x96xf32, #tpu.memory_space<vmem>>, %arg30: memref<2x32x32xbf16, #tpu.memory_space<vmem>>, %arg31: memref<2x1x32xf32, #tpu.memory_space<vmem>>, %arg32: memref<2x1x32xf32, #tpu.memory_space<vmem>>, %arg33: memref<2x1x32xf32, #tpu.memory_space<vmem>>, %arg34: memref<2x32x98xbf16, #tpu.memory_space<vmem>>, %arg35: memref<2x1x98xf32, #tpu.memory_space<vmem>>, %arg36: memref<2x32x32xbf16, #tpu.memory_space<vmem>>, %arg37: memref<2x1x32xf32, #tpu.memory_space<vmem>>, %arg38: memref<2x2x16x16xf32, #tpu.memory_space<vmem>>, %arg39: memref<2x2x16x16xf32, #tpu.memory_space<vmem>>, %arg40: memref<2x2x16x16xf32, #tpu.memory_space<vmem>>, %arg41: memref<2x1x32xf32, #tpu.memory_space<vmem>>, %arg42: memref<2x1x32xf32, #tpu.memory_space<vmem>>, %arg43: memref<2x32x128xbf16, #tpu.memory_space<vmem>>, %arg44: memref<2x1x128xf32, #tpu.memory_space<vmem>>, %arg45: memref<2x64x32xbf16, #tpu.memory_space<vmem>>, %arg46: memref<2x1x32xf32, #tpu.memory_space<vmem>>, %arg47: memref<1x32xf32, #tpu.memory_space<vmem>>, %arg48: memref<1x32xf32, #tpu.memory_space<vmem>>, %arg49: memref<32x64xbf16, #tpu.memory_space<vmem>>, %arg50: memref<1x64xf32, #tpu.memory_space<vmem>>, %arg51: memref<1x8x32xf32, #tpu.memory_space<vmem>>, %arg52: memref<1x8x64xf32, #tpu.memory_space<vmem>>) attributes {dimension_semantics = [#tpu.dimension_semantics<parallel>], iteration_bounds = array<i64: 2>, scalar_prefetch = 0 : i64, scratch_operands = 0 : i64, tpu.core_type = #tpu.core_type<tc>, window_params = [{transform_indices = @transform_0, window_bounds = array<i64: 1, 8, 32>}, {transform_indices = @transform_1, window_bounds = array<i64: 1, 8, 32>}, {pipeline_mode = #tpu.pipeline_mode<synchronous>, transform_indices = @transform_2, window_bounds = array<i64: 2, 1, 32>}, {pipeline_mode = #tpu.pipeline_mode<synchronous>, transform_indices = @transform_3, window_bounds = array<i64: 2, 1, 32>}, {pipeline_mode = #tpu.pipeline_mode<synchronous>, transform_indices = @transform_4, window_bounds = array<i64: 2, 32, 96>}, {pipeline_mode = #tpu.pipeline_mode<synchronous>, transform_indices = @transform_5, window_bounds = array<i64: 2, 1, 96>}, {pipeline_mode = #tpu.pipeline_mode<synchronous>, transform_indices = @transform_6, window_bounds = array<i64: 2, 32, 32>}, {pipeline_mode = #tpu.pipeline_mode<synchronous>, transform_indices = @transform_7, window_bounds = array<i64: 2, 1, 32>}, {pipeline_mode = #tpu.pipeline_mode<synchronous>, transform_indices = @transform_8, window_bounds = array<i64: 2, 1, 32>}, {pipeline_mode = #tpu.pipeline_mode<synchronous>, transform_indices = @transform_9, window_bounds = array<i64: 2, 1, 32>}, {pipeline_mode = #tpu.pipeline_mode<synchronous>, transform_indices = @transform_10, window_bounds = array<i64: 2, 32, 98>}, {pipeline_mode = #tpu.pipeline_mode<synchronous>, transform_indices = @transform_11, window_bounds = array<i64: 2, 1, 98>}, {pipeline_mode = #tpu.pipeline_mode<synchronous>, transform_indices = @transform_12, window_bounds = array<i64: 2, 32, 32>}, {pipeline_mode = #tpu.pipeline_mode<synchronous>, transform_indices = @transform_13, window_bounds = array<i64: 2, 1, 32>}, {pipeline_mode = #tpu.pipeline_mode<synchronous>, transform_indices = @transform_14, window_bounds = array<i64: 2, 2, 16, 16>}, {pipeline_mode = #tpu.pipeline_mode<synchronous>, transform_indices = @transform_15, window_bounds = array<i64: 2, 2, 16, 16>}, {pipeline_mode = #tpu.pipeline_mode<synchronous>, transform_indices = @transform_16, window_bounds = array<i64: 2, 2, 16, 16>}, {pipeline_mode = #tpu.pipeline_mode<synchronous>, transform_indices = @transform_17, window_bounds = array<i64: 2, 1, 32>}, {pipeline_mode = #tpu.pipeline_mode<synchronous>, transform_indices = @transform_18, window_bounds = array<i64: 2, 1, 32>}, {pipeline_mode = #tpu.pipeline_mode<synchronous>, transform_indices = @transform_19, window_bounds = array<i64: 2, 32, 128>}, {pipeline_mode = #tpu.pipeline_mode<synchronous>, transform_indices = @transform_20, window_bounds = array<i64: 2, 1, 128>}, {pipeline_mode = #tpu.pipeline_mode<synchronous>, transform_indices = @transform_21, window_bounds = array<i64: 2, 64, 32>}, {pipeline_mode = #tpu.pipeline_mode<synchronous>, transform_indices = @transform_22, window_bounds = array<i64: 2, 1, 32>}, {pipeline_mode = #tpu.pipeline_mode<synchronous>, transform_indices = @transform_23, window_bounds = array<i64: 1, 32>}, {pipeline_mode = #tpu.pipeline_mode<synchronous>, transform_indices = @transform_24, window_bounds = array<i64: 1, 32>}, {pipeline_mode = #tpu.pipeline_mode<synchronous>, transform_indices = @transform_25, window_bounds = array<i64: 2, 1, 32>}, {pipeline_mode = #tpu.pipeline_mode<synchronous>, transform_indices = @transform_26, window_bounds = array<i64: 2, 1, 32>}, {pipeline_mode = #tpu.pipeline_mode<synchronous>, transform_indices = @transform_27, window_bounds = array<i64: 2, 32, 96>}, {pipeline_mode = #tpu.pipeline_mode<synchronous>, transform_indices = @transform_28, window_bounds = array<i64: 2, 1, 96>}, {pipeline_mode = #tpu.pipeline_mode<synchronous>, transform_indices = @transform_29, window_bounds = array<i64: 2, 32, 32>}, {pipeline_mode = #tpu.pipeline_mode<synchronous>, transform_indices = @transform_30, window_bounds = array<i64: 2, 1, 32>}, {pipeline_mode = #tpu.pipeline_mode<synchronous>, transform_indices = @transform_31, window_bounds = array<i64: 2, 1, 32>}, {pipeline_mode = #tpu.pipeline_mode<synchronous>, transform_indices = @transform_32, window_bounds = array<i64: 2, 1, 32>}, {pipeline_mode = #tpu.pipeline_mode<synchronous>, transform_indices = @transform_33, window_bounds = array<i64: 2, 32, 98>}, {pipeline_mode = #tpu.pipeline_mode<synchronous>, transform_indices = @transform_34, window_bounds = array<i64: 2, 1, 98>}, {pipeline_mode = #tpu.pipeline_mode<synchronous>, transform_indices = @transform_35, window_bounds = array<i64: 2, 32, 32>}, {pipeline_mode = #tpu.pipeline_mode<synchronous>, transform_indices = @transform_36, window_bounds = array<i64: 2, 1, 32>}, {pipeline_mode = #tpu.pipeline_mode<synchronous>, transform_indices = @transform_37, window_bounds = array<i64: 2, 2, 16, 16>}, {pipeline_mode = #tpu.pipeline_mode<synchronous>, transform_indices = @transform_38, window_bounds = array<i64: 2, 2, 16, 16>}, {pipeline_mode = #tpu.pipeline_mode<synchronous>, transform_indices = @transform_39, window_bounds = array<i64: 2, 2, 16, 16>}, {pipeline_mode = #tpu.pipeline_mode<synchronous>, transform_indices = @transform_40, window_bounds = array<i64: 2, 1, 32>}, {pipeline_mode = #tpu.pipeline_mode<synchronous>, transform_indices = @transform_41, window_bounds = array<i64: 2, 1, 32>}, {pipeline_mode = #tpu.pipeline_mode<synchronous>, transform_indices = @transform_42, window_bounds = array<i64: 2, 32, 128>}, {pipeline_mode = #tpu.pipeline_mode<synchronous>, transform_indices = @transform_43, window_bounds = array<i64: 2, 1, 128>}, {pipeline_mode = #tpu.pipeline_mode<synchronous>, transform_indices = @transform_44, window_bounds = array<i64: 2, 64, 32>}, {pipeline_mode = #tpu.pipeline_mode<synchronous>, transform_indices = @transform_45, window_bounds = array<i64: 2, 1, 32>}, {pipeline_mode = #tpu.pipeline_mode<synchronous>, transform_indices = @transform_46, window_bounds = array<i64: 1, 32>}, {pipeline_mode = #tpu.pipeline_mode<synchronous>, transform_indices = @transform_47, window_bounds = array<i64: 1, 32>}, {pipeline_mode = #tpu.pipeline_mode<synchronous>, transform_indices = @transform_48, window_bounds = array<i64: 32, 64>}, {pipeline_mode = #tpu.pipeline_mode<synchronous>, transform_indices = @transform_49, window_bounds = array<i64: 1, 64>}, {transform_indices = @transform_50, window_bounds = array<i64: 1, 8, 32>}, {transform_indices = @transform_51, window_bounds = array<i64: 1, 8, 64>}]} {
    %c0 = arith.constant 0 : index
    %c0_0 = arith.constant 0 : index
    %c0_1 = arith.constant 0 : index
    %0 = vector.load %arg1[%c0, %c0_0, %c0_1] : memref<1x8x32xf32, #tpu.memory_space<vmem>>, vector<1x8x32xf32>
    %1 = vector.shape_cast %0 : vector<1x8x32xf32> to vector<8x32xf32>
    %2 = tpu.iota {dimensions = array<i32: 0>} : vector<8x8xi32>
    %3 = tpu.iota {dimensions = array<i32: 1>} : vector<8x8xi32>
    %4 = arith.cmpi sle, %3, %2 : vector<8x8xi32>
    %c4_i32 = arith.constant 4 : i32
    %5 = vector.broadcast %c4_i32 : i32 to vector<8x8xi32>
    %6 = arith.subi %2, %5 : vector<8x8xi32>
    %7 = arith.cmpi sgt, %3, %6 : vector<8x8xi32>
    %8 = arith.andi %4, %7 : vector<8x8xi1>
    %c0_2 = arith.constant 0 : index
    %c0_3 = arith.constant 0 : index
    %c0_4 = arith.constant 0 : index
    %9 = vector.load %arg3[%c0_2, %c0_3, %c0_4] : memref<2x1x32xf32, #tpu.memory_space<vmem>>, vector<1x1x32xf32>
    %10 = vector.shape_cast %9 : vector<1x1x32xf32> to vector<1x32xf32>
    %c0_5 = arith.constant 0 : index
    %c0_6 = arith.constant 0 : index
    %c0_7 = arith.constant 0 : index
    %11 = vector.load %arg4[%c0_5, %c0_6, %c0_7] : memref<2x1x32xf32, #tpu.memory_space<vmem>>, vector<1x1x32xf32>
    %12 = vector.shape_cast %11 : vector<1x1x32xf32> to vector<1x32xf32>
    %c0_8 = arith.constant 0 : index
    %c0_9 = arith.constant 0 : index
    %c0_10 = arith.constant 0 : index
    %13 = vector.load %arg5[%c0_8, %c0_9, %c0_10] : memref<2x32x96xbf16, #tpu.memory_space<vmem>>, vector<1x32x96xbf16>
    %14 = vector.shape_cast %13 : vector<1x32x96xbf16> to vector<32x96xbf16>
    %c0_11 = arith.constant 0 : index
    %c0_12 = arith.constant 0 : index
    %c0_13 = arith.constant 0 : index
    %15 = vector.load %arg6[%c0_11, %c0_12, %c0_13] : memref<2x1x96xf32, #tpu.memory_space<vmem>>, vector<1x1x96xf32>
    %16 = vector.shape_cast %15 : vector<1x1x96xf32> to vector<1x96xf32>
    %c0_14 = arith.constant 0 : index
    %c0_15 = arith.constant 0 : index
    %c0_16 = arith.constant 0 : index
    %17 = vector.load %arg7[%c0_14, %c0_15, %c0_16] : memref<2x32x32xbf16, #tpu.memory_space<vmem>>, vector<1x32x32xbf16>
    %18 = vector.shape_cast %17 : vector<1x32x32xbf16> to vector<32x32xbf16>
    %c0_17 = arith.constant 0 : index
    %c0_18 = arith.constant 0 : index
    %c0_19 = arith.constant 0 : index
    %19 = vector.load %arg8[%c0_17, %c0_18, %c0_19] : memref<2x1x32xf32, #tpu.memory_space<vmem>>, vector<1x1x32xf32>
    %20 = vector.shape_cast %19 : vector<1x1x32xf32> to vector<1x32xf32>
    %c0_20 = arith.constant 0 : index
    %c0_21 = arith.constant 0 : index
    %c0_22 = arith.constant 0 : index
    %21 = vector.load %arg9[%c0_20, %c0_21, %c0_22] : memref<2x1x32xf32, #tpu.memory_space<vmem>>, vector<1x1x32xf32>
    %22 = vector.shape_cast %21 : vector<1x1x32xf32> to vector<1x32xf32>
    %c0_23 = arith.constant 0 : index
    %c0_24 = arith.constant 0 : index
    %c0_25 = arith.constant 0 : index
    %23 = vector.load %arg10[%c0_23, %c0_24, %c0_25] : memref<2x1x32xf32, #tpu.memory_space<vmem>>, vector<1x1x32xf32>
    %24 = vector.shape_cast %23 : vector<1x1x32xf32> to vector<1x32xf32>
    %c0_26 = arith.constant 0 : index
    %c0_27 = arith.constant 0 : index
    %c0_28 = arith.constant 0 : index
    %25 = vector.load %arg11[%c0_26, %c0_27, %c0_28] : memref<2x32x98xbf16, #tpu.memory_space<vmem>>, vector<1x32x98xbf16>
    %26 = vector.shape_cast %25 : vector<1x32x98xbf16> to vector<32x98xbf16>
    %c0_29 = arith.constant 0 : index
    %c0_30 = arith.constant 0 : index
    %c0_31 = arith.constant 0 : index
    %27 = vector.load %arg12[%c0_29, %c0_30, %c0_31] : memref<2x1x98xf32, #tpu.memory_space<vmem>>, vector<1x1x98xf32>
    %28 = vector.shape_cast %27 : vector<1x1x98xf32> to vector<1x98xf32>
    %c0_32 = arith.constant 0 : index
    %c0_33 = arith.constant 0 : index
    %c0_34 = arith.constant 0 : index
    %29 = vector.load %arg13[%c0_32, %c0_33, %c0_34] : memref<2x32x32xbf16, #tpu.memory_space<vmem>>, vector<1x32x32xbf16>
    %30 = vector.shape_cast %29 : vector<1x32x32xbf16> to vector<32x32xbf16>
    %c0_35 = arith.constant 0 : index
    %c0_36 = arith.constant 0 : index
    %c0_37 = arith.constant 0 : index
    %31 = vector.load %arg14[%c0_35, %c0_36, %c0_37] : memref<2x1x32xf32, #tpu.memory_space<vmem>>, vector<1x1x32xf32>
    %32 = vector.shape_cast %31 : vector<1x1x32xf32> to vector<1x32xf32>
    %c0_38 = arith.constant 0 : index
    %c0_39 = arith.constant 0 : index
    %c0_40 = arith.constant 0 : index
    %c0_41 = arith.constant 0 : index
    %33 = vector.load %arg15[%c0_38, %c0_39, %c0_40, %c0_41] : memref<2x2x16x16xf32, #tpu.memory_space<vmem>>, vector<1x2x16x16xf32>
    %34 = vector.shape_cast %33 : vector<1x2x16x16xf32> to vector<2x16x16xf32>
    %c0_42 = arith.constant 0 : index
    %c0_43 = arith.constant 0 : index
    %c0_44 = arith.constant 0 : index
    %c0_45 = arith.constant 0 : index
    %35 = vector.load %arg16[%c0_42, %c0_43, %c0_44, %c0_45] : memref<2x2x16x16xf32, #tpu.memory_space<vmem>>, vector<1x2x16x16xf32>
    %36 = vector.shape_cast %35 : vector<1x2x16x16xf32> to vector<2x16x16xf32>
    %c0_46 = arith.constant 0 : index
    %c0_47 = arith.constant 0 : index
    %c0_48 = arith.constant 0 : index
    %c0_49 = arith.constant 0 : index
    %37 = vector.load %arg17[%c0_46, %c0_47, %c0_48, %c0_49] : memref<2x2x16x16xf32, #tpu.memory_space<vmem>>, vector<1x2x16x16xf32>
    %38 = vector.shape_cast %37 : vector<1x2x16x16xf32> to vector<2x16x16xf32>
    %c0_50 = arith.constant 0 : index
    %c0_51 = arith.constant 0 : index
    %c0_52 = arith.constant 0 : index
    %39 = vector.load %arg18[%c0_50, %c0_51, %c0_52] : memref<2x1x32xf32, #tpu.memory_space<vmem>>, vector<1x1x32xf32>
    %40 = vector.shape_cast %39 : vector<1x1x32xf32> to vector<1x32xf32>
    %c0_53 = arith.constant 0 : index
    %c0_54 = arith.constant 0 : index
    %c0_55 = arith.constant 0 : index
    %41 = vector.load %arg19[%c0_53, %c0_54, %c0_55] : memref<2x1x32xf32, #tpu.memory_space<vmem>>, vector<1x1x32xf32>
    %42 = vector.shape_cast %41 : vector<1x1x32xf32> to vector<1x32xf32>
    %c0_56 = arith.constant 0 : index
    %c0_57 = arith.constant 0 : index
    %c0_58 = arith.constant 0 : index
    %43 = vector.load %arg20[%c0_56, %c0_57, %c0_58] : memref<2x32x128xbf16, #tpu.memory_space<vmem>>, vector<1x32x128xbf16>
    %44 = vector.shape_cast %43 : vector<1x32x128xbf16> to vector<32x128xbf16>
    %c0_59 = arith.constant 0 : index
    %c0_60 = arith.constant 0 : index
    %c0_61 = arith.constant 0 : index
    %45 = vector.load %arg21[%c0_59, %c0_60, %c0_61] : memref<2x1x128xf32, #tpu.memory_space<vmem>>, vector<1x1x128xf32>
    %46 = vector.shape_cast %45 : vector<1x1x128xf32> to vector<1x128xf32>
    %c0_62 = arith.constant 0 : index
    %c0_63 = arith.constant 0 : index
    %c0_64 = arith.constant 0 : index
    %47 = vector.load %arg22[%c0_62, %c0_63, %c0_64] : memref<2x64x32xbf16, #tpu.memory_space<vmem>>, vector<1x64x32xbf16>
    %48 = vector.shape_cast %47 : vector<1x64x32xbf16> to vector<64x32xbf16>
    %c0_65 = arith.constant 0 : index
    %c0_66 = arith.constant 0 : index
    %c0_67 = arith.constant 0 : index
    %49 = vector.load %arg23[%c0_65, %c0_66, %c0_67] : memref<2x1x32xf32, #tpu.memory_space<vmem>>, vector<1x1x32xf32>
    %50 = vector.shape_cast %49 : vector<1x1x32xf32> to vector<1x32xf32>
    %cst = arith.constant dense<0.000000e+00> : vector<8xf32>
    %51 = vector.multi_reduction <add>, %1, %cst [1] : vector<8x32xf32> to vector<8xf32>
    %52 = vector.shape_cast %51 : vector<8xf32> to vector<8x1xf32>
    %cst_68 = arith.constant 3.200000e+01 : f32
    %53 = vector.broadcast %cst_68 : f32 to vector<8x1xf32>
    %54 = arith.divf %52, %53 : vector<8x1xf32>
    %55 = vector.broadcast %54 : vector<8x1xf32> to vector<8x32xf32>
    %56 = arith.subf %1, %55 : vector<8x32xf32>
    %57 = vector.broadcast %54 : vector<8x1xf32> to vector<8x32xf32>
    %58 = arith.subf %1, %57 : vector<8x32xf32>
    %59 = arith.mulf %56, %58 : vector<8x32xf32>
    %cst_69 = arith.constant dense<0.000000e+00> : vector<8xf32>
    %60 = vector.multi_reduction <add>, %59, %cst_69 [1] : vector<8x32xf32> to vector<8xf32>
    %61 = vector.shape_cast %60 : vector<8xf32> to vector<8x1xf32>
    %cst_70 = arith.constant 3.200000e+01 : f32
    %62 = vector.broadcast %cst_70 : f32 to vector<8x1xf32>
    %63 = arith.divf %61, %62 : vector<8x1xf32>
    %64 = vector.broadcast %54 : vector<8x1xf32> to vector<8x32xf32>
    %65 = arith.subf %1, %64 : vector<8x32xf32>
    %cst_71 = arith.constant 9.99999974E-6 : f32
    %66 = vector.broadcast %cst_71 : f32 to vector<8x1xf32>
    %67 = arith.addf %63, %66 : vector<8x1xf32>
    %68 = math.rsqrt %67 : vector<8x1xf32>
    %69 = vector.broadcast %68 : vector<8x1xf32> to vector<8x32xf32>
    %70 = arith.mulf %65, %69 : vector<8x32xf32>
    %71 = vector.broadcast %10 : vector<1x32xf32> to vector<8x32xf32>
    %72 = arith.mulf %70, %71 : vector<8x32xf32>
    %73 = vector.broadcast %12 : vector<1x32xf32> to vector<8x32xf32>
    %74 = arith.addf %72, %73 : vector<8x32xf32>
    %75 = arith.truncf %74 : vector<8x32xf32> to vector<8x32xbf16>
    %cst_72 = arith.constant dense<0.000000e+00> : vector<8x96xf32>
    %76 = tpu.matmul %75, %14, %cst_72 {dimension_numbers = #tpu.dot_dimension_numbers<[1], [0], [0], [1], [0, 0, 1, 1], [], []>} : vector<8x32xbf16>, vector<32x96xbf16>, vector<8x96xf32> -> vector<8x96xf32>
    %77 = vector.broadcast %16 : vector<1x96xf32> to vector<8x96xf32>
    %78 = arith.addf %76, %77 : vector<8x96xf32>
    %79 = vector.extract_strided_slice %78 {offsets = [0, 0], sizes = [8, 8], strides = [1, 1]} : vector<8x96xf32> to vector<8x8xf32>
    %80 = vector.extract_strided_slice %78 {offsets = [0, 32], sizes = [8, 8], strides = [1, 1]} : vector<8x96xf32> to vector<8x8xf32>
    %81 = vector.extract_strided_slice %78 {offsets = [0, 64], sizes = [8, 8], strides = [1, 1]} : vector<8x96xf32> to vector<8x8xf32>
    "tpu.trace_start"() <{level = 10 : i32, message = "qd,kd->qk"}> : () -> ()
    %cst_73 = arith.constant dense<0.000000e+00> : vector<8x8xf32>
    %82 = tpu.matmul %79, %80, %cst_73 {dimension_numbers = #tpu.dot_dimension_numbers<[1], [1], [0], [0], [0, 0, 1, 0], [], []>} : vector<8x8xf32>, vector<8x8xf32>, vector<8x8xf32> -> vector<8x8xf32>
    "tpu.trace_stop"() : () -> ()
    %cst_74 = arith.constant 0.353553385 : f32
    %83 = vector.broadcast %cst_74 : f32 to vector<8x8xf32>
    %84 = arith.mulf %82, %83 : vector<8x8xf32>
    %cst_75 = arith.constant -1.000000e+30 : f32
    %85 = vector.broadcast %cst_75 : f32 to vector<8x8xf32>
    %86 = arith.select %8, %84, %85 : vector<8x8xi1>, vector<8x8xf32>
    %cst_76 = arith.constant dense<0xFF800000> : vector<8xf32>
    %87 = vector.multi_reduction <maximumf>, %86, %cst_76 [1] : vector<8x8xf32> to vector<8xf32>
    %88 = vector.shape_cast %87 : vector<8xf32> to vector<8x1xf32>
    %89 = vector.broadcast %88 : vector<8x1xf32> to vector<8x8xf32>
    %90 = arith.subf %86, %89 : vector<8x8xf32>
    %91 = math.exp %90 : vector<8x8xf32>
    %cst_77 = arith.constant dense<0.000000e+00> : vector<8xf32>
    %92 = vector.multi_reduction <add>, %91, %cst_77 [1] : vector<8x8xf32> to vector<8xf32>
    %93 = vector.shape_cast %92 : vector<8xf32> to vector<8x1xf32>
    %94 = tpu.reciprocal %93 {approx = true} : vector<8x1xf32> -> vector<8x1xf32>
    %95 = vector.broadcast %94 : vector<8x1xf32> to vector<8x8xf32>
    %96 = arith.mulf %91, %95 : vector<8x8xf32>
    "tpu.trace_start"() <{level = 10 : i32, message = "qk,kd->qd"}> : () -> ()
    %cst_78 = arith.constant dense<0.000000e+00> : vector<8x8xf32>
    %97 = tpu.matmul %96, %81, %cst_78 {dimension_numbers = #tpu.dot_dimension_numbers<[1], [0], [0], [1], [0, 0, 1, 1], [], []>} : vector<8x8xf32>, vector<8x8xf32>, vector<8x8xf32> -> vector<8x8xf32>
    "tpu.trace_stop"() : () -> ()
    %98 = vector.extract_strided_slice %78 {offsets = [0, 8], sizes = [8, 8], strides = [1, 1]} : vector<8x96xf32> to vector<8x8xf32>
    %99 = vector.extract_strided_slice %78 {offsets = [0, 40], sizes = [8, 8], strides = [1, 1]} : vector<8x96xf32> to vector<8x8xf32>
    %100 = vector.extract_strided_slice %78 {offsets = [0, 72], sizes = [8, 8], strides = [1, 1]} : vector<8x96xf32> to vector<8x8xf32>
    "tpu.trace_start"() <{level = 10 : i32, message = "qd,kd->qk"}> : () -> ()
    %cst_79 = arith.constant dense<0.000000e+00> : vector<8x8xf32>
    %101 = tpu.matmul %98, %99, %cst_79 {dimension_numbers = #tpu.dot_dimension_numbers<[1], [1], [0], [0], [0, 0, 1, 0], [], []>} : vector<8x8xf32>, vector<8x8xf32>, vector<8x8xf32> -> vector<8x8xf32>
    "tpu.trace_stop"() : () -> ()
    %cst_80 = arith.constant 0.353553385 : f32
    %102 = vector.broadcast %cst_80 : f32 to vector<8x8xf32>
    %103 = arith.mulf %101, %102 : vector<8x8xf32>
    %cst_81 = arith.constant -1.000000e+30 : f32
    %104 = vector.broadcast %cst_81 : f32 to vector<8x8xf32>
    %105 = arith.select %8, %103, %104 : vector<8x8xi1>, vector<8x8xf32>
    %cst_82 = arith.constant dense<0xFF800000> : vector<8xf32>
    %106 = vector.multi_reduction <maximumf>, %105, %cst_82 [1] : vector<8x8xf32> to vector<8xf32>
    %107 = vector.shape_cast %106 : vector<8xf32> to vector<8x1xf32>
    %108 = vector.broadcast %107 : vector<8x1xf32> to vector<8x8xf32>
    %109 = arith.subf %105, %108 : vector<8x8xf32>
    %110 = math.exp %109 : vector<8x8xf32>
    %cst_83 = arith.constant dense<0.000000e+00> : vector<8xf32>
    %111 = vector.multi_reduction <add>, %110, %cst_83 [1] : vector<8x8xf32> to vector<8xf32>
    %112 = vector.shape_cast %111 : vector<8xf32> to vector<8x1xf32>
    %113 = tpu.reciprocal %112 {approx = true} : vector<8x1xf32> -> vector<8x1xf32>
    %114 = vector.broadcast %113 : vector<8x1xf32> to vector<8x8xf32>
    %115 = arith.mulf %110, %114 : vector<8x8xf32>
    "tpu.trace_start"() <{level = 10 : i32, message = "qk,kd->qd"}> : () -> ()
    %cst_84 = arith.constant dense<0.000000e+00> : vector<8x8xf32>
    %116 = tpu.matmul %115, %100, %cst_84 {dimension_numbers = #tpu.dot_dimension_numbers<[1], [0], [0], [1], [0, 0, 1, 1], [], []>} : vector<8x8xf32>, vector<8x8xf32>, vector<8x8xf32> -> vector<8x8xf32>
    "tpu.trace_stop"() : () -> ()
    %117 = vector.extract_strided_slice %78 {offsets = [0, 16], sizes = [8, 8], strides = [1, 1]} : vector<8x96xf32> to vector<8x8xf32>
    %118 = vector.extract_strided_slice %78 {offsets = [0, 48], sizes = [8, 8], strides = [1, 1]} : vector<8x96xf32> to vector<8x8xf32>
    %119 = vector.extract_strided_slice %78 {offsets = [0, 80], sizes = [8, 8], strides = [1, 1]} : vector<8x96xf32> to vector<8x8xf32>
    "tpu.trace_start"() <{level = 10 : i32, message = "qd,kd->qk"}> : () -> ()
    %cst_85 = arith.constant dense<0.000000e+00> : vector<8x8xf32>
    %120 = tpu.matmul %117, %118, %cst_85 {dimension_numbers = #tpu.dot_dimension_numbers<[1], [1], [0], [0], [0, 0, 1, 0], [], []>} : vector<8x8xf32>, vector<8x8xf32>, vector<8x8xf32> -> vector<8x8xf32>
    "tpu.trace_stop"() : () -> ()
    %cst_86 = arith.constant 0.353553385 : f32
    %121 = vector.broadcast %cst_86 : f32 to vector<8x8xf32>
    %122 = arith.mulf %120, %121 : vector<8x8xf32>
    %cst_87 = arith.constant -1.000000e+30 : f32
    %123 = vector.broadcast %cst_87 : f32 to vector<8x8xf32>
    %124 = arith.select %8, %122, %123 : vector<8x8xi1>, vector<8x8xf32>
    %cst_88 = arith.constant dense<0xFF800000> : vector<8xf32>
    %125 = vector.multi_reduction <maximumf>, %124, %cst_88 [1] : vector<8x8xf32> to vector<8xf32>
    %126 = vector.shape_cast %125 : vector<8xf32> to vector<8x1xf32>
    %127 = vector.broadcast %126 : vector<8x1xf32> to vector<8x8xf32>
    %128 = arith.subf %124, %127 : vector<8x8xf32>
    %129 = math.exp %128 : vector<8x8xf32>
    %cst_89 = arith.constant dense<0.000000e+00> : vector<8xf32>
    %130 = vector.multi_reduction <add>, %129, %cst_89 [1] : vector<8x8xf32> to vector<8xf32>
    %131 = vector.shape_cast %130 : vector<8xf32> to vector<8x1xf32>
    %132 = tpu.reciprocal %131 {approx = true} : vector<8x1xf32> -> vector<8x1xf32>
    %133 = vector.broadcast %132 : vector<8x1xf32> to vector<8x8xf32>
    %134 = arith.mulf %129, %133 : vector<8x8xf32>
    "tpu.trace_start"() <{level = 10 : i32, message = "qk,kd->qd"}> : () -> ()
    %cst_90 = arith.constant dense<0.000000e+00> : vector<8x8xf32>
    %135 = tpu.matmul %134, %119, %cst_90 {dimension_numbers = #tpu.dot_dimension_numbers<[1], [0], [0], [1], [0, 0, 1, 1], [], []>} : vector<8x8xf32>, vector<8x8xf32>, vector<8x8xf32> -> vector<8x8xf32>
    "tpu.trace_stop"() : () -> ()
    %136 = vector.extract_strided_slice %78 {offsets = [0, 24], sizes = [8, 8], strides = [1, 1]} : vector<8x96xf32> to vector<8x8xf32>
    %137 = vector.extract_strided_slice %78 {offsets = [0, 56], sizes = [8, 8], strides = [1, 1]} : vector<8x96xf32> to vector<8x8xf32>
    %138 = vector.extract_strided_slice %78 {offsets = [0, 88], sizes = [8, 8], strides = [1, 1]} : vector<8x96xf32> to vector<8x8xf32>
    "tpu.trace_start"() <{level = 10 : i32, message = "qd,kd->qk"}> : () -> ()
    %cst_91 = arith.constant dense<0.000000e+00> : vector<8x8xf32>
    %139 = tpu.matmul %136, %137, %cst_91 {dimension_numbers = #tpu.dot_dimension_numbers<[1], [1], [0], [0], [0, 0, 1, 0], [], []>} : vector<8x8xf32>, vector<8x8xf32>, vector<8x8xf32> -> vector<8x8xf32>
    "tpu.trace_stop"() : () -> ()
    %cst_92 = arith.constant 0.353553385 : f32
    %140 = vector.broadcast %cst_92 : f32 to vector<8x8xf32>
    %141 = arith.mulf %139, %140 : vector<8x8xf32>
    %cst_93 = arith.constant -1.000000e+30 : f32
    %142 = vector.broadcast %cst_93 : f32 to vector<8x8xf32>
    %143 = arith.select %8, %141, %142 : vector<8x8xi1>, vector<8x8xf32>
    %cst_94 = arith.constant dense<0xFF800000> : vector<8xf32>
    %144 = vector.multi_reduction <maximumf>, %143, %cst_94 [1] : vector<8x8xf32> to vector<8xf32>
    %145 = vector.shape_cast %144 : vector<8xf32> to vector<8x1xf32>
    %146 = vector.broadcast %145 : vector<8x1xf32> to vector<8x8xf32>
    %147 = arith.subf %143, %146 : vector<8x8xf32>
    %148 = math.exp %147 : vector<8x8xf32>
    %cst_95 = arith.constant dense<0.000000e+00> : vector<8xf32>
    %149 = vector.multi_reduction <add>, %148, %cst_95 [1] : vector<8x8xf32> to vector<8xf32>
    %150 = vector.shape_cast %149 : vector<8xf32> to vector<8x1xf32>
    %151 = tpu.reciprocal %150 {approx = true} : vector<8x1xf32> -> vector<8x1xf32>
    %152 = vector.broadcast %151 : vector<8x1xf32> to vector<8x8xf32>
    %153 = arith.mulf %148, %152 : vector<8x8xf32>
    "tpu.trace_start"() <{level = 10 : i32, message = "qk,kd->qd"}> : () -> ()
    %cst_96 = arith.constant dense<0.000000e+00> : vector<8x8xf32>
    %154 = tpu.matmul %153, %138, %cst_96 {dimension_numbers = #tpu.dot_dimension_numbers<[1], [0], [0], [1], [0, 0, 1, 1], [], []>} : vector<8x8xf32>, vector<8x8xf32>, vector<8x8xf32> -> vector<8x8xf32>
    "tpu.trace_stop"() : () -> ()
    %155 = tpu.concatenate %97, %116, %135, %154 in 1 : vector<8x8xf32>, vector<8x8xf32>, vector<8x8xf32>, vector<8x8xf32> -> vector<8x32xf32>
    %156 = arith.truncf %155 : vector<8x32xf32> to vector<8x32xbf16>
    %cst_97 = arith.constant dense<0.000000e+00> : vector<8x32xf32>
    %157 = tpu.matmul %156, %18, %cst_97 {dimension_numbers = #tpu.dot_dimension_numbers<[1], [0], [0], [1], [0, 0, 1, 1], [], []>} : vector<8x32xbf16>, vector<32x32xbf16>, vector<8x32xf32> -> vector<8x32xf32>
    %158 = vector.broadcast %20 : vector<1x32xf32> to vector<8x32xf32>
    %159 = arith.addf %157, %158 : vector<8x32xf32>
    %160 = arith.addf %1, %159 : vector<8x32xf32>
    %cst_98 = arith.constant dense<0.000000e+00> : vector<8xf32>
    %161 = vector.multi_reduction <add>, %160, %cst_98 [1] : vector<8x32xf32> to vector<8xf32>
    %162 = vector.shape_cast %161 : vector<8xf32> to vector<8x1xf32>
    %cst_99 = arith.constant 3.200000e+01 : f32
    %163 = vector.broadcast %cst_99 : f32 to vector<8x1xf32>
    %164 = arith.divf %162, %163 : vector<8x1xf32>
    %165 = vector.broadcast %164 : vector<8x1xf32> to vector<8x32xf32>
    %166 = arith.subf %160, %165 : vector<8x32xf32>
    %167 = vector.broadcast %164 : vector<8x1xf32> to vector<8x32xf32>
    %168 = arith.subf %160, %167 : vector<8x32xf32>
    %169 = arith.mulf %166, %168 : vector<8x32xf32>
    %cst_100 = arith.constant dense<0.000000e+00> : vector<8xf32>
    %170 = vector.multi_reduction <add>, %169, %cst_100 [1] : vector<8x32xf32> to vector<8xf32>
    %171 = vector.shape_cast %170 : vector<8xf32> to vector<8x1xf32>
    %cst_101 = arith.constant 3.200000e+01 : f32
    %172 = vector.broadcast %cst_101 : f32 to vector<8x1xf32>
    %173 = arith.divf %171, %172 : vector<8x1xf32>
    %174 = vector.broadcast %164 : vector<8x1xf32> to vector<8x32xf32>
    %175 = arith.subf %160, %174 : vector<8x32xf32>
    %cst_102 = arith.constant 9.99999974E-6 : f32
    %176 = vector.broadcast %cst_102 : f32 to vector<8x1xf32>
    %177 = arith.addf %173, %176 : vector<8x1xf32>
    %178 = math.rsqrt %177 : vector<8x1xf32>
    %179 = vector.broadcast %178 : vector<8x1xf32> to vector<8x32xf32>
    %180 = arith.mulf %175, %179 : vector<8x32xf32>
    %181 = vector.broadcast %22 : vector<1x32xf32> to vector<8x32xf32>
    %182 = arith.mulf %180, %181 : vector<8x32xf32>
    %183 = vector.broadcast %24 : vector<1x32xf32> to vector<8x32xf32>
    %184 = arith.addf %182, %183 : vector<8x32xf32>
    %185 = arith.truncf %184 : vector<8x32xf32> to vector<8x32xbf16>
    %cst_103 = arith.constant dense<0.000000e+00> : vector<8x98xf32>
    %186 = tpu.matmul %185, %26, %cst_103 {dimension_numbers = #tpu.dot_dimension_numbers<[1], [0], [0], [1], [0, 0, 1, 1], [], []>} : vector<8x32xbf16>, vector<32x98xbf16>, vector<8x98xf32> -> vector<8x98xf32>
    %187 = vector.broadcast %28 : vector<1x98xf32> to vector<8x98xf32>
    %188 = arith.addf %186, %187 : vector<8x98xf32>
    %189 = vector.extract_strided_slice %188 {offsets = [0, 96], sizes = [8, 2], strides = [1, 1]} : vector<8x98xf32> to vector<8x2xf32>
    %cst_104 = arith.constant 0.000000e+00 : f32
    %190 = vector.broadcast %cst_104 : f32 to vector<8x2xf32>
    %191 = arith.maximumf %189, %190 : vector<8x2xf32>
    %192 = math.absf %189 : vector<8x2xf32>
    %cst_105 = arith.constant 0.000000e+00 : f32
    %193 = vector.broadcast %cst_105 : f32 to vector<8x2xf32>
    %194 = arith.subf %193, %192 : vector<8x2xf32>
    %195 = math.exp %194 : vector<8x2xf32>
    %cst_106 = arith.constant 1.000000e+00 : f32
    %196 = vector.broadcast %cst_106 : f32 to vector<8x2xf32>
    %197 = arith.addf %196, %195 : vector<8x2xf32>
    %198 = math.log %197 : vector<8x2xf32>
    %199 = arith.addf %191, %198 : vector<8x2xf32>
    %cst_107 = arith.constant 0.00999999977 : f32
    %200 = vector.broadcast %cst_107 : f32 to vector<8x2xf32>
    %201 = arith.mulf %199, %200 : vector<8x2xf32>
    %202 = vector.extract_strided_slice %188 {offsets = [0, 0], sizes = [8, 16], strides = [1, 1]} : vector<8x98xf32> to vector<8x16xf32>
    %203 = arith.negf %202 : vector<8x16xf32>
    %204 = math.exp %203 : vector<8x16xf32>
    %cst_108 = arith.constant 1.000000e+00 : f32
    %205 = vector.broadcast %cst_108 : f32 to vector<8x16xf32>
    %206 = arith.addf %205, %204 : vector<8x16xf32>
    %207 = arith.divf %205, %206 : vector<8x16xf32>
    %208 = arith.mulf %202, %207 : vector<8x16xf32>
    %209 = vector.extract_strided_slice %188 {offsets = [0, 32], sizes = [8, 16], strides = [1, 1]} : vector<8x98xf32> to vector<8x16xf32>
    %210 = arith.negf %209 : vector<8x16xf32>
    %211 = math.exp %210 : vector<8x16xf32>
    %cst_109 = arith.constant 1.000000e+00 : f32
    %212 = vector.broadcast %cst_109 : f32 to vector<8x16xf32>
    %213 = arith.addf %212, %211 : vector<8x16xf32>
    %214 = arith.divf %212, %213 : vector<8x16xf32>
    %215 = arith.mulf %209, %214 : vector<8x16xf32>
    %216 = vector.extract_strided_slice %188 {offsets = [0, 64], sizes = [8, 16], strides = [1, 1]} : vector<8x98xf32> to vector<8x16xf32>
    %217 = arith.negf %216 : vector<8x16xf32>
    %218 = math.exp %217 : vector<8x16xf32>
    %cst_110 = arith.constant 1.000000e+00 : f32
    %219 = vector.broadcast %cst_110 : f32 to vector<8x16xf32>
    %220 = arith.addf %219, %218 : vector<8x16xf32>
    %221 = arith.divf %219, %220 : vector<8x16xf32>
    %222 = arith.mulf %216, %221 : vector<8x16xf32>
    %223 = arith.mulf %208, %208 : vector<8x16xf32>
    %cst_111 = arith.constant dense<0.000000e+00> : vector<8xf32>
    %224 = vector.multi_reduction <add>, %223, %cst_111 [1] : vector<8x16xf32> to vector<8xf32>
    %225 = vector.shape_cast %224 : vector<8xf32> to vector<8x1xf32>
    %cst_112 = arith.constant 9.99999997E-7 : f32
    %226 = vector.broadcast %cst_112 : f32 to vector<8x1xf32>
    %227 = arith.addf %225, %226 : vector<8x1xf32>
    %228 = math.rsqrt %227 : vector<8x1xf32>
    %229 = vector.broadcast %228 : vector<8x1xf32> to vector<8x16xf32>
    %230 = arith.mulf %208, %229 : vector<8x16xf32>
    %231 = arith.mulf %215, %215 : vector<8x16xf32>
    %cst_113 = arith.constant dense<0.000000e+00> : vector<8xf32>
    %232 = vector.multi_reduction <add>, %231, %cst_113 [1] : vector<8x16xf32> to vector<8xf32>
    %233 = vector.shape_cast %232 : vector<8xf32> to vector<8x1xf32>
    %cst_114 = arith.constant 9.99999997E-7 : f32
    %234 = vector.broadcast %cst_114 : f32 to vector<8x1xf32>
    %235 = arith.addf %233, %234 : vector<8x1xf32>
    %236 = math.rsqrt %235 : vector<8x1xf32>
    %237 = vector.broadcast %236 : vector<8x1xf32> to vector<8x16xf32>
    %238 = arith.mulf %215, %237 : vector<8x16xf32>
    %239 = vector.extract_strided_slice %201 {offsets = [0, 0], sizes = [8, 1], strides = [1, 1]} : vector<8x2xf32> to vector<8x1xf32>
    %240 = vector.broadcast %239 : vector<8x1xf32> to vector<8x16xf32>
    %241 = arith.mulf %222, %240 : vector<8x16xf32>
    %242 = vector.extract_strided_slice %34 {offsets = [0, 0, 0], sizes = [1, 16, 16], strides = [1, 1, 1]} : vector<2x16x16xf32> to vector<1x16x16xf32>
    %243 = vector.shape_cast %242 : vector<1x16x16xf32> to vector<16x16xf32>
    %244 = vector.extract_strided_slice %36 {offsets = [0, 0, 0], sizes = [1, 16, 16], strides = [1, 1, 1]} : vector<2x16x16xf32> to vector<1x16x16xf32>
    %245 = vector.shape_cast %244 : vector<1x16x16xf32> to vector<16x16xf32>
    %246 = vector.extract_strided_slice %38 {offsets = [0, 0, 0], sizes = [1, 16, 16], strides = [1, 1, 1]} : vector<2x16x16xf32> to vector<1x16x16xf32>
    %247 = vector.shape_cast %246 : vector<1x16x16xf32> to vector<16x16xf32>
    %248 = vector.extract_strided_slice %230 {offsets = [0, 0], sizes = [4, 16], strides = [1, 1]} : vector<8x16xf32> to vector<4x16xf32>
    %249 = vector.extract_strided_slice %238 {offsets = [0, 0], sizes = [4, 16], strides = [1, 1]} : vector<8x16xf32> to vector<4x16xf32>
    %250 = vector.extract_strided_slice %241 {offsets = [0, 0], sizes = [4, 16], strides = [1, 1]} : vector<8x16xf32> to vector<4x16xf32>
    %cst_115 = arith.constant dense<0.000000e+00> : vector<4x16xf32>
    %251 = tpu.matmul %248, %243, %cst_115 {dimension_numbers = #tpu.dot_dimension_numbers<[1], [0], [0], [1], [0, 0, 1, 1], [], []>} : vector<4x16xf32>, vector<16x16xf32>, vector<4x16xf32> -> vector<4x16xf32>
    %cst_116 = arith.constant dense<0.000000e+00> : vector<4x16xf32>
    %252 = tpu.matmul %248, %247, %cst_116 {dimension_numbers = #tpu.dot_dimension_numbers<[1], [0], [0], [1], [0, 0, 1, 1], [], []>} : vector<4x16xf32>, vector<16x16xf32>, vector<4x16xf32> -> vector<4x16xf32>
    %253 = arith.negf %251 : vector<4x16xf32>
    %254 = math.exp %253 : vector<4x16xf32>
    %cst_117 = arith.constant 1.000000e+00 : f32
    %255 = vector.broadcast %cst_117 : f32 to vector<4x16xf32>
    %256 = arith.addf %255, %254 : vector<4x16xf32>
    %257 = arith.divf %255, %256 : vector<4x16xf32>
    %258 = arith.mulf %251, %257 : vector<4x16xf32>
    %259 = arith.mulf %258, %252 : vector<4x16xf32>
    %cst_118 = arith.constant dense<0.000000e+00> : vector<4x16xf32>
    %260 = tpu.matmul %259, %245, %cst_118 {dimension_numbers = #tpu.dot_dimension_numbers<[1], [0], [0], [1], [0, 0, 1, 1], [], []>} : vector<4x16xf32>, vector<16x16xf32>, vector<4x16xf32> -> vector<4x16xf32>
    %cst_119 = arith.constant dense<0.000000e+00> : vector<4x16xf32>
    %261 = tpu.matmul %249, %243, %cst_119 {dimension_numbers = #tpu.dot_dimension_numbers<[1], [0], [0], [1], [0, 0, 1, 1], [], []>} : vector<4x16xf32>, vector<16x16xf32>, vector<4x16xf32> -> vector<4x16xf32>
    %cst_120 = arith.constant dense<0.000000e+00> : vector<4x16xf32>
    %262 = tpu.matmul %249, %247, %cst_120 {dimension_numbers = #tpu.dot_dimension_numbers<[1], [0], [0], [1], [0, 0, 1, 1], [], []>} : vector<4x16xf32>, vector<16x16xf32>, vector<4x16xf32> -> vector<4x16xf32>
    %263 = arith.negf %261 : vector<4x16xf32>
    %264 = math.exp %263 : vector<4x16xf32>
    %cst_121 = arith.constant 1.000000e+00 : f32
    %265 = vector.broadcast %cst_121 : f32 to vector<4x16xf32>
    %266 = arith.addf %265, %264 : vector<4x16xf32>
    %267 = arith.divf %265, %266 : vector<4x16xf32>
    %268 = arith.mulf %261, %267 : vector<4x16xf32>
    %269 = arith.mulf %268, %262 : vector<4x16xf32>
    "tpu.trace_start"() <{level = 10 : i32, message = "cd,ed->ce"}> : () -> ()
    %cst_122 = arith.constant dense<0.000000e+00> : vector<4x16xf32>
    %270 = tpu.matmul %250, %245, %cst_122 {dimension_numbers = #tpu.dot_dimension_numbers<[1], [1], [0], [0], [0, 0, 1, 0], [], []>} : vector<4x16xf32>, vector<16x16xf32>, vector<4x16xf32> -> vector<4x16xf32>
    "tpu.trace_stop"() : () -> ()
    %271 = arith.mulf %270, %262 : vector<4x16xf32>
    %cst_123 = arith.constant 1.000000e+00 : f32
    %272 = vector.broadcast %cst_123 : f32 to vector<4x16xf32>
    %273 = arith.subf %272, %267 : vector<4x16xf32>
    %274 = arith.mulf %268, %273 : vector<4x16xf32>
    %275 = arith.addf %267, %274 : vector<4x16xf32>
    %276 = arith.mulf %271, %275 : vector<4x16xf32>
    %277 = arith.mulf %270, %268 : vector<4x16xf32>
    %278 = tpu.transpose %249, [1, 0] : vector<4x16xf32> -> vector<16x4xf32>
    %279 = tpu.transpose %269, [1, 0] : vector<4x16xf32> -> vector<16x4xf32>
    %cst_124 = arith.constant dense<0.000000e+00> : vector<16x16xf32>
    %280 = tpu.matmul %279, %250, %cst_124 {dimension_numbers = #tpu.dot_dimension_numbers<[1], [0], [0], [1], [0, 0, 1, 1], [], []>} : vector<16x4xf32>, vector<4x16xf32>, vector<16x16xf32> -> vector<16x16xf32>
    %cst_125 = arith.constant dense<0.000000e+00> : vector<16x16xf32>
    %281 = tpu.matmul %278, %276, %cst_125 {dimension_numbers = #tpu.dot_dimension_numbers<[1], [0], [0], [1], [0, 0, 1, 1], [], []>} : vector<16x4xf32>, vector<4x16xf32>, vector<16x16xf32> -> vector<16x16xf32>
    %cst_126 = arith.constant dense<0.000000e+00> : vector<16x16xf32>
    %282 = tpu.matmul %278, %277, %cst_126 {dimension_numbers = #tpu.dot_dimension_numbers<[1], [0], [0], [1], [0, 0, 1, 1], [], []>} : vector<16x4xf32>, vector<4x16xf32>, vector<16x16xf32> -> vector<16x16xf32>
    %283 = arith.addf %243, %281 : vector<16x16xf32>
    %284 = arith.addf %245, %280 : vector<16x16xf32>
    %285 = arith.addf %247, %282 : vector<16x16xf32>
    %286 = vector.extract_strided_slice %230 {offsets = [4, 0], sizes = [4, 16], strides = [1, 1]} : vector<8x16xf32> to vector<4x16xf32>
    %cst_127 = arith.constant dense<0.000000e+00> : vector<4x16xf32>
    %287 = tpu.matmul %286, %283, %cst_127 {dimension_numbers = #tpu.dot_dimension_numbers<[1], [0], [0], [1], [0, 0, 1, 1], [], []>} : vector<4x16xf32>, vector<16x16xf32>, vector<4x16xf32> -> vector<4x16xf32>
    %cst_128 = arith.constant dense<0.000000e+00> : vector<4x16xf32>
    %288 = tpu.matmul %286, %285, %cst_128 {dimension_numbers = #tpu.dot_dimension_numbers<[1], [0], [0], [1], [0, 0, 1, 1], [], []>} : vector<4x16xf32>, vector<16x16xf32>, vector<4x16xf32> -> vector<4x16xf32>
    %289 = arith.negf %287 : vector<4x16xf32>
    %290 = math.exp %289 : vector<4x16xf32>
    %cst_129 = arith.constant 1.000000e+00 : f32
    %291 = vector.broadcast %cst_129 : f32 to vector<4x16xf32>
    %292 = arith.addf %291, %290 : vector<4x16xf32>
    %293 = arith.divf %291, %292 : vector<4x16xf32>
    %294 = arith.mulf %287, %293 : vector<4x16xf32>
    %295 = arith.mulf %294, %288 : vector<4x16xf32>
    %cst_130 = arith.constant dense<0.000000e+00> : vector<4x16xf32>
    %296 = tpu.matmul %295, %284, %cst_130 {dimension_numbers = #tpu.dot_dimension_numbers<[1], [0], [0], [1], [0, 0, 1, 1], [], []>} : vector<4x16xf32>, vector<16x16xf32>, vector<4x16xf32> -> vector<4x16xf32>
    %297 = tpu.concatenate %260, %296 in 0 : vector<4x16xf32>, vector<4x16xf32> -> vector<8x16xf32>
    %298 = vector.extract_strided_slice %188 {offsets = [0, 16], sizes = [8, 16], strides = [1, 1]} : vector<8x98xf32> to vector<8x16xf32>
    %299 = arith.negf %298 : vector<8x16xf32>
    %300 = math.exp %299 : vector<8x16xf32>
    %cst_131 = arith.constant 1.000000e+00 : f32
    %301 = vector.broadcast %cst_131 : f32 to vector<8x16xf32>
    %302 = arith.addf %301, %300 : vector<8x16xf32>
    %303 = arith.divf %301, %302 : vector<8x16xf32>
    %304 = arith.mulf %298, %303 : vector<8x16xf32>
    %305 = vector.extract_strided_slice %188 {offsets = [0, 48], sizes = [8, 16], strides = [1, 1]} : vector<8x98xf32> to vector<8x16xf32>
    %306 = arith.negf %305 : vector<8x16xf32>
    %307 = math.exp %306 : vector<8x16xf32>
    %cst_132 = arith.constant 1.000000e+00 : f32
    %308 = vector.broadcast %cst_132 : f32 to vector<8x16xf32>
    %309 = arith.addf %308, %307 : vector<8x16xf32>
    %310 = arith.divf %308, %309 : vector<8x16xf32>
    %311 = arith.mulf %305, %310 : vector<8x16xf32>
    %312 = vector.extract_strided_slice %188 {offsets = [0, 80], sizes = [8, 16], strides = [1, 1]} : vector<8x98xf32> to vector<8x16xf32>
    %313 = arith.negf %312 : vector<8x16xf32>
    %314 = math.exp %313 : vector<8x16xf32>
    %cst_133 = arith.constant 1.000000e+00 : f32
    %315 = vector.broadcast %cst_133 : f32 to vector<8x16xf32>
    %316 = arith.addf %315, %314 : vector<8x16xf32>
    %317 = arith.divf %315, %316 : vector<8x16xf32>
    %318 = arith.mulf %312, %317 : vector<8x16xf32>
    %319 = arith.mulf %304, %304 : vector<8x16xf32>
    %cst_134 = arith.constant dense<0.000000e+00> : vector<8xf32>
    %320 = vector.multi_reduction <add>, %319, %cst_134 [1] : vector<8x16xf32> to vector<8xf32>
    %321 = vector.shape_cast %320 : vector<8xf32> to vector<8x1xf32>
    %cst_135 = arith.constant 9.99999997E-7 : f32
    %322 = vector.broadcast %cst_135 : f32 to vector<8x1xf32>
    %323 = arith.addf %321, %322 : vector<8x1xf32>
    %324 = math.rsqrt %323 : vector<8x1xf32>
    %325 = vector.broadcast %324 : vector<8x1xf32> to vector<8x16xf32>
    %326 = arith.mulf %304, %325 : vector<8x16xf32>
    %327 = arith.mulf %311, %311 : vector<8x16xf32>
    %cst_136 = arith.constant dense<0.000000e+00> : vector<8xf32>
    %328 = vector.multi_reduction <add>, %327, %cst_136 [1] : vector<8x16xf32> to vector<8xf32>
    %329 = vector.shape_cast %328 : vector<8xf32> to vector<8x1xf32>
    %cst_137 = arith.constant 9.99999997E-7 : f32
    %330 = vector.broadcast %cst_137 : f32 to vector<8x1xf32>
    %331 = arith.addf %329, %330 : vector<8x1xf32>
    %332 = math.rsqrt %331 : vector<8x1xf32>
    %333 = vector.broadcast %332 : vector<8x1xf32> to vector<8x16xf32>
    %334 = arith.mulf %311, %333 : vector<8x16xf32>
    %335 = vector.extract_strided_slice %201 {offsets = [0, 1], sizes = [8, 1], strides = [1, 1]} : vector<8x2xf32> to vector<8x1xf32>
    %336 = vector.broadcast %335 : vector<8x1xf32> to vector<8x16xf32>
    %337 = arith.mulf %318, %336 : vector<8x16xf32>
    %338 = vector.extract_strided_slice %34 {offsets = [1, 0, 0], sizes = [1, 16, 16], strides = [1, 1, 1]} : vector<2x16x16xf32> to vector<1x16x16xf32>
    %339 = vector.shape_cast %338 : vector<1x16x16xf32> to vector<16x16xf32>
    %340 = vector.extract_strided_slice %36 {offsets = [1, 0, 0], sizes = [1, 16, 16], strides = [1, 1, 1]} : vector<2x16x16xf32> to vector<1x16x16xf32>
    %341 = vector.shape_cast %340 : vector<1x16x16xf32> to vector<16x16xf32>
    %342 = vector.extract_strided_slice %38 {offsets = [1, 0, 0], sizes = [1, 16, 16], strides = [1, 1, 1]} : vector<2x16x16xf32> to vector<1x16x16xf32>
    %343 = vector.shape_cast %342 : vector<1x16x16xf32> to vector<16x16xf32>
    %344 = vector.extract_strided_slice %326 {offsets = [0, 0], sizes = [4, 16], strides = [1, 1]} : vector<8x16xf32> to vector<4x16xf32>
    %345 = vector.extract_strided_slice %334 {offsets = [0, 0], sizes = [4, 16], strides = [1, 1]} : vector<8x16xf32> to vector<4x16xf32>
    %346 = vector.extract_strided_slice %337 {offsets = [0, 0], sizes = [4, 16], strides = [1, 1]} : vector<8x16xf32> to vector<4x16xf32>
    %cst_138 = arith.constant dense<0.000000e+00> : vector<4x16xf32>
    %347 = tpu.matmul %344, %339, %cst_138 {dimension_numbers = #tpu.dot_dimension_numbers<[1], [0], [0], [1], [0, 0, 1, 1], [], []>} : vector<4x16xf32>, vector<16x16xf32>, vector<4x16xf32> -> vector<4x16xf32>
    %cst_139 = arith.constant dense<0.000000e+00> : vector<4x16xf32>
    %348 = tpu.matmul %344, %343, %cst_139 {dimension_numbers = #tpu.dot_dimension_numbers<[1], [0], [0], [1], [0, 0, 1, 1], [], []>} : vector<4x16xf32>, vector<16x16xf32>, vector<4x16xf32> -> vector<4x16xf32>
    %349 = arith.negf %347 : vector<4x16xf32>
    %350 = math.exp %349 : vector<4x16xf32>
    %cst_140 = arith.constant 1.000000e+00 : f32
    %351 = vector.broadcast %cst_140 : f32 to vector<4x16xf32>
    %352 = arith.addf %351, %350 : vector<4x16xf32>
    %353 = arith.divf %351, %352 : vector<4x16xf32>
    %354 = arith.mulf %347, %353 : vector<4x16xf32>
    %355 = arith.mulf %354, %348 : vector<4x16xf32>
    %cst_141 = arith.constant dense<0.000000e+00> : vector<4x16xf32>
    %356 = tpu.matmul %355, %341, %cst_141 {dimension_numbers = #tpu.dot_dimension_numbers<[1], [0], [0], [1], [0, 0, 1, 1], [], []>} : vector<4x16xf32>, vector<16x16xf32>, vector<4x16xf32> -> vector<4x16xf32>
    %cst_142 = arith.constant dense<0.000000e+00> : vector<4x16xf32>
    %357 = tpu.matmul %345, %339, %cst_142 {dimension_numbers = #tpu.dot_dimension_numbers<[1], [0], [0], [1], [0, 0, 1, 1], [], []>} : vector<4x16xf32>, vector<16x16xf32>, vector<4x16xf32> -> vector<4x16xf32>
    %cst_143 = arith.constant dense<0.000000e+00> : vector<4x16xf32>
    %358 = tpu.matmul %345, %343, %cst_143 {dimension_numbers = #tpu.dot_dimension_numbers<[1], [0], [0], [1], [0, 0, 1, 1], [], []>} : vector<4x16xf32>, vector<16x16xf32>, vector<4x16xf32> -> vector<4x16xf32>
    %359 = arith.negf %357 : vector<4x16xf32>
    %360 = math.exp %359 : vector<4x16xf32>
    %cst_144 = arith.constant 1.000000e+00 : f32
    %361 = vector.broadcast %cst_144 : f32 to vector<4x16xf32>
    %362 = arith.addf %361, %360 : vector<4x16xf32>
    %363 = arith.divf %361, %362 : vector<4x16xf32>
    %364 = arith.mulf %357, %363 : vector<4x16xf32>
    %365 = arith.mulf %364, %358 : vector<4x16xf32>
    "tpu.trace_start"() <{level = 10 : i32, message = "cd,ed->ce"}> : () -> ()
    %cst_145 = arith.constant dense<0.000000e+00> : vector<4x16xf32>
    %366 = tpu.matmul %346, %341, %cst_145 {dimension_numbers = #tpu.dot_dimension_numbers<[1], [1], [0], [0], [0, 0, 1, 0], [], []>} : vector<4x16xf32>, vector<16x16xf32>, vector<4x16xf32> -> vector<4x16xf32>
    "tpu.trace_stop"() : () -> ()
    %367 = arith.mulf %366, %358 : vector<4x16xf32>
    %cst_146 = arith.constant 1.000000e+00 : f32
    %368 = vector.broadcast %cst_146 : f32 to vector<4x16xf32>
    %369 = arith.subf %368, %363 : vector<4x16xf32>
    %370 = arith.mulf %364, %369 : vector<4x16xf32>
    %371 = arith.addf %363, %370 : vector<4x16xf32>
    %372 = arith.mulf %367, %371 : vector<4x16xf32>
    %373 = arith.mulf %366, %364 : vector<4x16xf32>
    %374 = tpu.transpose %345, [1, 0] : vector<4x16xf32> -> vector<16x4xf32>
    %375 = tpu.transpose %365, [1, 0] : vector<4x16xf32> -> vector<16x4xf32>
    %cst_147 = arith.constant dense<0.000000e+00> : vector<16x16xf32>
    %376 = tpu.matmul %375, %346, %cst_147 {dimension_numbers = #tpu.dot_dimension_numbers<[1], [0], [0], [1], [0, 0, 1, 1], [], []>} : vector<16x4xf32>, vector<4x16xf32>, vector<16x16xf32> -> vector<16x16xf32>
    %cst_148 = arith.constant dense<0.000000e+00> : vector<16x16xf32>
    %377 = tpu.matmul %374, %372, %cst_148 {dimension_numbers = #tpu.dot_dimension_numbers<[1], [0], [0], [1], [0, 0, 1, 1], [], []>} : vector<16x4xf32>, vector<4x16xf32>, vector<16x16xf32> -> vector<16x16xf32>
    %cst_149 = arith.constant dense<0.000000e+00> : vector<16x16xf32>
    %378 = tpu.matmul %374, %373, %cst_149 {dimension_numbers = #tpu.dot_dimension_numbers<[1], [0], [0], [1], [0, 0, 1, 1], [], []>} : vector<16x4xf32>, vector<4x16xf32>, vector<16x16xf32> -> vector<16x16xf32>
    %379 = arith.addf %339, %377 : vector<16x16xf32>
    %380 = arith.addf %341, %376 : vector<16x16xf32>
    %381 = arith.addf %343, %378 : vector<16x16xf32>
    %382 = vector.extract_strided_slice %326 {offsets = [4, 0], sizes = [4, 16], strides = [1, 1]} : vector<8x16xf32> to vector<4x16xf32>
    %cst_150 = arith.constant dense<0.000000e+00> : vector<4x16xf32>
    %383 = tpu.matmul %382, %379, %cst_150 {dimension_numbers = #tpu.dot_dimension_numbers<[1], [0], [0], [1], [0, 0, 1, 1], [], []>} : vector<4x16xf32>, vector<16x16xf32>, vector<4x16xf32> -> vector<4x16xf32>
    %cst_151 = arith.constant dense<0.000000e+00> : vector<4x16xf32>
    %384 = tpu.matmul %382, %381, %cst_151 {dimension_numbers = #tpu.dot_dimension_numbers<[1], [0], [0], [1], [0, 0, 1, 1], [], []>} : vector<4x16xf32>, vector<16x16xf32>, vector<4x16xf32> -> vector<4x16xf32>
    %385 = arith.negf %383 : vector<4x16xf32>
    %386 = math.exp %385 : vector<4x16xf32>
    %cst_152 = arith.constant 1.000000e+00 : f32
    %387 = vector.broadcast %cst_152 : f32 to vector<4x16xf32>
    %388 = arith.addf %387, %386 : vector<4x16xf32>
    %389 = arith.divf %387, %388 : vector<4x16xf32>
    %390 = arith.mulf %383, %389 : vector<4x16xf32>
    %391 = arith.mulf %390, %384 : vector<4x16xf32>
    %cst_153 = arith.constant dense<0.000000e+00> : vector<4x16xf32>
    %392 = tpu.matmul %391, %380, %cst_153 {dimension_numbers = #tpu.dot_dimension_numbers<[1], [0], [0], [1], [0, 0, 1, 1], [], []>} : vector<4x16xf32>, vector<16x16xf32>, vector<4x16xf32> -> vector<4x16xf32>
    %393 = tpu.concatenate %356, %392 in 0 : vector<4x16xf32>, vector<4x16xf32> -> vector<8x16xf32>
    %394 = tpu.concatenate %297, %393 in 1 : vector<8x16xf32>, vector<8x16xf32> -> vector<8x32xf32>
    %395 = arith.truncf %394 : vector<8x32xf32> to vector<8x32xbf16>
    %cst_154 = arith.constant dense<0.000000e+00> : vector<8x32xf32>
    %396 = tpu.matmul %395, %30, %cst_154 {dimension_numbers = #tpu.dot_dimension_numbers<[1], [0], [0], [1], [0, 0, 1, 1], [], []>} : vector<8x32xbf16>, vector<32x32xbf16>, vector<8x32xf32> -> vector<8x32xf32>
    %397 = vector.broadcast %32 : vector<1x32xf32> to vector<8x32xf32>
    %398 = arith.addf %396, %397 : vector<8x32xf32>
    %399 = arith.addf %160, %398 : vector<8x32xf32>
    %cst_155 = arith.constant dense<0.000000e+00> : vector<8xf32>
    %400 = vector.multi_reduction <add>, %399, %cst_155 [1] : vector<8x32xf32> to vector<8xf32>
    %401 = vector.shape_cast %400 : vector<8xf32> to vector<8x1xf32>
    %cst_156 = arith.constant 3.200000e+01 : f32
    %402 = vector.broadcast %cst_156 : f32 to vector<8x1xf32>
    %403 = arith.divf %401, %402 : vector<8x1xf32>
    %404 = vector.broadcast %403 : vector<8x1xf32> to vector<8x32xf32>
    %405 = arith.subf %399, %404 : vector<8x32xf32>
    %406 = vector.broadcast %403 : vector<8x1xf32> to vector<8x32xf32>
    %407 = arith.subf %399, %406 : vector<8x32xf32>
    %408 = arith.mulf %405, %407 : vector<8x32xf32>
    %cst_157 = arith.constant dense<0.000000e+00> : vector<8xf32>
    %409 = vector.multi_reduction <add>, %408, %cst_157 [1] : vector<8x32xf32> to vector<8xf32>
    %410 = vector.shape_cast %409 : vector<8xf32> to vector<8x1xf32>
    %cst_158 = arith.constant 3.200000e+01 : f32
    %411 = vector.broadcast %cst_158 : f32 to vector<8x1xf32>
    %412 = arith.divf %410, %411 : vector<8x1xf32>
    %413 = vector.broadcast %403 : vector<8x1xf32> to vector<8x32xf32>
    %414 = arith.subf %399, %413 : vector<8x32xf32>
    %cst_159 = arith.constant 9.99999974E-6 : f32
    %415 = vector.broadcast %cst_159 : f32 to vector<8x1xf32>
    %416 = arith.addf %412, %415 : vector<8x1xf32>
    %417 = math.rsqrt %416 : vector<8x1xf32>
    %418 = vector.broadcast %417 : vector<8x1xf32> to vector<8x32xf32>
    %419 = arith.mulf %414, %418 : vector<8x32xf32>
    %420 = vector.broadcast %40 : vector<1x32xf32> to vector<8x32xf32>
    %421 = arith.mulf %419, %420 : vector<8x32xf32>
    %422 = vector.broadcast %42 : vector<1x32xf32> to vector<8x32xf32>
    %423 = arith.addf %421, %422 : vector<8x32xf32>
    %424 = arith.truncf %423 : vector<8x32xf32> to vector<8x32xbf16>
    %cst_160 = arith.constant dense<0.000000e+00> : vector<8x128xf32>
    %425 = tpu.matmul %424, %44, %cst_160 {dimension_numbers = #tpu.dot_dimension_numbers<[1], [0], [0], [1], [0, 0, 1, 1], [], []>} : vector<8x32xbf16>, vector<32x128xbf16>, vector<8x128xf32> -> vector<8x128xf32>
    %426 = vector.broadcast %46 : vector<1x128xf32> to vector<8x128xf32>
    %427 = arith.addf %425, %426 : vector<8x128xf32>
    %428 = vector.extract_strided_slice %427 {offsets = [0, 0], sizes = [8, 64], strides = [1, 1]} : vector<8x128xf32> to vector<8x64xf32>
    %429 = arith.negf %428 : vector<8x64xf32>
    %430 = math.exp %429 : vector<8x64xf32>
    %cst_161 = arith.constant 1.000000e+00 : f32
    %431 = vector.broadcast %cst_161 : f32 to vector<8x64xf32>
    %432 = arith.addf %431, %430 : vector<8x64xf32>
    %433 = arith.divf %431, %432 : vector<8x64xf32>
    %434 = arith.mulf %428, %433 : vector<8x64xf32>
    %435 = vector.extract_strided_slice %427 {offsets = [0, 64], sizes = [8, 64], strides = [1, 1]} : vector<8x128xf32> to vector<8x64xf32>
    %436 = arith.mulf %434, %435 : vector<8x64xf32>
    %437 = arith.truncf %436 : vector<8x64xf32> to vector<8x64xbf16>
    %cst_162 = arith.constant dense<0.000000e+00> : vector<8x32xf32>
    %438 = tpu.matmul %437, %48, %cst_162 {dimension_numbers = #tpu.dot_dimension_numbers<[1], [0], [0], [1], [0, 0, 1, 1], [], []>} : vector<8x64xbf16>, vector<64x32xbf16>, vector<8x32xf32> -> vector<8x32xf32>
    %439 = vector.broadcast %50 : vector<1x32xf32> to vector<8x32xf32>
    %440 = arith.addf %438, %439 : vector<8x32xf32>
    %441 = arith.addf %399, %440 : vector<8x32xf32>
    %c1 = arith.constant 1 : index
    %c0_163 = arith.constant 0 : index
    %c0_164 = arith.constant 0 : index
    %442 = vector.load %arg3[%c1, %c0_163, %c0_164] : memref<2x1x32xf32, #tpu.memory_space<vmem>>, vector<1x1x32xf32>
    %443 = vector.shape_cast %442 : vector<1x1x32xf32> to vector<1x32xf32>
    %c1_165 = arith.constant 1 : index
    %c0_166 = arith.constant 0 : index
    %c0_167 = arith.constant 0 : index
    %444 = vector.load %arg4[%c1_165, %c0_166, %c0_167] : memref<2x1x32xf32, #tpu.memory_space<vmem>>, vector<1x1x32xf32>
    %445 = vector.shape_cast %444 : vector<1x1x32xf32> to vector<1x32xf32>
    %c1_168 = arith.constant 1 : index
    %c0_169 = arith.constant 0 : index
    %c0_170 = arith.constant 0 : index
    %446 = vector.load %arg5[%c1_168, %c0_169, %c0_170] : memref<2x32x96xbf16, #tpu.memory_space<vmem>>, vector<1x32x96xbf16>
    %447 = vector.shape_cast %446 : vector<1x32x96xbf16> to vector<32x96xbf16>
    %c1_171 = arith.constant 1 : index
    %c0_172 = arith.constant 0 : index
    %c0_173 = arith.constant 0 : index
    %448 = vector.load %arg6[%c1_171, %c0_172, %c0_173] : memref<2x1x96xf32, #tpu.memory_space<vmem>>, vector<1x1x96xf32>
    %449 = vector.shape_cast %448 : vector<1x1x96xf32> to vector<1x96xf32>
    %c1_174 = arith.constant 1 : index
    %c0_175 = arith.constant 0 : index
    %c0_176 = arith.constant 0 : index
    %450 = vector.load %arg7[%c1_174, %c0_175, %c0_176] : memref<2x32x32xbf16, #tpu.memory_space<vmem>>, vector<1x32x32xbf16>
    %451 = vector.shape_cast %450 : vector<1x32x32xbf16> to vector<32x32xbf16>
    %c1_177 = arith.constant 1 : index
    %c0_178 = arith.constant 0 : index
    %c0_179 = arith.constant 0 : index
    %452 = vector.load %arg8[%c1_177, %c0_178, %c0_179] : memref<2x1x32xf32, #tpu.memory_space<vmem>>, vector<1x1x32xf32>
    %453 = vector.shape_cast %452 : vector<1x1x32xf32> to vector<1x32xf32>
    %c1_180 = arith.constant 1 : index
    %c0_181 = arith.constant 0 : index
    %c0_182 = arith.constant 0 : index
    %454 = vector.load %arg9[%c1_180, %c0_181, %c0_182] : memref<2x1x32xf32, #tpu.memory_space<vmem>>, vector<1x1x32xf32>
    %455 = vector.shape_cast %454 : vector<1x1x32xf32> to vector<1x32xf32>
    %c1_183 = arith.constant 1 : index
    %c0_184 = arith.constant 0 : index
    %c0_185 = arith.constant 0 : index
    %456 = vector.load %arg10[%c1_183, %c0_184, %c0_185] : memref<2x1x32xf32, #tpu.memory_space<vmem>>, vector<1x1x32xf32>
    %457 = vector.shape_cast %456 : vector<1x1x32xf32> to vector<1x32xf32>
    %c1_186 = arith.constant 1 : index
    %c0_187 = arith.constant 0 : index
    %c0_188 = arith.constant 0 : index
    %458 = vector.load %arg11[%c1_186, %c0_187, %c0_188] : memref<2x32x98xbf16, #tpu.memory_space<vmem>>, vector<1x32x98xbf16>
    %459 = vector.shape_cast %458 : vector<1x32x98xbf16> to vector<32x98xbf16>
    %c1_189 = arith.constant 1 : index
    %c0_190 = arith.constant 0 : index
    %c0_191 = arith.constant 0 : index
    %460 = vector.load %arg12[%c1_189, %c0_190, %c0_191] : memref<2x1x98xf32, #tpu.memory_space<vmem>>, vector<1x1x98xf32>
    %461 = vector.shape_cast %460 : vector<1x1x98xf32> to vector<1x98xf32>
    %c1_192 = arith.constant 1 : index
    %c0_193 = arith.constant 0 : index
    %c0_194 = arith.constant 0 : index
    %462 = vector.load %arg13[%c1_192, %c0_193, %c0_194] : memref<2x32x32xbf16, #tpu.memory_space<vmem>>, vector<1x32x32xbf16>
    %463 = vector.shape_cast %462 : vector<1x32x32xbf16> to vector<32x32xbf16>
    %c1_195 = arith.constant 1 : index
    %c0_196 = arith.constant 0 : index
    %c0_197 = arith.constant 0 : index
    %464 = vector.load %arg14[%c1_195, %c0_196, %c0_197] : memref<2x1x32xf32, #tpu.memory_space<vmem>>, vector<1x1x32xf32>
    %465 = vector.shape_cast %464 : vector<1x1x32xf32> to vector<1x32xf32>
    %c1_198 = arith.constant 1 : index
    %c0_199 = arith.constant 0 : index
    %c0_200 = arith.constant 0 : index
    %c0_201 = arith.constant 0 : index
    %466 = vector.load %arg15[%c1_198, %c0_199, %c0_200, %c0_201] : memref<2x2x16x16xf32, #tpu.memory_space<vmem>>, vector<1x2x16x16xf32>
    %467 = vector.shape_cast %466 : vector<1x2x16x16xf32> to vector<2x16x16xf32>
    %c1_202 = arith.constant 1 : index
    %c0_203 = arith.constant 0 : index
    %c0_204 = arith.constant 0 : index
    %c0_205 = arith.constant 0 : index
    %468 = vector.load %arg16[%c1_202, %c0_203, %c0_204, %c0_205] : memref<2x2x16x16xf32, #tpu.memory_space<vmem>>, vector<1x2x16x16xf32>
    %469 = vector.shape_cast %468 : vector<1x2x16x16xf32> to vector<2x16x16xf32>
    %c1_206 = arith.constant 1 : index
    %c0_207 = arith.constant 0 : index
    %c0_208 = arith.constant 0 : index
    %c0_209 = arith.constant 0 : index
    %470 = vector.load %arg17[%c1_206, %c0_207, %c0_208, %c0_209] : memref<2x2x16x16xf32, #tpu.memory_space<vmem>>, vector<1x2x16x16xf32>
    %471 = vector.shape_cast %470 : vector<1x2x16x16xf32> to vector<2x16x16xf32>
    %c1_210 = arith.constant 1 : index
    %c0_211 = arith.constant 0 : index
    %c0_212 = arith.constant 0 : index
    %472 = vector.load %arg18[%c1_210, %c0_211, %c0_212] : memref<2x1x32xf32, #tpu.memory_space<vmem>>, vector<1x1x32xf32>
    %473 = vector.shape_cast %472 : vector<1x1x32xf32> to vector<1x32xf32>
    %c1_213 = arith.constant 1 : index
    %c0_214 = arith.constant 0 : index
    %c0_215 = arith.constant 0 : index
    %474 = vector.load %arg19[%c1_213, %c0_214, %c0_215] : memref<2x1x32xf32, #tpu.memory_space<vmem>>, vector<1x1x32xf32>
    %475 = vector.shape_cast %474 : vector<1x1x32xf32> to vector<1x32xf32>
    %c1_216 = arith.constant 1 : index
    %c0_217 = arith.constant 0 : index
    %c0_218 = arith.constant 0 : index
    %476 = vector.load %arg20[%c1_216, %c0_217, %c0_218] : memref<2x32x128xbf16, #tpu.memory_space<vmem>>, vector<1x32x128xbf16>
    %477 = vector.shape_cast %476 : vector<1x32x128xbf16> to vector<32x128xbf16>
    %c1_219 = arith.constant 1 : index
    %c0_220 = arith.constant 0 : index
    %c0_221 = arith.constant 0 : index
    %478 = vector.load %arg21[%c1_219, %c0_220, %c0_221] : memref<2x1x128xf32, #tpu.memory_space<vmem>>, vector<1x1x128xf32>
    %479 = vector.shape_cast %478 : vector<1x1x128xf32> to vector<1x128xf32>
    %c1_222 = arith.constant 1 : index
    %c0_223 = arith.constant 0 : index
    %c0_224 = arith.constant 0 : index
    %480 = vector.load %arg22[%c1_222, %c0_223, %c0_224] : memref<2x64x32xbf16, #tpu.memory_space<vmem>>, vector<1x64x32xbf16>
    %481 = vector.shape_cast %480 : vector<1x64x32xbf16> to vector<64x32xbf16>
    %c1_225 = arith.constant 1 : index
    %c0_226 = arith.constant 0 : index
    %c0_227 = arith.constant 0 : index
    %482 = vector.load %arg23[%c1_225, %c0_226, %c0_227] : memref<2x1x32xf32, #tpu.memory_space<vmem>>, vector<1x1x32xf32>
    %483 = vector.shape_cast %482 : vector<1x1x32xf32> to vector<1x32xf32>
    %cst_228 = arith.constant dense<0.000000e+00> : vector<8xf32>
    %484 = vector.multi_reduction <add>, %441, %cst_228 [1] : vector<8x32xf32> to vector<8xf32>
    %485 = vector.shape_cast %484 : vector<8xf32> to vector<8x1xf32>
    %cst_229 = arith.constant 3.200000e+01 : f32
    %486 = vector.broadcast %cst_229 : f32 to vector<8x1xf32>
    %487 = arith.divf %485, %486 : vector<8x1xf32>
    %488 = vector.broadcast %487 : vector<8x1xf32> to vector<8x32xf32>
    %489 = arith.subf %441, %488 : vector<8x32xf32>
    %490 = vector.broadcast %487 : vector<8x1xf32> to vector<8x32xf32>
    %491 = arith.subf %441, %490 : vector<8x32xf32>
    %492 = arith.mulf %489, %491 : vector<8x32xf32>
    %cst_230 = arith.constant dense<0.000000e+00> : vector<8xf32>
    %493 = vector.multi_reduction <add>, %492, %cst_230 [1] : vector<8x32xf32> to vector<8xf32>
    %494 = vector.shape_cast %493 : vector<8xf32> to vector<8x1xf32>
    %cst_231 = arith.constant 3.200000e+01 : f32
    %495 = vector.broadcast %cst_231 : f32 to vector<8x1xf32>
    %496 = arith.divf %494, %495 : vector<8x1xf32>
    %497 = vector.broadcast %487 : vector<8x1xf32> to vector<8x32xf32>
    %498 = arith.subf %441, %497 : vector<8x32xf32>
    %cst_232 = arith.constant 9.99999974E-6 : f32
    %499 = vector.broadcast %cst_232 : f32 to vector<8x1xf32>
    %500 = arith.addf %496, %499 : vector<8x1xf32>
    %501 = math.rsqrt %500 : vector<8x1xf32>
    %502 = vector.broadcast %501 : vector<8x1xf32> to vector<8x32xf32>
    %503 = arith.mulf %498, %502 : vector<8x32xf32>
    %504 = vector.broadcast %443 : vector<1x32xf32> to vector<8x32xf32>
    %505 = arith.mulf %503, %504 : vector<8x32xf32>
    %506 = vector.broadcast %445 : vector<1x32xf32> to vector<8x32xf32>
    %507 = arith.addf %505, %506 : vector<8x32xf32>
    %508 = arith.truncf %507 : vector<8x32xf32> to vector<8x32xbf16>
    %cst_233 = arith.constant dense<0.000000e+00> : vector<8x96xf32>
    %509 = tpu.matmul %508, %447, %cst_233 {dimension_numbers = #tpu.dot_dimension_numbers<[1], [0], [0], [1], [0, 0, 1, 1], [], []>} : vector<8x32xbf16>, vector<32x96xbf16>, vector<8x96xf32> -> vector<8x96xf32>
    %510 = vector.broadcast %449 : vector<1x96xf32> to vector<8x96xf32>
    %511 = arith.addf %509, %510 : vector<8x96xf32>
    %512 = vector.extract_strided_slice %511 {offsets = [0, 0], sizes = [8, 8], strides = [1, 1]} : vector<8x96xf32> to vector<8x8xf32>
    %513 = vector.extract_strided_slice %511 {offsets = [0, 32], sizes = [8, 8], strides = [1, 1]} : vector<8x96xf32> to vector<8x8xf32>
    %514 = vector.extract_strided_slice %511 {offsets = [0, 64], sizes = [8, 8], strides = [1, 1]} : vector<8x96xf32> to vector<8x8xf32>
    "tpu.trace_start"() <{level = 10 : i32, message = "qd,kd->qk"}> : () -> ()
    %cst_234 = arith.constant dense<0.000000e+00> : vector<8x8xf32>
    %515 = tpu.matmul %512, %513, %cst_234 {dimension_numbers = #tpu.dot_dimension_numbers<[1], [1], [0], [0], [0, 0, 1, 0], [], []>} : vector<8x8xf32>, vector<8x8xf32>, vector<8x8xf32> -> vector<8x8xf32>
    "tpu.trace_stop"() : () -> ()
    %cst_235 = arith.constant 0.353553385 : f32
    %516 = vector.broadcast %cst_235 : f32 to vector<8x8xf32>
    %517 = arith.mulf %515, %516 : vector<8x8xf32>
    %cst_236 = arith.constant -1.000000e+30 : f32
    %518 = vector.broadcast %cst_236 : f32 to vector<8x8xf32>
    %519 = arith.select %8, %517, %518 : vector<8x8xi1>, vector<8x8xf32>
    %cst_237 = arith.constant dense<0xFF800000> : vector<8xf32>
    %520 = vector.multi_reduction <maximumf>, %519, %cst_237 [1] : vector<8x8xf32> to vector<8xf32>
    %521 = vector.shape_cast %520 : vector<8xf32> to vector<8x1xf32>
    %522 = vector.broadcast %521 : vector<8x1xf32> to vector<8x8xf32>
    %523 = arith.subf %519, %522 : vector<8x8xf32>
    %524 = math.exp %523 : vector<8x8xf32>
    %cst_238 = arith.constant dense<0.000000e+00> : vector<8xf32>
    %525 = vector.multi_reduction <add>, %524, %cst_238 [1] : vector<8x8xf32> to vector<8xf32>
    %526 = vector.shape_cast %525 : vector<8xf32> to vector<8x1xf32>
    %527 = tpu.reciprocal %526 {approx = true} : vector<8x1xf32> -> vector<8x1xf32>
    %528 = vector.broadcast %527 : vector<8x1xf32> to vector<8x8xf32>
    %529 = arith.mulf %524, %528 : vector<8x8xf32>
    "tpu.trace_start"() <{level = 10 : i32, message = "qk,kd->qd"}> : () -> ()
    %cst_239 = arith.constant dense<0.000000e+00> : vector<8x8xf32>
    %530 = tpu.matmul %529, %514, %cst_239 {dimension_numbers = #tpu.dot_dimension_numbers<[1], [0], [0], [1], [0, 0, 1, 1], [], []>} : vector<8x8xf32>, vector<8x8xf32>, vector<8x8xf32> -> vector<8x8xf32>
    "tpu.trace_stop"() : () -> ()
    %531 = vector.extract_strided_slice %511 {offsets = [0, 8], sizes = [8, 8], strides = [1, 1]} : vector<8x96xf32> to vector<8x8xf32>
    %532 = vector.extract_strided_slice %511 {offsets = [0, 40], sizes = [8, 8], strides = [1, 1]} : vector<8x96xf32> to vector<8x8xf32>
    %533 = vector.extract_strided_slice %511 {offsets = [0, 72], sizes = [8, 8], strides = [1, 1]} : vector<8x96xf32> to vector<8x8xf32>
    "tpu.trace_start"() <{level = 10 : i32, message = "qd,kd->qk"}> : () -> ()
    %cst_240 = arith.constant dense<0.000000e+00> : vector<8x8xf32>
    %534 = tpu.matmul %531, %532, %cst_240 {dimension_numbers = #tpu.dot_dimension_numbers<[1], [1], [0], [0], [0, 0, 1, 0], [], []>} : vector<8x8xf32>, vector<8x8xf32>, vector<8x8xf32> -> vector<8x8xf32>
    "tpu.trace_stop"() : () -> ()
    %cst_241 = arith.constant 0.353553385 : f32
    %535 = vector.broadcast %cst_241 : f32 to vector<8x8xf32>
    %536 = arith.mulf %534, %535 : vector<8x8xf32>
    %cst_242 = arith.constant -1.000000e+30 : f32
    %537 = vector.broadcast %cst_242 : f32 to vector<8x8xf32>
    %538 = arith.select %8, %536, %537 : vector<8x8xi1>, vector<8x8xf32>
    %cst_243 = arith.constant dense<0xFF800000> : vector<8xf32>
    %539 = vector.multi_reduction <maximumf>, %538, %cst_243 [1] : vector<8x8xf32> to vector<8xf32>
    %540 = vector.shape_cast %539 : vector<8xf32> to vector<8x1xf32>
    %541 = vector.broadcast %540 : vector<8x1xf32> to vector<8x8xf32>
    %542 = arith.subf %538, %541 : vector<8x8xf32>
    %543 = math.exp %542 : vector<8x8xf32>
    %cst_244 = arith.constant dense<0.000000e+00> : vector<8xf32>
    %544 = vector.multi_reduction <add>, %543, %cst_244 [1] : vector<8x8xf32> to vector<8xf32>
    %545 = vector.shape_cast %544 : vector<8xf32> to vector<8x1xf32>
    %546 = tpu.reciprocal %545 {approx = true} : vector<8x1xf32> -> vector<8x1xf32>
    %547 = vector.broadcast %546 : vector<8x1xf32> to vector<8x8xf32>
    %548 = arith.mulf %543, %547 : vector<8x8xf32>
    "tpu.trace_start"() <{level = 10 : i32, message = "qk,kd->qd"}> : () -> ()
    %cst_245 = arith.constant dense<0.000000e+00> : vector<8x8xf32>
    %549 = tpu.matmul %548, %533, %cst_245 {dimension_numbers = #tpu.dot_dimension_numbers<[1], [0], [0], [1], [0, 0, 1, 1], [], []>} : vector<8x8xf32>, vector<8x8xf32>, vector<8x8xf32> -> vector<8x8xf32>
    "tpu.trace_stop"() : () -> ()
    %550 = vector.extract_strided_slice %511 {offsets = [0, 16], sizes = [8, 8], strides = [1, 1]} : vector<8x96xf32> to vector<8x8xf32>
    %551 = vector.extract_strided_slice %511 {offsets = [0, 48], sizes = [8, 8], strides = [1, 1]} : vector<8x96xf32> to vector<8x8xf32>
    %552 = vector.extract_strided_slice %511 {offsets = [0, 80], sizes = [8, 8], strides = [1, 1]} : vector<8x96xf32> to vector<8x8xf32>
    "tpu.trace_start"() <{level = 10 : i32, message = "qd,kd->qk"}> : () -> ()
    %cst_246 = arith.constant dense<0.000000e+00> : vector<8x8xf32>
    %553 = tpu.matmul %550, %551, %cst_246 {dimension_numbers = #tpu.dot_dimension_numbers<[1], [1], [0], [0], [0, 0, 1, 0], [], []>} : vector<8x8xf32>, vector<8x8xf32>, vector<8x8xf32> -> vector<8x8xf32>
    "tpu.trace_stop"() : () -> ()
    %cst_247 = arith.constant 0.353553385 : f32
    %554 = vector.broadcast %cst_247 : f32 to vector<8x8xf32>
    %555 = arith.mulf %553, %554 : vector<8x8xf32>
    %cst_248 = arith.constant -1.000000e+30 : f32
    %556 = vector.broadcast %cst_248 : f32 to vector<8x8xf32>
    %557 = arith.select %8, %555, %556 : vector<8x8xi1>, vector<8x8xf32>
    %cst_249 = arith.constant dense<0xFF800000> : vector<8xf32>
    %558 = vector.multi_reduction <maximumf>, %557, %cst_249 [1] : vector<8x8xf32> to vector<8xf32>
    %559 = vector.shape_cast %558 : vector<8xf32> to vector<8x1xf32>
    %560 = vector.broadcast %559 : vector<8x1xf32> to vector<8x8xf32>
    %561 = arith.subf %557, %560 : vector<8x8xf32>
    %562 = math.exp %561 : vector<8x8xf32>
    %cst_250 = arith.constant dense<0.000000e+00> : vector<8xf32>
    %563 = vector.multi_reduction <add>, %562, %cst_250 [1] : vector<8x8xf32> to vector<8xf32>
    %564 = vector.shape_cast %563 : vector<8xf32> to vector<8x1xf32>
    %565 = tpu.reciprocal %564 {approx = true} : vector<8x1xf32> -> vector<8x1xf32>
    %566 = vector.broadcast %565 : vector<8x1xf32> to vector<8x8xf32>
    %567 = arith.mulf %562, %566 : vector<8x8xf32>
    "tpu.trace_start"() <{level = 10 : i32, message = "qk,kd->qd"}> : () -> ()
    %cst_251 = arith.constant dense<0.000000e+00> : vector<8x8xf32>
    %568 = tpu.matmul %567, %552, %cst_251 {dimension_numbers = #tpu.dot_dimension_numbers<[1], [0], [0], [1], [0, 0, 1, 1], [], []>} : vector<8x8xf32>, vector<8x8xf32>, vector<8x8xf32> -> vector<8x8xf32>
    "tpu.trace_stop"() : () -> ()
    %569 = vector.extract_strided_slice %511 {offsets = [0, 24], sizes = [8, 8], strides = [1, 1]} : vector<8x96xf32> to vector<8x8xf32>
    %570 = vector.extract_strided_slice %511 {offsets = [0, 56], sizes = [8, 8], strides = [1, 1]} : vector<8x96xf32> to vector<8x8xf32>
    %571 = vector.extract_strided_slice %511 {offsets = [0, 88], sizes = [8, 8], strides = [1, 1]} : vector<8x96xf32> to vector<8x8xf32>
    "tpu.trace_start"() <{level = 10 : i32, message = "qd,kd->qk"}> : () -> ()
    %cst_252 = arith.constant dense<0.000000e+00> : vector<8x8xf32>
    %572 = tpu.matmul %569, %570, %cst_252 {dimension_numbers = #tpu.dot_dimension_numbers<[1], [1], [0], [0], [0, 0, 1, 0], [], []>} : vector<8x8xf32>, vector<8x8xf32>, vector<8x8xf32> -> vector<8x8xf32>
    "tpu.trace_stop"() : () -> ()
    %cst_253 = arith.constant 0.353553385 : f32
    %573 = vector.broadcast %cst_253 : f32 to vector<8x8xf32>
    %574 = arith.mulf %572, %573 : vector<8x8xf32>
    %cst_254 = arith.constant -1.000000e+30 : f32
    %575 = vector.broadcast %cst_254 : f32 to vector<8x8xf32>
    %576 = arith.select %8, %574, %575 : vector<8x8xi1>, vector<8x8xf32>
    %cst_255 = arith.constant dense<0xFF800000> : vector<8xf32>
    %577 = vector.multi_reduction <maximumf>, %576, %cst_255 [1] : vector<8x8xf32> to vector<8xf32>
    %578 = vector.shape_cast %577 : vector<8xf32> to vector<8x1xf32>
    %579 = vector.broadcast %578 : vector<8x1xf32> to vector<8x8xf32>
    %580 = arith.subf %576, %579 : vector<8x8xf32>
    %581 = math.exp %580 : vector<8x8xf32>
    %cst_256 = arith.constant dense<0.000000e+00> : vector<8xf32>
    %582 = vector.multi_reduction <add>, %581, %cst_256 [1] : vector<8x8xf32> to vector<8xf32>
    %583 = vector.shape_cast %582 : vector<8xf32> to vector<8x1xf32>
    %584 = tpu.reciprocal %583 {approx = true} : vector<8x1xf32> -> vector<8x1xf32>
    %585 = vector.broadcast %584 : vector<8x1xf32> to vector<8x8xf32>
    %586 = arith.mulf %581, %585 : vector<8x8xf32>
    "tpu.trace_start"() <{level = 10 : i32, message = "qk,kd->qd"}> : () -> ()
    %cst_257 = arith.constant dense<0.000000e+00> : vector<8x8xf32>
    %587 = tpu.matmul %586, %571, %cst_257 {dimension_numbers = #tpu.dot_dimension_numbers<[1], [0], [0], [1], [0, 0, 1, 1], [], []>} : vector<8x8xf32>, vector<8x8xf32>, vector<8x8xf32> -> vector<8x8xf32>
    "tpu.trace_stop"() : () -> ()
    %588 = tpu.concatenate %530, %549, %568, %587 in 1 : vector<8x8xf32>, vector<8x8xf32>, vector<8x8xf32>, vector<8x8xf32> -> vector<8x32xf32>
    %589 = arith.truncf %588 : vector<8x32xf32> to vector<8x32xbf16>
    %cst_258 = arith.constant dense<0.000000e+00> : vector<8x32xf32>
    %590 = tpu.matmul %589, %451, %cst_258 {dimension_numbers = #tpu.dot_dimension_numbers<[1], [0], [0], [1], [0, 0, 1, 1], [], []>} : vector<8x32xbf16>, vector<32x32xbf16>, vector<8x32xf32> -> vector<8x32xf32>
    %591 = vector.broadcast %453 : vector<1x32xf32> to vector<8x32xf32>
    %592 = arith.addf %590, %591 : vector<8x32xf32>
    %593 = arith.addf %441, %592 : vector<8x32xf32>
    %cst_259 = arith.constant dense<0.000000e+00> : vector<8xf32>
    %594 = vector.multi_reduction <add>, %593, %cst_259 [1] : vector<8x32xf32> to vector<8xf32>
    %595 = vector.shape_cast %594 : vector<8xf32> to vector<8x1xf32>
    %cst_260 = arith.constant 3.200000e+01 : f32
    %596 = vector.broadcast %cst_260 : f32 to vector<8x1xf32>
    %597 = arith.divf %595, %596 : vector<8x1xf32>
    %598 = vector.broadcast %597 : vector<8x1xf32> to vector<8x32xf32>
    %599 = arith.subf %593, %598 : vector<8x32xf32>
    %600 = vector.broadcast %597 : vector<8x1xf32> to vector<8x32xf32>
    %601 = arith.subf %593, %600 : vector<8x32xf32>
    %602 = arith.mulf %599, %601 : vector<8x32xf32>
    %cst_261 = arith.constant dense<0.000000e+00> : vector<8xf32>
    %603 = vector.multi_reduction <add>, %602, %cst_261 [1] : vector<8x32xf32> to vector<8xf32>
    %604 = vector.shape_cast %603 : vector<8xf32> to vector<8x1xf32>
    %cst_262 = arith.constant 3.200000e+01 : f32
    %605 = vector.broadcast %cst_262 : f32 to vector<8x1xf32>
    %606 = arith.divf %604, %605 : vector<8x1xf32>
    %607 = vector.broadcast %597 : vector<8x1xf32> to vector<8x32xf32>
    %608 = arith.subf %593, %607 : vector<8x32xf32>
    %cst_263 = arith.constant 9.99999974E-6 : f32
    %609 = vector.broadcast %cst_263 : f32 to vector<8x1xf32>
    %610 = arith.addf %606, %609 : vector<8x1xf32>
    %611 = math.rsqrt %610 : vector<8x1xf32>
    %612 = vector.broadcast %611 : vector<8x1xf32> to vector<8x32xf32>
    %613 = arith.mulf %608, %612 : vector<8x32xf32>
    %614 = vector.broadcast %455 : vector<1x32xf32> to vector<8x32xf32>
    %615 = arith.mulf %613, %614 : vector<8x32xf32>
    %616 = vector.broadcast %457 : vector<1x32xf32> to vector<8x32xf32>
    %617 = arith.addf %615, %616 : vector<8x32xf32>
    %618 = arith.truncf %617 : vector<8x32xf32> to vector<8x32xbf16>
    %cst_264 = arith.constant dense<0.000000e+00> : vector<8x98xf32>
    %619 = tpu.matmul %618, %459, %cst_264 {dimension_numbers = #tpu.dot_dimension_numbers<[1], [0], [0], [1], [0, 0, 1, 1], [], []>} : vector<8x32xbf16>, vector<32x98xbf16>, vector<8x98xf32> -> vector<8x98xf32>
    %620 = vector.broadcast %461 : vector<1x98xf32> to vector<8x98xf32>
    %621 = arith.addf %619, %620 : vector<8x98xf32>
    %622 = vector.extract_strided_slice %621 {offsets = [0, 96], sizes = [8, 2], strides = [1, 1]} : vector<8x98xf32> to vector<8x2xf32>
    %cst_265 = arith.constant 0.000000e+00 : f32
    %623 = vector.broadcast %cst_265 : f32 to vector<8x2xf32>
    %624 = arith.maximumf %622, %623 : vector<8x2xf32>
    %625 = math.absf %622 : vector<8x2xf32>
    %cst_266 = arith.constant 0.000000e+00 : f32
    %626 = vector.broadcast %cst_266 : f32 to vector<8x2xf32>
    %627 = arith.subf %626, %625 : vector<8x2xf32>
    %628 = math.exp %627 : vector<8x2xf32>
    %cst_267 = arith.constant 1.000000e+00 : f32
    %629 = vector.broadcast %cst_267 : f32 to vector<8x2xf32>
    %630 = arith.addf %629, %628 : vector<8x2xf32>
    %631 = math.log %630 : vector<8x2xf32>
    %632 = arith.addf %624, %631 : vector<8x2xf32>
    %cst_268 = arith.constant 0.00999999977 : f32
    %633 = vector.broadcast %cst_268 : f32 to vector<8x2xf32>
    %634 = arith.mulf %632, %633 : vector<8x2xf32>
    %635 = vector.extract_strided_slice %621 {offsets = [0, 0], sizes = [8, 16], strides = [1, 1]} : vector<8x98xf32> to vector<8x16xf32>
    %636 = arith.negf %635 : vector<8x16xf32>
    %637 = math.exp %636 : vector<8x16xf32>
    %cst_269 = arith.constant 1.000000e+00 : f32
    %638 = vector.broadcast %cst_269 : f32 to vector<8x16xf32>
    %639 = arith.addf %638, %637 : vector<8x16xf32>
    %640 = arith.divf %638, %639 : vector<8x16xf32>
    %641 = arith.mulf %635, %640 : vector<8x16xf32>
    %642 = vector.extract_strided_slice %621 {offsets = [0, 32], sizes = [8, 16], strides = [1, 1]} : vector<8x98xf32> to vector<8x16xf32>
    %643 = arith.negf %642 : vector<8x16xf32>
    %644 = math.exp %643 : vector<8x16xf32>
    %cst_270 = arith.constant 1.000000e+00 : f32
    %645 = vector.broadcast %cst_270 : f32 to vector<8x16xf32>
    %646 = arith.addf %645, %644 : vector<8x16xf32>
    %647 = arith.divf %645, %646 : vector<8x16xf32>
    %648 = arith.mulf %642, %647 : vector<8x16xf32>
    %649 = vector.extract_strided_slice %621 {offsets = [0, 64], sizes = [8, 16], strides = [1, 1]} : vector<8x98xf32> to vector<8x16xf32>
    %650 = arith.negf %649 : vector<8x16xf32>
    %651 = math.exp %650 : vector<8x16xf32>
    %cst_271 = arith.constant 1.000000e+00 : f32
    %652 = vector.broadcast %cst_271 : f32 to vector<8x16xf32>
    %653 = arith.addf %652, %651 : vector<8x16xf32>
    %654 = arith.divf %652, %653 : vector<8x16xf32>
    %655 = arith.mulf %649, %654 : vector<8x16xf32>
    %656 = arith.mulf %641, %641 : vector<8x16xf32>
    %cst_272 = arith.constant dense<0.000000e+00> : vector<8xf32>
    %657 = vector.multi_reduction <add>, %656, %cst_272 [1] : vector<8x16xf32> to vector<8xf32>
    %658 = vector.shape_cast %657 : vector<8xf32> to vector<8x1xf32>
    %cst_273 = arith.constant 9.99999997E-7 : f32
    %659 = vector.broadcast %cst_273 : f32 to vector<8x1xf32>
    %660 = arith.addf %658, %659 : vector<8x1xf32>
    %661 = math.rsqrt %660 : vector<8x1xf32>
    %662 = vector.broadcast %661 : vector<8x1xf32> to vector<8x16xf32>
    %663 = arith.mulf %641, %662 : vector<8x16xf32>
    %664 = arith.mulf %648, %648 : vector<8x16xf32>
    %cst_274 = arith.constant dense<0.000000e+00> : vector<8xf32>
    %665 = vector.multi_reduction <add>, %664, %cst_274 [1] : vector<8x16xf32> to vector<8xf32>
    %666 = vector.shape_cast %665 : vector<8xf32> to vector<8x1xf32>
    %cst_275 = arith.constant 9.99999997E-7 : f32
    %667 = vector.broadcast %cst_275 : f32 to vector<8x1xf32>
    %668 = arith.addf %666, %667 : vector<8x1xf32>
    %669 = math.rsqrt %668 : vector<8x1xf32>
    %670 = vector.broadcast %669 : vector<8x1xf32> to vector<8x16xf32>
    %671 = arith.mulf %648, %670 : vector<8x16xf32>
    %672 = vector.extract_strided_slice %634 {offsets = [0, 0], sizes = [8, 1], strides = [1, 1]} : vector<8x2xf32> to vector<8x1xf32>
    %673 = vector.broadcast %672 : vector<8x1xf32> to vector<8x16xf32>
    %674 = arith.mulf %655, %673 : vector<8x16xf32>
    %675 = vector.extract_strided_slice %467 {offsets = [0, 0, 0], sizes = [1, 16, 16], strides = [1, 1, 1]} : vector<2x16x16xf32> to vector<1x16x16xf32>
    %676 = vector.shape_cast %675 : vector<1x16x16xf32> to vector<16x16xf32>
    %677 = vector.extract_strided_slice %469 {offsets = [0, 0, 0], sizes = [1, 16, 16], strides = [1, 1, 1]} : vector<2x16x16xf32> to vector<1x16x16xf32>
    %678 = vector.shape_cast %677 : vector<1x16x16xf32> to vector<16x16xf32>
    %679 = vector.extract_strided_slice %471 {offsets = [0, 0, 0], sizes = [1, 16, 16], strides = [1, 1, 1]} : vector<2x16x16xf32> to vector<1x16x16xf32>
    %680 = vector.shape_cast %679 : vector<1x16x16xf32> to vector<16x16xf32>
    %681 = vector.extract_strided_slice %663 {offsets = [0, 0], sizes = [4, 16], strides = [1, 1]} : vector<8x16xf32> to vector<4x16xf32>
    %682 = vector.extract_strided_slice %671 {offsets = [0, 0], sizes = [4, 16], strides = [1, 1]} : vector<8x16xf32> to vector<4x16xf32>
    %683 = vector.extract_strided_slice %674 {offsets = [0, 0], sizes = [4, 16], strides = [1, 1]} : vector<8x16xf32> to vector<4x16xf32>
    %cst_276 = arith.constant dense<0.000000e+00> : vector<4x16xf32>
    %684 = tpu.matmul %681, %676, %cst_276 {dimension_numbers = #tpu.dot_dimension_numbers<[1], [0], [0], [1], [0, 0, 1, 1], [], []>} : vector<4x16xf32>, vector<16x16xf32>, vector<4x16xf32> -> vector<4x16xf32>
    %cst_277 = arith.constant dense<0.000000e+00> : vector<4x16xf32>
    %685 = tpu.matmul %681, %680, %cst_277 {dimension_numbers = #tpu.dot_dimension_numbers<[1], [0], [0], [1], [0, 0, 1, 1], [], []>} : vector<4x16xf32>, vector<16x16xf32>, vector<4x16xf32> -> vector<4x16xf32>
    %686 = arith.negf %684 : vector<4x16xf32>
    %687 = math.exp %686 : vector<4x16xf32>
    %cst_278 = arith.constant 1.000000e+00 : f32
    %688 = vector.broadcast %cst_278 : f32 to vector<4x16xf32>
    %689 = arith.addf %688, %687 : vector<4x16xf32>
    %690 = arith.divf %688, %689 : vector<4x16xf32>
    %691 = arith.mulf %684, %690 : vector<4x16xf32>
    %692 = arith.mulf %691, %685 : vector<4x16xf32>
    %cst_279 = arith.constant dense<0.000000e+00> : vector<4x16xf32>
    %693 = tpu.matmul %692, %678, %cst_279 {dimension_numbers = #tpu.dot_dimension_numbers<[1], [0], [0], [1], [0, 0, 1, 1], [], []>} : vector<4x16xf32>, vector<16x16xf32>, vector<4x16xf32> -> vector<4x16xf32>
    %cst_280 = arith.constant dense<0.000000e+00> : vector<4x16xf32>
    %694 = tpu.matmul %682, %676, %cst_280 {dimension_numbers = #tpu.dot_dimension_numbers<[1], [0], [0], [1], [0, 0, 1, 1], [], []>} : vector<4x16xf32>, vector<16x16xf32>, vector<4x16xf32> -> vector<4x16xf32>
    %cst_281 = arith.constant dense<0.000000e+00> : vector<4x16xf32>
    %695 = tpu.matmul %682, %680, %cst_281 {dimension_numbers = #tpu.dot_dimension_numbers<[1], [0], [0], [1], [0, 0, 1, 1], [], []>} : vector<4x16xf32>, vector<16x16xf32>, vector<4x16xf32> -> vector<4x16xf32>
    %696 = arith.negf %694 : vector<4x16xf32>
    %697 = math.exp %696 : vector<4x16xf32>
    %cst_282 = arith.constant 1.000000e+00 : f32
    %698 = vector.broadcast %cst_282 : f32 to vector<4x16xf32>
    %699 = arith.addf %698, %697 : vector<4x16xf32>
    %700 = arith.divf %698, %699 : vector<4x16xf32>
    %701 = arith.mulf %694, %700 : vector<4x16xf32>
    %702 = arith.mulf %701, %695 : vector<4x16xf32>
    "tpu.trace_start"() <{level = 10 : i32, message = "cd,ed->ce"}> : () -> ()
    %cst_283 = arith.constant dense<0.000000e+00> : vector<4x16xf32>
    %703 = tpu.matmul %683, %678, %cst_283 {dimension_numbers = #tpu.dot_dimension_numbers<[1], [1], [0], [0], [0, 0, 1, 0], [], []>} : vector<4x16xf32>, vector<16x16xf32>, vector<4x16xf32> -> vector<4x16xf32>
    "tpu.trace_stop"() : () -> ()
    %704 = arith.mulf %703, %695 : vector<4x16xf32>
    %cst_284 = arith.constant 1.000000e+00 : f32
    %705 = vector.broadcast %cst_284 : f32 to vector<4x16xf32>
    %706 = arith.subf %705, %700 : vector<4x16xf32>
    %707 = arith.mulf %701, %706 : vector<4x16xf32>
    %708 = arith.addf %700, %707 : vector<4x16xf32>
    %709 = arith.mulf %704, %708 : vector<4x16xf32>
    %710 = arith.mulf %703, %701 : vector<4x16xf32>
    %711 = tpu.transpose %682, [1, 0] : vector<4x16xf32> -> vector<16x4xf32>
    %712 = tpu.transpose %702, [1, 0] : vector<4x16xf32> -> vector<16x4xf32>
    %cst_285 = arith.constant dense<0.000000e+00> : vector<16x16xf32>
    %713 = tpu.matmul %712, %683, %cst_285 {dimension_numbers = #tpu.dot_dimension_numbers<[1], [0], [0], [1], [0, 0, 1, 1], [], []>} : vector<16x4xf32>, vector<4x16xf32>, vector<16x16xf32> -> vector<16x16xf32>
    %cst_286 = arith.constant dense<0.000000e+00> : vector<16x16xf32>
    %714 = tpu.matmul %711, %709, %cst_286 {dimension_numbers = #tpu.dot_dimension_numbers<[1], [0], [0], [1], [0, 0, 1, 1], [], []>} : vector<16x4xf32>, vector<4x16xf32>, vector<16x16xf32> -> vector<16x16xf32>
    %cst_287 = arith.constant dense<0.000000e+00> : vector<16x16xf32>
    %715 = tpu.matmul %711, %710, %cst_287 {dimension_numbers = #tpu.dot_dimension_numbers<[1], [0], [0], [1], [0, 0, 1, 1], [], []>} : vector<16x4xf32>, vector<4x16xf32>, vector<16x16xf32> -> vector<16x16xf32>
    %716 = arith.addf %676, %714 : vector<16x16xf32>
    %717 = arith.addf %678, %713 : vector<16x16xf32>
    %718 = arith.addf %680, %715 : vector<16x16xf32>
    %719 = vector.extract_strided_slice %663 {offsets = [4, 0], sizes = [4, 16], strides = [1, 1]} : vector<8x16xf32> to vector<4x16xf32>
    %cst_288 = arith.constant dense<0.000000e+00> : vector<4x16xf32>
    %720 = tpu.matmul %719, %716, %cst_288 {dimension_numbers = #tpu.dot_dimension_numbers<[1], [0], [0], [1], [0, 0, 1, 1], [], []>} : vector<4x16xf32>, vector<16x16xf32>, vector<4x16xf32> -> vector<4x16xf32>
    %cst_289 = arith.constant dense<0.000000e+00> : vector<4x16xf32>
    %721 = tpu.matmul %719, %718, %cst_289 {dimension_numbers = #tpu.dot_dimension_numbers<[1], [0], [0], [1], [0, 0, 1, 1], [], []>} : vector<4x16xf32>, vector<16x16xf32>, vector<4x16xf32> -> vector<4x16xf32>
    %722 = arith.negf %720 : vector<4x16xf32>
    %723 = math.exp %722 : vector<4x16xf32>
    %cst_290 = arith.constant 1.000000e+00 : f32
    %724 = vector.broadcast %cst_290 : f32 to vector<4x16xf32>
    %725 = arith.addf %724, %723 : vector<4x16xf32>
    %726 = arith.divf %724, %725 : vector<4x16xf32>
    %727 = arith.mulf %720, %726 : vector<4x16xf32>
    %728 = arith.mulf %727, %721 : vector<4x16xf32>
    %cst_291 = arith.constant dense<0.000000e+00> : vector<4x16xf32>
    %729 = tpu.matmul %728, %717, %cst_291 {dimension_numbers = #tpu.dot_dimension_numbers<[1], [0], [0], [1], [0, 0, 1, 1], [], []>} : vector<4x16xf32>, vector<16x16xf32>, vector<4x16xf32> -> vector<4x16xf32>
    %730 = tpu.concatenate %693, %729 in 0 : vector<4x16xf32>, vector<4x16xf32> -> vector<8x16xf32>
    %731 = vector.extract_strided_slice %621 {offsets = [0, 16], sizes = [8, 16], strides = [1, 1]} : vector<8x98xf32> to vector<8x16xf32>
    %732 = arith.negf %731 : vector<8x16xf32>
    %733 = math.exp %732 : vector<8x16xf32>
    %cst_292 = arith.constant 1.000000e+00 : f32
    %734 = vector.broadcast %cst_292 : f32 to vector<8x16xf32>
    %735 = arith.addf %734, %733 : vector<8x16xf32>
    %736 = arith.divf %734, %735 : vector<8x16xf32>
    %737 = arith.mulf %731, %736 : vector<8x16xf32>
    %738 = vector.extract_strided_slice %621 {offsets = [0, 48], sizes = [8, 16], strides = [1, 1]} : vector<8x98xf32> to vector<8x16xf32>
    %739 = arith.negf %738 : vector<8x16xf32>
    %740 = math.exp %739 : vector<8x16xf32>
    %cst_293 = arith.constant 1.000000e+00 : f32
    %741 = vector.broadcast %cst_293 : f32 to vector<8x16xf32>
    %742 = arith.addf %741, %740 : vector<8x16xf32>
    %743 = arith.divf %741, %742 : vector<8x16xf32>
    %744 = arith.mulf %738, %743 : vector<8x16xf32>
    %745 = vector.extract_strided_slice %621 {offsets = [0, 80], sizes = [8, 16], strides = [1, 1]} : vector<8x98xf32> to vector<8x16xf32>
    %746 = arith.negf %745 : vector<8x16xf32>
    %747 = math.exp %746 : vector<8x16xf32>
    %cst_294 = arith.constant 1.000000e+00 : f32
    %748 = vector.broadcast %cst_294 : f32 to vector<8x16xf32>
    %749 = arith.addf %748, %747 : vector<8x16xf32>
    %750 = arith.divf %748, %749 : vector<8x16xf32>
    %751 = arith.mulf %745, %750 : vector<8x16xf32>
    %752 = arith.mulf %737, %737 : vector<8x16xf32>
    %cst_295 = arith.constant dense<0.000000e+00> : vector<8xf32>
    %753 = vector.multi_reduction <add>, %752, %cst_295 [1] : vector<8x16xf32> to vector<8xf32>
    %754 = vector.shape_cast %753 : vector<8xf32> to vector<8x1xf32>
    %cst_296 = arith.constant 9.99999997E-7 : f32
    %755 = vector.broadcast %cst_296 : f32 to vector<8x1xf32>
    %756 = arith.addf %754, %755 : vector<8x1xf32>
    %757 = math.rsqrt %756 : vector<8x1xf32>
    %758 = vector.broadcast %757 : vector<8x1xf32> to vector<8x16xf32>
    %759 = arith.mulf %737, %758 : vector<8x16xf32>
    %760 = arith.mulf %744, %744 : vector<8x16xf32>
    %cst_297 = arith.constant dense<0.000000e+00> : vector<8xf32>
    %761 = vector.multi_reduction <add>, %760, %cst_297 [1] : vector<8x16xf32> to vector<8xf32>
    %762 = vector.shape_cast %761 : vector<8xf32> to vector<8x1xf32>
    %cst_298 = arith.constant 9.99999997E-7 : f32
    %763 = vector.broadcast %cst_298 : f32 to vector<8x1xf32>
    %764 = arith.addf %762, %763 : vector<8x1xf32>
    %765 = math.rsqrt %764 : vector<8x1xf32>
    %766 = vector.broadcast %765 : vector<8x1xf32> to vector<8x16xf32>
    %767 = arith.mulf %744, %766 : vector<8x16xf32>
    %768 = vector.extract_strided_slice %634 {offsets = [0, 1], sizes = [8, 1], strides = [1, 1]} : vector<8x2xf32> to vector<8x1xf32>
    %769 = vector.broadcast %768 : vector<8x1xf32> to vector<8x16xf32>
    %770 = arith.mulf %751, %769 : vector<8x16xf32>
    %771 = vector.extract_strided_slice %467 {offsets = [1, 0, 0], sizes = [1, 16, 16], strides = [1, 1, 1]} : vector<2x16x16xf32> to vector<1x16x16xf32>
    %772 = vector.shape_cast %771 : vector<1x16x16xf32> to vector<16x16xf32>
    %773 = vector.extract_strided_slice %469 {offsets = [1, 0, 0], sizes = [1, 16, 16], strides = [1, 1, 1]} : vector<2x16x16xf32> to vector<1x16x16xf32>
    %774 = vector.shape_cast %773 : vector<1x16x16xf32> to vector<16x16xf32>
    %775 = vector.extract_strided_slice %471 {offsets = [1, 0, 0], sizes = [1, 16, 16], strides = [1, 1, 1]} : vector<2x16x16xf32> to vector<1x16x16xf32>
    %776 = vector.shape_cast %775 : vector<1x16x16xf32> to vector<16x16xf32>
    %777 = vector.extract_strided_slice %759 {offsets = [0, 0], sizes = [4, 16], strides = [1, 1]} : vector<8x16xf32> to vector<4x16xf32>
    %778 = vector.extract_strided_slice %767 {offsets = [0, 0], sizes = [4, 16], strides = [1, 1]} : vector<8x16xf32> to vector<4x16xf32>
    %779 = vector.extract_strided_slice %770 {offsets = [0, 0], sizes = [4, 16], strides = [1, 1]} : vector<8x16xf32> to vector<4x16xf32>
    %cst_299 = arith.constant dense<0.000000e+00> : vector<4x16xf32>
    %780 = tpu.matmul %777, %772, %cst_299 {dimension_numbers = #tpu.dot_dimension_numbers<[1], [0], [0], [1], [0, 0, 1, 1], [], []>} : vector<4x16xf32>, vector<16x16xf32>, vector<4x16xf32> -> vector<4x16xf32>
    %cst_300 = arith.constant dense<0.000000e+00> : vector<4x16xf32>
    %781 = tpu.matmul %777, %776, %cst_300 {dimension_numbers = #tpu.dot_dimension_numbers<[1], [0], [0], [1], [0, 0, 1, 1], [], []>} : vector<4x16xf32>, vector<16x16xf32>, vector<4x16xf32> -> vector<4x16xf32>
    %782 = arith.negf %780 : vector<4x16xf32>
    %783 = math.exp %782 : vector<4x16xf32>
    %cst_301 = arith.constant 1.000000e+00 : f32
    %784 = vector.broadcast %cst_301 : f32 to vector<4x16xf32>
    %785 = arith.addf %784, %783 : vector<4x16xf32>
    %786 = arith.divf %784, %785 : vector<4x16xf32>
    %787 = arith.mulf %780, %786 : vector<4x16xf32>
    %788 = arith.mulf %787, %781 : vector<4x16xf32>
    %cst_302 = arith.constant dense<0.000000e+00> : vector<4x16xf32>
    %789 = tpu.matmul %788, %774, %cst_302 {dimension_numbers = #tpu.dot_dimension_numbers<[1], [0], [0], [1], [0, 0, 1, 1], [], []>} : vector<4x16xf32>, vector<16x16xf32>, vector<4x16xf32> -> vector<4x16xf32>
    %cst_303 = arith.constant dense<0.000000e+00> : vector<4x16xf32>
    %790 = tpu.matmul %778, %772, %cst_303 {dimension_numbers = #tpu.dot_dimension_numbers<[1], [0], [0], [1], [0, 0, 1, 1], [], []>} : vector<4x16xf32>, vector<16x16xf32>, vector<4x16xf32> -> vector<4x16xf32>
    %cst_304 = arith.constant dense<0.000000e+00> : vector<4x16xf32>
    %791 = tpu.matmul %778, %776, %cst_304 {dimension_numbers = #tpu.dot_dimension_numbers<[1], [0], [0], [1], [0, 0, 1, 1], [], []>} : vector<4x16xf32>, vector<16x16xf32>, vector<4x16xf32> -> vector<4x16xf32>
    %792 = arith.negf %790 : vector<4x16xf32>
    %793 = math.exp %792 : vector<4x16xf32>
    %cst_305 = arith.constant 1.000000e+00 : f32
    %794 = vector.broadcast %cst_305 : f32 to vector<4x16xf32>
    %795 = arith.addf %794, %793 : vector<4x16xf32>
    %796 = arith.divf %794, %795 : vector<4x16xf32>
    %797 = arith.mulf %790, %796 : vector<4x16xf32>
    %798 = arith.mulf %797, %791 : vector<4x16xf32>
    "tpu.trace_start"() <{level = 10 : i32, message = "cd,ed->ce"}> : () -> ()
    %cst_306 = arith.constant dense<0.000000e+00> : vector<4x16xf32>
    %799 = tpu.matmul %779, %774, %cst_306 {dimension_numbers = #tpu.dot_dimension_numbers<[1], [1], [0], [0], [0, 0, 1, 0], [], []>} : vector<4x16xf32>, vector<16x16xf32>, vector<4x16xf32> -> vector<4x16xf32>
    "tpu.trace_stop"() : () -> ()
    %800 = arith.mulf %799, %791 : vector<4x16xf32>
    %cst_307 = arith.constant 1.000000e+00 : f32
    %801 = vector.broadcast %cst_307 : f32 to vector<4x16xf32>
    %802 = arith.subf %801, %796 : vector<4x16xf32>
    %803 = arith.mulf %797, %802 : vector<4x16xf32>
    %804 = arith.addf %796, %803 : vector<4x16xf32>
    %805 = arith.mulf %800, %804 : vector<4x16xf32>
    %806 = arith.mulf %799, %797 : vector<4x16xf32>
    %807 = tpu.transpose %778, [1, 0] : vector<4x16xf32> -> vector<16x4xf32>
    %808 = tpu.transpose %798, [1, 0] : vector<4x16xf32> -> vector<16x4xf32>
    %cst_308 = arith.constant dense<0.000000e+00> : vector<16x16xf32>
    %809 = tpu.matmul %808, %779, %cst_308 {dimension_numbers = #tpu.dot_dimension_numbers<[1], [0], [0], [1], [0, 0, 1, 1], [], []>} : vector<16x4xf32>, vector<4x16xf32>, vector<16x16xf32> -> vector<16x16xf32>
    %cst_309 = arith.constant dense<0.000000e+00> : vector<16x16xf32>
    %810 = tpu.matmul %807, %805, %cst_309 {dimension_numbers = #tpu.dot_dimension_numbers<[1], [0], [0], [1], [0, 0, 1, 1], [], []>} : vector<16x4xf32>, vector<4x16xf32>, vector<16x16xf32> -> vector<16x16xf32>
    %cst_310 = arith.constant dense<0.000000e+00> : vector<16x16xf32>
    %811 = tpu.matmul %807, %806, %cst_310 {dimension_numbers = #tpu.dot_dimension_numbers<[1], [0], [0], [1], [0, 0, 1, 1], [], []>} : vector<16x4xf32>, vector<4x16xf32>, vector<16x16xf32> -> vector<16x16xf32>
    %812 = arith.addf %772, %810 : vector<16x16xf32>
    %813 = arith.addf %774, %809 : vector<16x16xf32>
    %814 = arith.addf %776, %811 : vector<16x16xf32>
    %815 = vector.extract_strided_slice %759 {offsets = [4, 0], sizes = [4, 16], strides = [1, 1]} : vector<8x16xf32> to vector<4x16xf32>
    %cst_311 = arith.constant dense<0.000000e+00> : vector<4x16xf32>
    %816 = tpu.matmul %815, %812, %cst_311 {dimension_numbers = #tpu.dot_dimension_numbers<[1], [0], [0], [1], [0, 0, 1, 1], [], []>} : vector<4x16xf32>, vector<16x16xf32>, vector<4x16xf32> -> vector<4x16xf32>
    %cst_312 = arith.constant dense<0.000000e+00> : vector<4x16xf32>
    %817 = tpu.matmul %815, %814, %cst_312 {dimension_numbers = #tpu.dot_dimension_numbers<[1], [0], [0], [1], [0, 0, 1, 1], [], []>} : vector<4x16xf32>, vector<16x16xf32>, vector<4x16xf32> -> vector<4x16xf32>
    %818 = arith.negf %816 : vector<4x16xf32>
    %819 = math.exp %818 : vector<4x16xf32>
    %cst_313 = arith.constant 1.000000e+00 : f32
    %820 = vector.broadcast %cst_313 : f32 to vector<4x16xf32>
    %821 = arith.addf %820, %819 : vector<4x16xf32>
    %822 = arith.divf %820, %821 : vector<4x16xf32>
    %823 = arith.mulf %816, %822 : vector<4x16xf32>
    %824 = arith.mulf %823, %817 : vector<4x16xf32>
    %cst_314 = arith.constant dense<0.000000e+00> : vector<4x16xf32>
    %825 = tpu.matmul %824, %813, %cst_314 {dimension_numbers = #tpu.dot_dimension_numbers<[1], [0], [0], [1], [0, 0, 1, 1], [], []>} : vector<4x16xf32>, vector<16x16xf32>, vector<4x16xf32> -> vector<4x16xf32>
    %826 = tpu.concatenate %789, %825 in 0 : vector<4x16xf32>, vector<4x16xf32> -> vector<8x16xf32>
    %827 = tpu.concatenate %730, %826 in 1 : vector<8x16xf32>, vector<8x16xf32> -> vector<8x32xf32>
    %828 = arith.truncf %827 : vector<8x32xf32> to vector<8x32xbf16>
    %cst_315 = arith.constant dense<0.000000e+00> : vector<8x32xf32>
    %829 = tpu.matmul %828, %463, %cst_315 {dimension_numbers = #tpu.dot_dimension_numbers<[1], [0], [0], [1], [0, 0, 1, 1], [], []>} : vector<8x32xbf16>, vector<32x32xbf16>, vector<8x32xf32> -> vector<8x32xf32>
    %830 = vector.broadcast %465 : vector<1x32xf32> to vector<8x32xf32>
    %831 = arith.addf %829, %830 : vector<8x32xf32>
    %832 = arith.addf %593, %831 : vector<8x32xf32>
    %cst_316 = arith.constant dense<0.000000e+00> : vector<8xf32>
    %833 = vector.multi_reduction <add>, %832, %cst_316 [1] : vector<8x32xf32> to vector<8xf32>
    %834 = vector.shape_cast %833 : vector<8xf32> to vector<8x1xf32>
    %cst_317 = arith.constant 3.200000e+01 : f32
    %835 = vector.broadcast %cst_317 : f32 to vector<8x1xf32>
    %836 = arith.divf %834, %835 : vector<8x1xf32>
    %837 = vector.broadcast %836 : vector<8x1xf32> to vector<8x32xf32>
    %838 = arith.subf %832, %837 : vector<8x32xf32>
    %839 = vector.broadcast %836 : vector<8x1xf32> to vector<8x32xf32>
    %840 = arith.subf %832, %839 : vector<8x32xf32>
    %841 = arith.mulf %838, %840 : vector<8x32xf32>
    %cst_318 = arith.constant dense<0.000000e+00> : vector<8xf32>
    %842 = vector.multi_reduction <add>, %841, %cst_318 [1] : vector<8x32xf32> to vector<8xf32>
    %843 = vector.shape_cast %842 : vector<8xf32> to vector<8x1xf32>
    %cst_319 = arith.constant 3.200000e+01 : f32
    %844 = vector.broadcast %cst_319 : f32 to vector<8x1xf32>
    %845 = arith.divf %843, %844 : vector<8x1xf32>
    %846 = vector.broadcast %836 : vector<8x1xf32> to vector<8x32xf32>
    %847 = arith.subf %832, %846 : vector<8x32xf32>
    %cst_320 = arith.constant 9.99999974E-6 : f32
    %848 = vector.broadcast %cst_320 : f32 to vector<8x1xf32>
    %849 = arith.addf %845, %848 : vector<8x1xf32>
    %850 = math.rsqrt %849 : vector<8x1xf32>
    %851 = vector.broadcast %850 : vector<8x1xf32> to vector<8x32xf32>
    %852 = arith.mulf %847, %851 : vector<8x32xf32>
    %853 = vector.broadcast %473 : vector<1x32xf32> to vector<8x32xf32>
    %854 = arith.mulf %852, %853 : vector<8x32xf32>
    %855 = vector.broadcast %475 : vector<1x32xf32> to vector<8x32xf32>
    %856 = arith.addf %854, %855 : vector<8x32xf32>
    %857 = arith.truncf %856 : vector<8x32xf32> to vector<8x32xbf16>
    %cst_321 = arith.constant dense<0.000000e+00> : vector<8x128xf32>
    %858 = tpu.matmul %857, %477, %cst_321 {dimension_numbers = #tpu.dot_dimension_numbers<[1], [0], [0], [1], [0, 0, 1, 1], [], []>} : vector<8x32xbf16>, vector<32x128xbf16>, vector<8x128xf32> -> vector<8x128xf32>
    %859 = vector.broadcast %479 : vector<1x128xf32> to vector<8x128xf32>
    %860 = arith.addf %858, %859 : vector<8x128xf32>
    %861 = vector.extract_strided_slice %860 {offsets = [0, 0], sizes = [8, 64], strides = [1, 1]} : vector<8x128xf32> to vector<8x64xf32>
    %862 = arith.negf %861 : vector<8x64xf32>
    %863 = math.exp %862 : vector<8x64xf32>
    %cst_322 = arith.constant 1.000000e+00 : f32
    %864 = vector.broadcast %cst_322 : f32 to vector<8x64xf32>
    %865 = arith.addf %864, %863 : vector<8x64xf32>
    %866 = arith.divf %864, %865 : vector<8x64xf32>
    %867 = arith.mulf %861, %866 : vector<8x64xf32>
    %868 = vector.extract_strided_slice %860 {offsets = [0, 64], sizes = [8, 64], strides = [1, 1]} : vector<8x128xf32> to vector<8x64xf32>
    %869 = arith.mulf %867, %868 : vector<8x64xf32>
    %870 = arith.truncf %869 : vector<8x64xf32> to vector<8x64xbf16>
    %cst_323 = arith.constant dense<0.000000e+00> : vector<8x32xf32>
    %871 = tpu.matmul %870, %481, %cst_323 {dimension_numbers = #tpu.dot_dimension_numbers<[1], [0], [0], [1], [0, 0, 1, 1], [], []>} : vector<8x64xbf16>, vector<64x32xbf16>, vector<8x32xf32> -> vector<8x32xf32>
    %872 = vector.broadcast %483 : vector<1x32xf32> to vector<8x32xf32>
    %873 = arith.addf %871, %872 : vector<8x32xf32>
    %874 = arith.addf %832, %873 : vector<8x32xf32>
    %c0_324 = arith.constant 0 : index
    %c0_325 = arith.constant 0 : index
    %875 = vector.load %arg24[%c0_324, %c0_325] : memref<1x32xf32, #tpu.memory_space<vmem>>, vector<1x32xf32>
    %c0_326 = arith.constant 0 : index
    %c0_327 = arith.constant 0 : index
    %876 = vector.load %arg25[%c0_326, %c0_327] : memref<1x32xf32, #tpu.memory_space<vmem>>, vector<1x32xf32>
    %cst_328 = arith.constant dense<0.000000e+00> : vector<8xf32>
    %877 = vector.multi_reduction <add>, %874, %cst_328 [1] : vector<8x32xf32> to vector<8xf32>
    %878 = vector.shape_cast %877 : vector<8xf32> to vector<8x1xf32>
    %cst_329 = arith.constant 3.200000e+01 : f32
    %879 = vector.broadcast %cst_329 : f32 to vector<8x1xf32>
    %880 = arith.divf %878, %879 : vector<8x1xf32>
    %881 = vector.broadcast %880 : vector<8x1xf32> to vector<8x32xf32>
    %882 = arith.subf %874, %881 : vector<8x32xf32>
    %883 = vector.broadcast %880 : vector<8x1xf32> to vector<8x32xf32>
    %884 = arith.subf %874, %883 : vector<8x32xf32>
    %885 = arith.mulf %882, %884 : vector<8x32xf32>
    %cst_330 = arith.constant dense<0.000000e+00> : vector<8xf32>
    %886 = vector.multi_reduction <add>, %885, %cst_330 [1] : vector<8x32xf32> to vector<8xf32>
    %887 = vector.shape_cast %886 : vector<8xf32> to vector<8x1xf32>
    %cst_331 = arith.constant 3.200000e+01 : f32
    %888 = vector.broadcast %cst_331 : f32 to vector<8x1xf32>
    %889 = arith.divf %887, %888 : vector<8x1xf32>
    %890 = vector.broadcast %880 : vector<8x1xf32> to vector<8x32xf32>
    %891 = arith.subf %874, %890 : vector<8x32xf32>
    %cst_332 = arith.constant 9.99999974E-6 : f32
    %892 = vector.broadcast %cst_332 : f32 to vector<8x1xf32>
    %893 = arith.addf %889, %892 : vector<8x1xf32>
    %894 = math.rsqrt %893 : vector<8x1xf32>
    %895 = vector.broadcast %894 : vector<8x1xf32> to vector<8x32xf32>
    %896 = arith.mulf %891, %895 : vector<8x32xf32>
    %897 = vector.broadcast %875 : vector<1x32xf32> to vector<8x32xf32>
    %898 = arith.mulf %896, %897 : vector<8x32xf32>
    %899 = vector.broadcast %876 : vector<1x32xf32> to vector<8x32xf32>
    %900 = arith.addf %898, %899 : vector<8x32xf32>
    %c0_333 = arith.constant 0 : index
    %c0_334 = arith.constant 0 : index
    %c0_335 = arith.constant 0 : index
    %901 = vector.load %arg51[%c0_333, %c0_334, %c0_335] : memref<1x8x32xf32, #tpu.memory_space<vmem>>, vector<1x8x32xf32>
    %902 = vector.shape_cast %901 : vector<1x8x32xf32> to vector<8x32xf32>
    %903 = vector.shape_cast %900 : vector<8x32xf32> to vector<1x8x32xf32>
    tpu.vector_store %arg51[%c0_333, %c0_334, %c0_335], %903 {strides = array<i32>} : memref<1x8x32xf32, #tpu.memory_space<vmem>>, vector<1x8x32xf32>,
    %c0_336 = arith.constant 0 : index
    %c0_337 = arith.constant 0 : index
    %c0_338 = arith.constant 0 : index
    %904 = vector.load %arg2[%c0_336, %c0_337, %c0_338] : memref<1x8x32xf32, #tpu.memory_space<vmem>>, vector<1x8x32xf32>
    %905 = vector.shape_cast %904 : vector<1x8x32xf32> to vector<8x32xf32>
    %906 = tpu.iota {dimensions = array<i32: 0>} : vector<8x8xi32>
    %907 = tpu.iota {dimensions = array<i32: 1>} : vector<8x8xi32>
    %908 = arith.cmpi sle, %907, %906 : vector<8x8xi32>
    %c4_i32_339 = arith.constant 4 : i32
    %909 = vector.broadcast %c4_i32_339 : i32 to vector<8x8xi32>
    %910 = arith.subi %906, %909 : vector<8x8xi32>
    %911 = arith.cmpi sgt, %907, %910 : vector<8x8xi32>
    %912 = arith.andi %908, %911 : vector<8x8xi1>
    %c0_340 = arith.constant 0 : index
    %c0_341 = arith.constant 0 : index
    %c0_342 = arith.constant 0 : index
    %913 = vector.load %arg26[%c0_340, %c0_341, %c0_342] : memref<2x1x32xf32, #tpu.memory_space<vmem>>, vector<1x1x32xf32>
    %914 = vector.shape_cast %913 : vector<1x1x32xf32> to vector<1x32xf32>
    %c0_343 = arith.constant 0 : index
    %c0_344 = arith.constant 0 : index
    %c0_345 = arith.constant 0 : index
    %915 = vector.load %arg27[%c0_343, %c0_344, %c0_345] : memref<2x1x32xf32, #tpu.memory_space<vmem>>, vector<1x1x32xf32>
    %916 = vector.shape_cast %915 : vector<1x1x32xf32> to vector<1x32xf32>
    %c0_346 = arith.constant 0 : index
    %c0_347 = arith.constant 0 : index
    %c0_348 = arith.constant 0 : index
    %917 = vector.load %arg28[%c0_346, %c0_347, %c0_348] : memref<2x32x96xbf16, #tpu.memory_space<vmem>>, vector<1x32x96xbf16>
    %918 = vector.shape_cast %917 : vector<1x32x96xbf16> to vector<32x96xbf16>
    %c0_349 = arith.constant 0 : index
    %c0_350 = arith.constant 0 : index
    %c0_351 = arith.constant 0 : index
    %919 = vector.load %arg29[%c0_349, %c0_350, %c0_351] : memref<2x1x96xf32, #tpu.memory_space<vmem>>, vector<1x1x96xf32>
    %920 = vector.shape_cast %919 : vector<1x1x96xf32> to vector<1x96xf32>
    %c0_352 = arith.constant 0 : index
    %c0_353 = arith.constant 0 : index
    %c0_354 = arith.constant 0 : index
    %921 = vector.load %arg30[%c0_352, %c0_353, %c0_354] : memref<2x32x32xbf16, #tpu.memory_space<vmem>>, vector<1x32x32xbf16>
    %922 = vector.shape_cast %921 : vector<1x32x32xbf16> to vector<32x32xbf16>
    %c0_355 = arith.constant 0 : index
    %c0_356 = arith.constant 0 : index
    %c0_357 = arith.constant 0 : index
    %923 = vector.load %arg31[%c0_355, %c0_356, %c0_357] : memref<2x1x32xf32, #tpu.memory_space<vmem>>, vector<1x1x32xf32>
    %924 = vector.shape_cast %923 : vector<1x1x32xf32> to vector<1x32xf32>
    %c0_358 = arith.constant 0 : index
    %c0_359 = arith.constant 0 : index
    %c0_360 = arith.constant 0 : index
    %925 = vector.load %arg32[%c0_358, %c0_359, %c0_360] : memref<2x1x32xf32, #tpu.memory_space<vmem>>, vector<1x1x32xf32>
    %926 = vector.shape_cast %925 : vector<1x1x32xf32> to vector<1x32xf32>
    %c0_361 = arith.constant 0 : index
    %c0_362 = arith.constant 0 : index
    %c0_363 = arith.constant 0 : index
    %927 = vector.load %arg33[%c0_361, %c0_362, %c0_363] : memref<2x1x32xf32, #tpu.memory_space<vmem>>, vector<1x1x32xf32>
    %928 = vector.shape_cast %927 : vector<1x1x32xf32> to vector<1x32xf32>
    %c0_364 = arith.constant 0 : index
    %c0_365 = arith.constant 0 : index
    %c0_366 = arith.constant 0 : index
    %929 = vector.load %arg34[%c0_364, %c0_365, %c0_366] : memref<2x32x98xbf16, #tpu.memory_space<vmem>>, vector<1x32x98xbf16>
    %930 = vector.shape_cast %929 : vector<1x32x98xbf16> to vector<32x98xbf16>
    %c0_367 = arith.constant 0 : index
    %c0_368 = arith.constant 0 : index
    %c0_369 = arith.constant 0 : index
    %931 = vector.load %arg35[%c0_367, %c0_368, %c0_369] : memref<2x1x98xf32, #tpu.memory_space<vmem>>, vector<1x1x98xf32>
    %932 = vector.shape_cast %931 : vector<1x1x98xf32> to vector<1x98xf32>
    %c0_370 = arith.constant 0 : index
    %c0_371 = arith.constant 0 : index
    %c0_372 = arith.constant 0 : index
    %933 = vector.load %arg36[%c0_370, %c0_371, %c0_372] : memref<2x32x32xbf16, #tpu.memory_space<vmem>>, vector<1x32x32xbf16>
    %934 = vector.shape_cast %933 : vector<1x32x32xbf16> to vector<32x32xbf16>
    %c0_373 = arith.constant 0 : index
    %c0_374 = arith.constant 0 : index
    %c0_375 = arith.constant 0 : index
    %935 = vector.load %arg37[%c0_373, %c0_374, %c0_375] : memref<2x1x32xf32, #tpu.memory_space<vmem>>, vector<1x1x32xf32>
    %936 = vector.shape_cast %935 : vector<1x1x32xf32> to vector<1x32xf32>
    %c0_376 = arith.constant 0 : index
    %c0_377 = arith.constant 0 : index
    %c0_378 = arith.constant 0 : index
    %c0_379 = arith.constant 0 : index
    %937 = vector.load %arg38[%c0_376, %c0_377, %c0_378, %c0_379] : memref<2x2x16x16xf32, #tpu.memory_space<vmem>>, vector<1x2x16x16xf32>
    %938 = vector.shape_cast %937 : vector<1x2x16x16xf32> to vector<2x16x16xf32>
    %c0_380 = arith.constant 0 : index
    %c0_381 = arith.constant 0 : index
    %c0_382 = arith.constant 0 : index
    %c0_383 = arith.constant 0 : index
    %939 = vector.load %arg39[%c0_380, %c0_381, %c0_382, %c0_383] : memref<2x2x16x16xf32, #tpu.memory_space<vmem>>, vector<1x2x16x16xf32>
    %940 = vector.shape_cast %939 : vector<1x2x16x16xf32> to vector<2x16x16xf32>
    %c0_384 = arith.constant 0 : index
    %c0_385 = arith.constant 0 : index
    %c0_386 = arith.constant 0 : index
    %c0_387 = arith.constant 0 : index
    %941 = vector.load %arg40[%c0_384, %c0_385, %c0_386, %c0_387] : memref<2x2x16x16xf32, #tpu.memory_space<vmem>>, vector<1x2x16x16xf32>
    %942 = vector.shape_cast %941 : vector<1x2x16x16xf32> to vector<2x16x16xf32>
    %c0_388 = arith.constant 0 : index
    %c0_389 = arith.constant 0 : index
    %c0_390 = arith.constant 0 : index
    %943 = vector.load %arg41[%c0_388, %c0_389, %c0_390] : memref<2x1x32xf32, #tpu.memory_space<vmem>>, vector<1x1x32xf32>
    %944 = vector.shape_cast %943 : vector<1x1x32xf32> to vector<1x32xf32>
    %c0_391 = arith.constant 0 : index
    %c0_392 = arith.constant 0 : index
    %c0_393 = arith.constant 0 : index
    %945 = vector.load %arg42[%c0_391, %c0_392, %c0_393] : memref<2x1x32xf32, #tpu.memory_space<vmem>>, vector<1x1x32xf32>
    %946 = vector.shape_cast %945 : vector<1x1x32xf32> to vector<1x32xf32>
    %c0_394 = arith.constant 0 : index
    %c0_395 = arith.constant 0 : index
    %c0_396 = arith.constant 0 : index
    %947 = vector.load %arg43[%c0_394, %c0_395, %c0_396] : memref<2x32x128xbf16, #tpu.memory_space<vmem>>, vector<1x32x128xbf16>
    %948 = vector.shape_cast %947 : vector<1x32x128xbf16> to vector<32x128xbf16>
    %c0_397 = arith.constant 0 : index
    %c0_398 = arith.constant 0 : index
    %c0_399 = arith.constant 0 : index
    %949 = vector.load %arg44[%c0_397, %c0_398, %c0_399] : memref<2x1x128xf32, #tpu.memory_space<vmem>>, vector<1x1x128xf32>
    %950 = vector.shape_cast %949 : vector<1x1x128xf32> to vector<1x128xf32>
    %c0_400 = arith.constant 0 : index
    %c0_401 = arith.constant 0 : index
    %c0_402 = arith.constant 0 : index
    %951 = vector.load %arg45[%c0_400, %c0_401, %c0_402] : memref<2x64x32xbf16, #tpu.memory_space<vmem>>, vector<1x64x32xbf16>
    %952 = vector.shape_cast %951 : vector<1x64x32xbf16> to vector<64x32xbf16>
    %c0_403 = arith.constant 0 : index
    %c0_404 = arith.constant 0 : index
    %c0_405 = arith.constant 0 : index
    %953 = vector.load %arg46[%c0_403, %c0_404, %c0_405] : memref<2x1x32xf32, #tpu.memory_space<vmem>>, vector<1x1x32xf32>
    %954 = vector.shape_cast %953 : vector<1x1x32xf32> to vector<1x32xf32>
    %cst_406 = arith.constant dense<0.000000e+00> : vector<8xf32>
    %955 = vector.multi_reduction <add>, %905, %cst_406 [1] : vector<8x32xf32> to vector<8xf32>
    %956 = vector.shape_cast %955 : vector<8xf32> to vector<8x1xf32>
    %cst_407 = arith.constant 3.200000e+01 : f32
    %957 = vector.broadcast %cst_407 : f32 to vector<8x1xf32>
    %958 = arith.divf %956, %957 : vector<8x1xf32>
    %959 = vector.broadcast %958 : vector<8x1xf32> to vector<8x32xf32>
    %960 = arith.subf %905, %959 : vector<8x32xf32>
    %961 = vector.broadcast %958 : vector<8x1xf32> to vector<8x32xf32>
    %962 = arith.subf %905, %961 : vector<8x32xf32>
    %963 = arith.mulf %960, %962 : vector<8x32xf32>
    %cst_408 = arith.constant dense<0.000000e+00> : vector<8xf32>
    %964 = vector.multi_reduction <add>, %963, %cst_408 [1] : vector<8x32xf32> to vector<8xf32>
    %965 = vector.shape_cast %964 : vector<8xf32> to vector<8x1xf32>
    %cst_409 = arith.constant 3.200000e+01 : f32
    %966 = vector.broadcast %cst_409 : f32 to vector<8x1xf32>
    %967 = arith.divf %965, %966 : vector<8x1xf32>
    %968 = vector.broadcast %958 : vector<8x1xf32> to vector<8x32xf32>
    %969 = arith.subf %905, %968 : vector<8x32xf32>
    %cst_410 = arith.constant 9.99999974E-6 : f32
    %970 = vector.broadcast %cst_410 : f32 to vector<8x1xf32>
    %971 = arith.addf %967, %970 : vector<8x1xf32>
    %972 = math.rsqrt %971 : vector<8x1xf32>
    %973 = vector.broadcast %972 : vector<8x1xf32> to vector<8x32xf32>
    %974 = arith.mulf %969, %973 : vector<8x32xf32>
    %975 = vector.broadcast %914 : vector<1x32xf32> to vector<8x32xf32>
    %976 = arith.mulf %974, %975 : vector<8x32xf32>
    %977 = vector.broadcast %916 : vector<1x32xf32> to vector<8x32xf32>
    %978 = arith.addf %976, %977 : vector<8x32xf32>
    %979 = arith.truncf %978 : vector<8x32xf32> to vector<8x32xbf16>
    %cst_411 = arith.constant dense<0.000000e+00> : vector<8x96xf32>
    %980 = tpu.matmul %979, %918, %cst_411 {dimension_numbers = #tpu.dot_dimension_numbers<[1], [0], [0], [1], [0, 0, 1, 1], [], []>} : vector<8x32xbf16>, vector<32x96xbf16>, vector<8x96xf32> -> vector<8x96xf32>
    %981 = vector.broadcast %920 : vector<1x96xf32> to vector<8x96xf32>
    %982 = arith.addf %980, %981 : vector<8x96xf32>
    %983 = vector.extract_strided_slice %982 {offsets = [0, 0], sizes = [8, 8], strides = [1, 1]} : vector<8x96xf32> to vector<8x8xf32>
    %984 = vector.extract_strided_slice %982 {offsets = [0, 32], sizes = [8, 8], strides = [1, 1]} : vector<8x96xf32> to vector<8x8xf32>
    %985 = vector.extract_strided_slice %982 {offsets = [0, 64], sizes = [8, 8], strides = [1, 1]} : vector<8x96xf32> to vector<8x8xf32>
    "tpu.trace_start"() <{level = 10 : i32, message = "qd,kd->qk"}> : () -> ()
    %cst_412 = arith.constant dense<0.000000e+00> : vector<8x8xf32>
    %986 = tpu.matmul %983, %984, %cst_412 {dimension_numbers = #tpu.dot_dimension_numbers<[1], [1], [0], [0], [0, 0, 1, 0], [], []>} : vector<8x8xf32>, vector<8x8xf32>, vector<8x8xf32> -> vector<8x8xf32>
    "tpu.trace_stop"() : () -> ()
    %cst_413 = arith.constant 0.353553385 : f32
    %987 = vector.broadcast %cst_413 : f32 to vector<8x8xf32>
    %988 = arith.mulf %986, %987 : vector<8x8xf32>
    %cst_414 = arith.constant -1.000000e+30 : f32
    %989 = vector.broadcast %cst_414 : f32 to vector<8x8xf32>
    %990 = arith.select %912, %988, %989 : vector<8x8xi1>, vector<8x8xf32>
    %cst_415 = arith.constant dense<0xFF800000> : vector<8xf32>
    %991 = vector.multi_reduction <maximumf>, %990, %cst_415 [1] : vector<8x8xf32> to vector<8xf32>
    %992 = vector.shape_cast %991 : vector<8xf32> to vector<8x1xf32>
    %993 = vector.broadcast %992 : vector<8x1xf32> to vector<8x8xf32>
    %994 = arith.subf %990, %993 : vector<8x8xf32>
    %995 = math.exp %994 : vector<8x8xf32>
    %cst_416 = arith.constant dense<0.000000e+00> : vector<8xf32>
    %996 = vector.multi_reduction <add>, %995, %cst_416 [1] : vector<8x8xf32> to vector<8xf32>
    %997 = vector.shape_cast %996 : vector<8xf32> to vector<8x1xf32>
    %998 = tpu.reciprocal %997 {approx = true} : vector<8x1xf32> -> vector<8x1xf32>
    %999 = vector.broadcast %998 : vector<8x1xf32> to vector<8x8xf32>
    %1000 = arith.mulf %995, %999 : vector<8x8xf32>
    "tpu.trace_start"() <{level = 10 : i32, message = "qk,kd->qd"}> : () -> ()
    %cst_417 = arith.constant dense<0.000000e+00> : vector<8x8xf32>
    %1001 = tpu.matmul %1000, %985, %cst_417 {dimension_numbers = #tpu.dot_dimension_numbers<[1], [0], [0], [1], [0, 0, 1, 1], [], []>} : vector<8x8xf32>, vector<8x8xf32>, vector<8x8xf32> -> vector<8x8xf32>
    "tpu.trace_stop"() : () -> ()
    %1002 = vector.extract_strided_slice %982 {offsets = [0, 8], sizes = [8, 8], strides = [1, 1]} : vector<8x96xf32> to vector<8x8xf32>
    %1003 = vector.extract_strided_slice %982 {offsets = [0, 40], sizes = [8, 8], strides = [1, 1]} : vector<8x96xf32> to vector<8x8xf32>
    %1004 = vector.extract_strided_slice %982 {offsets = [0, 72], sizes = [8, 8], strides = [1, 1]} : vector<8x96xf32> to vector<8x8xf32>
    "tpu.trace_start"() <{level = 10 : i32, message = "qd,kd->qk"}> : () -> ()
    %cst_418 = arith.constant dense<0.000000e+00> : vector<8x8xf32>
    %1005 = tpu.matmul %1002, %1003, %cst_418 {dimension_numbers = #tpu.dot_dimension_numbers<[1], [1], [0], [0], [0, 0, 1, 0], [], []>} : vector<8x8xf32>, vector<8x8xf32>, vector<8x8xf32> -> vector<8x8xf32>
    "tpu.trace_stop"() : () -> ()
    %cst_419 = arith.constant 0.353553385 : f32
    %1006 = vector.broadcast %cst_419 : f32 to vector<8x8xf32>
    %1007 = arith.mulf %1005, %1006 : vector<8x8xf32>
    %cst_420 = arith.constant -1.000000e+30 : f32
    %1008 = vector.broadcast %cst_420 : f32 to vector<8x8xf32>
    %1009 = arith.select %912, %1007, %1008 : vector<8x8xi1>, vector<8x8xf32>
    %cst_421 = arith.constant dense<0xFF800000> : vector<8xf32>
    %1010 = vector.multi_reduction <maximumf>, %1009, %cst_421 [1] : vector<8x8xf32> to vector<8xf32>
    %1011 = vector.shape_cast %1010 : vector<8xf32> to vector<8x1xf32>
    %1012 = vector.broadcast %1011 : vector<8x1xf32> to vector<8x8xf32>
    %1013 = arith.subf %1009, %1012 : vector<8x8xf32>
    %1014 = math.exp %1013 : vector<8x8xf32>
    %cst_422 = arith.constant dense<0.000000e+00> : vector<8xf32>
    %1015 = vector.multi_reduction <add>, %1014, %cst_422 [1] : vector<8x8xf32> to vector<8xf32>
    %1016 = vector.shape_cast %1015 : vector<8xf32> to vector<8x1xf32>
    %1017 = tpu.reciprocal %1016 {approx = true} : vector<8x1xf32> -> vector<8x1xf32>
    %1018 = vector.broadcast %1017 : vector<8x1xf32> to vector<8x8xf32>
    %1019 = arith.mulf %1014, %1018 : vector<8x8xf32>
    "tpu.trace_start"() <{level = 10 : i32, message = "qk,kd->qd"}> : () -> ()
    %cst_423 = arith.constant dense<0.000000e+00> : vector<8x8xf32>
    %1020 = tpu.matmul %1019, %1004, %cst_423 {dimension_numbers = #tpu.dot_dimension_numbers<[1], [0], [0], [1], [0, 0, 1, 1], [], []>} : vector<8x8xf32>, vector<8x8xf32>, vector<8x8xf32> -> vector<8x8xf32>
    "tpu.trace_stop"() : () -> ()
    %1021 = vector.extract_strided_slice %982 {offsets = [0, 16], sizes = [8, 8], strides = [1, 1]} : vector<8x96xf32> to vector<8x8xf32>
    %1022 = vector.extract_strided_slice %982 {offsets = [0, 48], sizes = [8, 8], strides = [1, 1]} : vector<8x96xf32> to vector<8x8xf32>
    %1023 = vector.extract_strided_slice %982 {offsets = [0, 80], sizes = [8, 8], strides = [1, 1]} : vector<8x96xf32> to vector<8x8xf32>
    "tpu.trace_start"() <{level = 10 : i32, message = "qd,kd->qk"}> : () -> ()
    %cst_424 = arith.constant dense<0.000000e+00> : vector<8x8xf32>
    %1024 = tpu.matmul %1021, %1022, %cst_424 {dimension_numbers = #tpu.dot_dimension_numbers<[1], [1], [0], [0], [0, 0, 1, 0], [], []>} : vector<8x8xf32>, vector<8x8xf32>, vector<8x8xf32> -> vector<8x8xf32>
    "tpu.trace_stop"() : () -> ()
    %cst_425 = arith.constant 0.353553385 : f32
    %1025 = vector.broadcast %cst_425 : f32 to vector<8x8xf32>
    %1026 = arith.mulf %1024, %1025 : vector<8x8xf32>
    %cst_426 = arith.constant -1.000000e+30 : f32
    %1027 = vector.broadcast %cst_426 : f32 to vector<8x8xf32>
    %1028 = arith.select %912, %1026, %1027 : vector<8x8xi1>, vector<8x8xf32>
    %cst_427 = arith.constant dense<0xFF800000> : vector<8xf32>
    %1029 = vector.multi_reduction <maximumf>, %1028, %cst_427 [1] : vector<8x8xf32> to vector<8xf32>
    %1030 = vector.shape_cast %1029 : vector<8xf32> to vector<8x1xf32>
    %1031 = vector.broadcast %1030 : vector<8x1xf32> to vector<8x8xf32>
    %1032 = arith.subf %1028, %1031 : vector<8x8xf32>
    %1033 = math.exp %1032 : vector<8x8xf32>
    %cst_428 = arith.constant dense<0.000000e+00> : vector<8xf32>
    %1034 = vector.multi_reduction <add>, %1033, %cst_428 [1] : vector<8x8xf32> to vector<8xf32>
    %1035 = vector.shape_cast %1034 : vector<8xf32> to vector<8x1xf32>
    %1036 = tpu.reciprocal %1035 {approx = true} : vector<8x1xf32> -> vector<8x1xf32>
    %1037 = vector.broadcast %1036 : vector<8x1xf32> to vector<8x8xf32>
    %1038 = arith.mulf %1033, %1037 : vector<8x8xf32>
    "tpu.trace_start"() <{level = 10 : i32, message = "qk,kd->qd"}> : () -> ()
    %cst_429 = arith.constant dense<0.000000e+00> : vector<8x8xf32>
    %1039 = tpu.matmul %1038, %1023, %cst_429 {dimension_numbers = #tpu.dot_dimension_numbers<[1], [0], [0], [1], [0, 0, 1, 1], [], []>} : vector<8x8xf32>, vector<8x8xf32>, vector<8x8xf32> -> vector<8x8xf32>
    "tpu.trace_stop"() : () -> ()
    %1040 = vector.extract_strided_slice %982 {offsets = [0, 24], sizes = [8, 8], strides = [1, 1]} : vector<8x96xf32> to vector<8x8xf32>
    %1041 = vector.extract_strided_slice %982 {offsets = [0, 56], sizes = [8, 8], strides = [1, 1]} : vector<8x96xf32> to vector<8x8xf32>
    %1042 = vector.extract_strided_slice %982 {offsets = [0, 88], sizes = [8, 8], strides = [1, 1]} : vector<8x96xf32> to vector<8x8xf32>
    "tpu.trace_start"() <{level = 10 : i32, message = "qd,kd->qk"}> : () -> ()
    %cst_430 = arith.constant dense<0.000000e+00> : vector<8x8xf32>
    %1043 = tpu.matmul %1040, %1041, %cst_430 {dimension_numbers = #tpu.dot_dimension_numbers<[1], [1], [0], [0], [0, 0, 1, 0], [], []>} : vector<8x8xf32>, vector<8x8xf32>, vector<8x8xf32> -> vector<8x8xf32>
    "tpu.trace_stop"() : () -> ()
    %cst_431 = arith.constant 0.353553385 : f32
    %1044 = vector.broadcast %cst_431 : f32 to vector<8x8xf32>
    %1045 = arith.mulf %1043, %1044 : vector<8x8xf32>
    %cst_432 = arith.constant -1.000000e+30 : f32
    %1046 = vector.broadcast %cst_432 : f32 to vector<8x8xf32>
    %1047 = arith.select %912, %1045, %1046 : vector<8x8xi1>, vector<8x8xf32>
    %cst_433 = arith.constant dense<0xFF800000> : vector<8xf32>
    %1048 = vector.multi_reduction <maximumf>, %1047, %cst_433 [1] : vector<8x8xf32> to vector<8xf32>
    %1049 = vector.shape_cast %1048 : vector<8xf32> to vector<8x1xf32>
    %1050 = vector.broadcast %1049 : vector<8x1xf32> to vector<8x8xf32>
    %1051 = arith.subf %1047, %1050 : vector<8x8xf32>
    %1052 = math.exp %1051 : vector<8x8xf32>
    %cst_434 = arith.constant dense<0.000000e+00> : vector<8xf32>
    %1053 = vector.multi_reduction <add>, %1052, %cst_434 [1] : vector<8x8xf32> to vector<8xf32>
    %1054 = vector.shape_cast %1053 : vector<8xf32> to vector<8x1xf32>
    %1055 = tpu.reciprocal %1054 {approx = true} : vector<8x1xf32> -> vector<8x1xf32>
    %1056 = vector.broadcast %1055 : vector<8x1xf32> to vector<8x8xf32>
    %1057 = arith.mulf %1052, %1056 : vector<8x8xf32>
    "tpu.trace_start"() <{level = 10 : i32, message = "qk,kd->qd"}> : () -> ()
    %cst_435 = arith.constant dense<0.000000e+00> : vector<8x8xf32>
    %1058 = tpu.matmul %1057, %1042, %cst_435 {dimension_numbers = #tpu.dot_dimension_numbers<[1], [0], [0], [1], [0, 0, 1, 1], [], []>} : vector<8x8xf32>, vector<8x8xf32>, vector<8x8xf32> -> vector<8x8xf32>
    "tpu.trace_stop"() : () -> ()
    %1059 = tpu.concatenate %1001, %1020, %1039, %1058 in 1 : vector<8x8xf32>, vector<8x8xf32>, vector<8x8xf32>, vector<8x8xf32> -> vector<8x32xf32>
    %1060 = arith.truncf %1059 : vector<8x32xf32> to vector<8x32xbf16>
    %cst_436 = arith.constant dense<0.000000e+00> : vector<8x32xf32>
    %1061 = tpu.matmul %1060, %922, %cst_436 {dimension_numbers = #tpu.dot_dimension_numbers<[1], [0], [0], [1], [0, 0, 1, 1], [], []>} : vector<8x32xbf16>, vector<32x32xbf16>, vector<8x32xf32> -> vector<8x32xf32>
    %1062 = vector.broadcast %924 : vector<1x32xf32> to vector<8x32xf32>
    %1063 = arith.addf %1061, %1062 : vector<8x32xf32>
    %1064 = arith.addf %905, %1063 : vector<8x32xf32>
    %cst_437 = arith.constant dense<0.000000e+00> : vector<8xf32>
    %1065 = vector.multi_reduction <add>, %1064, %cst_437 [1] : vector<8x32xf32> to vector<8xf32>
    %1066 = vector.shape_cast %1065 : vector<8xf32> to vector<8x1xf32>
    %cst_438 = arith.constant 3.200000e+01 : f32
    %1067 = vector.broadcast %cst_438 : f32 to vector<8x1xf32>
    %1068 = arith.divf %1066, %1067 : vector<8x1xf32>
    %1069 = vector.broadcast %1068 : vector<8x1xf32> to vector<8x32xf32>
    %1070 = arith.subf %1064, %1069 : vector<8x32xf32>
    %1071 = vector.broadcast %1068 : vector<8x1xf32> to vector<8x32xf32>
    %1072 = arith.subf %1064, %1071 : vector<8x32xf32>
    %1073 = arith.mulf %1070, %1072 : vector<8x32xf32>
    %cst_439 = arith.constant dense<0.000000e+00> : vector<8xf32>
    %1074 = vector.multi_reduction <add>, %1073, %cst_439 [1] : vector<8x32xf32> to vector<8xf32>
    %1075 = vector.shape_cast %1074 : vector<8xf32> to vector<8x1xf32>
    %cst_440 = arith.constant 3.200000e+01 : f32
    %1076 = vector.broadcast %cst_440 : f32 to vector<8x1xf32>
    %1077 = arith.divf %1075, %1076 : vector<8x1xf32>
    %1078 = vector.broadcast %1068 : vector<8x1xf32> to vector<8x32xf32>
    %1079 = arith.subf %1064, %1078 : vector<8x32xf32>
    %cst_441 = arith.constant 9.99999974E-6 : f32
    %1080 = vector.broadcast %cst_441 : f32 to vector<8x1xf32>
    %1081 = arith.addf %1077, %1080 : vector<8x1xf32>
    %1082 = math.rsqrt %1081 : vector<8x1xf32>
    %1083 = vector.broadcast %1082 : vector<8x1xf32> to vector<8x32xf32>
    %1084 = arith.mulf %1079, %1083 : vector<8x32xf32>
    %1085 = vector.broadcast %926 : vector<1x32xf32> to vector<8x32xf32>
    %1086 = arith.mulf %1084, %1085 : vector<8x32xf32>
    %1087 = vector.broadcast %928 : vector<1x32xf32> to vector<8x32xf32>
    %1088 = arith.addf %1086, %1087 : vector<8x32xf32>
    %1089 = arith.truncf %1088 : vector<8x32xf32> to vector<8x32xbf16>
    %cst_442 = arith.constant dense<0.000000e+00> : vector<8x98xf32>
    %1090 = tpu.matmul %1089, %930, %cst_442 {dimension_numbers = #tpu.dot_dimension_numbers<[1], [0], [0], [1], [0, 0, 1, 1], [], []>} : vector<8x32xbf16>, vector<32x98xbf16>, vector<8x98xf32> -> vector<8x98xf32>
    %1091 = vector.broadcast %932 : vector<1x98xf32> to vector<8x98xf32>
    %1092 = arith.addf %1090, %1091 : vector<8x98xf32>
    %1093 = vector.extract_strided_slice %1092 {offsets = [0, 96], sizes = [8, 2], strides = [1, 1]} : vector<8x98xf32> to vector<8x2xf32>
    %cst_443 = arith.constant 0.000000e+00 : f32
    %1094 = vector.broadcast %cst_443 : f32 to vector<8x2xf32>
    %1095 = arith.maximumf %1093, %1094 : vector<8x2xf32>
    %1096 = math.absf %1093 : vector<8x2xf32>
    %cst_444 = arith.constant 0.000000e+00 : f32
    %1097 = vector.broadcast %cst_444 : f32 to vector<8x2xf32>
    %1098 = arith.subf %1097, %1096 : vector<8x2xf32>
    %1099 = math.exp %1098 : vector<8x2xf32>
    %cst_445 = arith.constant 1.000000e+00 : f32
    %1100 = vector.broadcast %cst_445 : f32 to vector<8x2xf32>
    %1101 = arith.addf %1100, %1099 : vector<8x2xf32>
    %1102 = math.log %1101 : vector<8x2xf32>
    %1103 = arith.addf %1095, %1102 : vector<8x2xf32>
    %cst_446 = arith.constant 0.00999999977 : f32
    %1104 = vector.broadcast %cst_446 : f32 to vector<8x2xf32>
    %1105 = arith.mulf %1103, %1104 : vector<8x2xf32>
    %1106 = vector.extract_strided_slice %1092 {offsets = [0, 0], sizes = [8, 16], strides = [1, 1]} : vector<8x98xf32> to vector<8x16xf32>
    %1107 = arith.negf %1106 : vector<8x16xf32>
    %1108 = math.exp %1107 : vector<8x16xf32>
    %cst_447 = arith.constant 1.000000e+00 : f32
    %1109 = vector.broadcast %cst_447 : f32 to vector<8x16xf32>
    %1110 = arith.addf %1109, %1108 : vector<8x16xf32>
    %1111 = arith.divf %1109, %1110 : vector<8x16xf32>
    %1112 = arith.mulf %1106, %1111 : vector<8x16xf32>
    %1113 = vector.extract_strided_slice %1092 {offsets = [0, 32], sizes = [8, 16], strides = [1, 1]} : vector<8x98xf32> to vector<8x16xf32>
    %1114 = arith.negf %1113 : vector<8x16xf32>
    %1115 = math.exp %1114 : vector<8x16xf32>
    %cst_448 = arith.constant 1.000000e+00 : f32
    %1116 = vector.broadcast %cst_448 : f32 to vector<8x16xf32>
    %1117 = arith.addf %1116, %1115 : vector<8x16xf32>
    %1118 = arith.divf %1116, %1117 : vector<8x16xf32>
    %1119 = arith.mulf %1113, %1118 : vector<8x16xf32>
    %1120 = vector.extract_strided_slice %1092 {offsets = [0, 64], sizes = [8, 16], strides = [1, 1]} : vector<8x98xf32> to vector<8x16xf32>
    %1121 = arith.negf %1120 : vector<8x16xf32>
    %1122 = math.exp %1121 : vector<8x16xf32>
    %cst_449 = arith.constant 1.000000e+00 : f32
    %1123 = vector.broadcast %cst_449 : f32 to vector<8x16xf32>
    %1124 = arith.addf %1123, %1122 : vector<8x16xf32>
    %1125 = arith.divf %1123, %1124 : vector<8x16xf32>
    %1126 = arith.mulf %1120, %1125 : vector<8x16xf32>
    %1127 = arith.mulf %1112, %1112 : vector<8x16xf32>
    %cst_450 = arith.constant dense<0.000000e+00> : vector<8xf32>
    %1128 = vector.multi_reduction <add>, %1127, %cst_450 [1] : vector<8x16xf32> to vector<8xf32>
    %1129 = vector.shape_cast %1128 : vector<8xf32> to vector<8x1xf32>
    %cst_451 = arith.constant 9.99999997E-7 : f32
    %1130 = vector.broadcast %cst_451 : f32 to vector<8x1xf32>
    %1131 = arith.addf %1129, %1130 : vector<8x1xf32>
    %1132 = math.rsqrt %1131 : vector<8x1xf32>
    %1133 = vector.broadcast %1132 : vector<8x1xf32> to vector<8x16xf32>
    %1134 = arith.mulf %1112, %1133 : vector<8x16xf32>
    %1135 = arith.mulf %1119, %1119 : vector<8x16xf32>
    %cst_452 = arith.constant dense<0.000000e+00> : vector<8xf32>
    %1136 = vector.multi_reduction <add>, %1135, %cst_452 [1] : vector<8x16xf32> to vector<8xf32>
    %1137 = vector.shape_cast %1136 : vector<8xf32> to vector<8x1xf32>
    %cst_453 = arith.constant 9.99999997E-7 : f32
    %1138 = vector.broadcast %cst_453 : f32 to vector<8x1xf32>
    %1139 = arith.addf %1137, %1138 : vector<8x1xf32>
    %1140 = math.rsqrt %1139 : vector<8x1xf32>
    %1141 = vector.broadcast %1140 : vector<8x1xf32> to vector<8x16xf32>
    %1142 = arith.mulf %1119, %1141 : vector<8x16xf32>
    %1143 = vector.extract_strided_slice %1105 {offsets = [0, 0], sizes = [8, 1], strides = [1, 1]} : vector<8x2xf32> to vector<8x1xf32>
    %1144 = vector.broadcast %1143 : vector<8x1xf32> to vector<8x16xf32>
    %1145 = arith.mulf %1126, %1144 : vector<8x16xf32>
    %1146 = vector.extract_strided_slice %938 {offsets = [0, 0, 0], sizes = [1, 16, 16], strides = [1, 1, 1]} : vector<2x16x16xf32> to vector<1x16x16xf32>
    %1147 = vector.shape_cast %1146 : vector<1x16x16xf32> to vector<16x16xf32>
    %1148 = vector.extract_strided_slice %940 {offsets = [0, 0, 0], sizes = [1, 16, 16], strides = [1, 1, 1]} : vector<2x16x16xf32> to vector<1x16x16xf32>
    %1149 = vector.shape_cast %1148 : vector<1x16x16xf32> to vector<16x16xf32>
    %1150 = vector.extract_strided_slice %942 {offsets = [0, 0, 0], sizes = [1, 16, 16], strides = [1, 1, 1]} : vector<2x16x16xf32> to vector<1x16x16xf32>
    %1151 = vector.shape_cast %1150 : vector<1x16x16xf32> to vector<16x16xf32>
    %1152 = vector.extract_strided_slice %1134 {offsets = [0, 0], sizes = [4, 16], strides = [1, 1]} : vector<8x16xf32> to vector<4x16xf32>
    %1153 = vector.extract_strided_slice %1142 {offsets = [0, 0], sizes = [4, 16], strides = [1, 1]} : vector<8x16xf32> to vector<4x16xf32>
    %1154 = vector.extract_strided_slice %1145 {offsets = [0, 0], sizes = [4, 16], strides = [1, 1]} : vector<8x16xf32> to vector<4x16xf32>
    %cst_454 = arith.constant dense<0.000000e+00> : vector<4x16xf32>
    %1155 = tpu.matmul %1152, %1147, %cst_454 {dimension_numbers = #tpu.dot_dimension_numbers<[1], [0], [0], [1], [0, 0, 1, 1], [], []>} : vector<4x16xf32>, vector<16x16xf32>, vector<4x16xf32> -> vector<4x16xf32>
    %cst_455 = arith.constant dense<0.000000e+00> : vector<4x16xf32>
    %1156 = tpu.matmul %1152, %1151, %cst_455 {dimension_numbers = #tpu.dot_dimension_numbers<[1], [0], [0], [1], [0, 0, 1, 1], [], []>} : vector<4x16xf32>, vector<16x16xf32>, vector<4x16xf32> -> vector<4x16xf32>
    %1157 = arith.negf %1155 : vector<4x16xf32>
    %1158 = math.exp %1157 : vector<4x16xf32>
    %cst_456 = arith.constant 1.000000e+00 : f32
    %1159 = vector.broadcast %cst_456 : f32 to vector<4x16xf32>
    %1160 = arith.addf %1159, %1158 : vector<4x16xf32>
    %1161 = arith.divf %1159, %1160 : vector<4x16xf32>
    %1162 = arith.mulf %1155, %1161 : vector<4x16xf32>
    %1163 = arith.mulf %1162, %1156 : vector<4x16xf32>
    %cst_457 = arith.constant dense<0.000000e+00> : vector<4x16xf32>
    %1164 = tpu.matmul %1163, %1149, %cst_457 {dimension_numbers = #tpu.dot_dimension_numbers<[1], [0], [0], [1], [0, 0, 1, 1], [], []>} : vector<4x16xf32>, vector<16x16xf32>, vector<4x16xf32> -> vector<4x16xf32>
    %cst_458 = arith.constant dense<0.000000e+00> : vector<4x16xf32>
    %1165 = tpu.matmul %1153, %1147, %cst_458 {dimension_numbers = #tpu.dot_dimension_numbers<[1], [0], [0], [1], [0, 0, 1, 1], [], []>} : vector<4x16xf32>, vector<16x16xf32>, vector<4x16xf32> -> vector<4x16xf32>
    %cst_459 = arith.constant dense<0.000000e+00> : vector<4x16xf32>
    %1166 = tpu.matmul %1153, %1151, %cst_459 {dimension_numbers = #tpu.dot_dimension_numbers<[1], [0], [0], [1], [0, 0, 1, 1], [], []>} : vector<4x16xf32>, vector<16x16xf32>, vector<4x16xf32> -> vector<4x16xf32>
    %1167 = arith.negf %1165 : vector<4x16xf32>
    %1168 = math.exp %1167 : vector<4x16xf32>
    %cst_460 = arith.constant 1.000000e+00 : f32
    %1169 = vector.broadcast %cst_460 : f32 to vector<4x16xf32>
    %1170 = arith.addf %1169, %1168 : vector<4x16xf32>
    %1171 = arith.divf %1169, %1170 : vector<4x16xf32>
    %1172 = arith.mulf %1165, %1171 : vector<4x16xf32>
    %1173 = arith.mulf %1172, %1166 : vector<4x16xf32>
    "tpu.trace_start"() <{level = 10 : i32, message = "cd,ed->ce"}> : () -> ()
    %cst_461 = arith.constant dense<0.000000e+00> : vector<4x16xf32>
    %1174 = tpu.matmul %1154, %1149, %cst_461 {dimension_numbers = #tpu.dot_dimension_numbers<[1], [1], [0], [0], [0, 0, 1, 0], [], []>} : vector<4x16xf32>, vector<16x16xf32>, vector<4x16xf32> -> vector<4x16xf32>
    "tpu.trace_stop"() : () -> ()
    %1175 = arith.mulf %1174, %1166 : vector<4x16xf32>
    %cst_462 = arith.constant 1.000000e+00 : f32
    %1176 = vector.broadcast %cst_462 : f32 to vector<4x16xf32>
    %1177 = arith.subf %1176, %1171 : vector<4x16xf32>
    %1178 = arith.mulf %1172, %1177 : vector<4x16xf32>
    %1179 = arith.addf %1171, %1178 : vector<4x16xf32>
    %1180 = arith.mulf %1175, %1179 : vector<4x16xf32>
    %1181 = arith.mulf %1174, %1172 : vector<4x16xf32>
    %1182 = tpu.transpose %1153, [1, 0] : vector<4x16xf32> -> vector<16x4xf32>
    %1183 = tpu.transpose %1173, [1, 0] : vector<4x16xf32> -> vector<16x4xf32>
    %cst_463 = arith.constant dense<0.000000e+00> : vector<16x16xf32>
    %1184 = tpu.matmul %1183, %1154, %cst_463 {dimension_numbers = #tpu.dot_dimension_numbers<[1], [0], [0], [1], [0, 0, 1, 1], [], []>} : vector<16x4xf32>, vector<4x16xf32>, vector<16x16xf32> -> vector<16x16xf32>
    %cst_464 = arith.constant dense<0.000000e+00> : vector<16x16xf32>
    %1185 = tpu.matmul %1182, %1180, %cst_464 {dimension_numbers = #tpu.dot_dimension_numbers<[1], [0], [0], [1], [0, 0, 1, 1], [], []>} : vector<16x4xf32>, vector<4x16xf32>, vector<16x16xf32> -> vector<16x16xf32>
    %cst_465 = arith.constant dense<0.000000e+00> : vector<16x16xf32>
    %1186 = tpu.matmul %1182, %1181, %cst_465 {dimension_numbers = #tpu.dot_dimension_numbers<[1], [0], [0], [1], [0, 0, 1, 1], [], []>} : vector<16x4xf32>, vector<4x16xf32>, vector<16x16xf32> -> vector<16x16xf32>
    %1187 = arith.addf %1147, %1185 : vector<16x16xf32>
    %1188 = arith.addf %1149, %1184 : vector<16x16xf32>
    %1189 = arith.addf %1151, %1186 : vector<16x16xf32>
    %1190 = vector.extract_strided_slice %1134 {offsets = [4, 0], sizes = [4, 16], strides = [1, 1]} : vector<8x16xf32> to vector<4x16xf32>
    %cst_466 = arith.constant dense<0.000000e+00> : vector<4x16xf32>
    %1191 = tpu.matmul %1190, %1187, %cst_466 {dimension_numbers = #tpu.dot_dimension_numbers<[1], [0], [0], [1], [0, 0, 1, 1], [], []>} : vector<4x16xf32>, vector<16x16xf32>, vector<4x16xf32> -> vector<4x16xf32>
    %cst_467 = arith.constant dense<0.000000e+00> : vector<4x16xf32>
    %1192 = tpu.matmul %1190, %1189, %cst_467 {dimension_numbers = #tpu.dot_dimension_numbers<[1], [0], [0], [1], [0, 0, 1, 1], [], []>} : vector<4x16xf32>, vector<16x16xf32>, vector<4x16xf32> -> vector<4x16xf32>
    %1193 = arith.negf %1191 : vector<4x16xf32>
    %1194 = math.exp %1193 : vector<4x16xf32>
    %cst_468 = arith.constant 1.000000e+00 : f32
    %1195 = vector.broadcast %cst_468 : f32 to vector<4x16xf32>
    %1196 = arith.addf %1195, %1194 : vector<4x16xf32>
    %1197 = arith.divf %1195, %1196 : vector<4x16xf32>
    %1198 = arith.mulf %1191, %1197 : vector<4x16xf32>
    %1199 = arith.mulf %1198, %1192 : vector<4x16xf32>
    %cst_469 = arith.constant dense<0.000000e+00> : vector<4x16xf32>
    %1200 = tpu.matmul %1199, %1188, %cst_469 {dimension_numbers = #tpu.dot_dimension_numbers<[1], [0], [0], [1], [0, 0, 1, 1], [], []>} : vector<4x16xf32>, vector<16x16xf32>, vector<4x16xf32> -> vector<4x16xf32>
    %1201 = tpu.concatenate %1164, %1200 in 0 : vector<4x16xf32>, vector<4x16xf32> -> vector<8x16xf32>
    %1202 = vector.extract_strided_slice %1092 {offsets = [0, 16], sizes = [8, 16], strides = [1, 1]} : vector<8x98xf32> to vector<8x16xf32>
    %1203 = arith.negf %1202 : vector<8x16xf32>
    %1204 = math.exp %1203 : vector<8x16xf32>
    %cst_470 = arith.constant 1.000000e+00 : f32
    %1205 = vector.broadcast %cst_470 : f32 to vector<8x16xf32>
    %1206 = arith.addf %1205, %1204 : vector<8x16xf32>
    %1207 = arith.divf %1205, %1206 : vector<8x16xf32>
    %1208 = arith.mulf %1202, %1207 : vector<8x16xf32>
    %1209 = vector.extract_strided_slice %1092 {offsets = [0, 48], sizes = [8, 16], strides = [1, 1]} : vector<8x98xf32> to vector<8x16xf32>
    %1210 = arith.negf %1209 : vector<8x16xf32>
    %1211 = math.exp %1210 : vector<8x16xf32>
    %cst_471 = arith.constant 1.000000e+00 : f32
    %1212 = vector.broadcast %cst_471 : f32 to vector<8x16xf32>
    %1213 = arith.addf %1212, %1211 : vector<8x16xf32>
    %1214 = arith.divf %1212, %1213 : vector<8x16xf32>
    %1215 = arith.mulf %1209, %1214 : vector<8x16xf32>
    %1216 = vector.extract_strided_slice %1092 {offsets = [0, 80], sizes = [8, 16], strides = [1, 1]} : vector<8x98xf32> to vector<8x16xf32>
    %1217 = arith.negf %1216 : vector<8x16xf32>
    %1218 = math.exp %1217 : vector<8x16xf32>
    %cst_472 = arith.constant 1.000000e+00 : f32
    %1219 = vector.broadcast %cst_472 : f32 to vector<8x16xf32>
    %1220 = arith.addf %1219, %1218 : vector<8x16xf32>
    %1221 = arith.divf %1219, %1220 : vector<8x16xf32>
    %1222 = arith.mulf %1216, %1221 : vector<8x16xf32>
    %1223 = arith.mulf %1208, %1208 : vector<8x16xf32>
    %cst_473 = arith.constant dense<0.000000e+00> : vector<8xf32>
    %1224 = vector.multi_reduction <add>, %1223, %cst_473 [1] : vector<8x16xf32> to vector<8xf32>
    %1225 = vector.shape_cast %1224 : vector<8xf32> to vector<8x1xf32>
    %cst_474 = arith.constant 9.99999997E-7 : f32
    %1226 = vector.broadcast %cst_474 : f32 to vector<8x1xf32>
    %1227 = arith.addf %1225, %1226 : vector<8x1xf32>
    %1228 = math.rsqrt %1227 : vector<8x1xf32>
    %1229 = vector.broadcast %1228 : vector<8x1xf32> to vector<8x16xf32>
    %1230 = arith.mulf %1208, %1229 : vector<8x16xf32>
    %1231 = arith.mulf %1215, %1215 : vector<8x16xf32>
    %cst_475 = arith.constant dense<0.000000e+00> : vector<8xf32>
    %1232 = vector.multi_reduction <add>, %1231, %cst_475 [1] : vector<8x16xf32> to vector<8xf32>
    %1233 = vector.shape_cast %1232 : vector<8xf32> to vector<8x1xf32>
    %cst_476 = arith.constant 9.99999997E-7 : f32
    %1234 = vector.broadcast %cst_476 : f32 to vector<8x1xf32>
    %1235 = arith.addf %1233, %1234 : vector<8x1xf32>
    %1236 = math.rsqrt %1235 : vector<8x1xf32>
    %1237 = vector.broadcast %1236 : vector<8x1xf32> to vector<8x16xf32>
    %1238 = arith.mulf %1215, %1237 : vector<8x16xf32>
    %1239 = vector.extract_strided_slice %1105 {offsets = [0, 1], sizes = [8, 1], strides = [1, 1]} : vector<8x2xf32> to vector<8x1xf32>
    %1240 = vector.broadcast %1239 : vector<8x1xf32> to vector<8x16xf32>
    %1241 = arith.mulf %1222, %1240 : vector<8x16xf32>
    %1242 = vector.extract_strided_slice %938 {offsets = [1, 0, 0], sizes = [1, 16, 16], strides = [1, 1, 1]} : vector<2x16x16xf32> to vector<1x16x16xf32>
    %1243 = vector.shape_cast %1242 : vector<1x16x16xf32> to vector<16x16xf32>
    %1244 = vector.extract_strided_slice %940 {offsets = [1, 0, 0], sizes = [1, 16, 16], strides = [1, 1, 1]} : vector<2x16x16xf32> to vector<1x16x16xf32>
    %1245 = vector.shape_cast %1244 : vector<1x16x16xf32> to vector<16x16xf32>
    %1246 = vector.extract_strided_slice %942 {offsets = [1, 0, 0], sizes = [1, 16, 16], strides = [1, 1, 1]} : vector<2x16x16xf32> to vector<1x16x16xf32>
    %1247 = vector.shape_cast %1246 : vector<1x16x16xf32> to vector<16x16xf32>
    %1248 = vector.extract_strided_slice %1230 {offsets = [0, 0], sizes = [4, 16], strides = [1, 1]} : vector<8x16xf32> to vector<4x16xf32>
    %1249 = vector.extract_strided_slice %1238 {offsets = [0, 0], sizes = [4, 16], strides = [1, 1]} : vector<8x16xf32> to vector<4x16xf32>
    %1250 = vector.extract_strided_slice %1241 {offsets = [0, 0], sizes = [4, 16], strides = [1, 1]} : vector<8x16xf32> to vector<4x16xf32>
    %cst_477 = arith.constant dense<0.000000e+00> : vector<4x16xf32>
    %1251 = tpu.matmul %1248, %1243, %cst_477 {dimension_numbers = #tpu.dot_dimension_numbers<[1], [0], [0], [1], [0, 0, 1, 1], [], []>} : vector<4x16xf32>, vector<16x16xf32>, vector<4x16xf32> -> vector<4x16xf32>
    %cst_478 = arith.constant dense<0.000000e+00> : vector<4x16xf32>
    %1252 = tpu.matmul %1248, %1247, %cst_478 {dimension_numbers = #tpu.dot_dimension_numbers<[1], [0], [0], [1], [0, 0, 1, 1], [], []>} : vector<4x16xf32>, vector<16x16xf32>, vector<4x16xf32> -> vector<4x16xf32>
    %1253 = arith.negf %1251 : vector<4x16xf32>
    %1254 = math.exp %1253 : vector<4x16xf32>
    %cst_479 = arith.constant 1.000000e+00 : f32
    %1255 = vector.broadcast %cst_479 : f32 to vector<4x16xf32>
    %1256 = arith.addf %1255, %1254 : vector<4x16xf32>
    %1257 = arith.divf %1255, %1256 : vector<4x16xf32>
    %1258 = arith.mulf %1251, %1257 : vector<4x16xf32>
    %1259 = arith.mulf %1258, %1252 : vector<4x16xf32>
    %cst_480 = arith.constant dense<0.000000e+00> : vector<4x16xf32>
    %1260 = tpu.matmul %1259, %1245, %cst_480 {dimension_numbers = #tpu.dot_dimension_numbers<[1], [0], [0], [1], [0, 0, 1, 1], [], []>} : vector<4x16xf32>, vector<16x16xf32>, vector<4x16xf32> -> vector<4x16xf32>
    %cst_481 = arith.constant dense<0.000000e+00> : vector<4x16xf32>
    %1261 = tpu.matmul %1249, %1243, %cst_481 {dimension_numbers = #tpu.dot_dimension_numbers<[1], [0], [0], [1], [0, 0, 1, 1], [], []>} : vector<4x16xf32>, vector<16x16xf32>, vector<4x16xf32> -> vector<4x16xf32>
    %cst_482 = arith.constant dense<0.000000e+00> : vector<4x16xf32>
    %1262 = tpu.matmul %1249, %1247, %cst_482 {dimension_numbers = #tpu.dot_dimension_numbers<[1], [0], [0], [1], [0, 0, 1, 1], [], []>} : vector<4x16xf32>, vector<16x16xf32>, vector<4x16xf32> -> vector<4x16xf32>
    %1263 = arith.negf %1261 : vector<4x16xf32>
    %1264 = math.exp %1263 : vector<4x16xf32>
    %cst_483 = arith.constant 1.000000e+00 : f32
    %1265 = vector.broadcast %cst_483 : f32 to vector<4x16xf32>
    %1266 = arith.addf %1265, %1264 : vector<4x16xf32>
    %1267 = arith.divf %1265, %1266 : vector<4x16xf32>
    %1268 = arith.mulf %1261, %1267 : vector<4x16xf32>
    %1269 = arith.mulf %1268, %1262 : vector<4x16xf32>
    "tpu.trace_start"() <{level = 10 : i32, message = "cd,ed->ce"}> : () -> ()
    %cst_484 = arith.constant dense<0.000000e+00> : vector<4x16xf32>
    %1270 = tpu.matmul %1250, %1245, %cst_484 {dimension_numbers = #tpu.dot_dimension_numbers<[1], [1], [0], [0], [0, 0, 1, 0], [], []>} : vector<4x16xf32>, vector<16x16xf32>, vector<4x16xf32> -> vector<4x16xf32>
    "tpu.trace_stop"() : () -> ()
    %1271 = arith.mulf %1270, %1262 : vector<4x16xf32>
    %cst_485 = arith.constant 1.000000e+00 : f32
    %1272 = vector.broadcast %cst_485 : f32 to vector<4x16xf32>
    %1273 = arith.subf %1272, %1267 : vector<4x16xf32>
    %1274 = arith.mulf %1268, %1273 : vector<4x16xf32>
    %1275 = arith.addf %1267, %1274 : vector<4x16xf32>
    %1276 = arith.mulf %1271, %1275 : vector<4x16xf32>
    %1277 = arith.mulf %1270, %1268 : vector<4x16xf32>
    %1278 = tpu.transpose %1249, [1, 0] : vector<4x16xf32> -> vector<16x4xf32>
    %1279 = tpu.transpose %1269, [1, 0] : vector<4x16xf32> -> vector<16x4xf32>
    %cst_486 = arith.constant dense<0.000000e+00> : vector<16x16xf32>
    %1280 = tpu.matmul %1279, %1250, %cst_486 {dimension_numbers = #tpu.dot_dimension_numbers<[1], [0], [0], [1], [0, 0, 1, 1], [], []>} : vector<16x4xf32>, vector<4x16xf32>, vector<16x16xf32> -> vector<16x16xf32>
    %cst_487 = arith.constant dense<0.000000e+00> : vector<16x16xf32>
    %1281 = tpu.matmul %1278, %1276, %cst_487 {dimension_numbers = #tpu.dot_dimension_numbers<[1], [0], [0], [1], [0, 0, 1, 1], [], []>} : vector<16x4xf32>, vector<4x16xf32>, vector<16x16xf32> -> vector<16x16xf32>
    %cst_488 = arith.constant dense<0.000000e+00> : vector<16x16xf32>
    %1282 = tpu.matmul %1278, %1277, %cst_488 {dimension_numbers = #tpu.dot_dimension_numbers<[1], [0], [0], [1], [0, 0, 1, 1], [], []>} : vector<16x4xf32>, vector<4x16xf32>, vector<16x16xf32> -> vector<16x16xf32>
    %1283 = arith.addf %1243, %1281 : vector<16x16xf32>
    %1284 = arith.addf %1245, %1280 : vector<16x16xf32>
    %1285 = arith.addf %1247, %1282 : vector<16x16xf32>
    %1286 = vector.extract_strided_slice %1230 {offsets = [4, 0], sizes = [4, 16], strides = [1, 1]} : vector<8x16xf32> to vector<4x16xf32>
    %cst_489 = arith.constant dense<0.000000e+00> : vector<4x16xf32>
    %1287 = tpu.matmul %1286, %1283, %cst_489 {dimension_numbers = #tpu.dot_dimension_numbers<[1], [0], [0], [1], [0, 0, 1, 1], [], []>} : vector<4x16xf32>, vector<16x16xf32>, vector<4x16xf32> -> vector<4x16xf32>
    %cst_490 = arith.constant dense<0.000000e+00> : vector<4x16xf32>
    %1288 = tpu.matmul %1286, %1285, %cst_490 {dimension_numbers = #tpu.dot_dimension_numbers<[1], [0], [0], [1], [0, 0, 1, 1], [], []>} : vector<4x16xf32>, vector<16x16xf32>, vector<4x16xf32> -> vector<4x16xf32>
    %1289 = arith.negf %1287 : vector<4x16xf32>
    %1290 = math.exp %1289 : vector<4x16xf32>
    %cst_491 = arith.constant 1.000000e+00 : f32
    %1291 = vector.broadcast %cst_491 : f32 to vector<4x16xf32>
    %1292 = arith.addf %1291, %1290 : vector<4x16xf32>
    %1293 = arith.divf %1291, %1292 : vector<4x16xf32>
    %1294 = arith.mulf %1287, %1293 : vector<4x16xf32>
    %1295 = arith.mulf %1294, %1288 : vector<4x16xf32>
    %cst_492 = arith.constant dense<0.000000e+00> : vector<4x16xf32>
    %1296 = tpu.matmul %1295, %1284, %cst_492 {dimension_numbers = #tpu.dot_dimension_numbers<[1], [0], [0], [1], [0, 0, 1, 1], [], []>} : vector<4x16xf32>, vector<16x16xf32>, vector<4x16xf32> -> vector<4x16xf32>
    %1297 = tpu.concatenate %1260, %1296 in 0 : vector<4x16xf32>, vector<4x16xf32> -> vector<8x16xf32>
    %1298 = tpu.concatenate %1201, %1297 in 1 : vector<8x16xf32>, vector<8x16xf32> -> vector<8x32xf32>
    %1299 = arith.truncf %1298 : vector<8x32xf32> to vector<8x32xbf16>
    %cst_493 = arith.constant dense<0.000000e+00> : vector<8x32xf32>
    %1300 = tpu.matmul %1299, %934, %cst_493 {dimension_numbers = #tpu.dot_dimension_numbers<[1], [0], [0], [1], [0, 0, 1, 1], [], []>} : vector<8x32xbf16>, vector<32x32xbf16>, vector<8x32xf32> -> vector<8x32xf32>
    %1301 = vector.broadcast %936 : vector<1x32xf32> to vector<8x32xf32>
    %1302 = arith.addf %1300, %1301 : vector<8x32xf32>
    %1303 = arith.addf %1064, %1302 : vector<8x32xf32>
    %cst_494 = arith.constant dense<0.000000e+00> : vector<8xf32>
    %1304 = vector.multi_reduction <add>, %1303, %cst_494 [1] : vector<8x32xf32> to vector<8xf32>
    %1305 = vector.shape_cast %1304 : vector<8xf32> to vector<8x1xf32>
    %cst_495 = arith.constant 3.200000e+01 : f32
    %1306 = vector.broadcast %cst_495 : f32 to vector<8x1xf32>
    %1307 = arith.divf %1305, %1306 : vector<8x1xf32>
    %1308 = vector.broadcast %1307 : vector<8x1xf32> to vector<8x32xf32>
    %1309 = arith.subf %1303, %1308 : vector<8x32xf32>
    %1310 = vector.broadcast %1307 : vector<8x1xf32> to vector<8x32xf32>
    %1311 = arith.subf %1303, %1310 : vector<8x32xf32>
    %1312 = arith.mulf %1309, %1311 : vector<8x32xf32>
    %cst_496 = arith.constant dense<0.000000e+00> : vector<8xf32>
    %1313 = vector.multi_reduction <add>, %1312, %cst_496 [1] : vector<8x32xf32> to vector<8xf32>
    %1314 = vector.shape_cast %1313 : vector<8xf32> to vector<8x1xf32>
    %cst_497 = arith.constant 3.200000e+01 : f32
    %1315 = vector.broadcast %cst_497 : f32 to vector<8x1xf32>
    %1316 = arith.divf %1314, %1315 : vector<8x1xf32>
    %1317 = vector.broadcast %1307 : vector<8x1xf32> to vector<8x32xf32>
    %1318 = arith.subf %1303, %1317 : vector<8x32xf32>
    %cst_498 = arith.constant 9.99999974E-6 : f32
    %1319 = vector.broadcast %cst_498 : f32 to vector<8x1xf32>
    %1320 = arith.addf %1316, %1319 : vector<8x1xf32>
    %1321 = math.rsqrt %1320 : vector<8x1xf32>
    %1322 = vector.broadcast %1321 : vector<8x1xf32> to vector<8x32xf32>
    %1323 = arith.mulf %1318, %1322 : vector<8x32xf32>
    %1324 = vector.broadcast %944 : vector<1x32xf32> to vector<8x32xf32>
    %1325 = arith.mulf %1323, %1324 : vector<8x32xf32>
    %1326 = vector.broadcast %946 : vector<1x32xf32> to vector<8x32xf32>
    %1327 = arith.addf %1325, %1326 : vector<8x32xf32>
    %1328 = arith.truncf %1327 : vector<8x32xf32> to vector<8x32xbf16>
    %cst_499 = arith.constant dense<0.000000e+00> : vector<8x128xf32>
    %1329 = tpu.matmul %1328, %948, %cst_499 {dimension_numbers = #tpu.dot_dimension_numbers<[1], [0], [0], [1], [0, 0, 1, 1], [], []>} : vector<8x32xbf16>, vector<32x128xbf16>, vector<8x128xf32> -> vector<8x128xf32>
    %1330 = vector.broadcast %950 : vector<1x128xf32> to vector<8x128xf32>
    %1331 = arith.addf %1329, %1330 : vector<8x128xf32>
    %1332 = vector.extract_strided_slice %1331 {offsets = [0, 0], sizes = [8, 64], strides = [1, 1]} : vector<8x128xf32> to vector<8x64xf32>
    %1333 = arith.negf %1332 : vector<8x64xf32>
    %1334 = math.exp %1333 : vector<8x64xf32>
    %cst_500 = arith.constant 1.000000e+00 : f32
    %1335 = vector.broadcast %cst_500 : f32 to vector<8x64xf32>
    %1336 = arith.addf %1335, %1334 : vector<8x64xf32>
    %1337 = arith.divf %1335, %1336 : vector<8x64xf32>
    %1338 = arith.mulf %1332, %1337 : vector<8x64xf32>
    %1339 = vector.extract_strided_slice %1331 {offsets = [0, 64], sizes = [8, 64], strides = [1, 1]} : vector<8x128xf32> to vector<8x64xf32>
    %1340 = arith.mulf %1338, %1339 : vector<8x64xf32>
    %1341 = arith.truncf %1340 : vector<8x64xf32> to vector<8x64xbf16>
    %cst_501 = arith.constant dense<0.000000e+00> : vector<8x32xf32>
    %1342 = tpu.matmul %1341, %952, %cst_501 {dimension_numbers = #tpu.dot_dimension_numbers<[1], [0], [0], [1], [0, 0, 1, 1], [], []>} : vector<8x64xbf16>, vector<64x32xbf16>, vector<8x32xf32> -> vector<8x32xf32>
    %1343 = vector.broadcast %954 : vector<1x32xf32> to vector<8x32xf32>
    %1344 = arith.addf %1342, %1343 : vector<8x32xf32>
    %1345 = arith.addf %1303, %1344 : vector<8x32xf32>
    %c1_502 = arith.constant 1 : index
    %c0_503 = arith.constant 0 : index
    %c0_504 = arith.constant 0 : index
    %1346 = vector.load %arg26[%c1_502, %c0_503, %c0_504] : memref<2x1x32xf32, #tpu.memory_space<vmem>>, vector<1x1x32xf32>
    %1347 = vector.shape_cast %1346 : vector<1x1x32xf32> to vector<1x32xf32>
    %c1_505 = arith.constant 1 : index
    %c0_506 = arith.constant 0 : index
    %c0_507 = arith.constant 0 : index
    %1348 = vector.load %arg27[%c1_505, %c0_506, %c0_507] : memref<2x1x32xf32, #tpu.memory_space<vmem>>, vector<1x1x32xf32>
    %1349 = vector.shape_cast %1348 : vector<1x1x32xf32> to vector<1x32xf32>
    %c1_508 = arith.constant 1 : index
    %c0_509 = arith.constant 0 : index
    %c0_510 = arith.constant 0 : index
    %1350 = vector.load %arg28[%c1_508, %c0_509, %c0_510] : memref<2x32x96xbf16, #tpu.memory_space<vmem>>, vector<1x32x96xbf16>
    %1351 = vector.shape_cast %1350 : vector<1x32x96xbf16> to vector<32x96xbf16>
    %c1_511 = arith.constant 1 : index
    %c0_512 = arith.constant 0 : index
    %c0_513 = arith.constant 0 : index
    %1352 = vector.load %arg29[%c1_511, %c0_512, %c0_513] : memref<2x1x96xf32, #tpu.memory_space<vmem>>, vector<1x1x96xf32>
    %1353 = vector.shape_cast %1352 : vector<1x1x96xf32> to vector<1x96xf32>
    %c1_514 = arith.constant 1 : index
    %c0_515 = arith.constant 0 : index
    %c0_516 = arith.constant 0 : index
    %1354 = vector.load %arg30[%c1_514, %c0_515, %c0_516] : memref<2x32x32xbf16, #tpu.memory_space<vmem>>, vector<1x32x32xbf16>
    %1355 = vector.shape_cast %1354 : vector<1x32x32xbf16> to vector<32x32xbf16>
    %c1_517 = arith.constant 1 : index
    %c0_518 = arith.constant 0 : index
    %c0_519 = arith.constant 0 : index
    %1356 = vector.load %arg31[%c1_517, %c0_518, %c0_519] : memref<2x1x32xf32, #tpu.memory_space<vmem>>, vector<1x1x32xf32>
    %1357 = vector.shape_cast %1356 : vector<1x1x32xf32> to vector<1x32xf32>
    %c1_520 = arith.constant 1 : index
    %c0_521 = arith.constant 0 : index
    %c0_522 = arith.constant 0 : index
    %1358 = vector.load %arg32[%c1_520, %c0_521, %c0_522] : memref<2x1x32xf32, #tpu.memory_space<vmem>>, vector<1x1x32xf32>
    %1359 = vector.shape_cast %1358 : vector<1x1x32xf32> to vector<1x32xf32>
    %c1_523 = arith.constant 1 : index
    %c0_524 = arith.constant 0 : index
    %c0_525 = arith.constant 0 : index
    %1360 = vector.load %arg33[%c1_523, %c0_524, %c0_525] : memref<2x1x32xf32, #tpu.memory_space<vmem>>, vector<1x1x32xf32>
    %1361 = vector.shape_cast %1360 : vector<1x1x32xf32> to vector<1x32xf32>
    %c1_526 = arith.constant 1 : index
    %c0_527 = arith.constant 0 : index
    %c0_528 = arith.constant 0 : index
    %1362 = vector.load %arg34[%c1_526, %c0_527, %c0_528] : memref<2x32x98xbf16, #tpu.memory_space<vmem>>, vector<1x32x98xbf16>
    %1363 = vector.shape_cast %1362 : vector<1x32x98xbf16> to vector<32x98xbf16>
    %c1_529 = arith.constant 1 : index
    %c0_530 = arith.constant 0 : index
    %c0_531 = arith.constant 0 : index
    %1364 = vector.load %arg35[%c1_529, %c0_530, %c0_531] : memref<2x1x98xf32, #tpu.memory_space<vmem>>, vector<1x1x98xf32>
    %1365 = vector.shape_cast %1364 : vector<1x1x98xf32> to vector<1x98xf32>
    %c1_532 = arith.constant 1 : index
    %c0_533 = arith.constant 0 : index
    %c0_534 = arith.constant 0 : index
    %1366 = vector.load %arg36[%c1_532, %c0_533, %c0_534] : memref<2x32x32xbf16, #tpu.memory_space<vmem>>, vector<1x32x32xbf16>
    %1367 = vector.shape_cast %1366 : vector<1x32x32xbf16> to vector<32x32xbf16>
    %c1_535 = arith.constant 1 : index
    %c0_536 = arith.constant 0 : index
    %c0_537 = arith.constant 0 : index
    %1368 = vector.load %arg37[%c1_535, %c0_536, %c0_537] : memref<2x1x32xf32, #tpu.memory_space<vmem>>, vector<1x1x32xf32>
    %1369 = vector.shape_cast %1368 : vector<1x1x32xf32> to vector<1x32xf32>
    %c1_538 = arith.constant 1 : index
    %c0_539 = arith.constant 0 : index
    %c0_540 = arith.constant 0 : index
    %c0_541 = arith.constant 0 : index
    %1370 = vector.load %arg38[%c1_538, %c0_539, %c0_540, %c0_541] : memref<2x2x16x16xf32, #tpu.memory_space<vmem>>, vector<1x2x16x16xf32>
    %1371 = vector.shape_cast %1370 : vector<1x2x16x16xf32> to vector<2x16x16xf32>
    %c1_542 = arith.constant 1 : index
    %c0_543 = arith.constant 0 : index
    %c0_544 = arith.constant 0 : index
    %c0_545 = arith.constant 0 : index
    %1372 = vector.load %arg39[%c1_542, %c0_543, %c0_544, %c0_545] : memref<2x2x16x16xf32, #tpu.memory_space<vmem>>, vector<1x2x16x16xf32>
    %1373 = vector.shape_cast %1372 : vector<1x2x16x16xf32> to vector<2x16x16xf32>
    %c1_546 = arith.constant 1 : index
    %c0_547 = arith.constant 0 : index
    %c0_548 = arith.constant 0 : index
    %c0_549 = arith.constant 0 : index
    %1374 = vector.load %arg40[%c1_546, %c0_547, %c0_548, %c0_549] : memref<2x2x16x16xf32, #tpu.memory_space<vmem>>, vector<1x2x16x16xf32>
    %1375 = vector.shape_cast %1374 : vector<1x2x16x16xf32> to vector<2x16x16xf32>
    %c1_550 = arith.constant 1 : index
    %c0_551 = arith.constant 0 : index
    %c0_552 = arith.constant 0 : index
    %1376 = vector.load %arg41[%c1_550, %c0_551, %c0_552] : memref<2x1x32xf32, #tpu.memory_space<vmem>>, vector<1x1x32xf32>
    %1377 = vector.shape_cast %1376 : vector<1x1x32xf32> to vector<1x32xf32>
    %c1_553 = arith.constant 1 : index
    %c0_554 = arith.constant 0 : index
    %c0_555 = arith.constant 0 : index
    %1378 = vector.load %arg42[%c1_553, %c0_554, %c0_555] : memref<2x1x32xf32, #tpu.memory_space<vmem>>, vector<1x1x32xf32>
    %1379 = vector.shape_cast %1378 : vector<1x1x32xf32> to vector<1x32xf32>
    %c1_556 = arith.constant 1 : index
    %c0_557 = arith.constant 0 : index
    %c0_558 = arith.constant 0 : index
    %1380 = vector.load %arg43[%c1_556, %c0_557, %c0_558] : memref<2x32x128xbf16, #tpu.memory_space<vmem>>, vector<1x32x128xbf16>
    %1381 = vector.shape_cast %1380 : vector<1x32x128xbf16> to vector<32x128xbf16>
    %c1_559 = arith.constant 1 : index
    %c0_560 = arith.constant 0 : index
    %c0_561 = arith.constant 0 : index
    %1382 = vector.load %arg44[%c1_559, %c0_560, %c0_561] : memref<2x1x128xf32, #tpu.memory_space<vmem>>, vector<1x1x128xf32>
    %1383 = vector.shape_cast %1382 : vector<1x1x128xf32> to vector<1x128xf32>
    %c1_562 = arith.constant 1 : index
    %c0_563 = arith.constant 0 : index
    %c0_564 = arith.constant 0 : index
    %1384 = vector.load %arg45[%c1_562, %c0_563, %c0_564] : memref<2x64x32xbf16, #tpu.memory_space<vmem>>, vector<1x64x32xbf16>
    %1385 = vector.shape_cast %1384 : vector<1x64x32xbf16> to vector<64x32xbf16>
    %c1_565 = arith.constant 1 : index
    %c0_566 = arith.constant 0 : index
    %c0_567 = arith.constant 0 : index
    %1386 = vector.load %arg46[%c1_565, %c0_566, %c0_567] : memref<2x1x32xf32, #tpu.memory_space<vmem>>, vector<1x1x32xf32>
    %1387 = vector.shape_cast %1386 : vector<1x1x32xf32> to vector<1x32xf32>
    %cst_568 = arith.constant dense<0.000000e+00> : vector<8xf32>
    %1388 = vector.multi_reduction <add>, %1345, %cst_568 [1] : vector<8x32xf32> to vector<8xf32>
    %1389 = vector.shape_cast %1388 : vector<8xf32> to vector<8x1xf32>
    %cst_569 = arith.constant 3.200000e+01 : f32
    %1390 = vector.broadcast %cst_569 : f32 to vector<8x1xf32>
    %1391 = arith.divf %1389, %1390 : vector<8x1xf32>
    %1392 = vector.broadcast %1391 : vector<8x1xf32> to vector<8x32xf32>
    %1393 = arith.subf %1345, %1392 : vector<8x32xf32>
    %1394 = vector.broadcast %1391 : vector<8x1xf32> to vector<8x32xf32>
    %1395 = arith.subf %1345, %1394 : vector<8x32xf32>
    %1396 = arith.mulf %1393, %1395 : vector<8x32xf32>
    %cst_570 = arith.constant dense<0.000000e+00> : vector<8xf32>
    %1397 = vector.multi_reduction <add>, %1396, %cst_570 [1] : vector<8x32xf32> to vector<8xf32>
    %1398 = vector.shape_cast %1397 : vector<8xf32> to vector<8x1xf32>
    %cst_571 = arith.constant 3.200000e+01 : f32
    %1399 = vector.broadcast %cst_571 : f32 to vector<8x1xf32>
    %1400 = arith.divf %1398, %1399 : vector<8x1xf32>
    %1401 = vector.broadcast %1391 : vector<8x1xf32> to vector<8x32xf32>
    %1402 = arith.subf %1345, %1401 : vector<8x32xf32>
    %cst_572 = arith.constant 9.99999974E-6 : f32
    %1403 = vector.broadcast %cst_572 : f32 to vector<8x1xf32>
    %1404 = arith.addf %1400, %1403 : vector<8x1xf32>
    %1405 = math.rsqrt %1404 : vector<8x1xf32>
    %1406 = vector.broadcast %1405 : vector<8x1xf32> to vector<8x32xf32>
    %1407 = arith.mulf %1402, %1406 : vector<8x32xf32>
    %1408 = vector.broadcast %1347 : vector<1x32xf32> to vector<8x32xf32>
    %1409 = arith.mulf %1407, %1408 : vector<8x32xf32>
    %1410 = vector.broadcast %1349 : vector<1x32xf32> to vector<8x32xf32>
    %1411 = arith.addf %1409, %1410 : vector<8x32xf32>
    %1412 = arith.truncf %1411 : vector<8x32xf32> to vector<8x32xbf16>
    %cst_573 = arith.constant dense<0.000000e+00> : vector<8x96xf32>
    %1413 = tpu.matmul %1412, %1351, %cst_573 {dimension_numbers = #tpu.dot_dimension_numbers<[1], [0], [0], [1], [0, 0, 1, 1], [], []>} : vector<8x32xbf16>, vector<32x96xbf16>, vector<8x96xf32> -> vector<8x96xf32>
    %1414 = vector.broadcast %1353 : vector<1x96xf32> to vector<8x96xf32>
    %1415 = arith.addf %1413, %1414 : vector<8x96xf32>
    %1416 = vector.extract_strided_slice %1415 {offsets = [0, 0], sizes = [8, 8], strides = [1, 1]} : vector<8x96xf32> to vector<8x8xf32>
    %1417 = vector.extract_strided_slice %1415 {offsets = [0, 32], sizes = [8, 8], strides = [1, 1]} : vector<8x96xf32> to vector<8x8xf32>
    %1418 = vector.extract_strided_slice %1415 {offsets = [0, 64], sizes = [8, 8], strides = [1, 1]} : vector<8x96xf32> to vector<8x8xf32>
    "tpu.trace_start"() <{level = 10 : i32, message = "qd,kd->qk"}> : () -> ()
    %cst_574 = arith.constant dense<0.000000e+00> : vector<8x8xf32>
    %1419 = tpu.matmul %1416, %1417, %cst_574 {dimension_numbers = #tpu.dot_dimension_numbers<[1], [1], [0], [0], [0, 0, 1, 0], [], []>} : vector<8x8xf32>, vector<8x8xf32>, vector<8x8xf32> -> vector<8x8xf32>
    "tpu.trace_stop"() : () -> ()
    %cst_575 = arith.constant 0.353553385 : f32
    %1420 = vector.broadcast %cst_575 : f32 to vector<8x8xf32>
    %1421 = arith.mulf %1419, %1420 : vector<8x8xf32>
    %cst_576 = arith.constant -1.000000e+30 : f32
    %1422 = vector.broadcast %cst_576 : f32 to vector<8x8xf32>
    %1423 = arith.select %912, %1421, %1422 : vector<8x8xi1>, vector<8x8xf32>
    %cst_577 = arith.constant dense<0xFF800000> : vector<8xf32>
    %1424 = vector.multi_reduction <maximumf>, %1423, %cst_577 [1] : vector<8x8xf32> to vector<8xf32>
    %1425 = vector.shape_cast %1424 : vector<8xf32> to vector<8x1xf32>
    %1426 = vector.broadcast %1425 : vector<8x1xf32> to vector<8x8xf32>
    %1427 = arith.subf %1423, %1426 : vector<8x8xf32>
    %1428 = math.exp %1427 : vector<8x8xf32>
    %cst_578 = arith.constant dense<0.000000e+00> : vector<8xf32>
    %1429 = vector.multi_reduction <add>, %1428, %cst_578 [1] : vector<8x8xf32> to vector<8xf32>
    %1430 = vector.shape_cast %1429 : vector<8xf32> to vector<8x1xf32>
    %1431 = tpu.reciprocal %1430 {approx = true} : vector<8x1xf32> -> vector<8x1xf32>
    %1432 = vector.broadcast %1431 : vector<8x1xf32> to vector<8x8xf32>
    %1433 = arith.mulf %1428, %1432 : vector<8x8xf32>
    "tpu.trace_start"() <{level = 10 : i32, message = "qk,kd->qd"}> : () -> ()
    %cst_579 = arith.constant dense<0.000000e+00> : vector<8x8xf32>
    %1434 = tpu.matmul %1433, %1418, %cst_579 {dimension_numbers = #tpu.dot_dimension_numbers<[1], [0], [0], [1], [0, 0, 1, 1], [], []>} : vector<8x8xf32>, vector<8x8xf32>, vector<8x8xf32> -> vector<8x8xf32>
    "tpu.trace_stop"() : () -> ()
    %1435 = vector.extract_strided_slice %1415 {offsets = [0, 8], sizes = [8, 8], strides = [1, 1]} : vector<8x96xf32> to vector<8x8xf32>
    %1436 = vector.extract_strided_slice %1415 {offsets = [0, 40], sizes = [8, 8], strides = [1, 1]} : vector<8x96xf32> to vector<8x8xf32>
    %1437 = vector.extract_strided_slice %1415 {offsets = [0, 72], sizes = [8, 8], strides = [1, 1]} : vector<8x96xf32> to vector<8x8xf32>
    "tpu.trace_start"() <{level = 10 : i32, message = "qd,kd->qk"}> : () -> ()
    %cst_580 = arith.constant dense<0.000000e+00> : vector<8x8xf32>
    %1438 = tpu.matmul %1435, %1436, %cst_580 {dimension_numbers = #tpu.dot_dimension_numbers<[1], [1], [0], [0], [0, 0, 1, 0], [], []>} : vector<8x8xf32>, vector<8x8xf32>, vector<8x8xf32> -> vector<8x8xf32>
    "tpu.trace_stop"() : () -> ()
    %cst_581 = arith.constant 0.353553385 : f32
    %1439 = vector.broadcast %cst_581 : f32 to vector<8x8xf32>
    %1440 = arith.mulf %1438, %1439 : vector<8x8xf32>
    %cst_582 = arith.constant -1.000000e+30 : f32
    %1441 = vector.broadcast %cst_582 : f32 to vector<8x8xf32>
    %1442 = arith.select %912, %1440, %1441 : vector<8x8xi1>, vector<8x8xf32>
    %cst_583 = arith.constant dense<0xFF800000> : vector<8xf32>
    %1443 = vector.multi_reduction <maximumf>, %1442, %cst_583 [1] : vector<8x8xf32> to vector<8xf32>
    %1444 = vector.shape_cast %1443 : vector<8xf32> to vector<8x1xf32>
    %1445 = vector.broadcast %1444 : vector<8x1xf32> to vector<8x8xf32>
    %1446 = arith.subf %1442, %1445 : vector<8x8xf32>
    %1447 = math.exp %1446 : vector<8x8xf32>
    %cst_584 = arith.constant dense<0.000000e+00> : vector<8xf32>
    %1448 = vector.multi_reduction <add>, %1447, %cst_584 [1] : vector<8x8xf32> to vector<8xf32>
    %1449 = vector.shape_cast %1448 : vector<8xf32> to vector<8x1xf32>
    %1450 = tpu.reciprocal %1449 {approx = true} : vector<8x1xf32> -> vector<8x1xf32>
    %1451 = vector.broadcast %1450 : vector<8x1xf32> to vector<8x8xf32>
    %1452 = arith.mulf %1447, %1451 : vector<8x8xf32>
    "tpu.trace_start"() <{level = 10 : i32, message = "qk,kd->qd"}> : () -> ()
    %cst_585 = arith.constant dense<0.000000e+00> : vector<8x8xf32>
    %1453 = tpu.matmul %1452, %1437, %cst_585 {dimension_numbers = #tpu.dot_dimension_numbers<[1], [0], [0], [1], [0, 0, 1, 1], [], []>} : vector<8x8xf32>, vector<8x8xf32>, vector<8x8xf32> -> vector<8x8xf32>
    "tpu.trace_stop"() : () -> ()
    %1454 = vector.extract_strided_slice %1415 {offsets = [0, 16], sizes = [8, 8], strides = [1, 1]} : vector<8x96xf32> to vector<8x8xf32>
    %1455 = vector.extract_strided_slice %1415 {offsets = [0, 48], sizes = [8, 8], strides = [1, 1]} : vector<8x96xf32> to vector<8x8xf32>
    %1456 = vector.extract_strided_slice %1415 {offsets = [0, 80], sizes = [8, 8], strides = [1, 1]} : vector<8x96xf32> to vector<8x8xf32>
    "tpu.trace_start"() <{level = 10 : i32, message = "qd,kd->qk"}> : () -> ()
    %cst_586 = arith.constant dense<0.000000e+00> : vector<8x8xf32>
    %1457 = tpu.matmul %1454, %1455, %cst_586 {dimension_numbers = #tpu.dot_dimension_numbers<[1], [1], [0], [0], [0, 0, 1, 0], [], []>} : vector<8x8xf32>, vector<8x8xf32>, vector<8x8xf32> -> vector<8x8xf32>
    "tpu.trace_stop"() : () -> ()
    %cst_587 = arith.constant 0.353553385 : f32
    %1458 = vector.broadcast %cst_587 : f32 to vector<8x8xf32>
    %1459 = arith.mulf %1457, %1458 : vector<8x8xf32>
    %cst_588 = arith.constant -1.000000e+30 : f32
    %1460 = vector.broadcast %cst_588 : f32 to vector<8x8xf32>
    %1461 = arith.select %912, %1459, %1460 : vector<8x8xi1>, vector<8x8xf32>
    %cst_589 = arith.constant dense<0xFF800000> : vector<8xf32>
    %1462 = vector.multi_reduction <maximumf>, %1461, %cst_589 [1] : vector<8x8xf32> to vector<8xf32>
    %1463 = vector.shape_cast %1462 : vector<8xf32> to vector<8x1xf32>
    %1464 = vector.broadcast %1463 : vector<8x1xf32> to vector<8x8xf32>
    %1465 = arith.subf %1461, %1464 : vector<8x8xf32>
    %1466 = math.exp %1465 : vector<8x8xf32>
    %cst_590 = arith.constant dense<0.000000e+00> : vector<8xf32>
    %1467 = vector.multi_reduction <add>, %1466, %cst_590 [1] : vector<8x8xf32> to vector<8xf32>
    %1468 = vector.shape_cast %1467 : vector<8xf32> to vector<8x1xf32>
    %1469 = tpu.reciprocal %1468 {approx = true} : vector<8x1xf32> -> vector<8x1xf32>
    %1470 = vector.broadcast %1469 : vector<8x1xf32> to vector<8x8xf32>
    %1471 = arith.mulf %1466, %1470 : vector<8x8xf32>
    "tpu.trace_start"() <{level = 10 : i32, message = "qk,kd->qd"}> : () -> ()
    %cst_591 = arith.constant dense<0.000000e+00> : vector<8x8xf32>
    %1472 = tpu.matmul %1471, %1456, %cst_591 {dimension_numbers = #tpu.dot_dimension_numbers<[1], [0], [0], [1], [0, 0, 1, 1], [], []>} : vector<8x8xf32>, vector<8x8xf32>, vector<8x8xf32> -> vector<8x8xf32>
    "tpu.trace_stop"() : () -> ()
    %1473 = vector.extract_strided_slice %1415 {offsets = [0, 24], sizes = [8, 8], strides = [1, 1]} : vector<8x96xf32> to vector<8x8xf32>
    %1474 = vector.extract_strided_slice %1415 {offsets = [0, 56], sizes = [8, 8], strides = [1, 1]} : vector<8x96xf32> to vector<8x8xf32>
    %1475 = vector.extract_strided_slice %1415 {offsets = [0, 88], sizes = [8, 8], strides = [1, 1]} : vector<8x96xf32> to vector<8x8xf32>
    "tpu.trace_start"() <{level = 10 : i32, message = "qd,kd->qk"}> : () -> ()
    %cst_592 = arith.constant dense<0.000000e+00> : vector<8x8xf32>
    %1476 = tpu.matmul %1473, %1474, %cst_592 {dimension_numbers = #tpu.dot_dimension_numbers<[1], [1], [0], [0], [0, 0, 1, 0], [], []>} : vector<8x8xf32>, vector<8x8xf32>, vector<8x8xf32> -> vector<8x8xf32>
    "tpu.trace_stop"() : () -> ()
    %cst_593 = arith.constant 0.353553385 : f32
    %1477 = vector.broadcast %cst_593 : f32 to vector<8x8xf32>
    %1478 = arith.mulf %1476, %1477 : vector<8x8xf32>
    %cst_594 = arith.constant -1.000000e+30 : f32
    %1479 = vector.broadcast %cst_594 : f32 to vector<8x8xf32>
    %1480 = arith.select %912, %1478, %1479 : vector<8x8xi1>, vector<8x8xf32>
    %cst_595 = arith.constant dense<0xFF800000> : vector<8xf32>
    %1481 = vector.multi_reduction <maximumf>, %1480, %cst_595 [1] : vector<8x8xf32> to vector<8xf32>
    %1482 = vector.shape_cast %1481 : vector<8xf32> to vector<8x1xf32>
    %1483 = vector.broadcast %1482 : vector<8x1xf32> to vector<8x8xf32>
    %1484 = arith.subf %1480, %1483 : vector<8x8xf32>
    %1485 = math.exp %1484 : vector<8x8xf32>
    %cst_596 = arith.constant dense<0.000000e+00> : vector<8xf32>
    %1486 = vector.multi_reduction <add>, %1485, %cst_596 [1] : vector<8x8xf32> to vector<8xf32>
    %1487 = vector.shape_cast %1486 : vector<8xf32> to vector<8x1xf32>
    %1488 = tpu.reciprocal %1487 {approx = true} : vector<8x1xf32> -> vector<8x1xf32>
    %1489 = vector.broadcast %1488 : vector<8x1xf32> to vector<8x8xf32>
    %1490 = arith.mulf %1485, %1489 : vector<8x8xf32>
    "tpu.trace_start"() <{level = 10 : i32, message = "qk,kd->qd"}> : () -> ()
    %cst_597 = arith.constant dense<0.000000e+00> : vector<8x8xf32>
    %1491 = tpu.matmul %1490, %1475, %cst_597 {dimension_numbers = #tpu.dot_dimension_numbers<[1], [0], [0], [1], [0, 0, 1, 1], [], []>} : vector<8x8xf32>, vector<8x8xf32>, vector<8x8xf32> -> vector<8x8xf32>
    "tpu.trace_stop"() : () -> ()
    %1492 = tpu.concatenate %1434, %1453, %1472, %1491 in 1 : vector<8x8xf32>, vector<8x8xf32>, vector<8x8xf32>, vector<8x8xf32> -> vector<8x32xf32>
    %1493 = arith.truncf %1492 : vector<8x32xf32> to vector<8x32xbf16>
    %cst_598 = arith.constant dense<0.000000e+00> : vector<8x32xf32>
    %1494 = tpu.matmul %1493, %1355, %cst_598 {dimension_numbers = #tpu.dot_dimension_numbers<[1], [0], [0], [1], [0, 0, 1, 1], [], []>} : vector<8x32xbf16>, vector<32x32xbf16>, vector<8x32xf32> -> vector<8x32xf32>
    %1495 = vector.broadcast %1357 : vector<1x32xf32> to vector<8x32xf32>
    %1496 = arith.addf %1494, %1495 : vector<8x32xf32>
    %1497 = arith.addf %1345, %1496 : vector<8x32xf32>
    %cst_599 = arith.constant dense<0.000000e+00> : vector<8xf32>
    %1498 = vector.multi_reduction <add>, %1497, %cst_599 [1] : vector<8x32xf32> to vector<8xf32>
    %1499 = vector.shape_cast %1498 : vector<8xf32> to vector<8x1xf32>
    %cst_600 = arith.constant 3.200000e+01 : f32
    %1500 = vector.broadcast %cst_600 : f32 to vector<8x1xf32>
    %1501 = arith.divf %1499, %1500 : vector<8x1xf32>
    %1502 = vector.broadcast %1501 : vector<8x1xf32> to vector<8x32xf32>
    %1503 = arith.subf %1497, %1502 : vector<8x32xf32>
    %1504 = vector.broadcast %1501 : vector<8x1xf32> to vector<8x32xf32>
    %1505 = arith.subf %1497, %1504 : vector<8x32xf32>
    %1506 = arith.mulf %1503, %1505 : vector<8x32xf32>
    %cst_601 = arith.constant dense<0.000000e+00> : vector<8xf32>
    %1507 = vector.multi_reduction <add>, %1506, %cst_601 [1] : vector<8x32xf32> to vector<8xf32>
    %1508 = vector.shape_cast %1507 : vector<8xf32> to vector<8x1xf32>
    %cst_602 = arith.constant 3.200000e+01 : f32
    %1509 = vector.broadcast %cst_602 : f32 to vector<8x1xf32>
    %1510 = arith.divf %1508, %1509 : vector<8x1xf32>
    %1511 = vector.broadcast %1501 : vector<8x1xf32> to vector<8x32xf32>
    %1512 = arith.subf %1497, %1511 : vector<8x32xf32>
    %cst_603 = arith.constant 9.99999974E-6 : f32
    %1513 = vector.broadcast %cst_603 : f32 to vector<8x1xf32>
    %1514 = arith.addf %1510, %1513 : vector<8x1xf32>
    %1515 = math.rsqrt %1514 : vector<8x1xf32>
    %1516 = vector.broadcast %1515 : vector<8x1xf32> to vector<8x32xf32>
    %1517 = arith.mulf %1512, %1516 : vector<8x32xf32>
    %1518 = vector.broadcast %1359 : vector<1x32xf32> to vector<8x32xf32>
    %1519 = arith.mulf %1517, %1518 : vector<8x32xf32>
    %1520 = vector.broadcast %1361 : vector<1x32xf32> to vector<8x32xf32>
    %1521 = arith.addf %1519, %1520 : vector<8x32xf32>
    %1522 = arith.truncf %1521 : vector<8x32xf32> to vector<8x32xbf16>
    %cst_604 = arith.constant dense<0.000000e+00> : vector<8x98xf32>
    %1523 = tpu.matmul %1522, %1363, %cst_604 {dimension_numbers = #tpu.dot_dimension_numbers<[1], [0], [0], [1], [0, 0, 1, 1], [], []>} : vector<8x32xbf16>, vector<32x98xbf16>, vector<8x98xf32> -> vector<8x98xf32>
    %1524 = vector.broadcast %1365 : vector<1x98xf32> to vector<8x98xf32>
    %1525 = arith.addf %1523, %1524 : vector<8x98xf32>
    %1526 = vector.extract_strided_slice %1525 {offsets = [0, 96], sizes = [8, 2], strides = [1, 1]} : vector<8x98xf32> to vector<8x2xf32>
    %cst_605 = arith.constant 0.000000e+00 : f32
    %1527 = vector.broadcast %cst_605 : f32 to vector<8x2xf32>
    %1528 = arith.maximumf %1526, %1527 : vector<8x2xf32>
    %1529 = math.absf %1526 : vector<8x2xf32>
    %cst_606 = arith.constant 0.000000e+00 : f32
    %1530 = vector.broadcast %cst_606 : f32 to vector<8x2xf32>
    %1531 = arith.subf %1530, %1529 : vector<8x2xf32>
    %1532 = math.exp %1531 : vector<8x2xf32>
    %cst_607 = arith.constant 1.000000e+00 : f32
    %1533 = vector.broadcast %cst_607 : f32 to vector<8x2xf32>
    %1534 = arith.addf %1533, %1532 : vector<8x2xf32>
    %1535 = math.log %1534 : vector<8x2xf32>
    %1536 = arith.addf %1528, %1535 : vector<8x2xf32>
    %cst_608 = arith.constant 0.00999999977 : f32
    %1537 = vector.broadcast %cst_608 : f32 to vector<8x2xf32>
    %1538 = arith.mulf %1536, %1537 : vector<8x2xf32>
    %1539 = vector.extract_strided_slice %1525 {offsets = [0, 0], sizes = [8, 16], strides = [1, 1]} : vector<8x98xf32> to vector<8x16xf32>
    %1540 = arith.negf %1539 : vector<8x16xf32>
    %1541 = math.exp %1540 : vector<8x16xf32>
    %cst_609 = arith.constant 1.000000e+00 : f32
    %1542 = vector.broadcast %cst_609 : f32 to vector<8x16xf32>
    %1543 = arith.addf %1542, %1541 : vector<8x16xf32>
    %1544 = arith.divf %1542, %1543 : vector<8x16xf32>
    %1545 = arith.mulf %1539, %1544 : vector<8x16xf32>
    %1546 = vector.extract_strided_slice %1525 {offsets = [0, 32], sizes = [8, 16], strides = [1, 1]} : vector<8x98xf32> to vector<8x16xf32>
    %1547 = arith.negf %1546 : vector<8x16xf32>
    %1548 = math.exp %1547 : vector<8x16xf32>
    %cst_610 = arith.constant 1.000000e+00 : f32
    %1549 = vector.broadcast %cst_610 : f32 to vector<8x16xf32>
    %1550 = arith.addf %1549, %1548 : vector<8x16xf32>
    %1551 = arith.divf %1549, %1550 : vector<8x16xf32>
    %1552 = arith.mulf %1546, %1551 : vector<8x16xf32>
    %1553 = vector.extract_strided_slice %1525 {offsets = [0, 64], sizes = [8, 16], strides = [1, 1]} : vector<8x98xf32> to vector<8x16xf32>
    %1554 = arith.negf %1553 : vector<8x16xf32>
    %1555 = math.exp %1554 : vector<8x16xf32>
    %cst_611 = arith.constant 1.000000e+00 : f32
    %1556 = vector.broadcast %cst_611 : f32 to vector<8x16xf32>
    %1557 = arith.addf %1556, %1555 : vector<8x16xf32>
    %1558 = arith.divf %1556, %1557 : vector<8x16xf32>
    %1559 = arith.mulf %1553, %1558 : vector<8x16xf32>
    %1560 = arith.mulf %1545, %1545 : vector<8x16xf32>
    %cst_612 = arith.constant dense<0.000000e+00> : vector<8xf32>
    %1561 = vector.multi_reduction <add>, %1560, %cst_612 [1] : vector<8x16xf32> to vector<8xf32>
    %1562 = vector.shape_cast %1561 : vector<8xf32> to vector<8x1xf32>
    %cst_613 = arith.constant 9.99999997E-7 : f32
    %1563 = vector.broadcast %cst_613 : f32 to vector<8x1xf32>
    %1564 = arith.addf %1562, %1563 : vector<8x1xf32>
    %1565 = math.rsqrt %1564 : vector<8x1xf32>
    %1566 = vector.broadcast %1565 : vector<8x1xf32> to vector<8x16xf32>
    %1567 = arith.mulf %1545, %1566 : vector<8x16xf32>
    %1568 = arith.mulf %1552, %1552 : vector<8x16xf32>
    %cst_614 = arith.constant dense<0.000000e+00> : vector<8xf32>
    %1569 = vector.multi_reduction <add>, %1568, %cst_614 [1] : vector<8x16xf32> to vector<8xf32>
    %1570 = vector.shape_cast %1569 : vector<8xf32> to vector<8x1xf32>
    %cst_615 = arith.constant 9.99999997E-7 : f32
    %1571 = vector.broadcast %cst_615 : f32 to vector<8x1xf32>
    %1572 = arith.addf %1570, %1571 : vector<8x1xf32>
    %1573 = math.rsqrt %1572 : vector<8x1xf32>
    %1574 = vector.broadcast %1573 : vector<8x1xf32> to vector<8x16xf32>
    %1575 = arith.mulf %1552, %1574 : vector<8x16xf32>
    %1576 = vector.extract_strided_slice %1538 {offsets = [0, 0], sizes = [8, 1], strides = [1, 1]} : vector<8x2xf32> to vector<8x1xf32>
    %1577 = vector.broadcast %1576 : vector<8x1xf32> to vector<8x16xf32>
    %1578 = arith.mulf %1559, %1577 : vector<8x16xf32>
    %1579 = vector.extract_strided_slice %1371 {offsets = [0, 0, 0], sizes = [1, 16, 16], strides = [1, 1, 1]} : vector<2x16x16xf32> to vector<1x16x16xf32>
    %1580 = vector.shape_cast %1579 : vector<1x16x16xf32> to vector<16x16xf32>
    %1581 = vector.extract_strided_slice %1373 {offsets = [0, 0, 0], sizes = [1, 16, 16], strides = [1, 1, 1]} : vector<2x16x16xf32> to vector<1x16x16xf32>
    %1582 = vector.shape_cast %1581 : vector<1x16x16xf32> to vector<16x16xf32>
    %1583 = vector.extract_strided_slice %1375 {offsets = [0, 0, 0], sizes = [1, 16, 16], strides = [1, 1, 1]} : vector<2x16x16xf32> to vector<1x16x16xf32>
    %1584 = vector.shape_cast %1583 : vector<1x16x16xf32> to vector<16x16xf32>
    %1585 = vector.extract_strided_slice %1567 {offsets = [0, 0], sizes = [4, 16], strides = [1, 1]} : vector<8x16xf32> to vector<4x16xf32>
    %1586 = vector.extract_strided_slice %1575 {offsets = [0, 0], sizes = [4, 16], strides = [1, 1]} : vector<8x16xf32> to vector<4x16xf32>
    %1587 = vector.extract_strided_slice %1578 {offsets = [0, 0], sizes = [4, 16], strides = [1, 1]} : vector<8x16xf32> to vector<4x16xf32>
    %cst_616 = arith.constant dense<0.000000e+00> : vector<4x16xf32>
    %1588 = tpu.matmul %1585, %1580, %cst_616 {dimension_numbers = #tpu.dot_dimension_numbers<[1], [0], [0], [1], [0, 0, 1, 1], [], []>} : vector<4x16xf32>, vector<16x16xf32>, vector<4x16xf32> -> vector<4x16xf32>
    %cst_617 = arith.constant dense<0.000000e+00> : vector<4x16xf32>
    %1589 = tpu.matmul %1585, %1584, %cst_617 {dimension_numbers = #tpu.dot_dimension_numbers<[1], [0], [0], [1], [0, 0, 1, 1], [], []>} : vector<4x16xf32>, vector<16x16xf32>, vector<4x16xf32> -> vector<4x16xf32>
    %1590 = arith.negf %1588 : vector<4x16xf32>
    %1591 = math.exp %1590 : vector<4x16xf32>
    %cst_618 = arith.constant 1.000000e+00 : f32
    %1592 = vector.broadcast %cst_618 : f32 to vector<4x16xf32>
    %1593 = arith.addf %1592, %1591 : vector<4x16xf32>
    %1594 = arith.divf %1592, %1593 : vector<4x16xf32>
    %1595 = arith.mulf %1588, %1594 : vector<4x16xf32>
    %1596 = arith.mulf %1595, %1589 : vector<4x16xf32>
    %cst_619 = arith.constant dense<0.000000e+00> : vector<4x16xf32>
    %1597 = tpu.matmul %1596, %1582, %cst_619 {dimension_numbers = #tpu.dot_dimension_numbers<[1], [0], [0], [1], [0, 0, 1, 1], [], []>} : vector<4x16xf32>, vector<16x16xf32>, vector<4x16xf32> -> vector<4x16xf32>
    %cst_620 = arith.constant dense<0.000000e+00> : vector<4x16xf32>
    %1598 = tpu.matmul %1586, %1580, %cst_620 {dimension_numbers = #tpu.dot_dimension_numbers<[1], [0], [0], [1], [0, 0, 1, 1], [], []>} : vector<4x16xf32>, vector<16x16xf32>, vector<4x16xf32> -> vector<4x16xf32>
    %cst_621 = arith.constant dense<0.000000e+00> : vector<4x16xf32>
    %1599 = tpu.matmul %1586, %1584, %cst_621 {dimension_numbers = #tpu.dot_dimension_numbers<[1], [0], [0], [1], [0, 0, 1, 1], [], []>} : vector<4x16xf32>, vector<16x16xf32>, vector<4x16xf32> -> vector<4x16xf32>
    %1600 = arith.negf %1598 : vector<4x16xf32>
    %1601 = math.exp %1600 : vector<4x16xf32>
    %cst_622 = arith.constant 1.000000e+00 : f32
    %1602 = vector.broadcast %cst_622 : f32 to vector<4x16xf32>
    %1603 = arith.addf %1602, %1601 : vector<4x16xf32>
    %1604 = arith.divf %1602, %1603 : vector<4x16xf32>
    %1605 = arith.mulf %1598, %1604 : vector<4x16xf32>
    %1606 = arith.mulf %1605, %1599 : vector<4x16xf32>
    "tpu.trace_start"() <{level = 10 : i32, message = "cd,ed->ce"}> : () -> ()
    %cst_623 = arith.constant dense<0.000000e+00> : vector<4x16xf32>
    %1607 = tpu.matmul %1587, %1582, %cst_623 {dimension_numbers = #tpu.dot_dimension_numbers<[1], [1], [0], [0], [0, 0, 1, 0], [], []>} : vector<4x16xf32>, vector<16x16xf32>, vector<4x16xf32> -> vector<4x16xf32>
    "tpu.trace_stop"() : () -> ()
    %1608 = arith.mulf %1607, %1599 : vector<4x16xf32>
    %cst_624 = arith.constant 1.000000e+00 : f32
    %1609 = vector.broadcast %cst_624 : f32 to vector<4x16xf32>
    %1610 = arith.subf %1609, %1604 : vector<4x16xf32>
    %1611 = arith.mulf %1605, %1610 : vector<4x16xf32>
    %1612 = arith.addf %1604, %1611 : vector<4x16xf32>
    %1613 = arith.mulf %1608, %1612 : vector<4x16xf32>
    %1614 = arith.mulf %1607, %1605 : vector<4x16xf32>
    %1615 = tpu.transpose %1586, [1, 0] : vector<4x16xf32> -> vector<16x4xf32>
    %1616 = tpu.transpose %1606, [1, 0] : vector<4x16xf32> -> vector<16x4xf32>
    %cst_625 = arith.constant dense<0.000000e+00> : vector<16x16xf32>
    %1617 = tpu.matmul %1616, %1587, %cst_625 {dimension_numbers = #tpu.dot_dimension_numbers<[1], [0], [0], [1], [0, 0, 1, 1], [], []>} : vector<16x4xf32>, vector<4x16xf32>, vector<16x16xf32> -> vector<16x16xf32>
    %cst_626 = arith.constant dense<0.000000e+00> : vector<16x16xf32>
    %1618 = tpu.matmul %1615, %1613, %cst_626 {dimension_numbers = #tpu.dot_dimension_numbers<[1], [0], [0], [1], [0, 0, 1, 1], [], []>} : vector<16x4xf32>, vector<4x16xf32>, vector<16x16xf32> -> vector<16x16xf32>
    %cst_627 = arith.constant dense<0.000000e+00> : vector<16x16xf32>
    %1619 = tpu.matmul %1615, %1614, %cst_627 {dimension_numbers = #tpu.dot_dimension_numbers<[1], [0], [0], [1], [0, 0, 1, 1], [], []>} : vector<16x4xf32>, vector<4x16xf32>, vector<16x16xf32> -> vector<16x16xf32>
    %1620 = arith.addf %1580, %1618 : vector<16x16xf32>
    %1621 = arith.addf %1582, %1617 : vector<16x16xf32>
    %1622 = arith.addf %1584, %1619 : vector<16x16xf32>
    %1623 = vector.extract_strided_slice %1567 {offsets = [4, 0], sizes = [4, 16], strides = [1, 1]} : vector<8x16xf32> to vector<4x16xf32>
    %cst_628 = arith.constant dense<0.000000e+00> : vector<4x16xf32>
    %1624 = tpu.matmul %1623, %1620, %cst_628 {dimension_numbers = #tpu.dot_dimension_numbers<[1], [0], [0], [1], [0, 0, 1, 1], [], []>} : vector<4x16xf32>, vector<16x16xf32>, vector<4x16xf32> -> vector<4x16xf32>
    %cst_629 = arith.constant dense<0.000000e+00> : vector<4x16xf32>
    %1625 = tpu.matmul %1623, %1622, %cst_629 {dimension_numbers = #tpu.dot_dimension_numbers<[1], [0], [0], [1], [0, 0, 1, 1], [], []>} : vector<4x16xf32>, vector<16x16xf32>, vector<4x16xf32> -> vector<4x16xf32>
    %1626 = arith.negf %1624 : vector<4x16xf32>
    %1627 = math.exp %1626 : vector<4x16xf32>
    %cst_630 = arith.constant 1.000000e+00 : f32
    %1628 = vector.broadcast %cst_630 : f32 to vector<4x16xf32>
    %1629 = arith.addf %1628, %1627 : vector<4x16xf32>
    %1630 = arith.divf %1628, %1629 : vector<4x16xf32>
    %1631 = arith.mulf %1624, %1630 : vector<4x16xf32>
    %1632 = arith.mulf %1631, %1625 : vector<4x16xf32>
    %cst_631 = arith.constant dense<0.000000e+00> : vector<4x16xf32>
    %1633 = tpu.matmul %1632, %1621, %cst_631 {dimension_numbers = #tpu.dot_dimension_numbers<[1], [0], [0], [1], [0, 0, 1, 1], [], []>} : vector<4x16xf32>, vector<16x16xf32>, vector<4x16xf32> -> vector<4x16xf32>
    %1634 = tpu.concatenate %1597, %1633 in 0 : vector<4x16xf32>, vector<4x16xf32> -> vector<8x16xf32>
    %1635 = vector.extract_strided_slice %1525 {offsets = [0, 16], sizes = [8, 16], strides = [1, 1]} : vector<8x98xf32> to vector<8x16xf32>
    %1636 = arith.negf %1635 : vector<8x16xf32>
    %1637 = math.exp %1636 : vector<8x16xf32>
    %cst_632 = arith.constant 1.000000e+00 : f32
    %1638 = vector.broadcast %cst_632 : f32 to vector<8x16xf32>
    %1639 = arith.addf %1638, %1637 : vector<8x16xf32>
    %1640 = arith.divf %1638, %1639 : vector<8x16xf32>
    %1641 = arith.mulf %1635, %1640 : vector<8x16xf32>
    %1642 = vector.extract_strided_slice %1525 {offsets = [0, 48], sizes = [8, 16], strides = [1, 1]} : vector<8x98xf32> to vector<8x16xf32>
    %1643 = arith.negf %1642 : vector<8x16xf32>
    %1644 = math.exp %1643 : vector<8x16xf32>
    %cst_633 = arith.constant 1.000000e+00 : f32
    %1645 = vector.broadcast %cst_633 : f32 to vector<8x16xf32>
    %1646 = arith.addf %1645, %1644 : vector<8x16xf32>
    %1647 = arith.divf %1645, %1646 : vector<8x16xf32>
    %1648 = arith.mulf %1642, %1647 : vector<8x16xf32>
    %1649 = vector.extract_strided_slice %1525 {offsets = [0, 80], sizes = [8, 16], strides = [1, 1]} : vector<8x98xf32> to vector<8x16xf32>
    %1650 = arith.negf %1649 : vector<8x16xf32>
    %1651 = math.exp %1650 : vector<8x16xf32>
    %cst_634 = arith.constant 1.000000e+00 : f32
    %1652 = vector.broadcast %cst_634 : f32 to vector<8x16xf32>
    %1653 = arith.addf %1652, %1651 : vector<8x16xf32>
    %1654 = arith.divf %1652, %1653 : vector<8x16xf32>
    %1655 = arith.mulf %1649, %1654 : vector<8x16xf32>
    %1656 = arith.mulf %1641, %1641 : vector<8x16xf32>
    %cst_635 = arith.constant dense<0.000000e+00> : vector<8xf32>
    %1657 = vector.multi_reduction <add>, %1656, %cst_635 [1] : vector<8x16xf32> to vector<8xf32>
    %1658 = vector.shape_cast %1657 : vector<8xf32> to vector<8x1xf32>
    %cst_636 = arith.constant 9.99999997E-7 : f32
    %1659 = vector.broadcast %cst_636 : f32 to vector<8x1xf32>
    %1660 = arith.addf %1658, %1659 : vector<8x1xf32>
    %1661 = math.rsqrt %1660 : vector<8x1xf32>
    %1662 = vector.broadcast %1661 : vector<8x1xf32> to vector<8x16xf32>
    %1663 = arith.mulf %1641, %1662 : vector<8x16xf32>
    %1664 = arith.mulf %1648, %1648 : vector<8x16xf32>
    %cst_637 = arith.constant dense<0.000000e+00> : vector<8xf32>
    %1665 = vector.multi_reduction <add>, %1664, %cst_637 [1] : vector<8x16xf32> to vector<8xf32>
    %1666 = vector.shape_cast %1665 : vector<8xf32> to vector<8x1xf32>
    %cst_638 = arith.constant 9.99999997E-7 : f32
    %1667 = vector.broadcast %cst_638 : f32 to vector<8x1xf32>
    %1668 = arith.addf %1666, %1667 : vector<8x1xf32>
    %1669 = math.rsqrt %1668 : vector<8x1xf32>
    %1670 = vector.broadcast %1669 : vector<8x1xf32> to vector<8x16xf32>
    %1671 = arith.mulf %1648, %1670 : vector<8x16xf32>
    %1672 = vector.extract_strided_slice %1538 {offsets = [0, 1], sizes = [8, 1], strides = [1, 1]} : vector<8x2xf32> to vector<8x1xf32>
    %1673 = vector.broadcast %1672 : vector<8x1xf32> to vector<8x16xf32>
    %1674 = arith.mulf %1655, %1673 : vector<8x16xf32>
    %1675 = vector.extract_strided_slice %1371 {offsets = [1, 0, 0], sizes = [1, 16, 16], strides = [1, 1, 1]} : vector<2x16x16xf32> to vector<1x16x16xf32>
    %1676 = vector.shape_cast %1675 : vector<1x16x16xf32> to vector<16x16xf32>
    %1677 = vector.extract_strided_slice %1373 {offsets = [1, 0, 0], sizes = [1, 16, 16], strides = [1, 1, 1]} : vector<2x16x16xf32> to vector<1x16x16xf32>
    %1678 = vector.shape_cast %1677 : vector<1x16x16xf32> to vector<16x16xf32>
    %1679 = vector.extract_strided_slice %1375 {offsets = [1, 0, 0], sizes = [1, 16, 16], strides = [1, 1, 1]} : vector<2x16x16xf32> to vector<1x16x16xf32>
    %1680 = vector.shape_cast %1679 : vector<1x16x16xf32> to vector<16x16xf32>
    %1681 = vector.extract_strided_slice %1663 {offsets = [0, 0], sizes = [4, 16], strides = [1, 1]} : vector<8x16xf32> to vector<4x16xf32>
    %1682 = vector.extract_strided_slice %1671 {offsets = [0, 0], sizes = [4, 16], strides = [1, 1]} : vector<8x16xf32> to vector<4x16xf32>
    %1683 = vector.extract_strided_slice %1674 {offsets = [0, 0], sizes = [4, 16], strides = [1, 1]} : vector<8x16xf32> to vector<4x16xf32>
    %cst_639 = arith.constant dense<0.000000e+00> : vector<4x16xf32>
    %1684 = tpu.matmul %1681, %1676, %cst_639 {dimension_numbers = #tpu.dot_dimension_numbers<[1], [0], [0], [1], [0, 0, 1, 1], [], []>} : vector<4x16xf32>, vector<16x16xf32>, vector<4x16xf32> -> vector<4x16xf32>
    %cst_640 = arith.constant dense<0.000000e+00> : vector<4x16xf32>
    %1685 = tpu.matmul %1681, %1680, %cst_640 {dimension_numbers = #tpu.dot_dimension_numbers<[1], [0], [0], [1], [0, 0, 1, 1], [], []>} : vector<4x16xf32>, vector<16x16xf32>, vector<4x16xf32> -> vector<4x16xf32>
    %1686 = arith.negf %1684 : vector<4x16xf32>
    %1687 = math.exp %1686 : vector<4x16xf32>
    %cst_641 = arith.constant 1.000000e+00 : f32
    %1688 = vector.broadcast %cst_641 : f32 to vector<4x16xf32>
    %1689 = arith.addf %1688, %1687 : vector<4x16xf32>
    %1690 = arith.divf %1688, %1689 : vector<4x16xf32>
    %1691 = arith.mulf %1684, %1690 : vector<4x16xf32>
    %1692 = arith.mulf %1691, %1685 : vector<4x16xf32>
    %cst_642 = arith.constant dense<0.000000e+00> : vector<4x16xf32>
    %1693 = tpu.matmul %1692, %1678, %cst_642 {dimension_numbers = #tpu.dot_dimension_numbers<[1], [0], [0], [1], [0, 0, 1, 1], [], []>} : vector<4x16xf32>, vector<16x16xf32>, vector<4x16xf32> -> vector<4x16xf32>
    %cst_643 = arith.constant dense<0.000000e+00> : vector<4x16xf32>
    %1694 = tpu.matmul %1682, %1676, %cst_643 {dimension_numbers = #tpu.dot_dimension_numbers<[1], [0], [0], [1], [0, 0, 1, 1], [], []>} : vector<4x16xf32>, vector<16x16xf32>, vector<4x16xf32> -> vector<4x16xf32>
    %cst_644 = arith.constant dense<0.000000e+00> : vector<4x16xf32>
    %1695 = tpu.matmul %1682, %1680, %cst_644 {dimension_numbers = #tpu.dot_dimension_numbers<[1], [0], [0], [1], [0, 0, 1, 1], [], []>} : vector<4x16xf32>, vector<16x16xf32>, vector<4x16xf32> -> vector<4x16xf32>
    %1696 = arith.negf %1694 : vector<4x16xf32>
    %1697 = math.exp %1696 : vector<4x16xf32>
    %cst_645 = arith.constant 1.000000e+00 : f32
    %1698 = vector.broadcast %cst_645 : f32 to vector<4x16xf32>
    %1699 = arith.addf %1698, %1697 : vector<4x16xf32>
    %1700 = arith.divf %1698, %1699 : vector<4x16xf32>
    %1701 = arith.mulf %1694, %1700 : vector<4x16xf32>
    %1702 = arith.mulf %1701, %1695 : vector<4x16xf32>
    "tpu.trace_start"() <{level = 10 : i32, message = "cd,ed->ce"}> : () -> ()
    %cst_646 = arith.constant dense<0.000000e+00> : vector<4x16xf32>
    %1703 = tpu.matmul %1683, %1678, %cst_646 {dimension_numbers = #tpu.dot_dimension_numbers<[1], [1], [0], [0], [0, 0, 1, 0], [], []>} : vector<4x16xf32>, vector<16x16xf32>, vector<4x16xf32> -> vector<4x16xf32>
    "tpu.trace_stop"() : () -> ()
    %1704 = arith.mulf %1703, %1695 : vector<4x16xf32>
    %cst_647 = arith.constant 1.000000e+00 : f32
    %1705 = vector.broadcast %cst_647 : f32 to vector<4x16xf32>
    %1706 = arith.subf %1705, %1700 : vector<4x16xf32>
    %1707 = arith.mulf %1701, %1706 : vector<4x16xf32>
    %1708 = arith.addf %1700, %1707 : vector<4x16xf32>
    %1709 = arith.mulf %1704, %1708 : vector<4x16xf32>
    %1710 = arith.mulf %1703, %1701 : vector<4x16xf32>
    %1711 = tpu.transpose %1682, [1, 0] : vector<4x16xf32> -> vector<16x4xf32>
    %1712 = tpu.transpose %1702, [1, 0] : vector<4x16xf32> -> vector<16x4xf32>
    %cst_648 = arith.constant dense<0.000000e+00> : vector<16x16xf32>
    %1713 = tpu.matmul %1712, %1683, %cst_648 {dimension_numbers = #tpu.dot_dimension_numbers<[1], [0], [0], [1], [0, 0, 1, 1], [], []>} : vector<16x4xf32>, vector<4x16xf32>, vector<16x16xf32> -> vector<16x16xf32>
    %cst_649 = arith.constant dense<0.000000e+00> : vector<16x16xf32>
    %1714 = tpu.matmul %1711, %1709, %cst_649 {dimension_numbers = #tpu.dot_dimension_numbers<[1], [0], [0], [1], [0, 0, 1, 1], [], []>} : vector<16x4xf32>, vector<4x16xf32>, vector<16x16xf32> -> vector<16x16xf32>
    %cst_650 = arith.constant dense<0.000000e+00> : vector<16x16xf32>
    %1715 = tpu.matmul %1711, %1710, %cst_650 {dimension_numbers = #tpu.dot_dimension_numbers<[1], [0], [0], [1], [0, 0, 1, 1], [], []>} : vector<16x4xf32>, vector<4x16xf32>, vector<16x16xf32> -> vector<16x16xf32>
    %1716 = arith.addf %1676, %1714 : vector<16x16xf32>
    %1717 = arith.addf %1678, %1713 : vector<16x16xf32>
    %1718 = arith.addf %1680, %1715 : vector<16x16xf32>
    %1719 = vector.extract_strided_slice %1663 {offsets = [4, 0], sizes = [4, 16], strides = [1, 1]} : vector<8x16xf32> to vector<4x16xf32>
    %cst_651 = arith.constant dense<0.000000e+00> : vector<4x16xf32>
    %1720 = tpu.matmul %1719, %1716, %cst_651 {dimension_numbers = #tpu.dot_dimension_numbers<[1], [0], [0], [1], [0, 0, 1, 1], [], []>} : vector<4x16xf32>, vector<16x16xf32>, vector<4x16xf32> -> vector<4x16xf32>
    %cst_652 = arith.constant dense<0.000000e+00> : vector<4x16xf32>
    %1721 = tpu.matmul %1719, %1718, %cst_652 {dimension_numbers = #tpu.dot_dimension_numbers<[1], [0], [0], [1], [0, 0, 1, 1], [], []>} : vector<4x16xf32>, vector<16x16xf32>, vector<4x16xf32> -> vector<4x16xf32>
    %1722 = arith.negf %1720 : vector<4x16xf32>
    %1723 = math.exp %1722 : vector<4x16xf32>
    %cst_653 = arith.constant 1.000000e+00 : f32
    %1724 = vector.broadcast %cst_653 : f32 to vector<4x16xf32>
    %1725 = arith.addf %1724, %1723 : vector<4x16xf32>
    %1726 = arith.divf %1724, %1725 : vector<4x16xf32>
    %1727 = arith.mulf %1720, %1726 : vector<4x16xf32>
    %1728 = arith.mulf %1727, %1721 : vector<4x16xf32>
    %cst_654 = arith.constant dense<0.000000e+00> : vector<4x16xf32>
    %1729 = tpu.matmul %1728, %1717, %cst_654 {dimension_numbers = #tpu.dot_dimension_numbers<[1], [0], [0], [1], [0, 0, 1, 1], [], []>} : vector<4x16xf32>, vector<16x16xf32>, vector<4x16xf32> -> vector<4x16xf32>
    %1730 = tpu.concatenate %1693, %1729 in 0 : vector<4x16xf32>, vector<4x16xf32> -> vector<8x16xf32>
    %1731 = tpu.concatenate %1634, %1730 in 1 : vector<8x16xf32>, vector<8x16xf32> -> vector<8x32xf32>
    %1732 = arith.truncf %1731 : vector<8x32xf32> to vector<8x32xbf16>
    %cst_655 = arith.constant dense<0.000000e+00> : vector<8x32xf32>
    %1733 = tpu.matmul %1732, %1367, %cst_655 {dimension_numbers = #tpu.dot_dimension_numbers<[1], [0], [0], [1], [0, 0, 1, 1], [], []>} : vector<8x32xbf16>, vector<32x32xbf16>, vector<8x32xf32> -> vector<8x32xf32>
    %1734 = vector.broadcast %1369 : vector<1x32xf32> to vector<8x32xf32>
    %1735 = arith.addf %1733, %1734 : vector<8x32xf32>
    %1736 = arith.addf %1497, %1735 : vector<8x32xf32>
    %cst_656 = arith.constant dense<0.000000e+00> : vector<8xf32>
    %1737 = vector.multi_reduction <add>, %1736, %cst_656 [1] : vector<8x32xf32> to vector<8xf32>
    %1738 = vector.shape_cast %1737 : vector<8xf32> to vector<8x1xf32>
    %cst_657 = arith.constant 3.200000e+01 : f32
    %1739 = vector.broadcast %cst_657 : f32 to vector<8x1xf32>
    %1740 = arith.divf %1738, %1739 : vector<8x1xf32>
    %1741 = vector.broadcast %1740 : vector<8x1xf32> to vector<8x32xf32>
    %1742 = arith.subf %1736, %1741 : vector<8x32xf32>
    %1743 = vector.broadcast %1740 : vector<8x1xf32> to vector<8x32xf32>
    %1744 = arith.subf %1736, %1743 : vector<8x32xf32>
    %1745 = arith.mulf %1742, %1744 : vector<8x32xf32>
    %cst_658 = arith.constant dense<0.000000e+00> : vector<8xf32>
    %1746 = vector.multi_reduction <add>, %1745, %cst_658 [1] : vector<8x32xf32> to vector<8xf32>
    %1747 = vector.shape_cast %1746 : vector<8xf32> to vector<8x1xf32>
    %cst_659 = arith.constant 3.200000e+01 : f32
    %1748 = vector.broadcast %cst_659 : f32 to vector<8x1xf32>
    %1749 = arith.divf %1747, %1748 : vector<8x1xf32>
    %1750 = vector.broadcast %1740 : vector<8x1xf32> to vector<8x32xf32>
    %1751 = arith.subf %1736, %1750 : vector<8x32xf32>
    %cst_660 = arith.constant 9.99999974E-6 : f32
    %1752 = vector.broadcast %cst_660 : f32 to vector<8x1xf32>
    %1753 = arith.addf %1749, %1752 : vector<8x1xf32>
    %1754 = math.rsqrt %1753 : vector<8x1xf32>
    %1755 = vector.broadcast %1754 : vector<8x1xf32> to vector<8x32xf32>
    %1756 = arith.mulf %1751, %1755 : vector<8x32xf32>
    %1757 = vector.broadcast %1377 : vector<1x32xf32> to vector<8x32xf32>
    %1758 = arith.mulf %1756, %1757 : vector<8x32xf32>
    %1759 = vector.broadcast %1379 : vector<1x32xf32> to vector<8x32xf32>
    %1760 = arith.addf %1758, %1759 : vector<8x32xf32>
    %1761 = arith.truncf %1760 : vector<8x32xf32> to vector<8x32xbf16>
    %cst_661 = arith.constant dense<0.000000e+00> : vector<8x128xf32>
    %1762 = tpu.matmul %1761, %1381, %cst_661 {dimension_numbers = #tpu.dot_dimension_numbers<[1], [0], [0], [1], [0, 0, 1, 1], [], []>} : vector<8x32xbf16>, vector<32x128xbf16>, vector<8x128xf32> -> vector<8x128xf32>
    %1763 = vector.broadcast %1383 : vector<1x128xf32> to vector<8x128xf32>
    %1764 = arith.addf %1762, %1763 : vector<8x128xf32>
    %1765 = vector.extract_strided_slice %1764 {offsets = [0, 0], sizes = [8, 64], strides = [1, 1]} : vector<8x128xf32> to vector<8x64xf32>
    %1766 = arith.negf %1765 : vector<8x64xf32>
    %1767 = math.exp %1766 : vector<8x64xf32>
    %cst_662 = arith.constant 1.000000e+00 : f32
    %1768 = vector.broadcast %cst_662 : f32 to vector<8x64xf32>
    %1769 = arith.addf %1768, %1767 : vector<8x64xf32>
    %1770 = arith.divf %1768, %1769 : vector<8x64xf32>
    %1771 = arith.mulf %1765, %1770 : vector<8x64xf32>
    %1772 = vector.extract_strided_slice %1764 {offsets = [0, 64], sizes = [8, 64], strides = [1, 1]} : vector<8x128xf32> to vector<8x64xf32>
    %1773 = arith.mulf %1771, %1772 : vector<8x64xf32>
    %1774 = arith.truncf %1773 : vector<8x64xf32> to vector<8x64xbf16>
    %cst_663 = arith.constant dense<0.000000e+00> : vector<8x32xf32>
    %1775 = tpu.matmul %1774, %1385, %cst_663 {dimension_numbers = #tpu.dot_dimension_numbers<[1], [0], [0], [1], [0, 0, 1, 1], [], []>} : vector<8x64xbf16>, vector<64x32xbf16>, vector<8x32xf32> -> vector<8x32xf32>
    %1776 = vector.broadcast %1387 : vector<1x32xf32> to vector<8x32xf32>
    %1777 = arith.addf %1775, %1776 : vector<8x32xf32>
    %1778 = arith.addf %1736, %1777 : vector<8x32xf32>
    %c0_664 = arith.constant 0 : index
    %c0_665 = arith.constant 0 : index
    %1779 = vector.load %arg47[%c0_664, %c0_665] : memref<1x32xf32, #tpu.memory_space<vmem>>, vector<1x32xf32>
    %c0_666 = arith.constant 0 : index
    %c0_667 = arith.constant 0 : index
    %1780 = vector.load %arg48[%c0_666, %c0_667] : memref<1x32xf32, #tpu.memory_space<vmem>>, vector<1x32xf32>
    %cst_668 = arith.constant dense<0.000000e+00> : vector<8xf32>
    %1781 = vector.multi_reduction <add>, %1778, %cst_668 [1] : vector<8x32xf32> to vector<8xf32>
    %1782 = vector.shape_cast %1781 : vector<8xf32> to vector<8x1xf32>
    %cst_669 = arith.constant 3.200000e+01 : f32
    %1783 = vector.broadcast %cst_669 : f32 to vector<8x1xf32>
    %1784 = arith.divf %1782, %1783 : vector<8x1xf32>
    %1785 = vector.broadcast %1784 : vector<8x1xf32> to vector<8x32xf32>
    %1786 = arith.subf %1778, %1785 : vector<8x32xf32>
    %1787 = vector.broadcast %1784 : vector<8x1xf32> to vector<8x32xf32>
    %1788 = arith.subf %1778, %1787 : vector<8x32xf32>
    %1789 = arith.mulf %1786, %1788 : vector<8x32xf32>
    %cst_670 = arith.constant dense<0.000000e+00> : vector<8xf32>
    %1790 = vector.multi_reduction <add>, %1789, %cst_670 [1] : vector<8x32xf32> to vector<8xf32>
    %1791 = vector.shape_cast %1790 : vector<8xf32> to vector<8x1xf32>
    %cst_671 = arith.constant 3.200000e+01 : f32
    %1792 = vector.broadcast %cst_671 : f32 to vector<8x1xf32>
    %1793 = arith.divf %1791, %1792 : vector<8x1xf32>
    %1794 = vector.broadcast %1784 : vector<8x1xf32> to vector<8x32xf32>
    %1795 = arith.subf %1778, %1794 : vector<8x32xf32>
    %cst_672 = arith.constant 9.99999974E-6 : f32
    %1796 = vector.broadcast %cst_672 : f32 to vector<8x1xf32>
    %1797 = arith.addf %1793, %1796 : vector<8x1xf32>
    %1798 = math.rsqrt %1797 : vector<8x1xf32>
    %1799 = vector.broadcast %1798 : vector<8x1xf32> to vector<8x32xf32>
    %1800 = arith.mulf %1795, %1799 : vector<8x32xf32>
    %1801 = vector.broadcast %1779 : vector<1x32xf32> to vector<8x32xf32>
    %1802 = arith.mulf %1800, %1801 : vector<8x32xf32>
    %1803 = vector.broadcast %1780 : vector<1x32xf32> to vector<8x32xf32>
    %1804 = arith.addf %1802, %1803 : vector<8x32xf32>
    %c0_673 = arith.constant 0 : index
    %c0_674 = arith.constant 0 : index
    %1805 = vector.load %arg49[%c0_673, %c0_674] : memref<32x64xbf16, #tpu.memory_space<vmem>>, vector<32x64xbf16>
    %c0_675 = arith.constant 0 : index
    %c0_676 = arith.constant 0 : index
    %1806 = vector.load %arg50[%c0_675, %c0_676] : memref<1x64xf32, #tpu.memory_space<vmem>>, vector<1x64xf32>
    %1807 = arith.truncf %1804 : vector<8x32xf32> to vector<8x32xbf16>
    %cst_677 = arith.constant dense<0.000000e+00> : vector<8x64xf32>
    %1808 = tpu.matmul %1807, %1805, %cst_677 {dimension_numbers = #tpu.dot_dimension_numbers<[1], [0], [0], [1], [0, 0, 1, 1], [], []>} : vector<8x32xbf16>, vector<32x64xbf16>, vector<8x64xf32> -> vector<8x64xf32>
    %1809 = vector.broadcast %1806 : vector<1x64xf32> to vector<8x64xf32>
    %1810 = arith.addf %1808, %1809 : vector<8x64xf32>
    %c0_678 = arith.constant 0 : index
    %c0_679 = arith.constant 0 : index
    %c0_680 = arith.constant 0 : index
    %1811 = vector.load %arg52[%c0_678, %c0_679, %c0_680] : memref<1x8x64xf32, #tpu.memory_space<vmem>>, vector<1x8x64xf32>
    %1812 = vector.shape_cast %1811 : vector<1x8x64xf32> to vector<8x64xf32>
    %1813 = vector.shape_cast %1810 : vector<8x64xf32> to vector<1x8x64xf32>
    tpu.vector_store %arg52[%c0_678, %c0_679, %c0_680], %1813 {strides = array<i32>} : memref<1x8x64xf32, #tpu.memory_space<vmem>>, vector<1x8x64xf32>,
    return
  }
  func.func @transform_0(%arg0: i32) -> (i32, i32, i32) {
    %c0_i32 = arith.constant 0 : i32
    %c0_i32_0 = arith.constant 0 : i32
    %c0_i32_1 = arith.constant 0 : i32
    return %arg0, %c0_i32, %c0_i32_0 : i32, i32, i32
  }
  func.func @transform_1(%arg0: i32) -> (i32, i32, i32) {
    %c0_i32 = arith.constant 0 : i32
    %c0_i32_0 = arith.constant 0 : i32
    %c0_i32_1 = arith.constant 0 : i32
    return %arg0, %c0_i32, %c0_i32_0 : i32, i32, i32
  }
  func.func @transform_2(%arg0: i32) -> (i32, i32, i32) {
    %c0_i32 = arith.constant 0 : i32
    %c0_i32_0 = arith.constant 0 : i32
    %c0_i32_1 = arith.constant 0 : i32
    %c0_i32_2 = arith.constant 0 : i32
    return %c0_i32, %c0_i32_0, %c0_i32_1 : i32, i32, i32
  }
  func.func @transform_3(%arg0: i32) -> (i32, i32, i32) {
    %c0_i32 = arith.constant 0 : i32
    %c0_i32_0 = arith.constant 0 : i32
    %c0_i32_1 = arith.constant 0 : i32
    %c0_i32_2 = arith.constant 0 : i32
    return %c0_i32, %c0_i32_0, %c0_i32_1 : i32, i32, i32
  }
  func.func @transform_4(%arg0: i32) -> (i32, i32, i32) {
    %c0_i32 = arith.constant 0 : i32
    %c0_i32_0 = arith.constant 0 : i32
    %c0_i32_1 = arith.constant 0 : i32
    %c0_i32_2 = arith.constant 0 : i32
    return %c0_i32, %c0_i32_0, %c0_i32_1 : i32, i32, i32
  }
  func.func @transform_5(%arg0: i32) -> (i32, i32, i32) {
    %c0_i32 = arith.constant 0 : i32
    %c0_i32_0 = arith.constant 0 : i32
    %c0_i32_1 = arith.constant 0 : i32
    %c0_i32_2 = arith.constant 0 : i32
    return %c0_i32, %c0_i32_0, %c0_i32_1 : i32, i32, i32
  }
  func.func @transform_6(%arg0: i32) -> (i32, i32, i32) {
    %c0_i32 = arith.constant 0 : i32
    %c0_i32_0 = arith.constant 0 : i32
    %c0_i32_1 = arith.constant 0 : i32
    %c0_i32_2 = arith.constant 0 : i32
    return %c0_i32, %c0_i32_0, %c0_i32_1 : i32, i32, i32
  }
  func.func @transform_7(%arg0: i32) -> (i32, i32, i32) {
    %c0_i32 = arith.constant 0 : i32
    %c0_i32_0 = arith.constant 0 : i32
    %c0_i32_1 = arith.constant 0 : i32
    %c0_i32_2 = arith.constant 0 : i32
    return %c0_i32, %c0_i32_0, %c0_i32_1 : i32, i32, i32
  }
  func.func @transform_8(%arg0: i32) -> (i32, i32, i32) {
    %c0_i32 = arith.constant 0 : i32
    %c0_i32_0 = arith.constant 0 : i32
    %c0_i32_1 = arith.constant 0 : i32
    %c0_i32_2 = arith.constant 0 : i32
    return %c0_i32, %c0_i32_0, %c0_i32_1 : i32, i32, i32
  }
  func.func @transform_9(%arg0: i32) -> (i32, i32, i32) {
    %c0_i32 = arith.constant 0 : i32
    %c0_i32_0 = arith.constant 0 : i32
    %c0_i32_1 = arith.constant 0 : i32
    %c0_i32_2 = arith.constant 0 : i32
    return %c0_i32, %c0_i32_0, %c0_i32_1 : i32, i32, i32
  }
  func.func @transform_10(%arg0: i32) -> (i32, i32, i32) {
    %c0_i32 = arith.constant 0 : i32
    %c0_i32_0 = arith.constant 0 : i32
    %c0_i32_1 = arith.constant 0 : i32
    %c0_i32_2 = arith.constant 0 : i32
    return %c0_i32, %c0_i32_0, %c0_i32_1 : i32, i32, i32
  }
  func.func @transform_11(%arg0: i32) -> (i32, i32, i32) {
    %c0_i32 = arith.constant 0 : i32
    %c0_i32_0 = arith.constant 0 : i32
    %c0_i32_1 = arith.constant 0 : i32
    %c0_i32_2 = arith.constant 0 : i32
    return %c0_i32, %c0_i32_0, %c0_i32_1 : i32, i32, i32
  }
  func.func @transform_12(%arg0: i32) -> (i32, i32, i32) {
    %c0_i32 = arith.constant 0 : i32
    %c0_i32_0 = arith.constant 0 : i32
    %c0_i32_1 = arith.constant 0 : i32
    %c0_i32_2 = arith.constant 0 : i32
    return %c0_i32, %c0_i32_0, %c0_i32_1 : i32, i32, i32
  }
  func.func @transform_13(%arg0: i32) -> (i32, i32, i32) {
    %c0_i32 = arith.constant 0 : i32
    %c0_i32_0 = arith.constant 0 : i32
    %c0_i32_1 = arith.constant 0 : i32
    %c0_i32_2 = arith.constant 0 : i32
    return %c0_i32, %c0_i32_0, %c0_i32_1 : i32, i32, i32
  }
  func.func @transform_14(%arg0: i32) -> (i32, i32, i32, i32) {
    %c0_i32 = arith.constant 0 : i32
    %c0_i32_0 = arith.constant 0 : i32
    %c0_i32_1 = arith.constant 0 : i32
    %c0_i32_2 = arith.constant 0 : i32
    %c0_i32_3 = arith.constant 0 : i32
    return %c0_i32, %c0_i32_0, %c0_i32_1, %c0_i32_2 : i32, i32, i32, i32
  }
  func.func @transform_15(%arg0: i32) -> (i32, i32, i32, i32) {
    %c0_i32 = arith.constant 0 : i32
    %c0_i32_0 = arith.constant 0 : i32
    %c0_i32_1 = arith.constant 0 : i32
    %c0_i32_2 = arith.constant 0 : i32
    %c0_i32_3 = arith.constant 0 : i32
    return %c0_i32, %c0_i32_0, %c0_i32_1, %c0_i32_2 : i32, i32, i32, i32
  }
  func.func @transform_16(%arg0: i32) -> (i32, i32, i32, i32) {
    %c0_i32 = arith.constant 0 : i32
    %c0_i32_0 = arith.constant 0 : i32
    %c0_i32_1 = arith.constant 0 : i32
    %c0_i32_2 = arith.constant 0 : i32
    %c0_i32_3 = arith.constant 0 : i32
    return %c0_i32, %c0_i32_0, %c0_i32_1, %c0_i32_2 : i32, i32, i32, i32
  }
  func.func @transform_17(%arg0: i32) -> (i32, i32, i32) {
    %c0_i32 = arith.constant 0 : i32
    %c0_i32_0 = arith.constant 0 : i32
    %c0_i32_1 = arith.constant 0 : i32
    %c0_i32_2 = arith.constant 0 : i32
    return %c0_i32, %c0_i32_0, %c0_i32_1 : i32, i32, i32
  }
  func.func @transform_18(%arg0: i32) -> (i32, i32, i32) {
    %c0_i32 = arith.constant 0 : i32
    %c0_i32_0 = arith.constant 0 : i32
    %c0_i32_1 = arith.constant 0 : i32
    %c0_i32_2 = arith.constant 0 : i32
    return %c0_i32, %c0_i32_0, %c0_i32_1 : i32, i32, i32
  }
  func.func @transform_19(%arg0: i32) -> (i32, i32, i32) {
    %c0_i32 = arith.constant 0 : i32
    %c0_i32_0 = arith.constant 0 : i32
    %c0_i32_1 = arith.constant 0 : i32
    %c0_i32_2 = arith.constant 0 : i32
    return %c0_i32, %c0_i32_0, %c0_i32_1 : i32, i32, i32
  }
  func.func @transform_20(%arg0: i32) -> (i32, i32, i32) {
    %c0_i32 = arith.constant 0 : i32
    %c0_i32_0 = arith.constant 0 : i32
    %c0_i32_1 = arith.constant 0 : i32
    %c0_i32_2 = arith.constant 0 : i32
    return %c0_i32, %c0_i32_0, %c0_i32_1 : i32, i32, i32
  }
  func.func @transform_21(%arg0: i32) -> (i32, i32, i32) {
    %c0_i32 = arith.constant 0 : i32
    %c0_i32_0 = arith.constant 0 : i32
    %c0_i32_1 = arith.constant 0 : i32
    %c0_i32_2 = arith.constant 0 : i32
    return %c0_i32, %c0_i32_0, %c0_i32_1 : i32, i32, i32
  }
  func.func @transform_22(%arg0: i32) -> (i32, i32, i32) {
    %c0_i32 = arith.constant 0 : i32
    %c0_i32_0 = arith.constant 0 : i32
    %c0_i32_1 = arith.constant 0 : i32
    %c0_i32_2 = arith.constant 0 : i32
    return %c0_i32, %c0_i32_0, %c0_i32_1 : i32, i32, i32
  }
  func.func @transform_23(%arg0: i32) -> (i32, i32) {
    %c0_i32 = arith.constant 0 : i32
    %c0_i32_0 = arith.constant 0 : i32
    %c0_i32_1 = arith.constant 0 : i32
    return %c0_i32, %c0_i32_0 : i32, i32
  }
  func.func @transform_24(%arg0: i32) -> (i32, i32) {
    %c0_i32 = arith.constant 0 : i32
    %c0_i32_0 = arith.constant 0 : i32
    %c0_i32_1 = arith.constant 0 : i32
    return %c0_i32, %c0_i32_0 : i32, i32
  }
  func.func @transform_25(%arg0: i32) -> (i32, i32, i32) {
    %c0_i32 = arith.constant 0 : i32
    %c0_i32_0 = arith.constant 0 : i32
    %c0_i32_1 = arith.constant 0 : i32
    %c0_i32_2 = arith.constant 0 : i32
    return %c0_i32, %c0_i32_0, %c0_i32_1 : i32, i32, i32
  }
  func.func @transform_26(%arg0: i32) -> (i32, i32, i32) {
    %c0_i32 = arith.constant 0 : i32
    %c0_i32_0 = arith.constant 0 : i32
    %c0_i32_1 = arith.constant 0 : i32
    %c0_i32_2 = arith.constant 0 : i32
    return %c0_i32, %c0_i32_0, %c0_i32_1 : i32, i32, i32
  }
  func.func @transform_27(%arg0: i32) -> (i32, i32, i32) {
    %c0_i32 = arith.constant 0 : i32
    %c0_i32_0 = arith.constant 0 : i32
    %c0_i32_1 = arith.constant 0 : i32
    %c0_i32_2 = arith.constant 0 : i32
    return %c0_i32, %c0_i32_0, %c0_i32_1 : i32, i32, i32
  }
  func.func @transform_28(%arg0: i32) -> (i32, i32, i32) {
    %c0_i32 = arith.constant 0 : i32
    %c0_i32_0 = arith.constant 0 : i32
    %c0_i32_1 = arith.constant 0 : i32
    %c0_i32_2 = arith.constant 0 : i32
    return %c0_i32, %c0_i32_0, %c0_i32_1 : i32, i32, i32
  }
  func.func @transform_29(%arg0: i32) -> (i32, i32, i32) {
    %c0_i32 = arith.constant 0 : i32
    %c0_i32_0 = arith.constant 0 : i32
    %c0_i32_1 = arith.constant 0 : i32
    %c0_i32_2 = arith.constant 0 : i32
    return %c0_i32, %c0_i32_0, %c0_i32_1 : i32, i32, i32
  }
  func.func @transform_30(%arg0: i32) -> (i32, i32, i32) {
    %c0_i32 = arith.constant 0 : i32
    %c0_i32_0 = arith.constant 0 : i32
    %c0_i32_1 = arith.constant 0 : i32
    %c0_i32_2 = arith.constant 0 : i32
    return %c0_i32, %c0_i32_0, %c0_i32_1 : i32, i32, i32
  }
  func.func @transform_31(%arg0: i32) -> (i32, i32, i32) {
    %c0_i32 = arith.constant 0 : i32
    %c0_i32_0 = arith.constant 0 : i32
    %c0_i32_1 = arith.constant 0 : i32
    %c0_i32_2 = arith.constant 0 : i32
    return %c0_i32, %c0_i32_0, %c0_i32_1 : i32, i32, i32
  }
  func.func @transform_32(%arg0: i32) -> (i32, i32, i32) {
    %c0_i32 = arith.constant 0 : i32
    %c0_i32_0 = arith.constant 0 : i32
    %c0_i32_1 = arith.constant 0 : i32
    %c0_i32_2 = arith.constant 0 : i32
    return %c0_i32, %c0_i32_0, %c0_i32_1 : i32, i32, i32
  }
  func.func @transform_33(%arg0: i32) -> (i32, i32, i32) {
    %c0_i32 = arith.constant 0 : i32
    %c0_i32_0 = arith.constant 0 : i32
    %c0_i32_1 = arith.constant 0 : i32
    %c0_i32_2 = arith.constant 0 : i32
    return %c0_i32, %c0_i32_0, %c0_i32_1 : i32, i32, i32
  }
  func.func @transform_34(%arg0: i32) -> (i32, i32, i32) {
    %c0_i32 = arith.constant 0 : i32
    %c0_i32_0 = arith.constant 0 : i32
    %c0_i32_1 = arith.constant 0 : i32
    %c0_i32_2 = arith.constant 0 : i32
    return %c0_i32, %c0_i32_0, %c0_i32_1 : i32, i32, i32
  }
  func.func @transform_35(%arg0: i32) -> (i32, i32, i32) {
    %c0_i32 = arith.constant 0 : i32
    %c0_i32_0 = arith.constant 0 : i32
    %c0_i32_1 = arith.constant 0 : i32
    %c0_i32_2 = arith.constant 0 : i32
    return %c0_i32, %c0_i32_0, %c0_i32_1 : i32, i32, i32
  }
  func.func @transform_36(%arg0: i32) -> (i32, i32, i32) {
    %c0_i32 = arith.constant 0 : i32
    %c0_i32_0 = arith.constant 0 : i32
    %c0_i32_1 = arith.constant 0 : i32
    %c0_i32_2 = arith.constant 0 : i32
    return %c0_i32, %c0_i32_0, %c0_i32_1 : i32, i32, i32
  }
  func.func @transform_37(%arg0: i32) -> (i32, i32, i32, i32) {
    %c0_i32 = arith.constant 0 : i32
    %c0_i32_0 = arith.constant 0 : i32
    %c0_i32_1 = arith.constant 0 : i32
    %c0_i32_2 = arith.constant 0 : i32
    %c0_i32_3 = arith.constant 0 : i32
    return %c0_i32, %c0_i32_0, %c0_i32_1, %c0_i32_2 : i32, i32, i32, i32
  }
  func.func @transform_38(%arg0: i32) -> (i32, i32, i32, i32) {
    %c0_i32 = arith.constant 0 : i32
    %c0_i32_0 = arith.constant 0 : i32
    %c0_i32_1 = arith.constant 0 : i32
    %c0_i32_2 = arith.constant 0 : i32
    %c0_i32_3 = arith.constant 0 : i32
    return %c0_i32, %c0_i32_0, %c0_i32_1, %c0_i32_2 : i32, i32, i32, i32
  }
  func.func @transform_39(%arg0: i32) -> (i32, i32, i32, i32) {
    %c0_i32 = arith.constant 0 : i32
    %c0_i32_0 = arith.constant 0 : i32
    %c0_i32_1 = arith.constant 0 : i32
    %c0_i32_2 = arith.constant 0 : i32
    %c0_i32_3 = arith.constant 0 : i32
    return %c0_i32, %c0_i32_0, %c0_i32_1, %c0_i32_2 : i32, i32, i32, i32
  }
  func.func @transform_40(%arg0: i32) -> (i32, i32, i32) {
    %c0_i32 = arith.constant 0 : i32
    %c0_i32_0 = arith.constant 0 : i32
    %c0_i32_1 = arith.constant 0 : i32
    %c0_i32_2 = arith.constant 0 : i32
    return %c0_i32, %c0_i32_0, %c0_i32_1 : i32, i32, i32
  }
  func.func @transform_41(%arg0: i32) -> (i32, i32, i32) {
    %c0_i32 = arith.constant 0 : i32
    %c0_i32_0 = arith.constant 0 : i32
    %c0_i32_1 = arith.constant 0 : i32
    %c0_i32_2 = arith.constant 0 : i32
    return %c0_i32, %c0_i32_0, %c0_i32_1 : i32, i32, i32
  }
  func.func @transform_42(%arg0: i32) -> (i32, i32, i32) {
    %c0_i32 = arith.constant 0 : i32
    %c0_i32_0 = arith.constant 0 : i32
    %c0_i32_1 = arith.constant 0 : i32
    %c0_i32_2 = arith.constant 0 : i32
    return %c0_i32, %c0_i32_0, %c0_i32_1 : i32, i32, i32
  }
  func.func @transform_43(%arg0: i32) -> (i32, i32, i32) {
    %c0_i32 = arith.constant 0 : i32
    %c0_i32_0 = arith.constant 0 : i32
    %c0_i32_1 = arith.constant 0 : i32
    %c0_i32_2 = arith.constant 0 : i32
    return %c0_i32, %c0_i32_0, %c0_i32_1 : i32, i32, i32
  }
  func.func @transform_44(%arg0: i32) -> (i32, i32, i32) {
    %c0_i32 = arith.constant 0 : i32
    %c0_i32_0 = arith.constant 0 : i32
    %c0_i32_1 = arith.constant 0 : i32
    %c0_i32_2 = arith.constant 0 : i32
    return %c0_i32, %c0_i32_0, %c0_i32_1 : i32, i32, i32
  }
  func.func @transform_45(%arg0: i32) -> (i32, i32, i32) {
    %c0_i32 = arith.constant 0 : i32
    %c0_i32_0 = arith.constant 0 : i32
    %c0_i32_1 = arith.constant 0 : i32
    %c0_i32_2 = arith.constant 0 : i32
    return %c0_i32, %c0_i32_0, %c0_i32_1 : i32, i32, i32
  }
  func.func @transform_46(%arg0: i32) -> (i32, i32) {
    %c0_i32 = arith.constant 0 : i32
    %c0_i32_0 = arith.constant 0 : i32
    %c0_i32_1 = arith.constant 0 : i32
    return %c0_i32, %c0_i32_0 : i32, i32
  }
  func.func @transform_47(%arg0: i32) -> (i32, i32) {
    %c0_i32 = arith.constant 0 : i32
    %c0_i32_0 = arith.constant 0 : i32
    %c0_i32_1 = arith.constant 0 : i32
    return %c0_i32, %c0_i32_0 : i32, i32
  }
  func.func @transform_48(%arg0: i32) -> (i32, i32) {
    %c0_i32 = arith.constant 0 : i32
    %c0_i32_0 = arith.constant 0 : i32
    %c0_i32_1 = arith.constant 0 : i32
    return %c0_i32, %c0_i32_0 : i32, i32
  }
  func.func @transform_49(%arg0: i32) -> (i32, i32) {
    %c0_i32 = arith.constant 0 : i32
    %c0_i32_0 = arith.constant 0 : i32
    %c0_i32_1 = arith.constant 0 : i32
    return %c0_i32, %c0_i32_0 : i32, i32
  }
  func.func @transform_50(%arg0: i32) -> (i32, i32, i32) {
    %c0_i32 = arith.constant 0 : i32
    %c0_i32_0 = arith.constant 0 : i32
    %c0_i32_1 = arith.constant 0 : i32
    return %arg0, %c0_i32, %c0_i32_0 : i32, i32, i32
  }
  func.func @transform_51(%arg0: i32) -> (i32, i32, i32) {
    %c0_i32 = arith.constant 0 : i32
    %c0_i32_0 = arith.constant 0 : i32
    %c0_i32_1 = arith.constant 0 : i32
    return %arg0, %c0_i32, %c0_i32_0 : i32, i32, i32
  }
}

</mosaic_0001>

<bundles_post_ra>
// kernel: lact_asr_model.1
= control target key start
LH: loop header
LB: loop body
LE: loop exit
PB: predicated region body
PF: predicated region fallthrough
CT: control target
= control target key end

     0   :  { %s19632_s6 = smov 1   ;;  %s19633_s10 = smov 2   ;;  %s22087_s0 = inlined_call_operand.smem [shape: u32[52], index: -1, kind: input, shape index: {}] }
   0x1   :  { %s19744_s5 = sld [smem:[%s22087_s0]]   ;;  %s19634_s14 = smov 3  }
   0x2   :  { %s19749_s9 = sld [smem:[%s22087_s0 + %s19632_s6]]   ;;  %s19635_s18 = smov 4  }
   0x3   :  { %s19754_s13 = sld [smem:[%s22087_s0 + %s19633_s10]]   ;;  %s19636_s22 = smov 5  }
   0x4   :  { %s19759_s17 = sld [smem:[%s22087_s0 + %s19634_s14]]   ;;  %s19637_s26 = smov 6  }
   0x5   :  { %s19764_s21 = sld [smem:[%s22087_s0 + %s19635_s18]]   ;;  %s19638_s30 = smov 7  }
   0x6   :  { %s19769_s25 = sld [smem:[%s22087_s0 + %s19636_s22]]   ;;  %s19639_s4 = smov 8  }
   0x7   :  { %22200 = sst [smem:[#allocation66_spill]] %s19744_s5  ;;  %s19640_s10 = smov 9  }
   0x8   :  { %22201 = sst [smem:[#allocation67_spill]] %s19749_s9  ;;  %s19641_s15 = smov 10  }
   0x9   :  { %22202 = sst [smem:[#allocation68_spill]] %s19754_s13  ;;  %s19642_s20 = smov 11  }
   0xa   :  { %22203 = sst [smem:[#allocation69_spill]] %s19759_s17  ;;  %s19644_s1 = smov 13  }
   0xb   :  { %22204 = sst [smem:[#allocation70_spill]] %s19764_s21  ;;  %s19645_s7 = smov 14  }
   0xc   :  { %22205 = sst [smem:[#allocation71_spill]] %s19769_s25  ;;  %s19647_s22 = smov 16  }
   0xd   :  { %s19774_s29 = sld [smem:[%s22087_s0 + %s19637_s26]]   ;;  %s19643_s26 = smov 12  }
   0xe   :  { %s19779_s3 = sld [smem:[%s22087_s0 + %s19638_s30]]   ;;  %s19648_s28 = smov 17  }
   0xf   :  { %s19784_s8 = sld [smem:[%s22087_s0 + %s19639_s4]]  }
  0x10   :  { %s19789_s14 = sld [smem:[%s22087_s0 + %s19640_s10]]  }
  0x11   :  { %s19794_s19 = sld [smem:[%s22087_s0 + %s19641_s15]]   ;;  %s19646_s15 = smov 15  }
  0x12   :  { %s19799_s24 = sld [smem:[%s22087_s0 + %s19642_s20]]  }
  0x13   :  { %22206 = sst [smem:[#allocation72_spill]] %s19774_s29 }
  0x14   :  { %22207 = sst [smem:[#allocation73_spill]] %s19779_s3 }
  0x15   :  { %22208 = sst [smem:[#allocation74_spill]] %s19784_s8 }
  0x16   :  { %22209 = sst [smem:[#allocation75_spill]] %s19789_s14 }
  0x17   :  { %22210 = sst [smem:[#allocation76_spill]] %s19794_s19 }
  0x18   :  { %22211 = sst [smem:[#allocation77_spill]] %s19799_s24 }
  0x19   :  { %s19804_s30 = sld [smem:[%s22087_s0 + %s19643_s26]]  }
  0x1a   :  { %s19809_s6 = sld [smem:[%s22087_s0 + %s19644_s1]]  }
  0x1b   :  { %s19814_s12 = sld [smem:[%s22087_s0 + %s19645_s7]]   ;;  %s19649_s7 = smov 18  }
  0x1c   :  { %s19819_s20 = sld [smem:[%s22087_s0 + %s19646_s15]]   ;;  %s19650_s15 = smov 19  }
  0x1d   :  { %s19824_s27 = sld [smem:[%s22087_s0 + %s19647_s22]]   ;;  %s19651_s22 = smov 20  }
  0x1e   :  { %s19829_s4 = sld [smem:[%s22087_s0 + %s19648_s28]]   ;;  %s19652_s28 = smov 21  }
  0x1f   :  { %22212 = sst [smem:[#allocation78_spill]] %s19804_s30 }
  0x20   :  { %22213 = sst [smem:[#allocation79_spill]] %s19809_s6 }
  0x21   :  { %22214 = sst [smem:[#allocation80_spill]] %s19814_s12 }
  0x22   :  { %22215 = sst [smem:[#allocation81_spill]] %s19819_s20 }
  0x23   :  { %22216 = sst [smem:[#allocation82_spill]] %s19824_s27 }
  0x24   :  { %22217 = sst [smem:[#allocation83_spill]] %s19829_s4 }
  0x25   :  { %s19834_s9 = sld [smem:[%s22087_s0 + %s19649_s7]]   ;;  %s19653_s7 = smov 22  }
  0x26   :  { %s19839_s30 = sld [smem:[%s22087_s0 + %s19650_s15]]   ;;  %s19654_s15 = smov 23  }
  0x27   :  { %s19844_s20 = sld [smem:[%s22087_s0 + %s19651_s22]]   ;;  %s19655_s22 = smov 24  }
  0x28   :  { %s19849_s4 = sld [smem:[%s22087_s0 + %s19652_s28]]   ;;  %s19656_s28 = smov 25  }
  0x29   :  { %s19859_s27 = sld [smem:[%s22087_s0 + %s19654_s15]]   ;;  %s19658_s15 = smov 27  }
  0x2b   :  { %22218 = sst [smem:[#allocation84_spill]] %s19834_s9 }
  0x2c   :  { %22219 = sst [smem:[#allocation85_spill]] %s19839_s30 }
  0x2d   :  { %22220 = sst [smem:[#allocation86_spill]] %s19844_s20 }
  0x2e   :  { %22221 = sst [smem:[#allocation87_spill]] %s19849_s4 }
  0x2f   :  { %s19854_s9 = sld [smem:[%s22087_s0 + %s19653_s7]]   ;;  %s19657_s7 = smov 26  }
  0x30   :  { %22223 = sst [smem:[#allocation89_spill]] %s19859_s27 }
  0x31   :  { %s19864_s20 = sld [smem:[%s22087_s0 + %s19655_s22]]   ;;  %s19659_s22 = smov 28  }
  0x32   :  { %s19869_s4 = sld [smem:[%s22087_s0 + %s19656_s28]]   ;;  %s19660_s28 = smov 29  }
  0x33   :  { %s19879_s27 = sld [smem:[%s22087_s0 + %s19658_s15]]   ;;  %s19662_s15 = smov 31  }
  0x34   :  { %s19884_s12 = sld [smem:[%s22087_s0 + %s19659_s22]]   ;;  %s19663_s22 = smov 32  }
  0x35   :  { %22222 = sst [smem:[#allocation88_spill]] %s19854_s9 }
  0x36   :  { %s19874_s9 = sld [smem:[%s22087_s0 + %s19657_s7]]   ;;  %s19661_s7 = smov 30  }
  0x37   :  { %22224 = sst [smem:[#allocation90_spill]] %s19864_s20 }
  0x38   :  { %22225 = sst [smem:[#allocation91_spill]] %s19869_s4 }
  0x39   :  { %22227 = sst [smem:[#allocation93_spill]] %s19879_s27 }
  0x3a   :  { %22228 = sst [smem:[#allocation94_spill]] %s19884_s12 }
  0x3b   :  { %s19889_s29 = sld [smem:[%s22087_s0 + %s19660_s28]]   ;;  %s19664_s28 = smov 33  }
  0x3c   :  { %22226 = sst [smem:[#allocation92_spill]] %s19874_s9 }
  0x3d   :  { %s19894_s17 = sld [smem:[%s22087_s0 + %s19661_s7]]   ;;  %s19665_s7 = smov 34  }
  0x3e   :  { %s19899_s13 = sld [smem:[%s22087_s0 + %s19662_s15]]   ;;  %s19666_s15 = smov 35  }
  0x3f   :  { %s19904_s21 = sld [smem:[%s22087_s0 + %s19663_s22]]   ;;  %s19667_s22 = smov 36  }
  0x40   :  { %s19909_s5 = sld [smem:[%s22087_s0 + %s19664_s28]]   ;;  %s19668_s28 = smov 37  }
  0x41   :  { %22229 = sst [smem:[#allocation95_spill]] %s19889_s29 }
  0x42   :  { %s19919_s12 = sld [smem:[%s22087_s0 + %s19666_s15]]   ;;  %s19670_s15 = smov 39  }
  0x43   :  { %22230 = sst [smem:[#allocation96_spill]] %s19894_s17 }
  0x44   :  { %22231 = sst [smem:[#allocation97_spill]] %s19899_s13 }
  0x45   :  { %22232 = sst [smem:[#allocation98_spill]] %s19904_s21 }
  0x46   :  { %22233 = sst [smem:[#allocation99_spill]] %s19909_s5 }
  0x47   :  { %s19914_s17 = sld [smem:[%s22087_s0 + %s19665_s7]]   ;;  %s19669_s7 = smov 38  }
  0x48   :  { %22235 = sst [smem:[#allocation101_spill]] %s19919_s12 }
  0x49   :  { %s19924_s21 = sld [smem:[%s22087_s0 + %s19667_s22]]   ;;  %s19671_s22 = smov 40  }
  0x4a   :  { %s19929_s9 = sld [smem:[%s22087_s0 + %s19668_s28]]   ;;  %s19672_s28 = smov 41  }
  0x4b   :  { %s19939_s20 = sld [smem:[%s22087_s0 + %s19670_s15]]   ;;  %s19674_s15 = smov 43  }
  0x4d   :  { %22234 = sst [smem:[#allocation100_spill]] %s19914_s17 }
  0x4e   :  { %s19934_s17 = sld [smem:[%s22087_s0 + %s19669_s7]]   ;;  %s19673_s7 = smov 42  }
  0x4f   :  { %22236 = sst [smem:[#allocation102_spill]] %s19924_s21 }
  0x50   :  { %22237 = sst [smem:[#allocation103_spill]] %s19929_s9 }
  0x51   :  { %22239 = sst [smem:[#allocation105_spill]] %s19939_s20 }
  0x52   :  { %s19944_s21 = sld [smem:[%s22087_s0 + %s19671_s22]]   ;;  %s19675_s22 = smov 44  }
  0x53   :  { %s19949_s9 = sld [smem:[%s22087_s0 + %s19672_s28]]   ;;  %s19676_s28 = smov 45  }
  0x54   :  { %22238 = sst [smem:[#allocation104_spill]] %s19934_s17 }
  0x55   :  { %s19954_s17 = sld [smem:[%s22087_s0 + %s19673_s7]]   ;;  %s19677_s7 = smov 46  }
  0x56   :  { %s19959_s20 = sld [smem:[%s22087_s0 + %s19674_s15]]   ;;  %s19678_s15 = smov 47  }
  0x57   :  { %s19964_s6 = sld [smem:[%s22087_s0 + %s19675_s22]]   ;;  %s19679_s22 = smov 48  }
  0x58   :  { %22240 = sst [smem:[#allocation106_spill]] %s19944_s21 }
  0x59   :  { %22241 = sst [smem:[#allocation107_spill]] %s19949_s9 }
  0x5a   :  { %s19969_s9 = sld [smem:[%s22087_s0 + %s19676_s28]]   ;;  %s19680_s28 = smov 49  }
  0x5b   :  { %22242 = sst [smem:[#allocation108_spill]] %s19954_s17 }
  0x5c   :  { %22243 = sst [smem:[#allocation109_spill]] %s19959_s20 }
  0x5d   :  { %22244 = sst [smem:[#allocation110_spill]] %s19964_s6 }
  0x5e   :  { %s19974_s19 = sld [smem:[%s22087_s0 + %s19677_s7]]   ;;  %s19681_s7 = smov 50  }
  0x5f   :  { %s19979_s20 = sld [smem:[%s22087_s0 + %s19678_s15]]   ;;  %s19682_s15 = smov 51  }
  0x60   :  { %22245 = sst [smem:[#allocation111_spill]] %s19969_s9 }
  0x61   :  { %s19984_s6 = sld [smem:[%s22087_s0 + %s19679_s22]]  }
  0x62   :  { %s19989_s8 = sld [smem:[%s22087_s0 + %s19680_s28]]  }
  0x64   :  { %22246 = sst [smem:[#allocation112_spill]] %s19974_s19 }
  0x65   :  { %22247 = sst [smem:[#allocation113_spill]] %s19979_s20 }
  0x66   :  { %s19994_s19 = sld [smem:[%s22087_s0 + %s19681_s7]]  }
  0x67   :  { %s19999_s20 = sld [smem:[%s22087_s0 + %s19682_s15]]  }
  0x6d   :  { %22248 = sst [smem:[#allocation114_spill]] %s19999_s20 }
  0x6e   :  { %109 = vsyncpa [#allocation3], 0 }
  0x6f   :  { %110 = vsyncpa [#allocation6], 0 }
  0x70   :  { %111 = vsyncpa [#allocation9], 0 }
  0x71   :  { %112 = vsyncpa [#allocation12], 0 }
  0x72   :  { %113 = vsyncpa [#allocation15], 0 }
  0x73   :  { %114 = vsyncpa [#allocation18], 0 }
  0x74   :  { %115 = vsyncpa [#allocation21], 0 }
  0x75   :  { %116 = vsyncpa [#allocation24], 0 }
  0x76   :  { %117 = vsyncpa [#allocation27], 0 }
  0x77   :  { %118 = vsyncpa [#allocation30], 0 }
  0x78   :  { %119 = vsyncpa [#allocation33], 0 }
  0x79   :  { %120 = vsyncpa [#allocation36], 0 }
  0x7a   :  { %121 = vsyncpa [#allocation39], 0 }
  0x7b   :  { %122 = vsyncpa [#allocation42], 0 }
  0x7c   :  { %123 = vsyncpa [#allocation45], 0 }
  0x7d   :  { %124 = vsyncpa [#allocation4], 0 }
  0x7e   :  { %126 = vsyncpa [#allocation4 + $0x1], 0 }
  0x7f   :  { %127 = vsyncpa [#allocation48], 0 }
  0x80   :  { %129 = vsyncpa [#allocation48 + $0x1], 0  ;;  %s20001_s0 = smov 0   ;;  %s20003_s22 = smov 0  }
  0x81   :  { %s20005_s23 = smov 0   ;;  %s20007_s26 = smov 0  }
  0x82 LB: > { %s22249_s30 = sld [smem:[#allocation85_spill]]  ;;  %s22250_s29 = sld [smem:[#allocation95_spill]]  ;;  %s19622_s22 = sphi %s20003_s22, %s22380_s22   ;;  %s19618_s0 = sphi %s20001_s0, %s22379_s0   ;;  %s19630_s26 = sphi %s20007_s26, %s22376_s26   ;;  %s19626_s23 = sphi %s20005_s23, %s22378_s23  }
  0x83   : > { %s22251_s27 = sld [smem:[#allocation93_spill]]  ;;  %s22252_s25 = sld [smem:[#allocation71_spill]] }
  0x84   : > { %s22253_s24 = sld [smem:[#allocation77_spill]]  ;;  %s22254_s21 = sld [smem:[#allocation106_spill]] }
  0x85   : > { %s22255_s17 = sld [smem:[#allocation108_spill]]  ;;  %s22256_s12 = sld [smem:[#allocation101_spill]] }
  0x86   : > { %s22257_s9 = sld [smem:[#allocation111_spill]]  ;;  %s22258_s5 = sld [smem:[#allocation99_spill]] }
  0x87   : > { %s22259_s13 = sld [smem:[#allocation97_spill]]  ;;  %s22260_s4 = sld [smem:[#allocation91_spill]] }
  0x88   : > { %s22261_s14 = sld [smem:[#allocation75_spill]]  ;;  %s22262_s3 = sld [smem:[#allocation73_spill]] }
  0x89   : > { %22263 = sst [smem:[#allocation115_spill]] %s19618_s0  ;;  %s20022_s28 = sadd.s32 4294967295, %s19630_s26  }
  0x8a   : > { %22264 = sst [smem:[#allocation116_spill]] %s19626_s23  ;;  %s15794_s1 = sadd.s32 4294967294, %s19630_s26  }
  0x8b   : > { %22265 = sst [smem:[#allocation117_spill]] %s19630_s26  ;;  %s20026_s2 = sadd.s32 1, %s19630_s26  }
  0x8c   : > { %22266 = sst [smem:[#allocation118_spill]] %s20026_s2  ;;  %s1202_s7 = sadd.s32 1, %s19626_s23 }
  0x8d   : > { %s1199_s10 = ssub.s32 %s19630_s26, %s20026_s2  ;;  %p1212_p0 = scmp.ne.s32.totalorder %s19626_s23, %s19622_s22 }
  0x8e   : > { %p1200_p1 = scmp.eq.s32.totalorder %s1199_s10, 0  ;;  %p1213_p2 = scmp.eq.s32.totalorder %s20022_s28, 1 }
  0x8f   : > { %p1218_p3 = scmp.ne.s32.totalorder %s19622_s22, %s19618_s0  ;;  %p1219_p4 = scmp.eq.s32.totalorder %s15794_s1, 1 }
  0x90   : > { %s20037_s11 = scalar_select %p1200_p1, %s19626_s23, %s1202_s7  }
  0x91   : > { %p20039_p5 = por %p1213_p2, %p1212_p0  ;;  %p20043_p6 = por %p1219_p4, %p1218_p3 }
  0x92   : > { %22267 = sst [smem:[#allocation119_spill]] %s20037_s11  ;;  %p15795_p7 = scmp.ge.s32.totalorder %s19630_s26, 1 }
  0x93   : > { %s22268_s15 = scalar_select %p20039_p5, 1, 0 }
  0x94   : > { %s22269_s16 = scalar_select %p20043_p6, 1, 0 }
  0x95   : > { %p1252_p8 = scmp.lt.s32.totalorder %s19630_s26, 3  ;;  %p22124_p9 = scmp.eq.s32.totalorder %s20022_s28, 0 }
  0x96   : > { %22270 = sst [smem:[#allocation120_spill]] %s22269_s16  ;;  %s19683_s1 = smov [#allocation5]  }
  0x97   : > { %p20050_p10 = pnand %p15795_p7, %p1252_p8  ;;  %s1289_s7 = sshll.u32 %s19683_s1, 4  ;;  %s20056_s7 = int_to_ptr.vmem [resolvable:$true] %s1289_s7 }
  0x98   : > { %s19684_s11 = smov [#allocation8]   ;;  %s19685_s2 = smov [#allocation11]  }
  0x99   : > { %s22271_s18 = scalar_select %p20050_p10, 1, 0 }
  0x9a   : > { %p18074_p11 = pneg %p20050_p10  ;;  %s1315_s23 = sshll.u32 %s19684_s11, 4  ;;  %s20064_s23 = int_to_ptr.vmem [resolvable:$true] %s1315_s23 }
  0x9b   : > { %s20066_s16 = sshll.u32 %s19685_s2, 4  ;;  %s18692_s0 = scalar_lea.hbm %s22262_s3, 32  ;;  %s1342_s16 = int_to_ptr.vmem [resolvable:$true] %s20066_s16 }
  0x9c   : > { %p20060_p12 = pnand %p22124_p9, %p18074_p11  ;;  %p18693_p13 = scmp.ne.s32.totalorder %s22262_s3, %s18692_s0 }
  0x9d   : > { %p18699_p3 = scmp.lt.u32.totalorder %s18692_s0, %s22262_s3 }
  0x9e   : > { %p20072_p0 = pneg %p20060_p12 }
  0xa0   : > { %p18695_p1 = pnand %p20072_p0, %p18693_p13 }
  0xa2   : > { %p18696_p2 = pneg %p18695_p1 }
  0xa4   : > { %p18701_p4 = pnand %p18699_p3, %p18696_p2 }
  0xa6   : > { %18704 = shalt.err (!%p18701_p4)
}
  0xa7   : > { %s18705_s2 = scalar_lea.vmem %s20056_s7, 32  ;;  %p18713_p9 = scmp.lt.s32.totalorder %s20056_s7, %s20056_s7 }
  0xa8   : > { %p18706_p7 = scmp.ne.s32.totalorder %s20056_s7, %s18705_s2  ;;  %p18714_p6 = scmp.lt.s32.totalorder %s18705_s2, %s18705_s2 }
  0xaa   : > { %p18708_p8 = pnand %p18706_p7, %p20072_p0  ;;  %p18715_p5 = por %p18714_p6, %p18713_p9 }
  0xac   : > { %p18709_p11 = pneg %p18708_p8 }
  0xae   : > { %p18716_p10 = pnand %p18715_p5, %p18709_p11 }
  0xb0   : > { %18719 = shalt.err (!%p18716_p10)
}
  0xb1   : > { %s22134_s11 = smov 16   ;;  %s22136_s0 = smov 1  }
  0xb2   : > { %18080 = dma.hbm_to_vmem [thread:$0]  (!%p20060_p12), %s22262_s3, 32, %s20056_s7, [#allocation6], %s22134_s11, %s22134_s11, %s22136_s0  }
  0xb3   : > { %s18720_s26 = scalar_lea.hbm %s22261_s14, 32 }
  0xb4   : > { %p18721_p13 = scmp.ne.s32.totalorder %s22261_s14, %s18720_s26  ;;  %p18727_p9 = scmp.lt.u32.totalorder %s18720_s26, %s22261_s14 }
  0xb6   : > { %p18723_p6 = pnand %p18721_p13, %p20072_p0 }
  0xb8   : > { %p18724_p5 = pneg %p18723_p6 }
  0xba   : > { %p18729_p10 = pnand %p18727_p9, %p18724_p5 }
  0xbc   : > { %18732 = shalt.err (!%p18729_p10)
}
  0xbd   : > { %s18733_s2 = scalar_lea.vmem %s20064_s23, 32  ;;  %p18741_p4 = scmp.lt.s32.totalorder %s20064_s23, %s20064_s23 }
  0xbe   : > { %p18734_p1 = scmp.ne.s32.totalorder %s20064_s23, %s18733_s2  ;;  %p18742_p7 = scmp.lt.s32.totalorder %s18733_s2, %s18733_s2 }
  0xc0   : > { %p18736_p2 = pnand %p18734_p1, %p20072_p0  ;;  %p18743_p8 = por %p18742_p7, %p18741_p4 }
  0xc2   : > { %p18737_p3 = pneg %p18736_p2 }
  0xc4   : > { %p18744_p11 = pnand %p18743_p8, %p18737_p3 }
  0xc6   : > { %18747 = shalt.err (!%p18744_p11)
}
  0xc7   : > { %18086 = dma.hbm_to_vmem [thread:$0]  (!%p20060_p12), %s22261_s14, 32, %s20064_s23, [#allocation9], %s22134_s11, %s22134_s11, %s22136_s0  }
  0xc8   : > { %s18748_s26 = scalar_lea.hbm %s22253_s24, 32 }
  0xc9   : > { %p18749_p13 = scmp.ne.s32.totalorder %s22253_s24, %s18748_s26  ;;  %p18755_p9 = scmp.lt.u32.totalorder %s18748_s26, %s22253_s24 }
  0xcb   : > { %p18751_p6 = pnand %p18749_p13, %p20072_p0 }
  0xcd   : > { %p18752_p5 = pneg %p18751_p6 }
  0xcf   : > { %p18757_p10 = pnand %p18755_p9, %p18752_p5 }
  0xd1   : > { %18760 = shalt.err (!%p18757_p10)
}
  0xd2   : > { %s18761_s7 = scalar_lea.vmem %s1342_s16, 32  ;;  %p18769_p4 = scmp.lt.s32.totalorder %s1342_s16, %s1342_s16 }
  0xd3   : > { %p18762_p1 = scmp.ne.s32.totalorder %s1342_s16, %s18761_s7  ;;  %p18770_p7 = scmp.lt.s32.totalorder %s18761_s7, %s18761_s7 }
  0xd5   : > { %p18764_p2 = pnand %p18762_p1, %p20072_p0  ;;  %p18771_p8 = por %p18770_p7, %p18769_p4 }
  0xd7   : > { %p18765_p3 = pneg %p18764_p2 }
  0xd9   : > { %p18772_p11 = pnand %p18771_p8, %p18765_p3 }
  0xdb   : > { %18775 = shalt.err (!%p18772_p11)
}
  0xdc   : > { %18092 = dma.hbm_to_vmem [thread:$0]  (!%p20060_p12), %s22253_s24, 32, %s1342_s16, [#allocation12], %s22134_s11, %s22134_s11, %s22136_s0  }
  0xdd   : > { %s19688_s23 = smov [#allocation14]   ;;  %s19689_s26 = smov [#allocation17]  }
  0xde   : > { %s1385_s2 = sshll.u32 %s19688_s23, 4  ;;  %s1421_s3 = sshll.u32 %s19689_s26, 4  ;;  %s1386_s2 = int_to_ptr.vmem [resolvable:$true] %s1385_s2  ;;  %s1422_s3 = int_to_ptr.vmem [resolvable:$true] %s1421_s3 }
  0xdf   : > { %s18776_s7 = scalar_lea.hbm %s22249_s30, 512 }
  0xe0   : > { %p18777_p13 = scmp.ne.s32.totalorder %s22249_s30, %s18776_s7  ;;  %p18783_p9 = scmp.lt.u32.totalorder %s18776_s7, %s22249_s30 }
  0xe2   : > { %p18779_p6 = pnand %p18777_p13, %p20072_p0 }
  0xe4   : > { %p18780_p5 = pneg %p18779_p6 }
  0xe6   : > { %p18785_p10 = pnand %p18783_p9, %p18780_p5 }
  0xe8   : > { %18788 = shalt.err (!%p18785_p10)
}
  0xe9   : > { %s18789_s14 = scalar_lea.vmem %s1386_s2, 512  ;;  %p18797_p4 = scmp.lt.s32.totalorder %s1386_s2, %s1386_s2 }
  0xea   : > { %p18790_p1 = scmp.ne.s32.totalorder %s1386_s2, %s18789_s14  ;;  %p18798_p7 = scmp.lt.s32.totalorder %s18789_s14, %s18789_s14 }
  0xec   : > { %p18792_p2 = pnand %p18790_p1, %p20072_p0  ;;  %p18799_p8 = por %p18798_p7, %p18797_p4 }
  0xee   : > { %p18793_p3 = pneg %p18792_p2 }
  0xf0   : > { %p18800_p11 = pnand %p18799_p8, %p18793_p3 }
  0xf2   : > { %18803 = shalt.err (!%p18800_p11)
}
  0xf3   : > { %s22130_s16 = smov 64   ;;  %s22132_s23 = smov 4  }
  0xf4   : > { %18098 = dma.hbm_to_vmem [thread:$0]  (!%p20060_p12), %s22249_s30, 512, %s1386_s2, [#allocation15], %s22130_s16, %s22130_s16, %s22132_s23  }
  0xf5   : > { %s18804_s26 = scalar_lea.hbm %s22260_s4, 32 }
  0xf6   : > { %p18805_p13 = scmp.ne.s32.totalorder %s22260_s4, %s18804_s26  ;;  %p18811_p9 = scmp.lt.u32.totalorder %s18804_s26, %s22260_s4 }
  0xf8   : > { %p18807_p6 = pnand %p18805_p13, %p20072_p0 }
  0xfa   : > { %p18808_p5 = pneg %p18807_p6 }
  0xfc   : > { %p18813_p10 = pnand %p18811_p9, %p18808_p5 }
  0xfe   : > { %18816 = shalt.err (!%p18813_p10)
}
  0xff   : > { %s18817_s14 = scalar_lea.vmem %s1422_s3, 32  ;;  %p18825_p4 = scmp.lt.s32.totalorder %s1422_s3, %s1422_s3 }
 0x100   : > { %p18818_p1 = scmp.ne.s32.totalorder %s1422_s3, %s18817_s14  ;;  %p18826_p7 = scmp.lt.s32.totalorder %s18817_s14, %s18817_s14 }
 0x102   : > { %p18820_p2 = pnand %p18818_p1, %p20072_p0  ;;  %p18827_p8 = por %p18826_p7, %p18825_p4 }
 0x104   : > { %p18821_p3 = pneg %p18820_p2 }
 0x106   : > { %p18828_p11 = pnand %p18827_p8, %p18821_p3 }
 0x108   : > { %18831 = shalt.err (!%p18828_p11)
}
 0x109   : > { %18104 = dma.hbm_to_vmem [thread:$0]  (!%p20060_p12), %s22260_s4, 32, %s1422_s3, [#allocation18], %s22134_s11, %s22134_s11, %s22136_s0  }
 0x10a   : > { %s19692_s2 = smov [#allocation20]   ;;  %s19693_s26 = smov [#allocation23]  }
 0x10b   : > { %s1447_s7 = sshll.u32 %s19692_s2, 4  ;;  %s1473_s16 = sshll.u32 %s19693_s26, 4  ;;  %s1448_s7 = int_to_ptr.vmem [resolvable:$true] %s1447_s7  ;;  %s1474_s16 = int_to_ptr.vmem [resolvable:$true] %s1473_s16 }
 0x10c   : > { %s18832_s14 = scalar_lea.hbm %s22251_s27, 512 }
 0x10d   : > { %p18833_p13 = scmp.ne.s32.totalorder %s22251_s27, %s18832_s14  ;;  %p18839_p9 = scmp.lt.u32.totalorder %s18832_s14, %s22251_s27 }
 0x10f   : > { %p18835_p6 = pnand %p18833_p13, %p20072_p0 }
 0x111   : > { %p18836_p5 = pneg %p18835_p6 }
 0x113   : > { %p18841_p10 = pnand %p18839_p9, %p18836_p5 }
 0x115   : > { %18844 = shalt.err (!%p18841_p10)
}
 0x116   : > { %s18845_s23 = scalar_lea.vmem %s1448_s7, 512  ;;  %p18853_p4 = scmp.lt.s32.totalorder %s1448_s7, %s1448_s7 }
 0x117   : > { %p18846_p1 = scmp.ne.s32.totalorder %s1448_s7, %s18845_s23  ;;  %p18854_p7 = scmp.lt.s32.totalorder %s18845_s23, %s18845_s23 }
 0x119   : > { %p18848_p2 = pnand %p18846_p1, %p20072_p0  ;;  %p18855_p8 = por %p18854_p7, %p18853_p4 }
 0x11b   : > { %p18849_p3 = pneg %p18848_p2 }
 0x11d   : > { %p18856_p11 = pnand %p18855_p8, %p18849_p3 }
 0x11f   : > { %18859 = shalt.err (!%p18856_p11)
}
 0x120   : > { %s22274_s3 = smov 4   ;;  %s22275_s2 = smov 64  }
 0x121   : > { %18110 = dma.hbm_to_vmem [thread:$0]  (!%p20060_p12), %s22251_s27, 512, %s1448_s7, [#allocation21], %s22275_s2, %s22275_s2, %s22274_s3  }
 0x122   : > { %s18860_s26 = scalar_lea.hbm %s22250_s29, 512 }
 0x123   : > { %p18861_p13 = scmp.ne.s32.totalorder %s22250_s29, %s18860_s26  ;;  %p18867_p9 = scmp.lt.u32.totalorder %s18860_s26, %s22250_s29 }
 0x125   : > { %p18863_p6 = pnand %p18861_p13, %p20072_p0 }
 0x127   : > { %p18864_p5 = pneg %p18863_p6 }
 0x129   : > { %p18869_p10 = pnand %p18867_p9, %p18864_p5 }
 0x12b   : > { %18872 = shalt.err (!%p18869_p10)
}
 0x12c   : > { %s18873_s23 = scalar_lea.vmem %s1474_s16, 512  ;;  %p18881_p4 = scmp.lt.s32.totalorder %s1474_s16, %s1474_s16 }
 0x12d   : > { %p18874_p1 = scmp.ne.s32.totalorder %s1474_s16, %s18873_s23  ;;  %p18882_p7 = scmp.lt.s32.totalorder %s18873_s23, %s18873_s23 }
 0x12f   : > { %p18876_p2 = pnand %p18874_p1, %p20072_p0  ;;  %p18883_p8 = por %p18882_p7, %p18881_p4 }
 0x131   : > { %p18877_p3 = pneg %p18876_p2 }
 0x133   : > { %p18884_p11 = pnand %p18883_p8, %p18877_p3 }
 0x135   : > { %18887 = shalt.err (!%p18884_p11)
}
 0x136   : > { %18116 = dma.hbm_to_vmem [thread:$0]  (!%p20060_p12), %s22250_s29, 512, %s1474_s16, [#allocation24], %s22275_s2, %s22275_s2, %s22274_s3  }
 0x137   : > { %s19694_s7 = smov [#allocation26]   ;;  %s19695_s26 = smov [#allocation29]  }
 0x138   : > { %s1499_s14 = sshll.u32 %s19694_s7, 4  ;;  %s1525_s11 = sshll.u32 %s19695_s26, 4  ;;  %s1500_s14 = int_to_ptr.vmem [resolvable:$true] %s1499_s14  ;;  %s1526_s11 = int_to_ptr.vmem [resolvable:$true] %s1525_s11 }
 0x139   : > { %s18888_s23 = scalar_lea.hbm %s22259_s13, 32 }
 0x13a   : > { %p18889_p13 = scmp.ne.s32.totalorder %s22259_s13, %s18888_s23  ;;  %p18895_p9 = scmp.lt.u32.totalorder %s18888_s23, %s22259_s13 }
 0x13c   : > { %p18891_p6 = pnand %p18889_p13, %p20072_p0 }
 0x13e   : > { %p18892_p5 = pneg %p18891_p6 }
 0x140   : > { %p18897_p10 = pnand %p18895_p9, %p18892_p5 }
 0x142   : > { %18900 = shalt.err (!%p18897_p10)
}
 0x143   : > { %s18901_s0 = scalar_lea.vmem %s1500_s14, 32  ;;  %p18909_p4 = scmp.lt.s32.totalorder %s1500_s14, %s1500_s14 }
 0x144   : > { %p18902_p1 = scmp.ne.s32.totalorder %s1500_s14, %s18901_s0  ;;  %p18910_p7 = scmp.lt.s32.totalorder %s18901_s0, %s18901_s0 }
 0x146   : > { %p18904_p2 = pnand %p18902_p1, %p20072_p0  ;;  %p18911_p8 = por %p18910_p7, %p18909_p4 }
 0x148   : > { %p18905_p3 = pneg %p18904_p2 }
 0x14a   : > { %p18912_p11 = pnand %p18911_p8, %p18905_p3 }
 0x14c   : > { %18915 = shalt.err (!%p18912_p11)
}
 0x14d   : > { %s22276_s16 = smov 1   ;;  %s22277_s7 = smov 16  }
 0x14e   : > { %18122 = dma.hbm_to_vmem [thread:$0]  (!%p20060_p12), %s22259_s13, 32, %s1500_s14, [#allocation27], %s22277_s7, %s22277_s7, %s22276_s16  }
 0x14f   : > { %s18916_s26 = scalar_lea.hbm %s22258_s5, 512 }
 0x150   : > { %p18917_p13 = scmp.ne.s32.totalorder %s22258_s5, %s18916_s26  ;;  %p18923_p9 = scmp.lt.u32.totalorder %s18916_s26, %s22258_s5 }
 0x152   : > { %p18919_p6 = pnand %p18917_p13, %p20072_p0 }
 0x154   : > { %p18920_p5 = pneg %p18919_p6 }
 0x156   : > { %p18925_p10 = pnand %p18923_p9, %p18920_p5 }
 0x158   : > { %18928 = shalt.err (!%p18925_p10)
}
 0x159   : > { %s18929_s0 = scalar_lea.vmem %s1526_s11, 512  ;;  %p18937_p4 = scmp.lt.s32.totalorder %s1526_s11, %s1526_s11 }
 0x15a   : > { %p18930_p1 = scmp.ne.s32.totalorder %s1526_s11, %s18929_s0  ;;  %p18938_p7 = scmp.lt.s32.totalorder %s18929_s0, %s18929_s0 }
 0x15c   : > { %p18932_p2 = pnand %p18930_p1, %p20072_p0  ;;  %p18939_p8 = por %p18938_p7, %p18937_p4 }
 0x15e   : > { %p18933_p3 = pneg %p18932_p2 }
 0x160   : > { %p18940_p11 = pnand %p18939_p8, %p18933_p3 }
 0x162   : > { %18943 = shalt.err (!%p18940_p11)
}
 0x163   : > { %18128 = dma.hbm_to_vmem [thread:$0]  (!%p20060_p12), %s22258_s5, 512, %s1526_s11, [#allocation30], %s22275_s2, %s22275_s2, %s22274_s3  }
 0x164   : > { %s19696_s14 = smov [#allocation32]   ;;  %s19697_s26 = smov [#allocation35]  }
 0x165   : > { %s1551_s23 = sshll.u32 %s19696_s14, 4  ;;  %s1586_s4 = sshll.u32 %s19697_s26, 4  ;;  %s1552_s23 = int_to_ptr.vmem [resolvable:$true] %s1551_s23  ;;  %s1587_s4 = int_to_ptr.vmem [resolvable:$true] %s1586_s4 }
 0x166   : > { %s18944_s0 = scalar_lea.hbm %s22256_s12, 512 }
 0x167   : > { %p18945_p13 = scmp.ne.s32.totalorder %s22256_s12, %s18944_s0  ;;  %p18951_p9 = scmp.lt.u32.totalorder %s18944_s0, %s22256_s12 }
 0x169   : > { %p18947_p6 = pnand %p18945_p13, %p20072_p0 }
 0x16b   : > { %p18948_p5 = pneg %p18947_p6 }
 0x16d   : > { %p18953_p10 = pnand %p18951_p9, %p18948_p5 }
 0x16f   : > { %18956 = shalt.err (!%p18953_p10)
}
 0x170   : > { %s18957_s13 = scalar_lea.vmem %s1552_s23, 512  ;;  %p18965_p4 = scmp.lt.s32.totalorder %s1552_s23, %s1552_s23 }
 0x171   : > { %p18958_p1 = scmp.ne.s32.totalorder %s1552_s23, %s18957_s13  ;;  %p18966_p7 = scmp.lt.s32.totalorder %s18957_s13, %s18957_s13 }
 0x173   : > { %p18960_p2 = pnand %p18958_p1, %p20072_p0  ;;  %p18967_p8 = por %p18966_p7, %p18965_p4 }
 0x175   : > { %p18961_p3 = pneg %p18960_p2 }
 0x177   : > { %p18968_p11 = pnand %p18967_p8, %p18961_p3 }
 0x179   : > { %18971 = shalt.err (!%p18968_p11)
}
 0x17a   : > { %18134 = dma.hbm_to_vmem [thread:$0]  (!%p20060_p12), %s22256_s12, 512, %s1552_s23, [#allocation33], %s22275_s2, %s22275_s2, %s22274_s3  }
 0x17b   : > { %s18972_s11 = scalar_lea.hbm %s22254_s21, 32 }
 0x17c   : > { %p18973_p13 = scmp.ne.s32.totalorder %s22254_s21, %s18972_s11  ;;  %p18979_p9 = scmp.lt.u32.totalorder %s18972_s11, %s22254_s21 }
 0x17e   : > { %p18975_p6 = pnand %p18973_p13, %p20072_p0 }
 0x180   : > { %p18976_p5 = pneg %p18975_p6 }
 0x182   : > { %p18981_p10 = pnand %p18979_p9, %p18976_p5 }
 0x184   : > { %18984 = shalt.err (!%p18981_p10)
}
 0x185   : > { %s18985_s13 = scalar_lea.vmem %s1587_s4, 32  ;;  %p18993_p4 = scmp.lt.s32.totalorder %s1587_s4, %s1587_s4 }
 0x186   : > { %p18986_p1 = scmp.ne.s32.totalorder %s1587_s4, %s18985_s13  ;;  %p18994_p7 = scmp.lt.s32.totalorder %s18985_s13, %s18985_s13 }
 0x188   : > { %p18988_p2 = pnand %p18986_p1, %p20072_p0  ;;  %p18995_p8 = por %p18994_p7, %p18993_p4 }
 0x18a   : > { %p18989_p3 = pneg %p18988_p2 }
 0x18c   : > { %p18996_p11 = pnand %p18995_p8, %p18989_p3 }
 0x18e   : > { %18999 = shalt.err (!%p18996_p11)
}
 0x18f   : > { %18140 = dma.hbm_to_vmem [thread:$0]  (!%p20060_p12), %s22254_s21, 32, %s1587_s4, [#allocation36], %s22277_s7, %s22277_s7, %s22276_s16  }
 0x190   : > { %s19698_s14 = smov [#allocation38]   ;;  %s19699_s26 = smov [#allocation41]  }
 0x191   : > { %s1612_s23 = sshll.u32 %s19698_s14, 4  ;;  %s1641_s0 = sshll.u32 %s19699_s26, 4  ;;  %s1613_s23 = int_to_ptr.vmem [resolvable:$true] %s1612_s23  ;;  %s1642_s0 = int_to_ptr.vmem [resolvable:$true] %s1641_s0 }
 0x192   : > { %s19000_s11 = scalar_lea.hbm %s22255_s17, 512 }
 0x193   : > { %p19001_p13 = scmp.ne.s32.totalorder %s22255_s17, %s19000_s11  ;;  %p19007_p9 = scmp.lt.u32.totalorder %s19000_s11, %s22255_s17 }
 0x195   : > { %p19003_p6 = pnand %p19001_p13, %p20072_p0 }
 0x197   : > { %p19004_p5 = pneg %p19003_p6 }
 0x199   : > { %p19009_p10 = pnand %p19007_p9, %p19004_p5 }
 0x19b   : > { %19012 = shalt.err (!%p19009_p10)
}
 0x19c   : > { %s19013_s13 = scalar_lea.vmem %s1613_s23, 512  ;;  %p19021_p4 = scmp.lt.s32.totalorder %s1613_s23, %s1613_s23 }
 0x19d   : > { %p19014_p1 = scmp.ne.s32.totalorder %s1613_s23, %s19013_s13  ;;  %p19022_p7 = scmp.lt.s32.totalorder %s19013_s13, %s19013_s13 }
 0x19f   : > { %p19016_p2 = pnand %p19014_p1, %p20072_p0  ;;  %p19023_p8 = por %p19022_p7, %p19021_p4 }
 0x1a1   : > { %p19017_p3 = pneg %p19016_p2 }
 0x1a3   : > { %p19024_p11 = pnand %p19023_p8, %p19017_p3 }
 0x1a5   : > { %19027 = shalt.err (!%p19024_p11)
}
 0x1a6   : > { %18146 = dma.hbm_to_vmem [thread:$0]  (!%p20060_p12), %s22255_s17, 512, %s1613_s23, [#allocation39], %s22275_s2, %s22275_s2, %s22274_s3  }
 0x1a7   : > { %s19028_s4 = scalar_lea.hbm %s22257_s9, 32 }
 0x1a8   : > { %p19029_p13 = scmp.ne.s32.totalorder %s22257_s9, %s19028_s4  ;;  %p19035_p9 = scmp.lt.u32.totalorder %s19028_s4, %s22257_s9 }
 0x1aa   : > { %p19031_p6 = pnand %p19029_p13, %p20072_p0 }
 0x1ac   : > { %p19032_p5 = pneg %p19031_p6 }
 0x1ae   : > { %p19037_p10 = pnand %p19035_p9, %p19032_p5 }
 0x1b0   : > { %19040 = shalt.err (!%p19037_p10)
}
 0x1b1   : > { %s19041_s14 = scalar_lea.vmem %s1642_s0, 32  ;;  %p19049_p4 = scmp.lt.s32.totalorder %s1642_s0, %s1642_s0 }
 0x1b2   : > { %p19042_p1 = scmp.ne.s32.totalorder %s1642_s0, %s19041_s14  ;;  %p19050_p7 = scmp.lt.s32.totalorder %s19041_s14, %s19041_s14 }
 0x1b4   : > { %p19044_p2 = pnand %p19042_p1, %p20072_p0  ;;  %p19051_p8 = por %p19050_p7, %p19049_p4 }
 0x1b6   : > { %p19045_p3 = pneg %p19044_p2 }
 0x1b8   : > { %p19052_p11 = pnand %p19051_p8, %p19045_p3 }
 0x1ba   : > { %19055 = shalt.err (!%p19052_p11)
}
 0x1bb   : > { %18152 = dma.hbm_to_vmem [thread:$0]  (!%p20060_p12), %s22257_s9, 32, %s1642_s0, [#allocation42], %s22277_s7, %s22277_s7, %s22276_s16  }
 0x1bc   : > { %s19700_s23 = smov [#allocation2]   ;;  %s19701_s11 = smov [#allocation7]  }
 0x1bd   : > { %s1273_s26 = sshll.u32 %s19700_s23, 4  ;;  %s1302_s13 = sshll.u32 %s19701_s11, 4  ;;  %s1274_s26 = int_to_ptr.vmem [resolvable:$true] %s1273_s26  ;;  %s1303_s13 = int_to_ptr.vmem [resolvable:$true] %s1302_s13 }
 0x1be   : > { %s19056_s4 = scalar_lea.hbm %s22252_s25, 32 }
 0x1bf   : > { %p19057_p13 = scmp.ne.s32.totalorder %s22252_s25, %s19056_s4  ;;  %p19063_p9 = scmp.lt.u32.totalorder %s19056_s4, %s22252_s25 }
 0x1c1   : > { %p19059_p6 = pnand %p19057_p13, %p20072_p0 }
 0x1c3   : > { %p19060_p5 = pneg %p19059_p6 }
 0x1c5   : > { %p19065_p10 = pnand %p19063_p9, %p19060_p5 }
 0x1c7   : > { %19068 = shalt.err (!%p19065_p10)
}
 0x1c8   : > { %s19069_s14 = scalar_lea.vmem %s1274_s26, 32  ;;  %p19077_p4 = scmp.lt.s32.totalorder %s1274_s26, %s1274_s26 }
 0x1c9   : > { %p19070_p1 = scmp.ne.s32.totalorder %s1274_s26, %s19069_s14  ;;  %p19078_p7 = scmp.lt.s32.totalorder %s19069_s14, %s19069_s14 }
 0x1cb   : > { %p19072_p2 = pnand %p19070_p1, %p20072_p0  ;;  %p19079_p8 = por %p19078_p7, %p19077_p4 }
 0x1cd   : > { %p19073_p3 = pneg %p19072_p2 }
 0x1cf   : > { %p19080_p11 = pnand %p19079_p8, %p19073_p3 }
 0x1d1   : > { %19083 = shalt.err (!%p19080_p11)
}
 0x1d2   : > { %s22278_s0 = sld [smem:[#allocation74_spill]] }
 0x1d3   : > { %18077 = dma.hbm_to_vmem [thread:$0]  (!%p20060_p12), %s22252_s25, 32, %s1274_s26, [#allocation3], %s22277_s7, %s22277_s7, %s22276_s16  }
 0x1d8   : > { %s22279_s11 = smov %s22278_s0  ;;  %s19084_s23 = scalar_lea.hbm %s22278_s0, 32 }
 0x1d9   : > { %p19085_p13 = scmp.ne.s32.totalorder %s22279_s11, %s19084_s23  ;;  %p19091_p9 = scmp.lt.u32.totalorder %s19084_s23, %s22279_s11 }
 0x1db   : > { %p19087_p6 = pnand %p19085_p13, %p20072_p0 }
 0x1dd   : > { %p19088_p5 = pneg %p19087_p6 }
 0x1df   : > { %p19093_p10 = pnand %p19091_p9, %p19088_p5 }
 0x1e1   : > { %19096 = shalt.err (!%p19093_p10)
}
 0x1e2   : > { %s19097_s4 = scalar_lea.vmem %s1303_s13, 32  ;;  %p19105_p4 = scmp.lt.s32.totalorder %s1303_s13, %s1303_s13 }
 0x1e3   : > { %p19098_p1 = scmp.ne.s32.totalorder %s1303_s13, %s19097_s4  ;;  %p19106_p7 = scmp.lt.s32.totalorder %s19097_s4, %s19097_s4 }
 0x1e5   : > { %p19100_p2 = pnand %p19098_p1, %p20072_p0  ;;  %p19107_p8 = por %p19106_p7, %p19105_p4 }
 0x1e7   : > { %p19101_p3 = pneg %p19100_p2 }
 0x1e9   : > { %p19108_p11 = pnand %p19107_p8, %p19101_p3 }
 0x1eb   : > { %19111 = shalt.err (!%p19108_p11)
}
 0x1ec   : > { %s22280_s26 = sld [smem:[#allocation76_spill]]  ;;  %s19702_s0 = smov [#allocation10]  }
 0x1ed   : > { %18083 = dma.hbm_to_vmem [thread:$0]  (!%p20060_p12), %s22279_s11, 32, %s1303_s13, [#allocation6], %s22277_s7, %s22277_s7, %s22276_s16  }
 0x1ee   : > { %s1328_s23 = sshll.u32 %s19702_s0, 4  ;;  %s19703_s5 = smov [#allocation13]   ;;  %s1329_s23 = int_to_ptr.vmem [resolvable:$true] %s1328_s23 }
 0x1ef   : > { %s1357_s9 = sshll.u32 %s19703_s5, 4  ;;  %s1358_s9 = int_to_ptr.vmem [resolvable:$true] %s1357_s9 }
 0x1f2   : > { %s22281_s14 = smov %s22280_s26  ;;  %s19112_s4 = scalar_lea.hbm %s22280_s26, 512 }
 0x1f3   : > { %p19113_p13 = scmp.ne.s32.totalorder %s22281_s14, %s19112_s4  ;;  %p19119_p9 = scmp.lt.u32.totalorder %s19112_s4, %s22281_s14 }
 0x1f5   : > { %p19115_p6 = pnand %p19113_p13, %p20072_p0 }
 0x1f7   : > { %p19116_p5 = pneg %p19115_p6 }
 0x1f9   : > { %p19121_p10 = pnand %p19119_p9, %p19116_p5 }
 0x1fb   : > { %19124 = shalt.err (!%p19121_p10)
}
 0x1fc   : > { %s19125_s12 = scalar_lea.vmem %s1329_s23, 512  ;;  %p19133_p4 = scmp.lt.s32.totalorder %s1329_s23, %s1329_s23 }
 0x1fd   : > { %p19126_p1 = scmp.ne.s32.totalorder %s1329_s23, %s19125_s12  ;;  %p19134_p7 = scmp.lt.s32.totalorder %s19125_s12, %s19125_s12 }
 0x1ff   : > { %p19128_p2 = pnand %p19126_p1, %p20072_p0  ;;  %p19135_p8 = por %p19134_p7, %p19133_p4 }
 0x201   : > { %p19129_p3 = pneg %p19128_p2 }
 0x203   : > { %p19136_p11 = pnand %p19135_p8, %p19129_p3 }
 0x205   : > { %19139 = shalt.err (!%p19136_p11)
}
 0x206   : > { %s22282_s5 = sld [smem:[#allocation79_spill]] }
 0x207   : > { %18089 = dma.hbm_to_vmem [thread:$0]  (!%p20060_p12), %s22281_s14, 512, %s1329_s23, [#allocation9], %s22275_s2, %s22275_s2, %s22274_s3  }
 0x20c   : > { %s19140_s13 = scalar_lea.hbm %s22282_s5, 32 }
 0x20d   : > { %p19141_p13 = scmp.ne.s32.totalorder %s22282_s5, %s19140_s13  ;;  %p19147_p9 = scmp.lt.u32.totalorder %s19140_s13, %s22282_s5 }
 0x20f   : > { %p19143_p6 = pnand %p19141_p13, %p20072_p0 }
 0x211   : > { %p19144_p5 = pneg %p19143_p6 }
 0x213   : > { %p19149_p10 = pnand %p19147_p9, %p19144_p5 }
 0x215   : > { %19152 = shalt.err (!%p19149_p10)
}
 0x216   : > { %s19153_s12 = scalar_lea.vmem %s1358_s9, 32  ;;  %p19161_p4 = scmp.lt.s32.totalorder %s1358_s9, %s1358_s9 }
 0x217   : > { %p19154_p1 = scmp.ne.s32.totalorder %s1358_s9, %s19153_s12  ;;  %p19162_p7 = scmp.lt.s32.totalorder %s19153_s12, %s19153_s12 }
 0x219   : > { %p19156_p2 = pnand %p19154_p1, %p20072_p0  ;;  %p19163_p8 = por %p19162_p7, %p19161_p4 }
 0x21b   : > { %p19157_p3 = pneg %p19156_p2 }
 0x21d   : > { %p19164_p11 = pnand %p19163_p8, %p19157_p3 }
 0x21f   : > { %19167 = shalt.err (!%p19164_p11)
}
 0x220   : > { %s22283_s3 = sld [smem:[#allocation90_spill]]  ;;  %s19704_s2 = smov [#allocation16]  }
 0x221   : > { %18095 = dma.hbm_to_vmem [thread:$0]  (!%p20060_p12), %s22282_s5, 32, %s1358_s9, [#allocation12], %s22277_s7, %s22277_s7, %s22276_s16  }
 0x222   : > { %s1411_s26 = sshll.u32 %s19704_s2, 4  ;;  %s19705_s0 = smov [#allocation19]   ;;  %s1412_s26 = int_to_ptr.vmem [resolvable:$true] %s1411_s26 }
 0x223   : > { %s1434_s23 = sshll.u32 %s19705_s0, 4  ;;  %s1435_s23 = int_to_ptr.vmem [resolvable:$true] %s1434_s23 }
 0x226   : > { %s19168_s4 = scalar_lea.hbm %s22283_s3, 16 }
 0x227   : > { %p19169_p13 = scmp.ne.s32.totalorder %s22283_s3, %s19168_s4  ;;  %p19175_p9 = scmp.lt.u32.totalorder %s19168_s4, %s22283_s3 }
 0x229   : > { %p19171_p6 = pnand %p19169_p13, %p20072_p0 }
 0x22b   : > { %p19172_p5 = pneg %p19171_p6 }
 0x22d   : > { %p19177_p10 = pnand %p19175_p9, %p19172_p5 }
 0x22f   : > { %19180 = shalt.err (!%p19177_p10)
}
 0x230   : > { %s19181_s13 = scalar_lea.vmem %s1412_s26, 16  ;;  %s19188_s9 = scalar_lea.vmem %s1412_s26, 32 }
 0x231   : > { %p19182_p1 = scmp.ne.s32.totalorder %s1412_s26, %s19181_s13  ;;  %p19189_p4 = scmp.lt.s32.totalorder %s1412_s26, %s1412_s26 }
 0x232   : > { %p19190_p7 = scmp.lt.s32.totalorder %s19188_s9, %s19181_s13 }
 0x233   : > { %p19184_p2 = pnand %p19182_p1, %p20072_p0 }
 0x234   : > { %p19191_p8 = por %p19190_p7, %p19189_p4 }
 0x235   : > { %p19185_p3 = pneg %p19184_p2 }
 0x237   : > { %p19192_p11 = pnand %p19191_p8, %p19185_p3 }
 0x239   : > { %19195 = shalt.err (!%p19192_p11)
}
 0x23a   : > { %s22284_s12 = sld [smem:[#allocation92_spill]] }
 0x23b   : > { %18101 = dma.hbm_to_vmem [thread:$0]  (!%p20060_p12), %s22283_s3, 16, %s1412_s26, [#allocation15]  }
 0x240   : > { %s19196_s2 = scalar_lea.hbm %s22284_s12, 32 }
 0x241   : > { %p19197_p13 = scmp.ne.s32.totalorder %s22284_s12, %s19196_s2  ;;  %p19203_p9 = scmp.lt.u32.totalorder %s19196_s2, %s22284_s12 }
 0x243   : > { %p19199_p6 = pnand %p19197_p13, %p20072_p0 }
 0x245   : > { %p19200_p5 = pneg %p19199_p6 }
 0x247   : > { %p19205_p10 = pnand %p19203_p9, %p19200_p5 }
 0x249   : > { %19208 = shalt.err (!%p19205_p10)
}
 0x24a   : > { %s19209_s0 = scalar_lea.vmem %s1435_s23, 32  ;;  %p19217_p4 = scmp.lt.s32.totalorder %s1435_s23, %s1435_s23 }
 0x24b   : > { %p19210_p1 = scmp.ne.s32.totalorder %s1435_s23, %s19209_s0  ;;  %p19218_p7 = scmp.lt.s32.totalorder %s19209_s0, %s19209_s0 }
 0x24d   : > { %p19212_p2 = pnand %p19210_p1, %p20072_p0  ;;  %p19219_p8 = por %p19218_p7, %p19217_p4 }
 0x24f   : > { %p19213_p3 = pneg %p19212_p2 }
 0x251   : > { %p19220_p11 = pnand %p19219_p8, %p19213_p3 }
 0x253   : > { %19223 = shalt.err (!%p19220_p11)
}
 0x254   : > { %s22285_s26 = sld [smem:[#allocation94_spill]]  ;;  %s19706_s13 = smov [#allocation22]  }
 0x255   : > { %18107 = dma.hbm_to_vmem [thread:$0]  (!%p20060_p12), %s22284_s12, 32, %s1435_s23, [#allocation18], %s22277_s7, %s22277_s7, %s22276_s16  }
 0x256   : > { %s1460_s9 = sshll.u32 %s19706_s13, 4  ;;  %s19707_s2 = smov [#allocation25]   ;;  %s1461_s9 = int_to_ptr.vmem [resolvable:$true] %s1460_s9 }
 0x257   : > { %s1486_s3 = sshll.u32 %s19707_s2, 4  ;;  %s1487_s3 = int_to_ptr.vmem [resolvable:$true] %s1486_s3 }
 0x25a   : > { %s22286_s4 = smov %s22285_s26  ;;  %s19224_s0 = scalar_lea.hbm %s22285_s26, 32 }
 0x25b   : > { %p19225_p13 = scmp.ne.s32.totalorder %s22286_s4, %s19224_s0  ;;  %p19231_p9 = scmp.lt.u32.totalorder %s19224_s0, %s22286_s4 }
 0x25d   : > { %p19227_p6 = pnand %p19225_p13, %p20072_p0 }
 0x25f   : > { %p19228_p5 = pneg %p19227_p6 }
 0x261   : > { %p19233_p10 = pnand %p19231_p9, %p19228_p5 }
 0x263   : > { %19236 = shalt.err (!%p19233_p10)
}
 0x264   : > { %s19237_s5 = scalar_lea.vmem %s1461_s9, 32  ;;  %p19245_p4 = scmp.lt.s32.totalorder %s1461_s9, %s1461_s9 }
 0x265   : > { %p19238_p1 = scmp.ne.s32.totalorder %s1461_s9, %s19237_s5  ;;  %p19246_p7 = scmp.lt.s32.totalorder %s19237_s5, %s19237_s5 }
 0x267   : > { %p19240_p2 = pnand %p19238_p1, %p20072_p0  ;;  %p19247_p8 = por %p19246_p7, %p19245_p4 }
 0x269   : > { %p19241_p3 = pneg %p19240_p2 }
 0x26b   : > { %p19248_p11 = pnand %p19247_p8, %p19241_p3 }
 0x26d   : > { %19251 = shalt.err (!%p19248_p11)
}
 0x26e   : > { %s22287_s23 = sld [smem:[#allocation96_spill]] }
 0x26f   : > { %18113 = dma.hbm_to_vmem [thread:$0]  (!%p20060_p12), %s22286_s4, 32, %s1461_s9, [#allocation21], %s22277_s7, %s22277_s7, %s22276_s16  }
 0x274   : > { %s22288_s13 = smov %s22287_s23  ;;  %s19252_s26 = scalar_lea.hbm %s22287_s23, 32 }
 0x275   : > { %p19253_p13 = scmp.ne.s32.totalorder %s22288_s13, %s19252_s26  ;;  %p19259_p9 = scmp.lt.u32.totalorder %s19252_s26, %s22288_s13 }
 0x277   : > { %p19255_p6 = pnand %p19253_p13, %p20072_p0 }
 0x279   : > { %p19256_p5 = pneg %p19255_p6 }
 0x27b   : > { %p19261_p10 = pnand %p19259_p9, %p19256_p5 }
 0x27d   : > { %19264 = shalt.err (!%p19261_p10)
}
 0x27e   : > { %s19265_s5 = scalar_lea.vmem %s1487_s3, 32  ;;  %p19273_p4 = scmp.lt.s32.totalorder %s1487_s3, %s1487_s3 }
 0x27f   : > { %p19266_p1 = scmp.ne.s32.totalorder %s1487_s3, %s19265_s5  ;;  %p19274_p7 = scmp.lt.s32.totalorder %s19265_s5, %s19265_s5 }
 0x281   : > { %p19268_p2 = pnand %p19266_p1, %p20072_p0  ;;  %p19275_p8 = por %p19274_p7, %p19273_p4 }
 0x283   : > { %p19269_p3 = pneg %p19268_p2 }
 0x285   : > { %p19276_p11 = pnand %p19275_p8, %p19269_p3 }
 0x287   : > { %19279 = shalt.err (!%p19276_p11)
}
 0x288   : > { %s22289_s9 = sld [smem:[#allocation98_spill]]  ;;  %s19708_s2 = smov [#allocation28]  }
 0x289   : > { %18119 = dma.hbm_to_vmem [thread:$0]  (!%p20060_p12), %s22288_s13, 32, %s1487_s3, [#allocation24], %s22277_s7, %s22277_s7, %s22276_s16  }
 0x28a   : > { %s1512_s0 = sshll.u32 %s19708_s2, 4  ;;  %s19709_s23 = smov [#allocation31]   ;;  %s1513_s0 = int_to_ptr.vmem [resolvable:$true] %s1512_s0 }
 0x28b   : > { %s1538_s26 = sshll.u32 %s19709_s23, 4  ;;  %s1539_s26 = int_to_ptr.vmem [resolvable:$true] %s1538_s26 }
 0x28e   : > { %s19280_s5 = scalar_lea.hbm %s22289_s9, 32 }
 0x28f   : > { %p19281_p13 = scmp.ne.s32.totalorder %s22289_s9, %s19280_s5  ;;  %p19287_p9 = scmp.lt.u32.totalorder %s19280_s5, %s22289_s9 }
 0x291   : > { %p19283_p6 = pnand %p19281_p13, %p20072_p0 }
 0x293   : > { %p19284_p5 = pneg %p19283_p6 }
 0x295   : > { %p19289_p10 = pnand %p19287_p9, %p19284_p5 }
 0x297   : > { %19292 = shalt.err (!%p19289_p10)
}
 0x298   : > { %s19293_s4 = scalar_lea.vmem %s1513_s0, 32  ;;  %p19301_p4 = scmp.lt.s32.totalorder %s1513_s0, %s1513_s0 }
 0x299   : > { %p19294_p1 = scmp.ne.s32.totalorder %s1513_s0, %s19293_s4  ;;  %p19302_p7 = scmp.lt.s32.totalorder %s19293_s4, %s19293_s4 }
 0x29b   : > { %p19296_p2 = pnand %p19294_p1, %p20072_p0  ;;  %p19303_p8 = por %p19302_p7, %p19301_p4 }
 0x29d   : > { %p19297_p3 = pneg %p19296_p2 }
 0x29f   : > { %p19304_p11 = pnand %p19303_p8, %p19297_p3 }
 0x2a1   : > { %19307 = shalt.err (!%p19304_p11)
}
 0x2a2   : > { %s22290_s3 = sld [smem:[#allocation100_spill]] }
 0x2a3   : > { %18125 = dma.hbm_to_vmem [thread:$0]  (!%p20060_p12), %s22289_s9, 32, %s1513_s0, [#allocation27], %s22277_s7, %s22277_s7, %s22276_s16  }
 0x2a8   : > { %s19308_s2 = scalar_lea.hbm %s22290_s3, 32 }
 0x2a9   : > { %p19309_p13 = scmp.ne.s32.totalorder %s22290_s3, %s19308_s2  ;;  %p19315_p9 = scmp.lt.u32.totalorder %s19308_s2, %s22290_s3 }
 0x2ab   : > { %p19311_p6 = pnand %p19309_p13, %p20072_p0 }
 0x2ad   : > { %p19312_p5 = pneg %p19311_p6 }
 0x2af   : > { %p19317_p10 = pnand %p19315_p9, %p19312_p5 }
 0x2b1   : > { %19320 = shalt.err (!%p19317_p10)
}
 0x2b2   : > { %s19321_s4 = scalar_lea.vmem %s1539_s26, 32  ;;  %p19329_p4 = scmp.lt.s32.totalorder %s1539_s26, %s1539_s26 }
 0x2b3   : > { %p19322_p1 = scmp.ne.s32.totalorder %s1539_s26, %s19321_s4  ;;  %p19330_p7 = scmp.lt.s32.totalorder %s19321_s4, %s19321_s4 }
 0x2b5   : > { %p19324_p2 = pnand %p19322_p1, %p20072_p0  ;;  %p19331_p8 = por %p19330_p7, %p19329_p4 }
 0x2b7   : > { %p19325_p3 = pneg %p19324_p2 }
 0x2b9   : > { %p19332_p11 = pnand %p19331_p8, %p19325_p3 }
 0x2bb   : > { %19335 = shalt.err (!%p19332_p11)
}
 0x2bc   : > { %s22291_s0 = sld [smem:[#allocation102_spill]]  ;;  %s19710_s23 = smov [#allocation34]  }
 0x2bd   : > { %18131 = dma.hbm_to_vmem [thread:$0]  (!%p20060_p12), %s22290_s3, 32, %s1539_s26, [#allocation30], %s22277_s7, %s22277_s7, %s22276_s16  }
 0x2be   : > { %s1564_s2 = sshll.u32 %s19710_s23, 4  ;;  %s19711_s9 = smov [#allocation37]   ;;  %s1565_s2 = int_to_ptr.vmem [resolvable:$true] %s1564_s2 }
 0x2bf   : > { %s1599_s11 = sshll.u32 %s19711_s9, 4  ;;  %s1600_s11 = int_to_ptr.vmem [resolvable:$true] %s1599_s11 }
 0x2c2   : > { %s22292_s5 = smov %s22291_s0  ;;  %s19336_s4 = scalar_lea.hbm %s22291_s0, 32 }
 0x2c3   : > { %p19337_p13 = scmp.ne.s32.totalorder %s22292_s5, %s19336_s4  ;;  %p19343_p9 = scmp.lt.u32.totalorder %s19336_s4, %s22292_s5 }
 0x2c5   : > { %p19339_p6 = pnand %p19337_p13, %p20072_p0 }
 0x2c7   : > { %p19340_p5 = pneg %p19339_p6 }
 0x2c9   : > { %p19345_p10 = pnand %p19343_p9, %p19340_p5 }
 0x2cb   : > { %19348 = shalt.err (!%p19345_p10)
}
 0x2cc   : > { %s19349_s12 = scalar_lea.vmem %s1565_s2, 32  ;;  %p19357_p4 = scmp.lt.s32.totalorder %s1565_s2, %s1565_s2 }
 0x2cd   : > { %p19350_p1 = scmp.ne.s32.totalorder %s1565_s2, %s19349_s12  ;;  %p19358_p7 = scmp.lt.s32.totalorder %s19349_s12, %s19349_s12 }
 0x2cf   : > { %p19352_p2 = pnand %p19350_p1, %p20072_p0  ;;  %p19359_p8 = por %p19358_p7, %p19357_p4 }
 0x2d1   : > { %p19353_p3 = pneg %p19352_p2 }
 0x2d3   : > { %p19360_p11 = pnand %p19359_p8, %p19353_p3 }
 0x2d5   : > { %19363 = shalt.err (!%p19360_p11)
}
 0x2d6   : > { %s22293_s9 = sld [smem:[#allocation107_spill]] }
 0x2d7   : > { %18137 = dma.hbm_to_vmem [thread:$0]  (!%p20060_p12), %s22292_s5, 32, %s1565_s2, [#allocation33], %s22277_s7, %s22277_s7, %s22276_s16  }
 0x2dc   : > { %s19364_s26 = scalar_lea.hbm %s22293_s9, 32 }
 0x2dd   : > { %p19365_p13 = scmp.ne.s32.totalorder %s22293_s9, %s19364_s26  ;;  %p19371_p9 = scmp.lt.u32.totalorder %s19364_s26, %s22293_s9 }
 0x2df   : > { %p19367_p6 = pnand %p19365_p13, %p20072_p0 }
 0x2e1   : > { %p19368_p5 = pneg %p19367_p6 }
 0x2e3   : > { %p19373_p10 = pnand %p19371_p9, %p19368_p5 }
 0x2e5   : > { %19376 = shalt.err (!%p19373_p10)
}
 0x2e6   : > { %s19377_s12 = scalar_lea.vmem %s1600_s11, 32  ;;  %p19385_p4 = scmp.lt.s32.totalorder %s1600_s11, %s1600_s11 }
 0x2e7   : > { %p19378_p1 = scmp.ne.s32.totalorder %s1600_s11, %s19377_s12  ;;  %p19386_p7 = scmp.lt.s32.totalorder %s19377_s12, %s19377_s12 }
 0x2e9   : > { %p19380_p2 = pnand %p19378_p1, %p20072_p0  ;;  %p19387_p8 = por %p19386_p7, %p19385_p4 }
 0x2eb   : > { %p19381_p3 = pneg %p19380_p2 }
 0x2ed   : > { %p19388_p11 = pnand %p19387_p8, %p19381_p3 }
 0x2ef   : > { %19391 = shalt.err (!%p19388_p11)
}
 0x2f0   : > { %s22294_s0 = sld [smem:[#allocation109_spill]]  ;;  %s19712_s23 = smov [#allocation40]  }
 0x2f1   : > { %18143 = dma.hbm_to_vmem [thread:$0]  (!%p20060_p12), %s22293_s9, 32, %s1600_s11, [#allocation36], %s22277_s7, %s22277_s7, %s22276_s16  }
 0x2f2   : > { %s1625_s4 = sshll.u32 %s19712_s23, 4  ;;  %s19713_s26 = smov [#allocation43]   ;;  %s1626_s4 = int_to_ptr.vmem [resolvable:$true] %s1625_s4 }
 0x2f3   : > { %s1655_s3 = sshll.u32 %s19713_s26, 4  ;;  %s1656_s3 = int_to_ptr.vmem [resolvable:$true] %s1655_s3 }
 0x2f6   : > { %s22295_s2 = smov %s22294_s0  ;;  %s19392_s12 = scalar_lea.hbm %s22294_s0, 32 }
 0x2f7   : > { %p19393_p13 = scmp.ne.s32.totalorder %s22295_s2, %s19392_s12  ;;  %p19399_p9 = scmp.lt.u32.totalorder %s19392_s12, %s22295_s2 }
 0x2f9   : > { %p19395_p6 = pnand %p19393_p13, %p20072_p0 }
 0x2fb   : > { %p19396_p5 = pneg %p19395_p6 }
 0x2fd   : > { %p19401_p10 = pnand %p19399_p9, %p19396_p5 }
 0x2ff   : > { %19404 = shalt.err (!%p19401_p10)
}
 0x300   : > { %s19405_s5 = scalar_lea.vmem %s1626_s4, 32  ;;  %p19413_p4 = scmp.lt.s32.totalorder %s1626_s4, %s1626_s4 }
 0x301   : > { %p19406_p1 = scmp.ne.s32.totalorder %s1626_s4, %s19405_s5  ;;  %p19414_p7 = scmp.lt.s32.totalorder %s19405_s5, %s19405_s5 }
 0x303   : > { %p19408_p2 = pnand %p19406_p1, %p20072_p0  ;;  %p19415_p8 = por %p19414_p7, %p19413_p4 }
 0x305   : > { %p19409_p3 = pneg %p19408_p2 }
 0x307   : > { %p19416_p11 = pnand %p19415_p8, %p19409_p3 }
 0x309   : > { %19419 = shalt.err (!%p19416_p11)
}
 0x30a   : > { %s22296_s11 = sld [smem:[#allocation112_spill]] }
 0x30b   : > { %18149 = dma.hbm_to_vmem [thread:$0]  (!%p20060_p12), %s22295_s2, 32, %s1626_s4, [#allocation39], %s22277_s7, %s22277_s7, %s22276_s16  }
 0x310   : > { %s19420_s0 = scalar_lea.hbm %s22296_s11, 16 }
 0x311   : > { %p19421_p13 = scmp.ne.s32.totalorder %s22296_s11, %s19420_s0  ;;  %p19427_p9 = scmp.lt.u32.totalorder %s19420_s0, %s22296_s11 }
 0x313   : > { %p19423_p6 = pnand %p19421_p13, %p20072_p0 }
 0x315   : > { %p19424_p5 = pneg %p19423_p6 }
 0x317   : > { %p19429_p10 = pnand %p19427_p9, %p19424_p5 }
 0x319   : > { %19432 = shalt.err (!%p19429_p10)
}
 0x31a   : > { %s19433_s5 = scalar_lea.vmem %s1656_s3, 16  ;;  %s19440_s23 = scalar_lea.vmem %s1656_s3, 32 }
 0x31b   : > { %p19434_p1 = scmp.ne.s32.totalorder %s1656_s3, %s19433_s5  ;;  %p19441_p4 = scmp.lt.s32.totalorder %s1656_s3, %s1656_s3 }
 0x31c   : > { %p19442_p7 = scmp.lt.s32.totalorder %s19440_s23, %s19433_s5 }
 0x31d   : > { %p19436_p2 = pnand %p19434_p1, %p20072_p0 }
 0x31e   : > { %p19443_p8 = por %p19442_p7, %p19441_p4 }
 0x31f   : > { %p19437_p3 = pneg %p19436_p2 }
 0x321   : > { %p19444_p11 = pnand %p19443_p8, %p19437_p3 }
 0x323   : > { %19447 = shalt.err (!%p19444_p11)
}
 0x324   : > { %s22297_s16 = sld [smem:[#allocation113_spill]]  ;;  %s19714_s7 = smov [#allocation44]  }
 0x325   : > { %18155 = dma.hbm_to_vmem [thread:$0]  (!%p20060_p12), %s22296_s11, 16, %s1656_s3, [#allocation42]  }
 0x326   : > { %s1666_s4 = sshll.u32 %s19714_s7, 4  ;;  %s1667_s4 = int_to_ptr.vmem [resolvable:$true] %s1666_s4 }
 0x32a   : > { %s19448_s26 = scalar_lea.hbm %s22297_s16, 16 }
 0x32b   : > { %p19449_p13 = scmp.ne.s32.totalorder %s22297_s16, %s19448_s26  ;;  %p19455_p9 = scmp.lt.u32.totalorder %s19448_s26, %s22297_s16 }
 0x32d   : > { %p19451_p6 = pnand %p19449_p13, %p20072_p0 }
 0x32f   : > { %p19452_p5 = pneg %p19451_p6 }
 0x331   : > { %p19457_p10 = pnand %p19455_p9, %p19452_p5 }
 0x333   : > { %19460 = shalt.err (!%p19457_p10)
}
 0x334   : > { %s19461_s12 = scalar_lea.vmem %s1667_s4, 16  ;;  %s19468_s0 = scalar_lea.vmem %s1667_s4, 32 }
 0x335   : > { %p19462_p1 = scmp.ne.s32.totalorder %s1667_s4, %s19461_s12  ;;  %p19469_p4 = scmp.lt.s32.totalorder %s1667_s4, %s1667_s4 }
 0x336   : > { %p19470_p7 = scmp.lt.s32.totalorder %s19468_s0, %s19461_s12 }
 0x337   : > { %p19464_p2 = pnand %p19462_p1, %p20072_p0 }
 0x338   : > { %p19471_p8 = por %p19470_p7, %p19469_p4 }
 0x339   : > { %p19465_p3 = pneg %p19464_p2 }
 0x33b   : > { %p19472_p11 = pnand %p19471_p8, %p19465_p3 }
 0x33d   : > { %19475 = shalt.err (!%p19472_p11)
}
 0x33e   : > { %18158 = dma.hbm_to_vmem [thread:$0]  (!%p20060_p12), %s22297_s16, 16, %s1667_s4, [#allocation45]  }
 0x33f   : > { %p22298_p13 = scmp.ne.s32.totalorder %s22271_s18, 0 }
 0x340   : > { %p22299_p6 = scmp.eq.s32.totalorder (!%p22298_p13), %s20022_s28, 0 }
 0x341   : > { %1699 = sbr.rel (%p22298_p13) target bundleno = 25126 (0x6226), region = 220 }
 0x348   : > { %19549 = dma.done.wait (%p22299_p6), [#allocation3], 32   ;;  %p22300_p5 = pmov %p22299_p6 }
 0x34a   : > { %19551 = vsyncadd (%p22300_p5), [#allocation3], 4294967264  ;;  %p22301_p0 = pmov %p22300_p5 }
 0x34c   : > { %19553 = dma.done.wait (%p22301_p0), [#allocation6], 64   ;;  %p22302_p9 = pmov %p22301_p0 }
 0x34d   : > { %p22303_p10 = pmov %p22301_p0 }
 0x34e   : > { %19555 = vsyncadd (%p22302_p9), [#allocation6], 4294967232 }
 0x34f   : > { %19557 = dma.done.wait (%p22303_p10), [#allocation9], 544   ;;  %p22304_p12 = pmov %p22301_p0 }
 0x350   : > { %p22305_p1 = pmov %p22301_p0 }
 0x351   : > { %19559 = vsyncadd (%p22304_p12), [#allocation9], 4294966752 }
 0x352   : > { %19561 = dma.done.wait (%p22305_p1), [#allocation12], 64   ;;  %p22306_p2 = pmov %p22301_p0 }
 0x353   : > { %p22307_p3 = pmov %p22301_p0 }
 0x354   : > { %19563 = vsyncadd (%p22306_p2), [#allocation12], 4294967232 }
 0x355   : > { %19565 = dma.done.wait (%p22307_p3), [#allocation15], 528   ;;  %p22308_p4 = pmov %p22301_p0 }
 0x356   : > { %p22309_p7 = pmov %p22301_p0 }
 0x357   : > { %19567 = vsyncadd (%p22308_p4), [#allocation15], 4294966768 }
 0x358   : > { %19569 = dma.done.wait (%p22309_p7), [#allocation18], 64   ;;  %p22310_p8 = pmov %p22301_p0 }
 0x359   : > { %p22311_p11 = pmov %p22301_p0 }
 0x35a   : > { %19571 = vsyncadd (%p22310_p8), [#allocation18], 4294967232 }
 0x35b   : > { %19573 = dma.done.wait (%p22311_p11), [#allocation21], 544   ;;  %p22312_p13 = pmov %p22301_p0 }
 0x35c   : > { %p22313_p6 = pmov %p22301_p0 }
 0x35d   : > { %19575 = vsyncadd (%p22312_p13), [#allocation21], 4294966752 }
 0x35e   : > { %19577 = dma.done.wait (%p22313_p6), [#allocation24], 544   ;;  %p22314_p5 = pmov %p22301_p0 }
 0x360   : > { %19579 = vsyncadd (%p22314_p5), [#allocation24], 4294966752 }
 0x361   : > { %19581 = dma.done.wait (%p22301_p0), [#allocation27], 64   ;;  %p22315_p9 = pmov %p22301_p0 }
 0x362   : > { %p22316_p10 = pmov %p22301_p0 }
 0x363   : > { %19583 = vsyncadd (%p22315_p9), [#allocation27], 4294967232 }
 0x364   : > { %19585 = dma.done.wait (%p22316_p10), [#allocation30], 544   ;;  %p22317_p12 = pmov %p22301_p0 }
 0x365   : > { %p22318_p1 = pmov %p22301_p0 }
 0x366   : > { %19587 = vsyncadd (%p22317_p12), [#allocation30], 4294966752 }
 0x367   : > { %19589 = dma.done.wait (%p22318_p1), [#allocation33], 544   ;;  %p22319_p2 = pmov %p22301_p0 }
 0x368   : > { %p22320_p3 = pmov %p22301_p0 }
 0x369   : > { %19591 = vsyncadd (%p22319_p2), [#allocation33], 4294966752 }
 0x36a   : > { %19593 = dma.done.wait (%p22320_p3), [#allocation36], 64   ;;  %p22321_p4 = pmov %p22301_p0 }
 0x36b   : > { %p22322_p7 = pmov %p22301_p0 }
 0x36c   : > { %19595 = vsyncadd (%p22321_p4), [#allocation36], 4294967232 }
 0x36d   : > { %19597 = dma.done.wait (%p22322_p7), [#allocation39], 544   ;;  %p22323_p8 = pmov %p22301_p0 }
 0x36e   : > { %p22324_p11 = pmov %p22301_p0 }
 0x36f   : > { %19599 = vsyncadd (%p22323_p8), [#allocation39], 4294966752 }
 0x370   : > { %19601 = dma.done.wait (%p22324_p11), [#allocation42], 48   ;;  %p22325_p13 = pmov %p22301_p0 }
 0x371   : > { %p22326_p6 = pmov %p22301_p0 }
 0x372   : > { %19603 = vsyncadd (%p22325_p13), [#allocation42], 4294967248 }
 0x373   : > { %19605 = dma.done.wait (%p22326_p6), [#allocation45], 16   ;;  %p22327_p5 = pmov %p22301_p0 }
 0x374   : > { %s22328_s18 = sld [smem:[#allocation66_spill]]  ;;  %s22329_s10 = sld [smem:[#allocation70_spill]]  ;;  %vm2005_vm0 = vcmask 261120   ;;  %v19715_v8 = vmov 0.0   ;;  %vm19716_vm1 = vmmov 0   ;;  %vm2099_vm2 = vcmask 64512  }
 0x375   : > { %19607 = vsyncadd (%p22327_p5), [#allocation45], 4294967280  ;;  %p1935_p0 = scmp.lt.s32.totalorder %s20022_s28, 1  ;;  %s22330_s23 = sld [smem:[#allocation68_spill]]  ;;  %16734 = vmatprep.subr.bf16.mxu0 %v19715_v8  ;;  %16738 = vmatprep.mubr.msk.bf16.mxu0 %vm19716_vm1, %v19715_v8  ;;  %v15861_v20 = vld [vmem:[#allocation2] ss:$0 sm:$0xff]  ;;  %v1945_v28 = vlaneseq }
 0x376   : > { %s22332_s4 = sld [smem:[#allocation69_spill]]  ;;  %16742 = vmatprep.subr.mxu1 %v19715_v8  ;;  %16744 = vmatprep.mubr.msk.f32.mxu1 %vm19716_vm1, %v19715_v8  ;;  %s22176_s26 = smov 64   ;;  %vm2777_vm6 = vcmask 130048   ;;  %vm2779_vm7 = vcmask 195584   ;;  %vm3509_vm8 = vcmask 1043456   ;;  %vm3502_vm10 = vcmask 31744  }
 0x377   : > { %s20504_s1 = scalar_select %p1935_p0, %s20022_s28, 1  ;;  %v1946_v29 = vshrl.u32 %v1945_v28, 7  ;;  %v1948_v30 = vand.u32 127, %v1945_v28  ;;  %vm20704_vm9 = vmpackc.low %vm2777_vm6, %vm2777_vm6  ;;  %vm5218_vm11 = vcmask 523264  }
 0x378   : > { %s22174_s12 = smov 96   ;;  %s22158_s0 = smov 88  }
 0x379   : > { %s22151_s3 = sshll.u32 %s20504_s1, 3  ;;  %v15858_v31 = vadd.s32 4294967292, %v1946_v29  ;;  %vm1949_vm3 = vcmp.le.s32.totalorder %v1948_v30, %v1946_v29  ;;  %s22346_s2 = smov 112  }
 0x37a   : > { %s1938_s5 = scalar_lea.vmem %s22328_s18, %s22151_s3  ;;  %v18366_v7 = vld [vmem:[%s22329_s10] sm:$0xff]   ;;  %v18367_v9 = vld [vmem:[%s22329_s10 + $0x8] sm:$0xff]   ;;  %s22152_s18 = smov 120  }
 0x37b   : > { %v20510_v0 = vld [vmem:[%s1938_s5] sm:$0xff]  ;;  %s22331_s7 = smov %s22330_s23  ;;  %16735 = vmatpush3.bf16.msra.mxu0 %v18366_v7  ;;  %vm1951_vm4 = vcmp.gt.s32.totalorder %v1948_v30, %v15858_v31  ;;  %s22166_s5 = smov 80  }
 0x37c   : > { %v2006_v1 = vsel %vm2005_vm0, %v20510_v0, 0.0  ;;  %16736 = vmatprep.subr.bf16.mxu0 %v19715_v8  ;;  %v15859_v14 = vld [vmem:[%s22330_s23] ss:$0 sm:$0xff]  ;;  %vm20548_vm5 = vmand %vm1949_vm3, %vm1951_vm4  ;;  %s22178_s23 = smov 112   ;;  %s22156_s3 = smov 72  }
 0x37d   : > { %2007 = vadd.xlane.f32.xlu0 %v2006_v1  ;;  %v15860_v16 = vld [vmem:[%s22332_s4] ss:$0 sm:$0xff]  ;;  %s22347_s9 = sld [smem:[#allocation78_spill]]  ;;  %s22348_s11 = smov 16  }
 0x37e   : > { %s22349_s13 = sld [smem:[#allocation83_spill]]  ;;  %s22350_s14 = sld [smem:[#allocation84_spill]] }
 0x37f   : > { %16737 = vmatpush3.bf16.msra.mxu0 %v18367_v9  ;;  %s22351_s16 = sld [smem:[#allocation87_spill]]  ;;  %s22352_s17 = sld [smem:[#allocation86_spill]] }
 0x380   : > { %16757 = vmatprep.subr.mxu0 %v19715_v8  ;;  %s22353_s21 = smov 64   ;;  %s22354_s24 = sld [smem:[#allocation88_spill]] }
 0x381   : > { %s22358_s25 = smov 104   ;;  %s22359_s27 = smov 40  }
 0x382   : > { %s22360_s29 = smov 56   ;;  %s22361_s30 = smov 8  }
 0x383   : > { %s22362_s20 = smov 24   ;;  %p22370_p10 = scmp.ne.s32.totalorder %s22268_s15, 0 }
 0x40a   : > { %v2008_v2 = vpop.xlane.xlu0 %2007 }
 0x40b   : > { %v2010_v3 = vmul.f32 0.03125, %v2008_v2 }
 0x40d   : > { %v2011_v4 = vsub.f32 %v20510_v0, %v2010_v3 }
 0x40f   : > { %v2012_v5 = vmul.f32 %v2011_v4, %v2011_v4 }
 0x411   : > { %v2013_v6 = vsel %vm2005_vm0, %v2012_v5, 0.0 }
 0x412   : > { %2014 = vadd.xlane.f32.xlu0 %v2013_v6 }
 0x49f   : > { %v2015_v10 = vpop.xlane.xlu0 %2014 }
 0x4a0   : > { %v2016_v11 = vmul.f32 0.03125, %v2015_v10 }
 0x4a2   : > { %v2017_v12 = vadd.f32 1e-05, %v2016_v11 }
 0x4a4   : > { %18424 = vrsqrt.f32 %v2017_v12 }
 0x4ae   : > { %v18425_v13 = vpop.eup %18424 }
 0x4af   : > { %v2019_v15 = vmul.f32 %v18425_v13, %v2011_v4 }
 0x4b1   : > { %v2026_v17 = vmul.f32 %v15859_v14, %v2019_v15 }
 0x4b3   : > { %v2033_v18 = vadd.f32 %v15860_v16, %v2026_v17 }
 0x4b5   : > { %v2034_v19 = vpack.c.bf16 %v2033_v18, %v2033_v18 }
 0x4b7   : > { %16739 = vmatmul.mubr.msk.bf16.vlgmr.msra.gmra.mrb[0].mxu0 %vm2005_vm0, %v2034_v19 }
 0x4b8   : > { %16759 = vmatprep.mubr.msk.f32.mxu0 %vm19716_vm1, %v19715_v8 }
 0x58a   : > { %v2090_v21 = vpop.f32.mrb[0].mxu0 }
 0x58b   : > { %v20531_v22 = vadd.f32 %v15861_v20, %v2090_v21  ;;  %v16740_v23 = vpop.f32.mrb[1].mxu0 }
 0x58c   : > { %v2093_v24 = vpop.f32.mrb[2].mxu0 }
 0x58d   : > { %2187 = vrot.lane.b32.xlu0 %v20531_v22, %s22176_s26  ;;  %2097 = vrot.lane.b32.xlu1 %v20531_v22, %s22174_s12  ;;  %v16741_v25 = vpop.f32.mrb[3].mxu0 }
 0x591   : > { %2265 = vrot.lane.b32.xlu0 %v20531_v22, %s22158_s0  ;;  %s22162_s0 = smov 56  }
 0x595   : > { %2263 = vrot.lane.b32.xlu0 %v20531_v22, %s22152_s18  ;;  %s22154_s18 = smov 104  }
 0x5ff   : > { %v2098_v26 = vpop.permute.xlu1 %2097  ;;  %v2188_v27 = vpop.permute.xlu0 %2187 }
 0x600   : > { %16743 = vmatpush3.xpose.msk.msra.mxu1 %vm2099_vm2, %v2098_v26 }
 0x601   : > { %16747 = vmatprep.subr.mxu1 %v19715_v8 }
 0x603   : > { %16745 = vmatmul.mubr.msk.f32.vlgmr.msra.gmra.mrb[0].mxu1 %vm2099_vm2, %v20531_v22  ;;  %v2266_v43 = vpop.permute.xlu0 %2265 }
 0x604   : > { %16748 = vmatpush3.msra.mxu1 %v2188_v27  ;;  %16749 = vmatprep.mubr.msk.f32.mxu1 %vm19716_vm1, %v19715_v8 }
 0x605   : > { %16752 = vmatprep.subr.mxu1 %v19715_v8 }
 0x607   : > { %v2264_v44 = vpop.permute.xlu0 %2263 }
 0x6d6   : > { %v2170_v32 = vpop.f32.mrb[0].mxu1 }
 0x6d7   : > { %v2174_v34 = vmul.f32 0.35355338, %v2170_v32  ;;  %v16746_v35 = vpop.f32.mrb[1].mxu1 }
 0x6d9   : > { %v2175_v36 = vsel %vm20548_vm5, %v2174_v34, -1e+30 }
 0x6da   : > { %v2176_v37 = vsel %vm2099_vm2, %v2175_v36, -inf }
 0x6db   : > { %2177 = vmax.xlane.f32.xlu1 %v2176_v37 }
 0x6ec   : > { %2432 = vrot.lane.b32.xlu1 %v20531_v22, %s22166_s5  ;;  %s22168_s5 = smov 24  }
 0x768   : > { %v2178_v38 = vpop.xlane.xlu1 %2177 }
 0x769   : > { %v2179_v39 = vsub.f32 %v2175_v36, %v2178_v38 }
 0x76b   : > { %v2180_v40 = vmul.f32 1.442695, %v2179_v39 }
 0x76c   : > { %v2433_v49 = vpop.permute.xlu1 %2432 }
 0x76d   : > { %18426 = vpow2.f32 %v2180_v40 }
 0x777   : > { %v18427_v41 = vpop.eup %18426 }
 0x778   : > { %v2182_v42 = vsel %vm2099_vm2, %v18427_v41, 0.0 }
 0x779   : > { %2183 = vadd.xlane.f32.xlu0 %v2182_v42 }
 0x78f   : > { %2430 = vrot.lane.b32.xlu0 %v20531_v22, %s22178_s23 }
 0x793   : > { %2599 = vrot.lane.b32.xlu0 %v20531_v22, %s22156_s3  ;;  %s22164_s3 = smov 40  }
 0x797   : > { %2597 = vrot.lane.b32.xlu0 %v20531_v22, %s22154_s18  ;;  %s22160_s18 = smov 48  }
 0x806   : > { %v2184_v45 = vpop.xlane.xlu0 %2183 }
 0x807   : > { %18428 = vrcp.f32 %v2184_v45 }
 0x80a   : > { %v2431_v48 = vpop.permute.xlu0 %2430 }
 0x80e   : > { %v2600_v50 = vpop.permute.xlu0 %2599 }
 0x811   : > { %v18429_v46 = vpop.eup %18428 }
 0x812   : > { %v2186_v47 = vmul.f32 %v18429_v46, %v18427_v41  ;;  %v2598_v51 = vpop.permute.xlu0 %2597 }
 0x814   : > { %16750 = vmatmul.mubr.msk.f32.vlgmr.msra.gmra.mrb[2].mxu1 %vm2099_vm2, %v2186_v47 }
 0x815   : > { %16753 = vmatpush3.xpose.msk.msra.mxu1 %vm2099_vm2, %v2266_v43  ;;  %16754 = vmatprep.mubr.msk.f32.mxu1 %vm19716_vm1, %v19715_v8 }
 0x816   : > { %16762 = vmatprep.subr.mxu1 %v19715_v8 }
 0x818   : > { %16755 = vmatmul.mubr.msk.f32.vlgmr.msra.gmra.mrb[4].mxu1 %vm2099_vm2, %v2264_v44 }
 0x819   : > { %16763 = vmatpush3.xpose.msk.msra.mxu1 %vm2099_vm2, %v2433_v49  ;;  %16764 = vmatprep.mubr.msk.f32.mxu1 %vm19716_vm1, %v19715_v8 }
 0x81a   : > { %16772 = vmatprep.subr.mxu1 %v19715_v8 }
 0x81c   : > { %16765 = vmatmul.mubr.msk.f32.vlgmr.msra.gmra.mrb[6].mxu1 %vm2099_vm2, %v2431_v48 }
 0x81d   : > { %16773 = vmatpush3.xpose.msk.msra.mxu1 %vm2099_vm2, %v2600_v50  ;;  %16774 = vmatprep.mubr.msk.f32.mxu1 %vm19716_vm1, %v19715_v8  ;;  %v15877_v50 = vld [vmem:[#allocation5] ss:$0 sm:$0xff] }
 0x81e   : > { %16782 = vmatprep.subr.bf16.mxu1 %v19715_v8 }
 0x820   : > { %16775 = vmatmul.mubr.msk.f32.vlgmr.msra.gmra.mrb[8].mxu1 %vm2099_vm2, %v2598_v51 }
 0x821   : > { %16786 = vmatprep.mubr.msk.bf16.mxu1 %vm19716_vm1, %v19715_v8 }
 0x8e7   : > { %v20582_v52 = vpop.f32.mrb[2].mxu1 }
 0x8e8   : > { %v16751_v53 = vpop.f32.mrb[3].mxu1 }
 0x8eb   : > { %v2337_v54 = vpop.f32.mrb[4].mxu1 }
 0x8ec   : > { %v2341_v55 = vmul.f32 0.35355338, %v2337_v54  ;;  %v16756_v56 = vpop.f32.mrb[5].mxu1 }
 0x8ee   : > { %v2342_v57 = vsel %vm20548_vm5, %v2341_v55, -1e+30 }
 0x8ef   : > { %v2504_v58 = vpop.f32.mrb[6].mxu1  ;;  %v2343_v59 = vsel %vm2099_vm2, %v2342_v57, -inf }
 0x8f0   : > { %v2508_v60 = vmul.f32 0.35355338, %v2504_v58  ;;  %2344 = vmax.xlane.f32.xlu0 %v2343_v59  ;;  %v16766_v61 = vpop.f32.mrb[7].mxu1 }
 0x8f2   : > { %v2509_v62 = vsel %vm20548_vm5, %v2508_v60, -1e+30 }
 0x8f3   : > { %v2671_v63 = vpop.f32.mrb[8].mxu1  ;;  %v2510_v1 = vsel %vm2099_vm2, %v2509_v62, -inf }
 0x8f4   : > { %v2675_v2 = vmul.f32 0.35355338, %v2671_v63  ;;  %2511 = vmax.xlane.f32.xlu1 %v2510_v1  ;;  %v16776_v3 = vpop.f32.mrb[9].mxu1  ;;  %v18370_v63 = vld [vmem:[#allocation10] sm:$0xff]   ;;  %v18371_v1 = vld [vmem:[#allocation10 + $0x8] sm:$0xff]  }
 0x8f6   : > { %v2676_v4 = vsel %vm20548_vm5, %v2675_v2, -1e+30 }
 0x8f7   : > { %v2677_v5 = vsel %vm2099_vm2, %v2676_v4, -inf }
 0x8f8   : > { %2678 = vmax.xlane.f32.xlu0 %v2677_v5  ;;  %v15881_v5 = vld [vmem:[#allocation7] ss:$0 sm:$0xff] }
 0x905   : > { %2521 = vrot.lane.b32.xlu1 %v20531_v22, %s22160_s18  ;;  %s22335_s18 = sld [smem:[#allocation72_spill]] }
 0x90b   : > { %v18368_v35 = vld [vmem:[%s22335_s18] sm:$0xff]   ;;  %v18369_v36 = vld [vmem:[%s22335_s18 + $0x8] sm:$0xff]  }
 0x90c   : > { %16783 = vmatpush3.bf16.msra.mxu1 %v18368_v35 }
 0x90d   : > { %16784 = vmatprep.subr.bf16.mxu1 %v19715_v8 }
 0x910   : > { %16785 = vmatpush3.bf16.msra.mxu1 %v18369_v36 }
 0x97d   : > { %v2345_v6 = vpop.xlane.xlu0 %2344 }
 0x97e   : > { %v2346_v7 = vsub.f32 %v2342_v57, %v2345_v6 }
 0x980   : > { %v2347_v9 = vmul.f32 1.442695, %v2346_v7  ;;  %v15882_v7 = vld [vmem:[#allocation8] ss:$0 sm:$0xff] }
 0x981   : > { %v2512_v10 = vpop.xlane.xlu1 %2511 }
 0x982   : > { %18430 = vpow2.f32 %v2347_v9  ;;  %v2513_v11 = vsub.f32 %v2509_v62, %v2512_v10 }
 0x984   : > { %v2514_v12 = vmul.f32 1.442695, %v2513_v11 }
 0x985   : > { %v2679_v13 = vpop.xlane.xlu0 %2678  ;;  %v2522_v24 = vpop.permute.xlu1 %2521 }
 0x986   : > { %18432 = vpow2.f32 %v2514_v12  ;;  %v2680_v14 = vsub.f32 %v2676_v4, %v2679_v13  ;;  %v15883_v12 = vld [vmem:[#allocation11] ss:$0 sm:$0xff] }
 0x988   : > { %v2681_v15 = vmul.f32 1.442695, %v2680_v14 }
 0x98a   : > { %18434 = vpow2.f32 %v2681_v15 }
 0x98c   : > { %v18431_v16 = vpop.eup %18430 }
 0x98d   : > { %v2349_v17 = vsel %vm2099_vm2, %v18431_v16, 0.0 }
 0x98e   : > { %2350 = vadd.xlane.f32.xlu0 %v2349_v17 }
 0x990   : > { %v18433_v18 = vpop.eup %18432 }
 0x991   : > { %v2516_v19 = vsel %vm2099_vm2, %v18433_v18, 0.0 }
 0x992   : > { %2517 = vadd.xlane.f32.xlu0 %v2516_v19 }
 0x994   : > { %v18435_v20 = vpop.eup %18434 }
 0x995   : > { %v2683_v21 = vsel %vm2099_vm2, %v18435_v20, 0.0 }
 0x996   : > { %2684 = vadd.xlane.f32.xlu1 %v2683_v21 }
 0x9a7   : > { %2688 = vrot.lane.b32.xlu1 %v20531_v22, %s22164_s3  ;;  %s22172_s3 = smov 16  }
 0x9a8   : > { %2354 = vrot.lane.b32.xlu0 %v20531_v22, %s22162_s0  ;;  %s22170_s0 = smov 8  }
 0xa1b   : > { %v2351_v23 = vpop.xlane.xlu0 %2350 }
 0xa1c   : > { %18436 = vrcp.f32 %v2351_v23 }
 0xa1f   : > { %v2518_v25 = vpop.xlane.xlu0 %2517 }
 0xa20   : > { %18438 = vrcp.f32 %v2518_v25 }
 0xa23   : > { %v2685_v26 = vpop.xlane.xlu1 %2684  ;;  %v2355_v27 = vpop.permute.xlu0 %2354 }
 0xa24   : > { %18440 = vrcp.f32 %v2685_v26  ;;  %16758 = vmatpush3.msra.mxu0 %v2355_v27 }
 0xa25   : > { %16767 = vmatprep.subr.mxu0 %v19715_v8 }
 0xa26   : > { %v18437_v28 = vpop.eup %18436 }
 0xa27   : > { %v2353_v29 = vmul.f32 %v18437_v28, %v18431_v16  ;;  %v2689_v31 = vpop.permute.xlu1 %2688 }
 0xa29   : > { %16760 = vmatmul.mubr.msk.f32.vlgmr.msra.gmra.mrb[4].mxu0 %vm2099_vm2, %v2353_v29  ;;  %v19731_v29 = vmov 0.0|0.0  }
 0xa2a   : > { %v18439_v30 = vpop.eup %18438  ;;  %16768 = vmatpush3.msra.mxu0 %v2522_v24  ;;  %16769 = vmatprep.mubr.msk.f32.mxu0 %vm19716_vm1, %v19715_v8 }
 0xa2b   : > { %16777 = vmatprep.subr.mxu0 %v19715_v8  ;;  %v2520_v22 = vmul.f32 %v18439_v30, %v18433_v18  ;;  %17734 = vmatprep.subr.bf16.mxu1 %v19731_v29 }
 0xa2d   : > { %16770 = vmatmul.mubr.msk.f32.vlgmr.msra.gmra.mrb[6].mxu0 %vm2099_vm2, %v2520_v22 }
 0xa2e   : > { %v18441_v32 = vpop.eup %18440  ;;  %16778 = vmatpush3.msra.mxu0 %v2689_v31  ;;  %16779 = vmatprep.mubr.msk.f32.mxu0 %vm19716_vm1, %v19715_v8 }
 0xa2f   : > { %v2687_v34 = vmul.f32 %v18441_v32, %v18435_v20  ;;  %16790 = vmatprep.subr.bf16.mxu0 %v19715_v8  ;;  %v19732_v32 = vmov 96  }
 0xa30   : > { %18357 = vset.pattern.permute.xlu1 %v19732_v32 }
 0xa31   : > { %16780 = vmatmul.mubr.msk.f32.vlgmr.msra.gmra.mrb[8].mxu0 %vm2099_vm2, %v2687_v34 }
 0xa32   : > { %16794 = vmatprep.mubr.msk.bf16.mxu0 %vm19716_vm1, %v19715_v8  ;;  %16791 = vmatpush3.bf16.msra.mxu0 %v18370_v63 }
 0xa33   : > { %16792 = vmatprep.subr.bf16.mxu0 %v19715_v8 }
 0xa36   : > { %16793 = vmatpush3.bf16.msra.mxu0 %v18371_v1 }
 0xa37   : > { %17737 = vmatprep.subr.bf16.mxu0 %v19731_v29 }
 0xafc   : > { %v2426_v37 = vpop.f32.mrb[4].mxu0 }
 0xafd   : > { %2765 = vrot.lane.b32.xlu1 %v2426_v37, %s22170_s0  ;;  %v16761_v38 = vpop.f32.mrb[5].mxu0  ;;  %s22337_s0 = sld [smem:[#allocation82_spill]] }
 0xb00   : > { %v2593_v39 = vpop.f32.mrb[6].mxu0 }
 0xb01   : > { %2769 = vrot.lane.b32.xlu0 %v2593_v39, %s22172_s3  ;;  %v16771_v40 = vpop.f32.mrb[7].mxu0 }
 0xb03   : > { %s22338_s3 = smov %s22337_s0  ;;  %v20653_v28 = vld [vmem:[%s22337_s0] sm:$0xff]  ;;  %s22339_s0 = sld [smem:[#allocation81_spill]] }
 0xb04   : > { %v2760_v41 = vpop.f32.mrb[8].mxu0  ;;  %v20660_v22 = vld [vmem:[%s22338_s3 + $0x8] sm:$0xff] }
 0xb05   : > { %2773 = vrot.lane.b32.xlu1 %v2760_v41, %s22168_s5  ;;  %v16781_v42 = vpop.f32.mrb[9].mxu0  ;;  %s22336_s5 = sld [smem:[#allocation80_spill]]  ;;  %v17738_v31 = vpack.c.bf16 %v20660_v22, %v20653_v28 }
 0xb0b   : > { %v20647_v26 = vld [vmem:[%s22336_s5] sm:$0xff]  ;;  %v20650_v27 = vld [vmem:[%s22336_s5 + $0x8] sm:$0xff] }
 0xb0c   : > { %v17735_v30 = vpack.c.bf16 %v20650_v27, %v20647_v26 }
 0xb6f   : > { %v2766_v43 = vpop.permute.xlu1 %2765 }
 0xb70   : > { %v2776_v45 = vsel %vm2099_vm2, %v20582_v52, %v2766_v43 }
 0xb73   : > { %v2770_v44 = vpop.permute.xlu0 %2769 }
 0xb74   : > { %v2778_v46 = vsel %vm2777_vm6, %v2776_v45, %v2770_v44 }
 0xb77   : > { %v2774_v47 = vpop.permute.xlu1 %2773 }
 0xb78   : > { %v2780_v48 = vsel %vm2779_vm7, %v2778_v46, %v2774_v47 }
 0xb79   : > { %v2781_v49 = vpack.c.bf16 %v2780_v48, %v2780_v48 }
 0xb7b   : > { %16787 = vmatmul.mubr.msk.bf16.vlgmr.msra.gmra.mrb[12].mxu1 %vm2005_vm0, %v2781_v49 }
 0xb7c   : > { %16802 = vmatprep.mubr.msk.f32.mxu1 %vm19716_vm1, %v19715_v8  ;;  %17736 = vmatpush3.bf16.msra.mxu1 %v17735_v30 }
 0xb7d   : > { %17740 = vmatprep.subr.bf16.mxu1 %v19731_v29 }
 0xc4e   : > { %v2837_v51 = vpop.f32.mrb[12].mxu1 }
 0xc4f   : > { %v2838_v53 = vadd.f32 %v15877_v50, %v2837_v51  ;;  %v16788_v54 = vpop.f32.mrb[13].mxu1  ;;  %v20686_v50 = vld [vmem:[%s22339_s0] sm:$0xff] }
 0xc50   : > { %v2840_v55 = vpop.f32.mrb[14].mxu1 }
 0xc51   : > { %v20628_v56 = vadd.f32 %v2838_v53, %v20510_v0  ;;  %v16789_v52 = vpop.f32.mrb[15].mxu1 }
 0xc53   : > { %v2844_v57 = vsel %vm2005_vm0, %v20628_v56, 0.0 }
 0xc54   : > { %2845 = vadd.xlane.f32.xlu0 %v2844_v57 }
 0xce1   : > { %v2846_v58 = vpop.xlane.xlu0 %2845 }
 0xce2   : > { %v2847_v59 = vmul.f32 0.03125, %v2846_v58 }
 0xce4   : > { %v2848_v60 = vsub.f32 %v20628_v56, %v2847_v59 }
 0xce6   : > { %v2849_v61 = vmul.f32 %v2848_v60, %v2848_v60 }
 0xce8   : > { %v2850_v62 = vsel %vm2005_vm0, %v2849_v61, 0.0 }
 0xce9   : > { %2851 = vadd.xlane.f32.xlu1 %v2850_v62 }
 0xd76   : > { %v2852_v0 = vpop.xlane.xlu1 %2851 }
 0xd77   : > { %v2853_v2 = vmul.f32 0.03125, %v2852_v0 }
 0xd79   : > { %v2854_v3 = vadd.f32 1e-05, %v2853_v2 }
 0xd7b   : > { %18442 = vrsqrt.f32 %v2854_v3 }
 0xd85   : > { %v18443_v4 = vpop.eup %18442 }
 0xd86   : > { %v2856_v6 = vmul.f32 %v18443_v4, %v2848_v60 }
 0xd88   : > { %v2863_v9 = vmul.f32 %v15881_v5, %v2856_v6 }
 0xd8a   : > { %v2870_v10 = vadd.f32 %v15882_v7, %v2863_v9 }
 0xd8c   : > { %v2871_v11 = vpack.c.bf16 %v2870_v10, %v2870_v10 }
 0xd8e   : > { %16795 = vmatmul.mubr.msk.bf16.vlgmr.msra.gmra.mrb[12].mxu0 %vm2005_vm0, %v2871_v11 }
 0xd8f   : > { %16809 = vmatprep.mubr.msk.f32.mxu0 %vm19716_vm1, %v19715_v8  ;;  %17739 = vmatpush3.bf16.msra.mxu0 %v17738_v31 }
 0xd90   : > { %17743 = vmatprep.subr.bf16.mxu0 %v19731_v29 }
 0xe61   : > { %v2927_v13 = vpop.f32.mrb[12].mxu0 }
 0xe62   : > { %v2928_v14 = vadd.f32 %v15883_v12, %v2927_v13  ;;  %v16796_v15 = vpop.f32.mrb[13].mxu0 }
 0xe63   : > { %v2930_v16 = vpop.f32.mrb[14].mxu0 }
 0xe64   : > { %v15887_v17 = vmul.f32 -1.442695, %v2928_v14  ;;  %v16797_v18 = vpop.f32.mrb[15].mxu0  ;;  %v2934_v34 = vand.u32 2147483647, %v2928_v14  ;;  %v2933_v47 = vmax.f32 %v2928_v14, 0.0 }
 0xe66   : > { %18444 = vpow2.f32 %v15887_v17  ;;  %v2935_v35 = vsub.f32 0.0, %v2934_v34 }
 0xe68   : > { %v2936_v36 = vmul.f32 1.442695, %v2935_v35 }
 0xe70   : > { %v18445_v19 = vpop.eup %18444 }
 0xe71   : > { %v2946_v20 = vadd.f32 1.0, %v18445_v19 }
 0xe73   : > { %18446 = vrcp.f32 %v2946_v20 }
 0xe74   : > { %18448 = vpow2.f32 %v2936_v36 }
 0xe7d   : > { %v18447_v21 = vpop.eup %18446 }
 0xe7e   : > { %v20638_v23 = vmul.f32 %v18447_v21, %v2928_v14  ;;  %v18449_v37 = vpop.eup %18448 }
 0xe7f   : > { %v2938_v38 = vadd.f32 1.0, %v18449_v37 }
 0xe80   : > { %v20642_v24 = vmul.f32 %v20638_v23, %v20638_v23 }
 0xe81   : > { %18450 = vlog2.f32 %v2938_v38 }
 0xe82   : > { %v2951_v25 = vsel %vm2777_vm6, %v20642_v24, 0.0 }
 0xe83   : > { %2952 = vadd.xlane.f32.xlu0 %v2951_v25 }
 0xe8b   : > { %v18451_v43 = vpop.eup %18450 }
 0xe8c   : > { %v2940_v45 = vmul.f32 0.6931472, %v18451_v43 }
 0xe8e   : > { %v2941_v48 = vadd.f32 %v2940_v45, %v2933_v47 }
 0xe90   : > { %v20682_v49 = vmul.f32 0.01, %v2941_v48 }
 0xe99   : > { %2958 = vrot.lane.b32.xlu0 %v20642_v24, %s22174_s12  ;;  %s22340_s12 = smov %s22339_s0  ;;  %s22341_s0 = smov 96  }
 0xe9a   : > { %v20689_v51 = vld [vmem:[%s22340_s12 + $0x8] sm:$0xff] }
 0xe9b   : > { %v17741_v53 = vpack.c.bf16 %v20689_v51, %v20686_v50 }
 0xf10   : > { %v2953_v39 = vpop.xlane.xlu0 %2952 }
 0xf11   : > { %v2954_v40 = vadd.f32 1e-06, %v2953_v39 }
 0xf13   : > { %18452 = vrsqrt.f32 %v2954_v40 }
 0xf14   : > { %v2959_v41 = vpop.permute.xlu0 %2958 }
 0xf15   : > { %v2961_v42 = vsel %vm2777_vm6, %v2959_v41, 0.0  ;;  %v19733_v41 = vmov 97  }
 0xf16   : > { %2962 = vadd.xlane.f32.xlu1 %v2961_v42 }
 0xf1d   : > { %v18453_v44 = vpop.eup %18452 }
 0xf1e   : > { %v20671_v46 = vmul.f32 %v18453_v44, %v20638_v23 }
 0xf20   : > { %16803 = vmatmul.mubr.msk.f32.vlgmr.msra.gmra.mrb[10].mxu1 %vm2777_vm6, %v20671_v46  ;;  %16810 = vmatmul.mubr.msk.f32.vlgmr.msra.gmra.mrb[10].mxu0 %vm2777_vm6, %v20671_v46 }
 0xf21   : > { %16816 = vmatprep.mubr.msk.f32.mxu1 %vm19716_vm1, %v19715_v8  ;;  %17745 = vmatpush3.bf16.msra.mxu0 %v17735_v30 }
 0xf22   : > { %16823 = vmatprep.mubr.msk.f32.mxu0 %vm19716_vm1, %v19715_v8  ;;  %17749 = vmatprep.subr.bf16.mxu0 %v19731_v29 }
 0xf23   : > { %17742 = vmatpush3.bf16.msra.mxu1 %v17741_v53 }
 0xf24   : > { %17746 = vmatprep.subr.bf16.mxu1 %v19731_v29 }
 0xf27   : > { %2969 = vperm.xlu1 %18357, %v20682_v49  }
 0xfa3   : > { %v2963_v54 = vpop.xlane.xlu1 %2962 }
 0xfa4   : > { %v2964_v55 = vadd.f32 1e-06, %v2963_v54 }
 0xfa6   : > { %18454 = vrsqrt.f32 %v2964_v55 }
 0xfa7   : > { %v2970_v52 = vpop.permute.xlu1 %2969 }
 0xfa8   : > { %v2972_v57 = vmul.f32 %v2970_v52, %v20638_v23  ;;  %v3755_v52 = vrot.slane %v20671_v46, 4 }
 0xfaa   : > { %3351 = vrot.lane.b32.xlu1 %v2972_v57, %s22176_s26  ;;  %v20747_v57 = vld [vmem:[%s22336_s5 + $0x10] sm:$0xff]  ;;  %s22344_s26 = smov 80  }
 0xfb0   : > { %v18455_v58 = vpop.eup %18454 }
 0xfb1   : > { %v2966_v59 = vmul.f32 %v18455_v58, %v20638_v23 }
 0xfb3   : > { %3198 = vrot.lane.b32.xlu0 %v2966_v59, %s22341_s0 }
 0xff3   : > { %v3042_v60 = vpop.f32.mrb[10].mxu1  ;;  %v3112_v61 = vpop.f32.mrb[10].mxu0 }
 0xff4   : > { %v15890_v62 = vmul.f32 -1.442695, %v3042_v60  ;;  %v16804_v63 = vpop.f32.mrb[11].mxu1  ;;  %v16811_v1 = vpop.f32.mrb[11].mxu0 }
 0xff6   : > { %18456 = vpow2.f32 %v15890_v62 }
0x1000   : > { %v18457_v0 = vpop.eup %18456 }
0x1001   : > { %v3119_v2 = vadd.f32 1.0, %v18457_v0 }
0x1003   : > { %18458 = vrcp.f32 %v3119_v2 }
0x100d   : > { %v18459_v3 = vpop.eup %18458 }
0x100e   : > { %v3122_v4 = vmul.f32 %v18459_v3, %v3042_v60 }
0x1010   : > { %v3123_v5 = vmul.f32 %v3122_v4, %v3112_v61 }
0x1012   : > { %16817 = vmatmul.mubr.msk.f32.vlgmr.msra.gmra.mrb[16].mxu1 %vm2777_vm6, %v3123_v5 }
0x1013   : > { %17748 = vmatpush3.bf16.msra.mxu1 %v17738_v31  ;;  %16830 = vmatprep.mubr.msk.f32.mxu1 %vm19716_vm1, %v19715_v8 }
0x101c   : > { %v3352_v6 = vpop.permute.xlu1 %3351 }
0x101d   : > { %16840 = vmatprep.subr.msk.mxu1 %vm3509_vm8, %v3352_v6 }
0x1025   : > { %v3199_v9 = vpop.permute.xlu0 %3198 }
0x1026   : > { %16824 = vmatmul.mubr.msk.f32.vlgmr.msra.gmra.mrb[16].mxu0 %vm2777_vm6, %v3199_v9  ;;  %3438 = vxpose.xlu1.b32.start.end [1/1] (short) (narrow) %v3199_v9, 16 }
0x1027   : > { %17752 = vmatpush3.bf16.xpose.msk.msra.mxu0 %vm20704_vm9, %v17741_v53  ;;  %16831 = vmatmul.mubr.msk.f32.vlgmr.msra.gmra.mrb[18].mxu1 %vm2777_vm6, %v3199_v9 }
0x1028   : > { %16841 = vmatpush3.msk.msra.mxu1 %vm3509_vm8, %v3352_v6  ;;  %16837 = vmatprep.mubr.msk.f32.mxu0 %vm19716_vm1, %v19715_v8 }
0x102e   : > { %16838 = vmatmul.mubr.msk.f32.vlgmr.msra.gmra.mrb[18].mxu0 %vm2777_vm6, %v3352_v6 }
0x1044   : > { %18358 = vset.pattern.permute.xlu1 %v19733_v41 }
0x10a6   : > { %v3454_v10 = vpop.trf.xlu1 }
0x10a7   : > { %16852 = vmatprep.mubr.msk.f32.mxu0 %vm3502_vm10, %v3454_v10 }
0x10aa   : > { %v3455_v38 = vpop.trf.xlu1 }
0x10e5   : > { %v20717_v11 = vpop.f32.mrb[16].mxu1 }
0x10e6   : > { %v16818_v12 = vpop.f32.mrb[17].mxu1 }
0x10f9   : > { %v3268_v13 = vpop.f32.mrb[16].mxu0 }
0x10fa   : > { %v15894_v14 = vmul.f32 -1.442695, %v3268_v13  ;;  %v3338_v15 = vpop.f32.mrb[18].mxu1  ;;  %v16825_v16 = vpop.f32.mrb[17].mxu0 }
0x10fb   : > { %v16832_v17 = vpop.f32.mrb[19].mxu1  ;;  %v20782_v16 = vld [vmem:[%s22340_s12 + $0x18] sm:$0xff] }
0x10fc   : > { %18460 = vpow2.f32 %v15894_v14 }
0x1101   : > { %v3427_v18 = vpop.f32.mrb[18].mxu0 }
0x1102   : > { %v3431_v19 = vmul.f32 %v3427_v18, %v3338_v15  ;;  %v16839_v20 = vpop.f32.mrb[19].mxu0 }
0x1106   : > { %v18461_v21 = vpop.eup %18460 }
0x1107   : > { %v3345_v25 = vadd.f32 1.0, %v18461_v21  ;;  %v20789_v21 = vld [vmem:[%s22338_s3 + $0x10] sm:$0xff] }
0x1109   : > { %18462 = vrcp.f32 %v3345_v25  ;;  %v20792_v25 = vld [vmem:[%s22338_s3 + $0x18] sm:$0xff] }
0x1113   : > { %v18463_v30 = vpop.eup %18462 }
0x1114   : > { %v3348_v31 = vmul.f32 %v18463_v30, %v3268_v13  ;;  %v3432_v34 = vsub.f32 1.0, %v18463_v30 }
0x1116   : > { %v3433_v35 = vmul.f32 %v3432_v34, %v3348_v31  ;;  %v3436_v36 = vmul.f32 %v3427_v18, %v3348_v31  ;;  %v3349_v37 = vmul.f32 %v3348_v31, %v3338_v15  ;;  %v20779_v15 = vld [vmem:[%s22340_s12 + $0x10] sm:$0xff] }
0x1117   : > { %v17769_v18 = vpack.c.bf16 %v20782_v16, %v20779_v15 }
0x1118   : > { %v3434_v39 = vadd.f32 %v18463_v30, %v3433_v35  ;;  %3470 = vxpose.xlu0.b32.start.end [1/1] (short) (narrow) %v3349_v37, 16  ;;  %16850 = vmatprep.subr.msk.mxu0 %vm3509_vm8, %v3436_v36  ;;  %v17766_v35 = vpack.c.bf16 %v20792_v25, %v20789_v21 }
0x1119   : > { %16851 = vmatpush3.msk.msra.mxu0 %vm3509_vm8, %v3436_v36 }
0x111a   : > { %v3435_v40 = vmul.f32 %v3434_v39, %v3431_v19  ;;  %16853 = vmatmul.mubr.msk.f32.vlgmr.msra.gmra.mrb[20].mxu0 %vm3502_vm10, %v3455_v38  ;;  %17756 = vmatprep.subr.bf16.mxu0 %v19731_v29 }
0x111b   : > { %16866 = vmatprep.mubr.msk.f32.mxu0 %vm19716_vm1, %v19715_v8 }
0x111c   : > { %16845 = vmatprep.subr.msk.mxu1 %vm3509_vm8, %v3435_v40 }
0x1145   : > { %3983 = vrot.lane.b32.xlu0 %v20642_v24, %s22178_s23 }
0x1198   : > { %v3486_v42 = vpop.trf.xlu0 }
0x1199   : > { %16842 = vmatprep.mubr.msk.f32.mxu1 %vm3502_vm10, %v3486_v42 }
0x119c   : > { %v3487_v43 = vpop.trf.xlu0 }
0x119d   : > { %16843 = vmatmul.mubr.msk.f32.vlgmr.msra.gmra.mrb[20].mxu1 %vm3502_vm10, %v3487_v43 }
0x119e   : > { %16846 = vmatpush3.msk.msra.mxu1 %vm3509_vm8, %v3435_v40  ;;  %16847 = vmatprep.mubr.msk.f32.mxu1 %vm3502_vm10, %v3454_v10 }
0x119f   : > { %17753 = vmatprep.subr.bf16.mxu1 %v19731_v29 }
0x11a1   : > { %16848 = vmatmul.mubr.msk.f32.vlgmr.msra.gmra.mrb[22].mxu1 %vm3502_vm10, %v3455_v38 }
0x11a2   : > { %16859 = vmatprep.mubr.msk.f32.mxu1 %vm19716_vm1, %v19715_v8 }
0x11b7   : > { %v3984_v44 = vpop.permute.xlu0 %3983 }
0x11b8   : > { %v3986_v45 = vsel %vm2777_vm6, %v3984_v44, 0.0 }
0x11b9   : > { %3987 = vadd.xlane.f32.xlu1 %v3986_v45 }
0x11ca   : > { %4002 = vperm.xlu1 %18358, %v20682_v49   ;;  %v20750_v49 = vld [vmem:[%s22336_s5 + $0x18] sm:$0xff] }
0x11ed   : > { %v16854_v47 = vpop.f32.mrb[20].mxu0 }
0x11ee   : > { %v3754_v48 = vadd.f32 %v16854_v47, %v20660_v22  ;;  %v3740_v53 = vpop.f32.mrb[21].mxu0  ;;  %v20754_v22 = vpack.c.bf16 %v20750_v49, %v20747_v57 }
0x11ef   : > { %v3753_v54 = vadd.f32 %v3740_v53, %v20653_v28 }
0x11f1   : > { %v17757_v55 = vpack.c.bf16 %v3754_v48, %v3753_v54 }
0x11f3   : > { %17758 = vmatpush3.bf16.msra.mxu0 %v17757_v55 }
0x11f4   : > { %17762 = vmatprep.subr.bf16.mxu0 %v19731_v29 }
0x11f6   : > { %16867 = vmatmul.mubr.msk.f32.vlgmr.msra.gmra.mrb[22].mxu0 %vm2777_vm6, %v3755_v52 }
0x11f7   : > { %16880 = vmatprep.mubr.msk.f32.mxu0 %vm19716_vm1, %v19715_v8  ;;  %17764 = vmatpush3.bf16.msra.mxu0 %v20754_v22 }
0x11f8   : > { %17768 = vmatprep.subr.bf16.mxu0 %v19731_v29 }
0x1246   : > { %v3988_v28 = vpop.xlane.xlu1 %3987 }
0x1247   : > { %v3989_v46 = vadd.f32 1e-06, %v3988_v28 }
0x1249   : > { %18464 = vrsqrt.f32 %v3989_v46 }
0x124a   : > { %v4003_v31 = vpop.permute.xlu1 %4002 }
0x124b   : > { %v4005_v36 = vmul.f32 %v4003_v31, %v20638_v23 }
0x1253   : > { %v18465_v58 = vpop.eup %18464 }
0x1254   : > { %v20759_v59 = vmul.f32 %v18465_v58, %v20638_v23 }
0x1256   : > { %4007 = vrot.lane.b32.xlu0 %v20759_v59, %s22178_s23  ;;  %s22345_s23 = smov 48  }
0x125a   : > { %3992 = vrot.lane.b32.xlu0 %v20642_v24, %s22344_s26 }
0x1270   : > { %v16844_v60 = vpop.f32.mrb[20].mxu1 }
0x1271   : > { %v3752_v61 = vadd.f32 %v16844_v60, %v20689_v51  ;;  %v3578_v62 = vpop.f32.mrb[21].mxu1 }
0x1272   : > { %v3751_v63 = vadd.f32 %v3578_v62, %v20686_v50 }
0x1274   : > { %v17760_v1 = vpack.c.bf16 %v3752_v61, %v3751_v63  ;;  %v16849_v0 = vpop.f32.mrb[22].mxu1 }
0x1275   : > { %v3750_v2 = vadd.f32 %v16849_v0, %v20650_v27  ;;  %v3662_v3 = vpop.f32.mrb[23].mxu1 }
0x1276   : > { %v3749_v4 = vadd.f32 %v3662_v3, %v20647_v26 }
0x1278   : > { %v17754_v5 = vpack.c.bf16 %v3750_v2, %v3749_v4 }
0x127a   : > { %17755 = vmatpush3.bf16.msra.mxu1 %v17754_v5 }
0x127b   : > { %17759 = vmatprep.subr.bf16.mxu1 %v19731_v29 }
0x127d   : > { %16860 = vmatmul.mubr.msk.f32.vlgmr.msra.gmra.mrb[24].mxu1 %vm2777_vm6, %v3755_v52 }
0x127e   : > { %17761 = vmatpush3.bf16.msra.mxu1 %v17760_v1  ;;  %16873 = vmatprep.mubr.msk.f32.mxu1 %vm19716_vm1, %v19715_v8 }
0x127f   : > { %17765 = vmatprep.subr.bf16.mxu1 %v19731_v29 }
0x12c8   : > { %v4008_v24 = vpop.permute.xlu0 %4007 }
0x12c9   : > { %v3894_v50 = vpop.f32.mrb[22].mxu0  ;;  %16881 = vmatmul.mubr.msk.f32.vlgmr.msra.gmra.mrb[24].mxu0 %vm2777_vm6, %v4008_v24 }
0x12ca   : > { %v16868_v27 = vpop.f32.mrb[23].mxu0  ;;  %16894 = vmatprep.mubr.msk.f32.mxu0 %vm19716_vm1, %v19715_v8  ;;  %17770 = vmatpush3.bf16.msra.mxu0 %v17769_v18 }
0x12cb   : > { %17774 = vmatprep.subr.bf16.mxu0 %v19731_v29 }
0x12cc   : > { %v3993_v26 = vpop.permute.xlu0 %3992 }
0x12cd   : > { %v3995_v51 = vsel %vm2777_vm6, %v3993_v26, 0.0 }
0x12ce   : > { %3996 = vadd.xlane.f32.xlu0 %v3995_v51 }
0x1350   : > { %v3824_v6 = vpop.f32.mrb[24].mxu1 }
0x1351   : > { %v15909_v9 = vmul.f32 -1.442695, %v3824_v6  ;;  %v16861_v10 = vpop.f32.mrb[25].mxu1 }
0x1353   : > { %18466 = vpow2.f32 %v15909_v9 }
0x135b   : > { %v3997_v12 = vpop.xlane.xlu0 %3996 }
0x135c   : > { %v3998_v13 = vadd.f32 1e-06, %v3997_v12 }
0x135d   : > { %v18467_v14 = vpop.eup %18466 }
0x135e   : > { %v3901_v17 = vadd.f32 1.0, %v18467_v14  ;;  %18468 = vrsqrt.f32 %v3998_v13  ;;  %v4788_v13 = vrot.slane %v20759_v59, 4 }
0x1360   : > { %18470 = vrcp.f32 %v3901_v17 }
0x1368   : > { %v18469_v19 = vpop.eup %18468 }
0x1369   : > { %v4000_v20 = vmul.f32 %v18469_v19, %v20638_v23 }
0x136a   : > { %v18471_v30 = vpop.eup %18470 }
0x136b   : > { %v3904_v34 = vmul.f32 %v18471_v30, %v3824_v6  ;;  %4233 = vrot.lane.b32.xlu1 %v4000_v20, %s22344_s26 }
0x136d   : > { %v3905_v37 = vmul.f32 %v3904_v34, %v3894_v50 }
0x136f   : > { %4386 = vrot.lane.b32.xlu1 %v4005_v36, %s22345_s23  ;;  %16874 = vmatmul.mubr.msk.f32.vlgmr.msra.gmra.mrb[26].mxu1 %vm2777_vm6, %v3905_v37 }
0x1370   : > { %17767 = vmatpush3.bf16.msra.mxu1 %v17766_v35  ;;  %16887 = vmatprep.mubr.msk.f32.mxu1 %vm19716_vm1, %v19715_v8 }
0x1371   : > { %17771 = vmatprep.subr.bf16.mxu1 %v19731_v29 }
0x1373   : > { %16888 = vmatmul.mubr.msk.f32.vlgmr.msra.gmra.mrb[28].mxu1 %vm2777_vm6, %v4008_v24 }
0x1374   : > { %17773 = vmatpush3.bf16.msra.mxu1 %v20754_v22  ;;  %16901 = vmatprep.mubr.msk.f32.mxu1 %vm19716_vm1, %v19715_v8 }
0x1375   : > { %17777 = vmatprep.subr.bf16.mxu1 %v19731_v29 }
0x139c   : > { %v4077_v23 = vpop.f32.mrb[24].mxu0 }
0x139d   : > { %v16882_v38 = vpop.f32.mrb[25].mxu0  ;;  %v15913_v42 = vmul.f32 -1.442695, %v4077_v23 }
0x139f   : > { %18472 = vpow2.f32 %v15913_v42 }
0x13a9   : > { %v18473_v43 = vpop.eup %18472 }
0x13aa   : > { %v4154_v44 = vadd.f32 1.0, %v18473_v43 }
0x13ac   : > { %18474 = vrcp.f32 %v4154_v44 }
0x13b6   : > { %v18475_v45 = vpop.eup %18474 }
0x13b7   : > { %v4157_v54 = vmul.f32 %v18475_v45, %v4077_v23 }
0x13dd   : > { %v4234_v39 = vpop.permute.xlu1 %4233 }
0x13de   : > { %4473 = vxpose.xlu0.b32.start.end [1/1] (short) (narrow) %v4234_v39, 16  ;;  %16902 = vmatmul.mubr.msk.f32.vlgmr.msra.gmra.mrb[30].mxu1 %vm2777_vm6, %v4234_v39 }
0x13df   : > { %17780 = vmatpush3.bf16.xpose.msk.msra.mxu1 %vm20704_vm9, %v17769_v18  ;;  %16915 = vmatprep.mubr.msk.f32.mxu1 %vm19716_vm1, %v19715_v8 }
0x13e1   : > { %v4387_v40 = vpop.permute.xlu1 %4386 }
0x13e6   : > { %16916 = vmatmul.mubr.msk.f32.vlgmr.msra.gmra.mrb[32].mxu1 %vm2777_vm6, %v4387_v40 }
0x1442   : > { %v3975_v47 = vpop.f32.mrb[26].mxu1 }
0x1443   : > { %v3980_v48 = vrot.slane %v3975_v47, 4  ;;  %v16875_v53 = vpop.f32.mrb[27].mxu1 }
0x1444   : > { %v18372_v53 = vld [vmem:[%s22347_s9] sm:$0xff]  }
0x1445   : > { %v20816_v55 = vsel %vm3509_vm8, %v20717_v11, %v3980_v48 }
0x1446   : > { %v4147_v52 = vpop.f32.mrb[28].mxu1 }
0x1447   : > { %v4158_v22 = vmul.f32 %v4157_v54, %v4147_v52  ;;  %v16889_v28 = vpop.f32.mrb[29].mxu1  ;;  %v18373_v54 = vld [vmem:[%s22347_s9 + $0x8] sm:$0xff]  }
0x1449   : > { %16895 = vmatmul.mubr.msk.f32.vlgmr.msra.gmra.mrb[26].mxu0 %vm2777_vm6, %v4158_v22 }
0x144a   : > { %17776 = vmatpush3.bf16.msra.mxu0 %v17766_v35  ;;  %16908 = vmatprep.mubr.msk.f32.mxu0 %vm19716_vm1, %v19715_v8 }
0x144b   : > { %16918 = vmatprep.subr.msk.mxu0 %vm3509_vm8, %v4387_v40 }
0x144d   : > { %16909 = vmatmul.mubr.msk.f32.vlgmr.msra.gmra.mrb[28].mxu0 %vm2777_vm6, %v4234_v39 }
0x144e   : > { %16919 = vmatpush3.msk.msra.mxu0 %vm3509_vm8, %v4387_v40 }
0x145e   : > { %v4489_v46 = vpop.trf.xlu0 }
0x145f   : > { %16930 = vmatprep.mubr.msk.f32.mxu1 %vm3502_vm10, %v4489_v46 }
0x1462   : > { %v4490_v4 = vpop.trf.xlu0 }
0x14b1   : > { %v4303_v11 = vpop.f32.mrb[30].mxu1 }
0x14b2   : > { %v15917_v58 = vmul.f32 -1.442695, %v4303_v11  ;;  %v16903_v60 = vpop.f32.mrb[31].mxu1 }
0x14b4   : > { %18476 = vpow2.f32 %v15917_v58 }
0x14b9   : > { %v4462_v61 = vpop.f32.mrb[32].mxu1 }
0x14ba   : > { %v16917_v62 = vpop.f32.mrb[33].mxu1 }
0x14be   : > { %v18477_v63 = vpop.eup %18476 }
0x14bf   : > { %v4380_v1 = vadd.f32 1.0, %v18477_v63 }
0x14c1   : > { %18478 = vrcp.f32 %v4380_v1 }
0x14cb   : > { %v18479_v0 = vpop.eup %18478 }
0x14cc   : > { %v4383_v2 = vmul.f32 %v18479_v0, %v4303_v11  ;;  %v4467_v5 = vsub.f32 1.0, %v18479_v0 }
0x14ce   : > { %v4471_v3 = vmul.f32 %v4462_v61, %v4383_v2  ;;  %v4468_v50 = vmul.f32 %v4467_v5, %v4383_v2 }
0x14d0   : > { %16928 = vmatprep.subr.msk.mxu1 %vm3509_vm8, %v4471_v3  ;;  %v4469_v9 = vadd.f32 %v18479_v0, %v4468_v50 }
0x14d1   : > { %16929 = vmatpush3.msk.msra.mxu1 %vm3509_vm8, %v4471_v3 }
0x14d2   : > { %16931 = vmatmul.mubr.msk.f32.vlgmr.msra.gmra.mrb[34].mxu1 %vm3502_vm10, %v4490_v4  ;;  %17784 = vmatprep.subr.bf16.mxu1 %v19731_v29 }
0x14d3   : > { %16944 = vmatprep.mubr.msk.f32.mxu1 %vm19716_vm1, %v19715_v8 }
0x151c   : > { %v20831_v24 = vpop.f32.mrb[26].mxu0 }
0x151d   : > { %v16896_v27 = vpop.f32.mrb[27].mxu0 }
0x1520   : > { %v4373_v26 = vpop.f32.mrb[28].mxu0 }
0x1521   : > { %v4384_v51 = vmul.f32 %v4383_v2, %v4373_v26  ;;  %v4466_v6 = vmul.f32 %v4462_v61, %v4373_v26  ;;  %v16910_v10 = vpop.f32.mrb[29].mxu0  ;;  %v15934_v61 = vld [vmem:[#allocation13] ss:$0 sm:$0xff]  ;;  %v18374_v26 = vld [vmem:[#allocation14] sm:$0xff]  }
0x1523   : > { %v4470_v12 = vmul.f32 %v4469_v9, %v4466_v6  ;;  %4505 = vxpose.xlu1.b32.start.end [1/1] (short) (narrow) %v4384_v51, 16  ;;  %v18375_v51 = vld [vmem:[#allocation14 + $0x8] sm:$0xff]  }
0x1525   : > { %16923 = vmatprep.subr.msk.mxu0 %vm3509_vm8, %v4470_v12 }
0x1541   : > { %18359 = vset.pattern.permute.xlu1 %v19732_v32 }
0x1545   : > { %4789 = vrot.lane.b32.xlu1 %v4788_v13, %s22346_s2 }
0x15a3   : > { %v4521_v14 = vpop.trf.xlu1 }
0x15a4   : > { %16920 = vmatprep.mubr.msk.f32.mxu0 %vm3502_vm10, %v4521_v14  ;;  %v15939_v14 = vld [vmem:[%s22350_s14] ss:$0 sm:$0xff] }
0x15a5   : > { %v16932_v17 = vpop.f32.mrb[34].mxu1 }
0x15a6   : > { %v4787_v18 = vadd.f32 %v16932_v17, %v20792_v25  ;;  %v4773_v19 = vpop.f32.mrb[35].mxu1 }
0x15a7   : > { %v4522_v20 = vpop.trf.xlu1  ;;  %v4786_v30 = vadd.f32 %v4773_v19, %v20789_v21 }
0x15a8   : > { %16921 = vmatmul.mubr.msk.f32.vlgmr.msra.gmra.mrb[30].mxu0 %vm3502_vm10, %v4522_v20  ;;  %v18376_v20 = vld [vmem:[%s22351_s16] sm:$0xff]  }
0x15a9   : > { %16924 = vmatpush3.msk.msra.mxu0 %vm3509_vm8, %v4470_v12  ;;  %16925 = vmatprep.mubr.msk.f32.mxu0 %vm3502_vm10, %v4489_v46  ;;  %v17785_v31 = vpack.c.bf16 %v4787_v18, %v4786_v30  ;;  %v15938_v12 = vld [vmem:[%s22349_s13] ss:$0 sm:$0xff]  ;;  %v18377_v30 = vld [vmem:[%s22351_s16 + $0x8] sm:$0xff]  }
0x15aa   : > { %17781 = vmatprep.subr.bf16.mxu0 %v19731_v29 }
0x15ab   : > { %17786 = vmatpush3.bf16.msra.mxu1 %v17785_v31  ;;  %v18378_v31 = vld [vmem:[%s22351_s16 + $0x10] sm:$0xff]  }
0x15ac   : > { %16926 = vmatmul.mubr.msk.f32.vlgmr.msra.gmra.mrb[32].mxu0 %vm3502_vm10, %v4490_v4  ;;  %16954 = vmatprep.subr.bf16.mxu1 %v19715_v8 }
0x15ad   : > { %16937 = vmatprep.mubr.msk.f32.mxu0 %vm19716_vm1, %v19715_v8 }
0x15b7   : > { %v4790_v59 = vpop.permute.xlu1 %4789 }
0x15b8   : > { %16945 = vmatmul.mubr.msk.f32.vlgmr.msra.gmra.mrb[36].mxu1 %vm2777_vm6, %v4790_v59 }
0x15b9   : > { %16958 = vmatprep.mubr.msk.bf16.mxu1 %vm19716_vm1, %v19715_v8  ;;  %16955 = vmatpush3.bf16.msra.mxu1 %v18372_v53 }
0x15ba   : > { %16956 = vmatprep.subr.bf16.mxu1 %v19715_v8 }
0x15bd   : > { %16957 = vmatpush3.bf16.msra.mxu1 %v18373_v54 }
0x15be   : > { %16970 = vmatprep.subr.bf16.mxu1 %v19715_v8 }
0x167b   : > { %v16922_v21 = vpop.f32.mrb[30].mxu0 }
0x167c   : > { %v4785_v25 = vadd.f32 %v16922_v21, %v20782_v16  ;;  %v4611_v34 = vpop.f32.mrb[31].mxu0  ;;  %v15940_v21 = vld [vmem:[%s22352_s17] ss:$0 sm:$0xff] }
0x167d   : > { %v4784_v35 = vadd.f32 %v4611_v34, %v20779_v15 }
0x167f   : > { %v17788_v36 = vpack.c.bf16 %v4785_v25, %v4784_v35  ;;  %v16927_v37 = vpop.f32.mrb[32].mxu0 }
0x1680   : > { %v4783_v23 = vadd.f32 %v16927_v37, %v20750_v49  ;;  %v4695_v38 = vpop.f32.mrb[33].mxu0 }
0x1681   : > { %v4782_v39 = vadd.f32 %v4695_v38, %v20747_v57 }
0x1683   : > { %v17782_v40 = vpack.c.bf16 %v4783_v23, %v4782_v39 }
0x1685   : > { %17783 = vmatpush3.bf16.msra.mxu0 %v17782_v40 }
0x1686   : > { %17787 = vmatprep.subr.bf16.mxu0 %v19731_v29 }
0x1688   : > { %16938 = vmatmul.mubr.msk.f32.vlgmr.msra.gmra.mrb[34].mxu0 %vm2777_vm6, %v4790_v59  ;;  %v18379_v59 = vld [vmem:[%s22351_s16 + $0x18] sm:$0xff]  }
0x1689   : > { %17789 = vmatpush3.bf16.msra.mxu0 %v17788_v36  ;;  %16951 = vmatprep.mubr.msk.f32.mxu0 %vm19716_vm1, %v19715_v8 }
0x168a   : > { %16962 = vmatprep.subr.bf16.mxu0 %v19715_v8 }
0x168b   : > { %v4929_v15 = vpop.f32.mrb[36].mxu1 }
0x168c   : > { %v16946_v16 = vpop.f32.mrb[37].mxu1 }
0x175b   : > { %v4859_v49 = vpop.f32.mrb[34].mxu0 }
0x175c   : > { %v15932_v42 = vmul.f32 -1.442695, %v4859_v49  ;;  %v16939_v43 = vpop.f32.mrb[35].mxu0 }
0x175d   : > { %v15945_v43 = vld [vmem:[%s22354_s24] ss:$0 sm:$0xff] }
0x175e   : > { %18480 = vpow2.f32 %v15932_v42 }
0x1768   : > { %v18481_v57 = vpop.eup %18480 }
0x1769   : > { %v4936_v44 = vadd.f32 1.0, %v18481_v57 }
0x176b   : > { %18482 = vrcp.f32 %v4936_v44 }
0x1775   : > { %v18483_v45 = vpop.eup %18482 }
0x1776   : > { %v4939_v47 = vmul.f32 %v18483_v45, %v4859_v49 }
0x1778   : > { %v4940_v48 = vmul.f32 %v4939_v47, %v4929_v15 }
0x177a   : > { %16952 = vmatmul.mubr.msk.f32.vlgmr.msra.gmra.mrb[36].mxu0 %vm2777_vm6, %v4940_v48 }
0x177b   : > { %16966 = vmatprep.mubr.msk.bf16.mxu0 %vm19716_vm1, %v19715_v8  ;;  %16963 = vmatpush3.bf16.msra.mxu0 %v18374_v26 }
0x177c   : > { %16964 = vmatprep.subr.bf16.mxu0 %v19715_v8 }
0x177f   : > { %16965 = vmatpush3.bf16.msra.mxu0 %v18375_v51 }
0x1780   : > { %16982 = vmatprep.subr.bf16.mxu0 %v19715_v8 }
0x184d   : > { %v5010_v52 = vpop.f32.mrb[36].mxu0 }
0x184e   : > { %v5015_v22 = vrot.slane %v5010_v52, 4  ;;  %v16953_v28 = vpop.f32.mrb[37].mxu0 }
0x1850   : > { %v5017_v46 = vsel %vm3509_vm8, %v20831_v24, %v5015_v22 }
0x1851   : > { %5019 = vrot.lane.b32.xlu0 %v5017_v46, %s22348_s11 }
0x18c3   : > { %v5020_v11 = vpop.permute.xlu0 %5019 }
0x18c4   : > { %v5022_v58 = vsel %vm2777_vm6, %v20816_v55, %v5020_v11 }
0x18c5   : > { %v5023_v60 = vpack.c.bf16 %v5022_v58, %v5022_v58  ;;  %v18380_v58 = vld [vmem:[%s22329_s10 + $0x10] sm:$0xff]  }
0x18c7   : > { %16959 = vmatmul.mubr.msk.bf16.vlgmr.msra.gmra.mrb[40].mxu1 %vm2005_vm0, %v5023_v60  ;;  %v18381_v60 = vld [vmem:[%s22329_s10 + $0x18] sm:$0xff]   ;;  %s22355_s10 = smov 88  }
0x18c8   : > { %16978 = vmatprep.mubr.msk.bf16.mxu1 %vm19716_vm1, %v19715_v8  ;;  %16971 = vmatpush3.bf16.msra.mxu1 %v18376_v20 }
0x18c9   : > { %16972 = vmatprep.subr.bf16.mxu1 %v19715_v8 }
0x18cc   : > { %16973 = vmatpush3.bf16.msra.mxu1 %v18377_v30 }
0x18cd   : > { %16974 = vmatprep.subr.bf16.mxu1 %v19715_v8 }
0x18d0   : > { %16975 = vmatpush3.bf16.msra.mxu1 %v18378_v31 }
0x18d1   : > { %16976 = vmatprep.subr.bf16.mxu1 %v19715_v8 }
0x18d4   : > { %16977 = vmatpush3.bf16.msra.mxu1 %v18379_v59 }
0x18d5   : > { %17000 = vmatprep.subr.mxu1 %v19715_v8 }
0x199a   : > { %v5079_v62 = vpop.f32.mrb[40].mxu1 }
0x199b   : > { %v5080_v63 = vadd.f32 %v15934_v61, %v5079_v62  ;;  %v16960_v1 = vpop.f32.mrb[41].mxu1 }
0x199c   : > { %v5082_v0 = vpop.f32.mrb[42].mxu1 }
0x199d   : > { %v20876_v2 = vadd.f32 %v5080_v63, %v20628_v56  ;;  %v16961_v3 = vpop.f32.mrb[43].mxu1  ;;  %v15989_v0 = vld [vmem:[%s22331_s7 + $0x1] ss:$0 sm:$0xff]  ;;  %s22357_s7 = smov 72  }
0x199e   : > { %v15990_v3 = vld [vmem:[%s22332_s4 + $0x1] ss:$0 sm:$0xff]  ;;  %s22356_s4 = smov 120  }
0x199f   : > { %v5086_v4 = vsel %vm2005_vm0, %v20876_v2, 0.0 }
0x19a0   : > { %5087 = vadd.xlane.f32.xlu1 %v5086_v4 }
0x1a2d   : > { %v5088_v55 = vpop.xlane.xlu1 %5087 }
0x1a2e   : > { %v5089_v5 = vmul.f32 0.03125, %v5088_v55 }
0x1a30   : > { %v5090_v24 = vsub.f32 %v20876_v2, %v5089_v5 }
0x1a32   : > { %v5091_v50 = vmul.f32 %v5090_v24, %v5090_v24 }
0x1a34   : > { %v5092_v27 = vsel %vm2005_vm0, %v5091_v50, 0.0 }
0x1a35   : > { %5093 = vadd.xlane.f32.xlu0 %v5092_v27 }
0x1ac2   : > { %v5094_v56 = vpop.xlane.xlu0 %5093 }
0x1ac3   : > { %v5095_v6 = vmul.f32 0.03125, %v5094_v56 }
0x1ac5   : > { %v5096_v9 = vadd.f32 1e-05, %v5095_v6 }
0x1ac7   : > { %18484 = vrsqrt.f32 %v5096_v9 }
0x1ad1   : > { %v18485_v10 = vpop.eup %18484 }
0x1ad2   : > { %v5098_v13 = vmul.f32 %v18485_v10, %v5090_v24  ;;  %v15991_v24 = vld [vmem:[#allocation2 + $0x1] ss:$0 sm:$0xff] }
0x1ad4   : > { %v5105_v17 = vmul.f32 %v15938_v12, %v5098_v13 }
0x1ad6   : > { %v5112_v18 = vadd.f32 %v15939_v14, %v5105_v17 }
0x1ad8   : > { %v5113_v19 = vpack.c.bf16 %v5112_v18, %v5112_v18 }
0x1ada   : > { %16967 = vmatmul.mubr.msk.bf16.vlgmr.msra.gmra.mrb[40].mxu0 %vm2005_vm0, %v5113_v19 }
0x1adb   : > { %16986 = vmatprep.mubr.msk.bf16.mxu0 %vm19716_vm1, %v19715_v8  ;;  %16983 = vmatpush3.bf16.msra.mxu0 %v18380_v58 }
0x1adc   : > { %16984 = vmatprep.subr.bf16.mxu0 %v19715_v8 }
0x1adf   : > { %16985 = vmatpush3.bf16.msra.mxu0 %v18381_v60 }
0x1ae0   : > { %16990 = vmatprep.subr.mxu0 %v19715_v8 }
0x1bad   : > { %v5169_v25 = vpop.f32.mrb[40].mxu0 }
0x1bae   : > { %v5170_v34 = vadd.f32 %v15940_v21, %v5169_v25  ;;  %v16968_v35 = vpop.f32.mrb[41].mxu0 }
0x1baf   : > { %v5172_v36 = vpop.f32.mrb[42].mxu0 }
0x1bb0   : > { %5183 = vrot.lane.b32.xlu1 %v5170_v34, %s22353_s21  ;;  %v16969_v37 = vpop.f32.mrb[43].mxu0  ;;  %v15944_v23 = vmul.f32 -1.442695, %v5170_v34 }
0x1bb2   : > { %18486 = vpow2.f32 %v15944_v23 }
0x1bbc   : > { %v18487_v38 = vpop.eup %18486 }
0x1bbd   : > { %v5178_v39 = vadd.f32 1.0, %v18487_v38 }
0x1bbf   : > { %18488 = vrcp.f32 %v5178_v39 }
0x1bc9   : > { %v18489_v40 = vpop.eup %18488 }
0x1bca   : > { %v5181_v15 = vmul.f32 %v18489_v40, %v5170_v34 }
0x1c22   : > { %v5184_v16 = vpop.permute.xlu1 %5183 }
0x1c23   : > { %v5186_v49 = vmul.f32 %v5184_v16, %v5181_v15 }
0x1c25   : > { %v5187_v42 = vpack.c.bf16 %v5186_v49, %v5186_v49 }
0x1c27   : > { %16979 = vmatmul.mubr.msk.bf16.vlgmr.msra.gmra.mrb[44].mxu1 %vm5218_vm11, %v5187_v42 }
0x1c28   : > { %17002 = vmatprep.mubr.msk.f32.mxu1 %vm19716_vm1, %v19715_v8 }
0x1cfa   : > { %v5256_v57 = vpop.f32.mrb[44].mxu1 }
0x1cfb   : > { %v5257_v44 = vadd.f32 %v15945_v43, %v5256_v57  ;;  %v16980_v45 = vpop.f32.mrb[45].mxu1 }
0x1cfc   : > { %v5259_v47 = vpop.f32.mrb[46].mxu1 }
0x1cfd   : > { %v20904_v48 = vadd.f32 %v5257_v44, %v20876_v2  ;;  %v16981_v53 = vpop.f32.mrb[47].mxu1 }
0x1cff   : > { %v5336_v54 = vsel %vm2005_vm0, %v20904_v48, 0.0 }
0x1d00   : > { %5337 = vadd.xlane.f32.xlu0 %v5336_v54 }
0x1d8d   : > { %v5338_v52 = vpop.xlane.xlu0 %5337 }
0x1d8e   : > { %v5339_v22 = vmul.f32 0.03125, %v5338_v52 }
0x1d90   : > { %v5340_v28 = vsub.f32 %v20904_v48, %v5339_v22 }
0x1d92   : > { %v5341_v46 = vmul.f32 %v5340_v28, %v5340_v28 }
0x1d94   : > { %v5342_v11 = vsel %vm2005_vm0, %v5341_v46, 0.0 }
0x1d95   : > { %5343 = vadd.xlane.f32.xlu0 %v5342_v11 }
0x1e22   : > { %v5344_v61 = vpop.xlane.xlu0 %5343 }
0x1e23   : > { %v5345_v62 = vmul.f32 0.03125, %v5344_v61 }
0x1e25   : > { %v5346_v63 = vadd.f32 1e-05, %v5345_v62 }
0x1e27   : > { %18490 = vrsqrt.f32 %v5346_v63 }
0x1e31   : > { %v18491_v1 = vpop.eup %18490 }
0x1e32   : > { %v5348_v2 = vmul.f32 %v18491_v1, %v5340_v28 }
0x1e34   : > { %v5355_v4 = vmul.f32 %v15989_v0, %v5348_v2 }
0x1e36   : > { %v5362_v55 = vadd.f32 %v15990_v3, %v5355_v4 }
0x1e38   : > { %v5363_v5 = vpack.c.bf16 %v5362_v55, %v5362_v55 }
0x1e3a   : > { %16987 = vmatmul.mubr.msk.bf16.vlgmr.msra.gmra.mrb[44].mxu0 %vm2005_vm0, %v5363_v5 }
0x1e3b   : > { %16992 = vmatprep.mubr.msk.f32.mxu0 %vm19716_vm1, %v19715_v8 }
0x1f0d   : > { %v5419_v50 = vpop.f32.mrb[44].mxu0 }
0x1f0e   : > { %v20919_v27 = vadd.f32 %v15991_v24, %v5419_v50  ;;  %v16988_v26 = vpop.f32.mrb[45].mxu0 }
0x1f0f   : > { %v5422_v51 = vpop.f32.mrb[46].mxu0 }
0x1f10   : > { %5593 = vrot.lane.b32.xlu0 %v20919_v27, %s22355_s10  ;;  %5426 = vrot.lane.b32.xlu1 %v20919_v27, %s22341_s0  ;;  %v16989_v56 = vpop.f32.mrb[47].mxu0 }
0x1f14   : > { %5591 = vrot.lane.b32.xlu1 %v20919_v27, %s22356_s4 }
0x1f18   : > { %5760 = vrot.lane.b32.xlu1 %v20919_v27, %s22344_s26 }
0x1f1c   : > { %5758 = vrot.lane.b32.xlu1 %v20919_v27, %s22346_s2 }
0x1f20   : > { %5927 = vrot.lane.b32.xlu1 %v20919_v27, %s22357_s7 }
0x1f24   : > { %5925 = vrot.lane.b32.xlu1 %v20919_v27, %s22358_s25 }
0x1f82   : > { %v5594_v6 = vpop.permute.xlu0 %5593  ;;  %v5427_v9 = vpop.permute.xlu1 %5426 }
0x1f83   : > { %16991 = vmatpush3.xpose.msk.msra.mxu0 %vm2099_vm2, %v5427_v9  ;;  %17001 = vmatpush3.xpose.msk.msra.mxu1 %vm2099_vm2, %v5594_v6 }
0x1f84   : > { %17010 = vmatprep.subr.mxu1 %v19715_v8  ;;  %16995 = vmatprep.subr.mxu0 %v19715_v8 }
0x1f86   : > { %16993 = vmatmul.mubr.msk.f32.vlgmr.msra.gmra.mrb[38].mxu0 %vm2099_vm2, %v20919_v27  ;;  %v5592_v10 = vpop.permute.xlu1 %5591 }
0x1f87   : > { %17003 = vmatmul.mubr.msk.f32.vlgmr.msra.gmra.mrb[38].mxu1 %vm2099_vm2, %v5592_v10  ;;  %16997 = vmatprep.mubr.msk.f32.mxu0 %vm19716_vm1, %v19715_v8 }
0x1f88   : > { %17012 = vmatprep.mubr.msk.f32.mxu1 %vm19716_vm1, %v19715_v8 }
0x1f8a   : > { %v5761_v12 = vpop.permute.xlu1 %5760 }
0x1f8b   : > { %17011 = vmatpush3.xpose.msk.msra.mxu1 %vm2099_vm2, %v5761_v12 }
0x1f8c   : > { %17020 = vmatprep.subr.mxu1 %v19715_v8 }
0x1f8e   : > { %v5759_v13 = vpop.permute.xlu1 %5758 }
0x1f8f   : > { %17013 = vmatmul.mubr.msk.f32.vlgmr.msra.gmra.mrb[48].mxu1 %vm2099_vm2, %v5759_v13 }
0x1f90   : > { %17022 = vmatprep.mubr.msk.f32.mxu1 %vm19716_vm1, %v19715_v8 }
0x1f92   : > { %v5928_v14 = vpop.permute.xlu1 %5927 }
0x1f93   : > { %17021 = vmatpush3.xpose.msk.msra.mxu1 %vm2099_vm2, %v5928_v14 }
0x1f94   : > { %17030 = vmatprep.subr.bf16.mxu1 %v19715_v8 }
0x1f96   : > { %v5926_v17 = vpop.permute.xlu1 %5925 }
0x1f97   : > { %17023 = vmatmul.mubr.msk.f32.vlgmr.msra.gmra.mrb[50].mxu1 %vm2099_vm2, %v5926_v17 }
0x1f98   : > { %17034 = vmatprep.mubr.msk.bf16.mxu1 %vm19716_vm1, %v19715_v8 }
0x2059   : > { %v5498_v18 = vpop.f32.mrb[38].mxu0 }
0x205a   : > { %v5502_v19 = vmul.f32 0.35355338, %v5498_v18  ;;  %v16994_v20 = vpop.f32.mrb[39].mxu0  ;;  %v5665_v30 = vpop.f32.mrb[38].mxu1 }
0x205b   : > { %v5669_v31 = vmul.f32 0.35355338, %v5665_v30  ;;  %v17004_v59 = vpop.f32.mrb[39].mxu1  ;;  %v18383_v20 = vld [vmem:[%s22335_s18 + $0x18] sm:$0xff]  }
0x205c   : > { %v5503_v21 = vsel %vm20548_vm5, %v5502_v19, -1e+30  ;;  %v18382_v19 = vld [vmem:[%s22335_s18 + $0x10] sm:$0xff]  }
0x205d   : > { %v5504_v25 = vsel %vm2099_vm2, %v5503_v21, -inf  ;;  %v5670_v34 = vsel %vm20548_vm5, %v5669_v31, -1e+30  ;;  %17031 = vmatpush3.bf16.msra.mxu1 %v18382_v19 }
0x205e   : > { %5505 = vmax.xlane.f32.xlu1 %v5504_v25  ;;  %v5671_v35 = vsel %vm2099_vm2, %v5670_v34, -inf  ;;  %17032 = vmatprep.subr.bf16.mxu1 %v19715_v8 }
0x205f   : > { %5672 = vmax.xlane.f32.xlu0 %v5671_v35 }
0x2061   : > { %17033 = vmatpush3.bf16.msra.mxu1 %v18383_v20 }
0x2062   : > { %v5832_v36 = vpop.f32.mrb[48].mxu1  ;;  %17790 = vmatprep.subr.bf16.mxu1 %v19731_v29 }
0x2063   : > { %v5836_v37 = vmul.f32 0.35355338, %v5832_v36  ;;  %v17014_v23 = vpop.f32.mrb[49].mxu1 }
0x2065   : > { %v5837_v38 = vsel %vm20548_vm5, %v5836_v37, -1e+30 }
0x2066   : > { %v5838_v39 = vsel %vm2099_vm2, %v5837_v38, -inf }
0x2067   : > { %5839 = vmax.xlane.f32.xlu0 %v5838_v39 }
0x206a   : > { %v5999_v40 = vpop.f32.mrb[50].mxu1 }
0x206b   : > { %v6003_v15 = vmul.f32 0.35355338, %v5999_v40  ;;  %v17024_v16 = vpop.f32.mrb[51].mxu1 }
0x206d   : > { %v6004_v49 = vsel %vm20548_vm5, %v6003_v15, -1e+30  ;;  %v16007_v15 = vld [vmem:[#allocation5 + $0x1] ss:$0 sm:$0xff] }
0x206e   : > { %v6005_v42 = vsel %vm2099_vm2, %v6004_v49, -inf }
0x206f   : > { %6006 = vmax.xlane.f32.xlu0 %v6005_v42  ;;  %5515 = vrot.lane.b32.xlu1 %v20919_v27, %s22353_s21 }
0x20eb   : > { %v5506_v43 = vpop.xlane.xlu1 %5505 }
0x20ec   : > { %v5507_v57 = vsub.f32 %v5503_v21, %v5506_v43  ;;  %v5673_v44 = vpop.xlane.xlu0 %5672 }
0x20ed   : > { %v5674_v45 = vsub.f32 %v5670_v34, %v5673_v44 }
0x20ee   : > { %v5508_v47 = vmul.f32 1.442695, %v5507_v57 }
0x20ef   : > { %v5675_v53 = vmul.f32 1.442695, %v5674_v45  ;;  %v5516_v54 = vpop.permute.xlu1 %5515 }
0x20f0   : > { %18492 = vpow2.f32 %v5508_v47  ;;  %16996 = vmatpush3.msra.mxu0 %v5516_v54 }
0x20f1   : > { %18494 = vpow2.f32 %v5675_v53  ;;  %17005 = vmatprep.subr.mxu0 %v19715_v8 }
0x20f4   : > { %v5840_v52 = vpop.xlane.xlu0 %5839 }
0x20f5   : > { %v5841_v22 = vsub.f32 %v5837_v38, %v5840_v52 }
0x20f7   : > { %v5842_v28 = vmul.f32 1.442695, %v5841_v22 }
0x20f9   : > { %18496 = vpow2.f32 %v5842_v28  ;;  %v18384_v28 = vld [vmem:[#allocation10 + $0x10] sm:$0xff]  }
0x20fa   : > { %v18493_v46 = vpop.eup %18492 }
0x20fb   : > { %v18495_v11 = vpop.eup %18494  ;;  %v5510_v58 = vsel %vm2099_vm2, %v18493_v46, 0.0 }
0x20fc   : > { %v6007_v60 = vpop.xlane.xlu0 %6006  ;;  %5511 = vadd.xlane.f32.xlu1 %v5510_v58  ;;  %v5677_v61 = vsel %vm2099_vm2, %v18495_v11, 0.0 }
0x20fd   : > { %v6008_v62 = vsub.f32 %v6004_v49, %v6007_v60  ;;  %5678 = vadd.xlane.f32.xlu0 %v5677_v61  ;;  %v16011_v61 = vld [vmem:[#allocation7 + $0x1] ss:$0 sm:$0xff] }
0x20ff   : > { %v6009_v63 = vmul.f32 1.442695, %v6008_v62 }
0x2101   : > { %18498 = vpow2.f32 %v6009_v63  ;;  %v16012_v63 = vld [vmem:[#allocation8 + $0x1] ss:$0 sm:$0xff] }
0x2103   : > { %v18497_v1 = vpop.eup %18496 }
0x2104   : > { %v5844_v0 = vsel %vm2099_vm2, %v18497_v1, 0.0 }
0x2105   : > { %5845 = vadd.xlane.f32.xlu1 %v5844_v0 }
0x210b   : > { %v18499_v2 = vpop.eup %18498 }
0x210c   : > { %v6011_v3 = vsel %vm2099_vm2, %v18499_v2, 0.0 }
0x210d   : > { %6012 = vadd.xlane.f32.xlu0 %v6011_v3  ;;  %v16013_v3 = vld [vmem:[#allocation11 + $0x1] ss:$0 sm:$0xff] }
0x2116   : > { %5849 = vrot.lane.b32.xlu1 %v20919_v27, %s22345_s23 }
0x211a   : > { %6016 = vrot.lane.b32.xlu1 %v20919_v27, %s22359_s27 }
0x2123   : > { %5682 = vrot.lane.b32.xlu0 %v20919_v27, %s22360_s29 }
0x2189   : > { %v5512_v4 = vpop.xlane.xlu1 %5511 }
0x218a   : > { %18500 = vrcp.f32 %v5512_v4  ;;  %v5679_v55 = vpop.xlane.xlu0 %5678 }
0x218b   : > { %18502 = vrcp.f32 %v5679_v55 }
0x2192   : > { %v5846_v5 = vpop.xlane.xlu1 %5845 }
0x2193   : > { %18504 = vrcp.f32 %v5846_v5 }
0x2194   : > { %v18501_v24 = vpop.eup %18500 }
0x2195   : > { %v5514_v50 = vmul.f32 %v18501_v24, %v18493_v46  ;;  %v18503_v51 = vpop.eup %18502  ;;  %v18385_v46 = vld [vmem:[#allocation10 + $0x18] sm:$0xff]  }
0x2196   : > { %v5850_v56 = vpop.permute.xlu1 %5849  ;;  %v5681_v9 = vmul.f32 %v18503_v51, %v18495_v11 }
0x2197   : > { %16998 = vmatmul.mubr.msk.f32.vlgmr.msra.gmra.mrb[48].mxu0 %vm2099_vm2, %v5514_v50 }
0x2198   : > { %17007 = vmatprep.mubr.msk.f32.mxu0 %vm19716_vm1, %v19715_v8 }
0x219a   : > { %v6013_v26 = vpop.xlane.xlu0 %6012  ;;  %v6017_v12 = vpop.permute.xlu1 %6016 }
0x219b   : > { %18506 = vrcp.f32 %v6013_v26 }
0x219d   : > { %v18505_v27 = vpop.eup %18504 }
0x219e   : > { %v5683_v6 = vpop.permute.xlu0 %5682  ;;  %v5848_v10 = vmul.f32 %v18505_v27, %v18497_v1 }
0x219f   : > { %17006 = vmatpush3.msra.mxu0 %v5683_v6 }
0x21a0   : > { %17008 = vmatmul.mubr.msk.f32.vlgmr.msra.gmra.mrb[50].mxu0 %vm2099_vm2, %v5681_v9  ;;  %17015 = vmatprep.subr.mxu0 %v19715_v8 }
0x21a1   : > { %17016 = vmatpush3.msra.mxu0 %v5850_v56  ;;  %17017 = vmatprep.mubr.msk.f32.mxu0 %vm19716_vm1, %v19715_v8 }
0x21a2   : > { %17025 = vmatprep.subr.mxu0 %v19715_v8 }
0x21a4   : > { %17018 = vmatmul.mubr.msk.f32.vlgmr.msra.gmra.mrb[52].mxu0 %vm2099_vm2, %v5848_v10 }
0x21a5   : > { %v18507_v13 = vpop.eup %18506  ;;  %17026 = vmatpush3.msra.mxu0 %v6017_v12  ;;  %17027 = vmatprep.mubr.msk.f32.mxu0 %vm19716_vm1, %v19715_v8  ;;  %v21030_v12 = vld [vmem:[%s22336_s5 + $0x20] sm:$0xff] }
0x21a6   : > { %v6015_v14 = vmul.f32 %v18507_v13, %v18499_v2  ;;  %17038 = vmatprep.subr.bf16.mxu0 %v19715_v8  ;;  %v21033_v13 = vld [vmem:[%s22336_s5 + $0x28] sm:$0xff] }
0x21a8   : > { %17028 = vmatmul.mubr.msk.f32.vlgmr.msra.gmra.mrb[54].mxu0 %vm2099_vm2, %v6015_v14  ;;  %v21036_v14 = vld [vmem:[%s22338_s3 + $0x20] sm:$0xff] }
0x21a9   : > { %17042 = vmatprep.mubr.msk.bf16.mxu0 %vm19716_vm1, %v19715_v8  ;;  %17039 = vmatpush3.bf16.msra.mxu0 %v18384_v28 }
0x21aa   : > { %17040 = vmatprep.subr.bf16.mxu0 %v19715_v8 }
0x21ad   : > { %17041 = vmatpush3.bf16.msra.mxu0 %v18385_v46 }
0x21ae   : > { %17793 = vmatprep.subr.bf16.mxu0 %v19731_v29 }
0x226a   : > { %v5587_v17 = vpop.f32.mrb[48].mxu0 }
0x226b   : > { %v16999_v18 = vpop.f32.mrb[49].mxu0 }
0x226c   : > { %v21041_v18 = vld [vmem:[%s22338_s3 + $0x28] sm:$0xff] }
0x226d   : > { %v17794_v19 = vpack.c.bf16 %v21041_v18, %v21036_v14 }
0x2273   : > { %v5754_v30 = vpop.f32.mrb[50].mxu0 }
0x2274   : > { %6093 = vrot.lane.b32.xlu1 %v5754_v30, %s22361_s30  ;;  %v17009_v31 = vpop.f32.mrb[51].mxu0 }
0x2277   : > { %v5921_v59 = vpop.f32.mrb[52].mxu0 }
0x2278   : > { %6097 = vrot.lane.b32.xlu0 %v5921_v59, %s22348_s11  ;;  %v17019_v21 = vpop.f32.mrb[53].mxu0 }
0x227b   : > { %v6088_v25 = vpop.f32.mrb[54].mxu0 }
0x227c   : > { %6101 = vrot.lane.b32.xlu1 %v6088_v25, %s22362_s20  ;;  %v17029_v34 = vpop.f32.mrb[55].mxu0 }
0x22e6   : > { %v6094_v35 = vpop.permute.xlu1 %6093 }
0x22e7   : > { %v6104_v37 = vsel %vm2099_vm2, %v5587_v17, %v6094_v35  ;;  %v17791_v17 = vpack.c.bf16 %v21033_v13, %v21030_v12 }
0x22ea   : > { %v6098_v36 = vpop.permute.xlu0 %6097 }
0x22eb   : > { %v6105_v23 = vsel %vm2777_vm6, %v6104_v37, %v6098_v36 }
0x22ee   : > { %v6102_v38 = vpop.permute.xlu1 %6101 }
0x22ef   : > { %v6106_v39 = vsel %vm2779_vm7, %v6105_v23, %v6102_v38 }
0x22f0   : > { %v6107_v40 = vpack.c.bf16 %v6106_v39, %v6106_v39 }
0x22f2   : > { %17035 = vmatmul.mubr.msk.bf16.vlgmr.msra.gmra.mrb[52].mxu1 %vm2005_vm0, %v6107_v40 }
0x22f3   : > { %17050 = vmatprep.mubr.msk.f32.mxu1 %vm19716_vm1, %v19715_v8  ;;  %17792 = vmatpush3.bf16.msra.mxu1 %v17791_v17 }
0x22f4   : > { %17796 = vmatprep.subr.bf16.mxu1 %v19731_v29 }
0x23c5   : > { %v6163_v16 = vpop.f32.mrb[52].mxu1 }
0x23c6   : > { %v6164_v49 = vadd.f32 %v16007_v15, %v6163_v16  ;;  %v17036_v42 = vpop.f32.mrb[53].mxu1 }
0x23c7   : > { %v6166_v43 = vpop.f32.mrb[54].mxu1  ;;  %v21069_v42 = vld [vmem:[%s22340_s12 + $0x28] sm:$0xff] }
0x23c8   : > { %v21010_v57 = vadd.f32 %v6164_v49, %v20904_v48  ;;  %v17037_v44 = vpop.f32.mrb[55].mxu1  ;;  %v21066_v49 = vld [vmem:[%s22340_s12 + $0x20] sm:$0xff] }
0x23c9   : > { %v17797_v43 = vpack.c.bf16 %v21069_v42, %v21066_v49 }
0x23ca   : > { %v6170_v45 = vsel %vm2005_vm0, %v21010_v57, 0.0 }
0x23cb   : > { %6171 = vadd.xlane.f32.xlu0 %v6170_v45 }
0x2458   : > { %v6172_v47 = vpop.xlane.xlu0 %6171 }
0x2459   : > { %v6173_v53 = vmul.f32 0.03125, %v6172_v47 }
0x245b   : > { %v6174_v54 = vsub.f32 %v21010_v57, %v6173_v53 }
0x245d   : > { %v6175_v52 = vmul.f32 %v6174_v54, %v6174_v54 }
0x245f   : > { %v6176_v22 = vsel %vm2005_vm0, %v6175_v52, 0.0 }
0x2460   : > { %6177 = vadd.xlane.f32.xlu1 %v6176_v22 }
0x24ed   : > { %v6178_v48 = vpop.xlane.xlu1 %6177 }
0x24ee   : > { %v6179_v11 = vmul.f32 0.03125, %v6178_v48 }
0x24f0   : > { %v6180_v58 = vadd.f32 1e-05, %v6179_v11 }
0x24f2   : > { %18508 = vrsqrt.f32 %v6180_v58 }
0x24fc   : > { %v18509_v60 = vpop.eup %18508 }
0x24fd   : > { %v6182_v62 = vmul.f32 %v18509_v60, %v6174_v54 }
0x24ff   : > { %v6189_v1 = vmul.f32 %v16011_v61, %v6182_v62 }
0x2501   : > { %v6196_v0 = vadd.f32 %v16012_v63, %v6189_v1 }
0x2503   : > { %v6197_v2 = vpack.c.bf16 %v6196_v0, %v6196_v0 }
0x2505   : > { %17043 = vmatmul.mubr.msk.bf16.vlgmr.msra.gmra.mrb[56].mxu0 %vm2005_vm0, %v6197_v2 }
0x2506   : > { %17057 = vmatprep.mubr.msk.f32.mxu0 %vm19716_vm1, %v19715_v8  ;;  %17795 = vmatpush3.bf16.msra.mxu0 %v17794_v19 }
0x2507   : > { %17799 = vmatprep.subr.bf16.mxu0 %v19731_v29 }
0x25d8   : > { %v6253_v4 = vpop.f32.mrb[56].mxu0 }
0x25d9   : > { %v6254_v55 = vadd.f32 %v16013_v3, %v6253_v4  ;;  %v17044_v5 = vpop.f32.mrb[57].mxu0 }
0x25da   : > { %v6256_v24 = vpop.f32.mrb[58].mxu0 }
0x25db   : > { %v16017_v50 = vmul.f32 -1.442695, %v6254_v55  ;;  %v17045_v26 = vpop.f32.mrb[59].mxu0  ;;  %v6260_v20 = vand.u32 2147483647, %v6254_v55  ;;  %v6259_v40 = vmax.f32 %v6254_v55, 0.0 }
0x25dd   : > { %18510 = vpow2.f32 %v16017_v50  ;;  %v6261_v30 = vsub.f32 0.0, %v6260_v20 }
0x25df   : > { %v6262_v31 = vmul.f32 1.442695, %v6261_v30 }
0x25e7   : > { %v18511_v51 = vpop.eup %18510 }
0x25e8   : > { %v6272_v56 = vadd.f32 1.0, %v18511_v51 }
0x25ea   : > { %18512 = vrcp.f32 %v6272_v56 }
0x25eb   : > { %18514 = vpow2.f32 %v6262_v31 }
0x25f4   : > { %v18513_v6 = vpop.eup %18512 }
0x25f5   : > { %v21021_v9 = vmul.f32 %v18513_v6, %v6254_v55  ;;  %v18515_v59 = vpop.eup %18514 }
0x25f6   : > { %v6264_v21 = vadd.f32 1.0, %v18515_v59 }
0x25f7   : > { %v21025_v27 = vmul.f32 %v21021_v9, %v21021_v9 }
0x25f8   : > { %18516 = vlog2.f32 %v6264_v21 }
0x25f9   : > { %v6277_v10 = vsel %vm2777_vm6, %v21025_v27, 0.0 }
0x25fa   : > { %6278 = vadd.xlane.f32.xlu0 %v6277_v10 }
0x2602   : > { %v18517_v37 = vpop.eup %18516 }
0x2603   : > { %v6266_v38 = vmul.f32 0.6931472, %v18517_v37 }
0x2605   : > { %v6267_v15 = vadd.f32 %v6266_v38, %v6259_v40 }
0x2607   : > { %v21062_v16 = vmul.f32 0.01, %v6267_v15 }
0x2610   : > { %6284 = vrot.lane.b32.xlu0 %v21025_v27, %s22341_s0 }
0x2687   : > { %v6279_v25 = vpop.xlane.xlu0 %6278 }
0x2688   : > { %v6280_v34 = vadd.f32 1e-06, %v6279_v25 }
0x268a   : > { %18518 = vrsqrt.f32 %v6280_v34 }
0x268b   : > { %v6285_v35 = vpop.permute.xlu0 %6284 }
0x268c   : > { %v6287_v36 = vsel %vm2777_vm6, %v6285_v35, 0.0 }
0x268d   : > { %6288 = vadd.xlane.f32.xlu1 %v6287_v36 }
0x2694   : > { %v18519_v23 = vpop.eup %18518 }
0x2695   : > { %v21051_v39 = vmul.f32 %v18519_v23, %v21021_v9 }
0x2697   : > { %17051 = vmatmul.mubr.msk.f32.vlgmr.msra.gmra.mrb[56].mxu1 %vm2777_vm6, %v21051_v39  ;;  %17058 = vmatmul.mubr.msk.f32.vlgmr.msra.gmra.mrb[60].mxu0 %vm2777_vm6, %v21051_v39 }
0x2698   : > { %17064 = vmatprep.mubr.msk.f32.mxu1 %vm19716_vm1, %v19715_v8  ;;  %17801 = vmatpush3.bf16.msra.mxu0 %v17791_v17 }
0x2699   : > { %17071 = vmatprep.mubr.msk.f32.mxu0 %vm19716_vm1, %v19715_v8  ;;  %17805 = vmatprep.subr.bf16.mxu0 %v19731_v29 }
0x269a   : > { %17798 = vmatpush3.bf16.msra.mxu1 %v17797_v43 }
0x269b   : > { %17802 = vmatprep.subr.bf16.mxu1 %v19731_v29 }
0x269e   : > { %6295 = vperm.xlu1 %18359, %v21062_v16  }
0x271a   : > { %v6289_v44 = vpop.xlane.xlu1 %6288 }
0x271b   : > { %v6290_v45 = vadd.f32 1e-06, %v6289_v44 }
0x271d   : > { %18520 = vrsqrt.f32 %v6290_v45 }
0x271e   : > { %v6296_v47 = vpop.permute.xlu1 %6295 }
0x271f   : > { %v6298_v53 = vmul.f32 %v6296_v47, %v21021_v9  ;;  %v7079_v47 = vrot.slane %v21051_v39, 4 }
0x2721   : > { %6677 = vrot.lane.b32.xlu1 %v6298_v53, %s22353_s21  ;;  %v21121_v53 = vld [vmem:[%s22336_s5 + $0x30] sm:$0xff] }
0x2727   : > { %v18521_v54 = vpop.eup %18520 }
0x2728   : > { %v6292_v52 = vmul.f32 %v18521_v54, %v21021_v9 }
0x272a   : > { %6524 = vrot.lane.b32.xlu0 %v6292_v52, %s22341_s0 }
0x276a   : > { %v6368_v22 = vpop.f32.mrb[56].mxu1  ;;  %v6438_v28 = vpop.f32.mrb[60].mxu0 }
0x276b   : > { %v16020_v46 = vmul.f32 -1.442695, %v6368_v22  ;;  %v17052_v48 = vpop.f32.mrb[57].mxu1  ;;  %v17059_v11 = vpop.f32.mrb[61].mxu0 }
0x276d   : > { %18522 = vpow2.f32 %v16020_v46 }
0x2777   : > { %v18523_v58 = vpop.eup %18522 }
0x2778   : > { %v6445_v60 = vadd.f32 1.0, %v18523_v58 }
0x277a   : > { %18524 = vrcp.f32 %v6445_v60 }
0x2784   : > { %v18525_v61 = vpop.eup %18524 }
0x2785   : > { %v6448_v62 = vmul.f32 %v18525_v61, %v6368_v22 }
0x2787   : > { %v6449_v63 = vmul.f32 %v6448_v62, %v6438_v28 }
0x2789   : > { %17065 = vmatmul.mubr.msk.f32.vlgmr.msra.gmra.mrb[58].mxu1 %vm2777_vm6, %v6449_v63 }
0x278a   : > { %17804 = vmatpush3.bf16.msra.mxu1 %v17794_v19  ;;  %17078 = vmatprep.mubr.msk.f32.mxu1 %vm19716_vm1, %v19715_v8 }
0x2793   : > { %v6678_v1 = vpop.permute.xlu1 %6677 }
0x2794   : > { %17088 = vmatprep.subr.msk.mxu1 %vm3509_vm8, %v6678_v1 }
0x279c   : > { %v6525_v0 = vpop.permute.xlu0 %6524 }
0x279d   : > { %17072 = vmatmul.mubr.msk.f32.vlgmr.msra.gmra.mrb[62].mxu0 %vm2777_vm6, %v6525_v0  ;;  %6764 = vxpose.xlu1.b32.start.end [1/1] (short) (narrow) %v6525_v0, 16 }
0x279e   : > { %17808 = vmatpush3.bf16.xpose.msk.msra.mxu0 %vm20704_vm9, %v17797_v43  ;;  %17079 = vmatmul.mubr.msk.f32.vlgmr.msra.gmra.mrb[60].mxu1 %vm2777_vm6, %v6525_v0 }
0x279f   : > { %17089 = vmatpush3.msk.msra.mxu1 %vm3509_vm8, %v6678_v1  ;;  %17085 = vmatprep.mubr.msk.f32.mxu0 %vm19716_vm1, %v19715_v8 }
0x27a5   : > { %17086 = vmatmul.mubr.msk.f32.vlgmr.msra.gmra.mrb[64].mxu0 %vm2777_vm6, %v6678_v1 }
0x27bb   : > { %18360 = vset.pattern.permute.xlu1 %v19733_v41 }
0x281d   : > { %v6780_v2 = vpop.trf.xlu1 }
0x281e   : > { %17100 = vmatprep.mubr.msk.f32.mxu0 %vm3502_vm10, %v6780_v2 }
0x2821   : > { %v6781_v25 = vpop.trf.xlu1 }
0x285c   : > { %v21092_v3 = vpop.f32.mrb[58].mxu1 }
0x285d   : > { %v17066_v4 = vpop.f32.mrb[59].mxu1 }
0x2870   : > { %v6594_v55 = vpop.f32.mrb[62].mxu0 }
0x2871   : > { %v16024_v5 = vmul.f32 -1.442695, %v6594_v55  ;;  %v6664_v24 = vpop.f32.mrb[60].mxu1  ;;  %v17073_v50 = vpop.f32.mrb[63].mxu0 }
0x2872   : > { %v17080_v26 = vpop.f32.mrb[61].mxu1  ;;  %v21156_v50 = vld [vmem:[%s22340_s12 + $0x38] sm:$0xff] }
0x2873   : > { %18526 = vpow2.f32 %v16024_v5 }
0x2878   : > { %v6753_v51 = vpop.f32.mrb[64].mxu0 }
0x2879   : > { %v6757_v56 = vmul.f32 %v6753_v51, %v6664_v24  ;;  %v17087_v6 = vpop.f32.mrb[65].mxu0 }
0x287d   : > { %v18527_v10 = vpop.eup %18526 }
0x287e   : > { %v6671_v17 = vadd.f32 1.0, %v18527_v10  ;;  %v21163_v10 = vld [vmem:[%s22338_s3 + $0x30] sm:$0xff] }
0x2880   : > { %18528 = vrcp.f32 %v6671_v17  ;;  %v21166_v17 = vld [vmem:[%s22338_s3 + $0x38] sm:$0xff]  ;;  %s22363_s3 = sld [smem:[#allocation67_spill]] }
0x288a   : > { %v18529_v19 = vpop.eup %18528 }
0x288b   : > { %v6674_v20 = vmul.f32 %v18529_v19, %v6594_v55  ;;  %v6758_v30 = vsub.f32 1.0, %v18529_v19 }
0x288d   : > { %v6759_v31 = vmul.f32 %v6758_v30, %v6674_v20  ;;  %v6675_v59 = vmul.f32 %v6674_v20, %v6664_v24  ;;  %v6762_v21 = vmul.f32 %v6753_v51, %v6674_v20  ;;  %v21153_v24 = vld [vmem:[%s22340_s12 + $0x30] sm:$0xff] }
0x288e   : > { %v17825_v51 = vpack.c.bf16 %v21156_v50, %v21153_v24 }
0x288f   : > { %v6760_v34 = vadd.f32 %v18529_v19, %v6759_v31  ;;  %6796 = vxpose.xlu0.b32.start.end [1/1] (short) (narrow) %v6675_v59, 16  ;;  %17098 = vmatprep.subr.msk.mxu0 %vm3509_vm8, %v6762_v21  ;;  %v17822_v31 = vpack.c.bf16 %v21166_v17, %v21163_v10 }
0x2890   : > { %17099 = vmatpush3.msk.msra.mxu0 %vm3509_vm8, %v6762_v21 }
0x2891   : > { %v6761_v35 = vmul.f32 %v6760_v34, %v6757_v56  ;;  %17101 = vmatmul.mubr.msk.f32.vlgmr.msra.gmra.mrb[66].mxu0 %vm3502_vm10, %v6781_v25  ;;  %17812 = vmatprep.subr.bf16.mxu0 %v19731_v29 }
0x2892   : > { %17114 = vmatprep.mubr.msk.f32.mxu0 %vm19716_vm1, %v19715_v8 }
0x2893   : > { %17093 = vmatprep.subr.msk.mxu1 %vm3509_vm8, %v6761_v35 }
0x28bc   : > { %7307 = vrot.lane.b32.xlu0 %v21025_v27, %s22346_s2 }
0x290f   : > { %v6812_v36 = vpop.trf.xlu0 }
0x2910   : > { %17090 = vmatprep.mubr.msk.f32.mxu1 %vm3502_vm10, %v6812_v36 }
0x2913   : > { %v6813_v37 = vpop.trf.xlu0 }
0x2914   : > { %17091 = vmatmul.mubr.msk.f32.vlgmr.msra.gmra.mrb[62].mxu1 %vm3502_vm10, %v6813_v37 }
0x2915   : > { %17094 = vmatpush3.msk.msra.mxu1 %vm3509_vm8, %v6761_v35  ;;  %17095 = vmatprep.mubr.msk.f32.mxu1 %vm3502_vm10, %v6780_v2 }
0x2916   : > { %17809 = vmatprep.subr.bf16.mxu1 %v19731_v29 }
0x2918   : > { %17096 = vmatmul.mubr.msk.f32.vlgmr.msra.gmra.mrb[64].mxu1 %vm3502_vm10, %v6781_v25 }
0x2919   : > { %17107 = vmatprep.mubr.msk.f32.mxu1 %vm19716_vm1, %v19715_v8 }
0x292e   : > { %v7308_v23 = vpop.permute.xlu0 %7307 }
0x292f   : > { %v7310_v38 = vsel %vm2777_vm6, %v7308_v23, 0.0 }
0x2930   : > { %7311 = vadd.xlane.f32.xlu1 %v7310_v38 }
0x2941   : > { %7326 = vperm.xlu1 %18360, %v21062_v16   ;;  %v21124_v16 = vld [vmem:[%s22336_s5 + $0x38] sm:$0xff]  ;;  %s22364_s5 = sshll.u32 %s20504_s1, 3  ;;  %s22366_s1 = sld [smem:[#allocation105_spill]] }
0x2964   : > { %v17102_v40 = vpop.f32.mrb[66].mxu0 }
0x2965   : > { %v7078_v15 = vadd.f32 %v17102_v40, %v21041_v18  ;;  %v7064_v43 = vpop.f32.mrb[67].mxu0  ;;  %v21128_v18 = vpack.c.bf16 %v21124_v16, %v21121_v53 }
0x2966   : > { %v7077_v44 = vadd.f32 %v21036_v14, %v7064_v43 }
0x2968   : > { %v17813_v45 = vpack.c.bf16 %v7078_v15, %v7077_v44 }
0x296a   : > { %17814 = vmatpush3.bf16.msra.mxu0 %v17813_v45 }
0x296b   : > { %17818 = vmatprep.subr.bf16.mxu0 %v19731_v29 }
0x296d   : > { %17115 = vmatmul.mubr.msk.f32.vlgmr.msra.gmra.mrb[68].mxu0 %vm2777_vm6, %v7079_v47 }
0x296e   : > { %17128 = vmatprep.mubr.msk.f32.mxu0 %vm19716_vm1, %v19715_v8  ;;  %17820 = vmatpush3.bf16.msra.mxu0 %v21128_v18 }
0x296f   : > { %17824 = vmatprep.subr.bf16.mxu0 %v19731_v29 }
0x29bd   : > { %v7312_v14 = vpop.xlane.xlu1 %7311 }
0x29be   : > { %v7313_v39 = vadd.f32 1e-06, %v7312_v14 }
0x29c0   : > { %18530 = vrsqrt.f32 %v7313_v39 }
0x29c1   : > { %v7327_v20 = vpop.permute.xlu1 %7326 }
0x29c2   : > { %v7329_v59 = vmul.f32 %v7327_v20, %v21021_v9 }
0x29ca   : > { %v18531_v54 = vpop.eup %18530 }
0x29cb   : > { %v21133_v52 = vmul.f32 %v18531_v54, %v21021_v9 }
0x29cd   : > { %7331 = vrot.lane.b32.xlu0 %v21133_v52, %s22346_s2 }
0x29d1   : > { %7316 = vrot.lane.b32.xlu0 %v21025_v27, %s22344_s26 }
0x29e7   : > { %v17092_v22 = vpop.f32.mrb[62].mxu1 }
0x29e8   : > { %v7076_v28 = vadd.f32 %v17092_v22, %v21069_v42  ;;  %v6902_v46 = vpop.f32.mrb[63].mxu1 }
0x29e9   : > { %v7075_v48 = vadd.f32 %v21066_v49, %v6902_v46 }
0x29eb   : > { %v17816_v11 = vpack.c.bf16 %v7076_v28, %v7075_v48  ;;  %v17097_v58 = vpop.f32.mrb[64].mxu1 }
0x29ec   : > { %v7074_v60 = vadd.f32 %v17097_v58, %v21033_v13  ;;  %v6986_v61 = vpop.f32.mrb[65].mxu1 }
0x29ed   : > { %v7073_v62 = vadd.f32 %v21030_v12, %v6986_v61 }
0x29ef   : > { %v17810_v63 = vpack.c.bf16 %v7074_v60, %v7073_v62 }
0x29f1   : > { %17811 = vmatpush3.bf16.msra.mxu1 %v17810_v63 }
0x29f2   : > { %17815 = vmatprep.subr.bf16.mxu1 %v19731_v29 }
0x29f4   : > { %17108 = vmatmul.mubr.msk.f32.vlgmr.msra.gmra.mrb[66].mxu1 %vm2777_vm6, %v7079_v47 }
0x29f5   : > { %17817 = vmatpush3.bf16.msra.mxu1 %v17816_v11  ;;  %17121 = vmatprep.mubr.msk.f32.mxu1 %vm19716_vm1, %v19715_v8 }
0x29f6   : > { %17821 = vmatprep.subr.bf16.mxu1 %v19731_v29 }
0x2a3f   : > { %v7332_v27 = vpop.permute.xlu0 %7331 }
0x2a40   : > { %v7218_v49 = vpop.f32.mrb[68].mxu0  ;;  %17129 = vmatmul.mubr.msk.f32.vlgmr.msra.gmra.mrb[70].mxu0 %vm2777_vm6, %v7332_v27 }
0x2a41   : > { %v17116_v13 = vpop.f32.mrb[69].mxu0  ;;  %17142 = vmatprep.mubr.msk.f32.mxu0 %vm19716_vm1, %v19715_v8  ;;  %17826 = vmatpush3.bf16.msra.mxu0 %v17825_v51 }
0x2a42   : > { %17830 = vmatprep.subr.bf16.mxu0 %v19731_v29 }
0x2a43   : > { %v7317_v12 = vpop.permute.xlu0 %7316 }
0x2a44   : > { %v7319_v42 = vsel %vm2777_vm6, %v7317_v12, 0.0 }
0x2a45   : > { %7320 = vadd.xlane.f32.xlu0 %v7319_v42 }
0x2ac7   : > { %v7148_v1 = vpop.f32.mrb[66].mxu1 }
0x2ac8   : > { %v16039_v0 = vmul.f32 -1.442695, %v7148_v1  ;;  %v17109_v2 = vpop.f32.mrb[67].mxu1 }
0x2aca   : > { %18532 = vpow2.f32 %v16039_v0 }
0x2ad2   : > { %v7321_v4 = vpop.xlane.xlu0 %7320 }
0x2ad3   : > { %v7322_v55 = vadd.f32 1e-06, %v7321_v4 }
0x2ad4   : > { %v18533_v5 = vpop.eup %18532 }
0x2ad5   : > { %v7225_v26 = vadd.f32 1.0, %v18533_v5  ;;  %18534 = vrsqrt.f32 %v7322_v55  ;;  %v8112_v55 = vrot.slane %v21133_v52, 4 }
0x2ad7   : > { %18536 = vrcp.f32 %v7225_v26 }
0x2adf   : > { %v18535_v56 = vpop.eup %18534 }
0x2ae0   : > { %v7324_v6 = vmul.f32 %v18535_v56, %v21021_v9 }
0x2ae1   : > { %v18537_v19 = vpop.eup %18536 }
0x2ae2   : > { %v7228_v30 = vmul.f32 %v18537_v19, %v7148_v1  ;;  %7557 = vrot.lane.b32.xlu1 %v7324_v6, %s22344_s26 }
0x2ae4   : > { %v7229_v21 = vmul.f32 %v7228_v30, %v7218_v49 }
0x2ae6   : > { %7710 = vrot.lane.b32.xlu1 %v7329_v59, %s22345_s23  ;;  %17122 = vmatmul.mubr.msk.f32.vlgmr.msra.gmra.mrb[68].mxu1 %vm2777_vm6, %v7229_v21 }
0x2ae7   : > { %17823 = vmatpush3.bf16.msra.mxu1 %v17822_v31  ;;  %17135 = vmatprep.mubr.msk.f32.mxu1 %vm19716_vm1, %v19715_v8 }
0x2ae8   : > { %17827 = vmatprep.subr.bf16.mxu1 %v19731_v29 }
0x2aea   : > { %17136 = vmatmul.mubr.msk.f32.vlgmr.msra.gmra.mrb[70].mxu1 %vm2777_vm6, %v7332_v27 }
0x2aeb   : > { %17829 = vmatpush3.bf16.msra.mxu1 %v21128_v18  ;;  %17149 = vmatprep.mubr.msk.f32.mxu1 %vm19716_vm1, %v19715_v8 }
0x2aec   : > { %17833 = vmatprep.subr.bf16.mxu1 %v19731_v29 }
0x2b13   : > { %v7401_v9 = vpop.f32.mrb[70].mxu0 }
0x2b14   : > { %v17130_v25 = vpop.f32.mrb[71].mxu0  ;;  %v16043_v36 = vmul.f32 -1.442695, %v7401_v9 }
0x2b16   : > { %18538 = vpow2.f32 %v16043_v36 }
0x2b20   : > { %v18539_v37 = vpop.eup %18538 }
0x2b21   : > { %v7478_v23 = vadd.f32 1.0, %v18539_v37 }
0x2b23   : > { %18540 = vrcp.f32 %v7478_v23 }
0x2b2d   : > { %v18541_v38 = vpop.eup %18540 }
0x2b2e   : > { %v7481_v44 = vmul.f32 %v18541_v38, %v7401_v9 }
0x2b54   : > { %v7558_v34 = vpop.permute.xlu1 %7557 }
0x2b55   : > { %7797 = vxpose.xlu0.b32.start.end [1/1] (short) (narrow) %v7558_v34, 16  ;;  %17150 = vmatmul.mubr.msk.f32.vlgmr.msra.gmra.mrb[72].mxu1 %vm2777_vm6, %v7558_v34 }
0x2b56   : > { %17836 = vmatpush3.bf16.xpose.msk.msra.mxu1 %vm20704_vm9, %v17825_v51  ;;  %17163 = vmatprep.mubr.msk.f32.mxu1 %vm19716_vm1, %v19715_v8 }
0x2b58   : > { %v7711_v35 = vpop.permute.xlu1 %7710 }
0x2b5d   : > { %17164 = vmatmul.mubr.msk.f32.vlgmr.msra.gmra.mrb[74].mxu1 %vm2777_vm6, %v7711_v35 }
0x2bb9   : > { %v7299_v40 = vpop.f32.mrb[68].mxu1 }
0x2bba   : > { %v7304_v15 = vrot.slane %v7299_v40, 4  ;;  %v17123_v43 = vpop.f32.mrb[69].mxu1 }
0x2bbb   : > { %v18386_v43 = vld [vmem:[%s22347_s9 + $0x10] sm:$0xff]  }
0x2bbc   : > { %v21190_v45 = vsel %vm3509_vm8, %v21092_v3, %v7304_v15 }
0x2bbd   : > { %v7471_v47 = vpop.f32.mrb[70].mxu1 }
0x2bbe   : > { %v7482_v18 = vmul.f32 %v7481_v44, %v7471_v47  ;;  %v17137_v14 = vpop.f32.mrb[71].mxu1  ;;  %v18387_v44 = vld [vmem:[%s22347_s9 + $0x18] sm:$0xff]   ;;  %s1942_s9 = scalar_lea.vmem %s22363_s3, %s22364_s5  ;;  %s22367_s3 = sld [smem:[#allocation104_spill]] }
0x2bbf   : > { %s22368_s5 = sld [smem:[#allocation110_spill]] }
0x2bc0   : > { %17143 = vmatmul.mubr.msk.f32.vlgmr.msra.gmra.mrb[72].mxu0 %vm2777_vm6, %v7482_v18 }
0x2bc1   : > { %17832 = vmatpush3.bf16.msra.mxu0 %v17822_v31  ;;  %17156 = vmatprep.mubr.msk.f32.mxu0 %vm19716_vm1, %v19715_v8 }
0x2bc2   : > { %17166 = vmatprep.subr.msk.mxu0 %vm3509_vm8, %v7711_v35 }
0x2bc4   : > { %17157 = vmatmul.mubr.msk.f32.vlgmr.msra.gmra.mrb[74].mxu0 %vm2777_vm6, %v7558_v34 }
0x2bc5   : > { %17167 = vmatpush3.msk.msra.mxu0 %vm3509_vm8, %v7711_v35 }
0x2bd5   : > { %v7813_v39 = vpop.trf.xlu0 }
0x2bd6   : > { %17178 = vmatprep.mubr.msk.f32.mxu1 %vm3502_vm10, %v7813_v39 }
0x2bd9   : > { %v7814_v62 = vpop.trf.xlu0 }
0x2c28   : > { %v7627_v3 = vpop.f32.mrb[72].mxu1 }
0x2c29   : > { %v16047_v54 = vmul.f32 -1.442695, %v7627_v3  ;;  %v17151_v22 = vpop.f32.mrb[73].mxu1 }
0x2c2b   : > { %18542 = vpow2.f32 %v16047_v54 }
0x2c30   : > { %v7786_v28 = vpop.f32.mrb[74].mxu1 }
0x2c31   : > { %v17165_v46 = vpop.f32.mrb[75].mxu1 }
0x2c35   : > { %v18543_v48 = vpop.eup %18542 }
0x2c36   : > { %v7704_v11 = vadd.f32 1.0, %v18543_v48  ;;  %v16064_v48 = vld [vmem:[#allocation13 + $0x1] ss:$0 sm:$0xff] }
0x2c38   : > { %18544 = vrcp.f32 %v7704_v11 }
0x2c42   : > { %v18545_v58 = vpop.eup %18544 }
0x2c43   : > { %v7707_v60 = vmul.f32 %v18545_v58, %v7627_v3  ;;  %v7791_v63 = vsub.f32 1.0, %v18545_v58 }
0x2c45   : > { %v7795_v61 = vmul.f32 %v7786_v28, %v7707_v60  ;;  %v7792_v49 = vmul.f32 %v7791_v63, %v7707_v60 }
0x2c47   : > { %17176 = vmatprep.subr.msk.mxu1 %vm3509_vm8, %v7795_v61  ;;  %v7793_v0 = vadd.f32 %v18545_v58, %v7792_v49 }
0x2c48   : > { %17177 = vmatpush3.msk.msra.mxu1 %vm3509_vm8, %v7795_v61 }
0x2c49   : > { %17179 = vmatmul.mubr.msk.f32.vlgmr.msra.gmra.mrb[76].mxu1 %vm3502_vm10, %v7814_v62  ;;  %17840 = vmatprep.subr.bf16.mxu1 %v19731_v29 }
0x2c4a   : > { %17192 = vmatprep.mubr.msk.f32.mxu1 %vm19716_vm1, %v19715_v8 }
0x2c93   : > { %v21205_v27 = vpop.f32.mrb[72].mxu0 }
0x2c94   : > { %v17144_v13 = vpop.f32.mrb[73].mxu0 }
0x2c97   : > { %v7697_v12 = vpop.f32.mrb[74].mxu0 }
0x2c98   : > { %v7708_v42 = vmul.f32 %v7707_v60, %v7697_v12  ;;  %v7790_v1 = vmul.f32 %v7786_v28, %v7697_v12  ;;  %v17158_v2 = vpop.f32.mrb[75].mxu0  ;;  %v21252_v28 = vld [vmem:[%s1942_s9] sm:$0xff]  ;;  %s22365_s9 = sld [smem:[#allocation103_spill]] }
0x2c99   : > { %v8669_v46 = vsel %vm2005_vm0, %v21252_v28, 0.0 }
0x2c9a   : > { %v7794_v4 = vmul.f32 %v7793_v0, %v7790_v1  ;;  %7829 = vxpose.xlu1.b32.start.end [1/1] (short) (narrow) %v7708_v42, 16 }
0x2c9c   : > { %17171 = vmatprep.subr.msk.mxu0 %vm3509_vm8, %v7794_v4 }
0x2cb8   : > { %18361 = vset.pattern.permute.xlu1 %v19732_v32 }
0x2cbc   : > { %8113 = vrot.lane.b32.xlu1 %v8112_v55, %s22346_s2  ;;  %v18388_v55 = vld [vmem:[#allocation14 + $0x10] sm:$0xff]  }
0x2d1a   : > { %v7845_v5 = vpop.trf.xlu1 }
0x2d1b   : > { %17168 = vmatprep.mubr.msk.f32.mxu0 %vm3502_vm10, %v7845_v5  ;;  %v18389_v5 = vld [vmem:[#allocation14 + $0x18] sm:$0xff]  }
0x2d1c   : > { %v17180_v26 = vpop.f32.mrb[76].mxu1 }
0x2d1d   : > { %v8111_v51 = vadd.f32 %v17180_v26, %v21166_v17  ;;  %v8097_v56 = vpop.f32.mrb[77].mxu1 }
0x2d1e   : > { %v7846_v6 = vpop.trf.xlu1  ;;  %v8110_v19 = vadd.f32 %v21163_v10, %v8097_v56 }
0x2d1f   : > { %17169 = vmatmul.mubr.msk.f32.vlgmr.msra.gmra.mrb[76].mxu0 %vm3502_vm10, %v7846_v6 }
0x2d20   : > { %17172 = vmatpush3.msk.msra.mxu0 %vm3509_vm8, %v7794_v4  ;;  %17173 = vmatprep.mubr.msk.f32.mxu0 %vm3502_vm10, %v7813_v39  ;;  %v17841_v20 = vpack.c.bf16 %v8111_v51, %v8110_v19 }
0x2d21   : > { %17837 = vmatprep.subr.bf16.mxu0 %v19731_v29 }
0x2d22   : > { %17842 = vmatpush3.bf16.msra.mxu1 %v17841_v20 }
0x2d23   : > { %17174 = vmatmul.mubr.msk.f32.vlgmr.msra.gmra.mrb[78].mxu0 %vm3502_vm10, %v7814_v62  ;;  %17202 = vmatprep.subr.bf16.mxu1 %v19715_v8 }
0x2d24   : > { %17185 = vmatprep.mubr.msk.f32.mxu0 %vm19716_vm1, %v19715_v8 }
0x2d2e   : > { %v8114_v52 = vpop.permute.xlu1 %8113 }
0x2d2f   : > { %17193 = vmatmul.mubr.msk.f32.vlgmr.msra.gmra.mrb[78].mxu1 %vm2777_vm6, %v8114_v52 }
0x2d30   : > { %17206 = vmatprep.mubr.msk.bf16.mxu1 %vm19716_vm1, %v19715_v8  ;;  %17203 = vmatpush3.bf16.msra.mxu1 %v18386_v43 }
0x2d31   : > { %17204 = vmatprep.subr.bf16.mxu1 %v19715_v8 }
0x2d34   : > { %17205 = vmatpush3.bf16.msra.mxu1 %v18387_v44 }
0x2d35   : > { %17218 = vmatprep.subr.bf16.mxu1 %v19715_v8 }
0x2df2   : > { %v17170_v10 = vpop.f32.mrb[76].mxu0 }
0x2df3   : > { %v8109_v17 = vadd.f32 %v17170_v10, %v21156_v50  ;;  %v7935_v30 = vpop.f32.mrb[77].mxu0  ;;  %v16068_v10 = vld [vmem:[%s22349_s13 + $0x1] ss:$0 sm:$0xff] }
0x2df4   : > { %v8108_v31 = vadd.f32 %v21153_v24, %v7935_v30  ;;  %v16069_v30 = vld [vmem:[%s22350_s14 + $0x1] ss:$0 sm:$0xff] }
0x2df6   : > { %v17844_v59 = vpack.c.bf16 %v8109_v17, %v8108_v31  ;;  %v17175_v21 = vpop.f32.mrb[78].mxu0 }
0x2df7   : > { %v8107_v9 = vadd.f32 %v17175_v21, %v21124_v16  ;;  %v8019_v25 = vpop.f32.mrb[79].mxu0  ;;  %v16083_v21 = vld [vmem:[#allocation17] ss:$0 sm:$0xff] }
0x2df8   : > { %v8106_v34 = vadd.f32 %v21121_v53, %v8019_v25 }
0x2dfa   : > { %v17838_v35 = vpack.c.bf16 %v8107_v9, %v8106_v34  ;;  %v18390_v34 = vld [vmem:[#allocation20] sm:$0xff]  }
0x2dfc   : > { %17839 = vmatpush3.bf16.msra.mxu0 %v17838_v35 }
0x2dfd   : > { %17843 = vmatprep.subr.bf16.mxu0 %v19731_v29 }
0x2dff   : > { %17186 = vmatmul.mubr.msk.f32.vlgmr.msra.gmra.mrb[80].mxu0 %vm2777_vm6, %v8114_v52 }
0x2e00   : > { %17845 = vmatpush3.bf16.msra.mxu0 %v17844_v59  ;;  %17199 = vmatprep.mubr.msk.f32.mxu0 %vm19716_vm1, %v19715_v8 }
0x2e01   : > { %17210 = vmatprep.subr.bf16.mxu0 %v19715_v8 }
0x2e02   : > { %v8253_v24 = vpop.f32.mrb[78].mxu1 }
0x2e03   : > { %v17194_v50 = vpop.f32.mrb[79].mxu1 }
0x2e04   : > { %v16084_v50 = vld [vmem:[#allocation19] ss:$0 sm:$0xff] }
0x2ed2   : > { %v8183_v16 = vpop.f32.mrb[80].mxu0 }
0x2ed3   : > { %v16062_v36 = vmul.f32 -1.442695, %v8183_v16  ;;  %v17187_v37 = vpop.f32.mrb[81].mxu0 }
0x2ed5   : > { %18546 = vpow2.f32 %v16062_v36 }
0x2edf   : > { %v18547_v53 = vpop.eup %18546 }
0x2ee0   : > { %v8260_v23 = vadd.f32 1.0, %v18547_v53  ;;  %v18392_v53 = vld [vmem:[%s22351_s16 + $0x20] sm:$0xff]  }
0x2ee2   : > { %18548 = vrcp.f32 %v8260_v23  ;;  %v18393_v23 = vld [vmem:[%s22351_s16 + $0x28] sm:$0xff]  }
0x2eec   : > { %v18549_v38 = vpop.eup %18548 }
0x2eed   : > { %v8263_v40 = vmul.f32 %v18549_v38, %v8183_v16  ;;  %v18391_v16 = vld [vmem:[#allocation20 + $0x8] sm:$0xff]   ;;  %v18394_v38 = vld [vmem:[%s22351_s16 + $0x30] sm:$0xff]  }
0x2eef   : > { %v8264_v15 = vmul.f32 %v8263_v40, %v8253_v24  ;;  %v18395_v40 = vld [vmem:[%s22351_s16 + $0x38] sm:$0xff]  }
0x2ef1   : > { %17200 = vmatmul.mubr.msk.f32.vlgmr.msra.gmra.mrb[82].mxu0 %vm2777_vm6, %v8264_v15  ;;  %v16070_v15 = vld [vmem:[%s22352_s17 + $0x1] ss:$0 sm:$0xff] }
0x2ef2   : > { %17214 = vmatprep.mubr.msk.bf16.mxu0 %vm19716_vm1, %v19715_v8  ;;  %17211 = vmatpush3.bf16.msra.mxu0 %v18388_v55 }
0x2ef3   : > { %17212 = vmatprep.subr.bf16.mxu0 %v19715_v8 }
0x2ef6   : > { %17213 = vmatpush3.bf16.msra.mxu0 %v18389_v5 }
0x2ef7   : > { %17230 = vmatprep.subr.bf16.mxu0 %v19715_v8 }
0x2fc4   : > { %v8334_v47 = vpop.f32.mrb[82].mxu0 }
0x2fc5   : > { %v8339_v18 = vrot.slane %v8334_v47, 4  ;;  %v17201_v14 = vpop.f32.mrb[83].mxu0 }
0x2fc7   : > { %v8341_v39 = vsel %vm3509_vm8, %v21205_v27, %v8339_v18 }
0x2fc8   : > { %8343 = vrot.lane.b32.xlu0 %v8341_v39, %s22348_s11  ;;  %v16085_v39 = vld [vmem:[#allocation22] ss:$0 sm:$0xff] }
0x2fe7   : > { %8670 = vadd.xlane.f32.xlu0 %v8669_v46 }
0x303a   : > { %v8344_v3 = vpop.permute.xlu0 %8343 }
0x303b   : > { %v8346_v54 = vsel %vm2777_vm6, %v21190_v45, %v8344_v3 }
0x303c   : > { %v8347_v22 = vpack.c.bf16 %v8346_v54, %v8346_v54 }
0x303e   : > { %17207 = vmatmul.mubr.msk.bf16.vlgmr.msra.gmra.mrb[80].mxu1 %vm2005_vm0, %v8347_v22 }
0x303f   : > { %17226 = vmatprep.mubr.msk.bf16.mxu1 %vm19716_vm1, %v19715_v8  ;;  %17219 = vmatpush3.bf16.msra.mxu1 %v18392_v53 }
0x3040   : > { %17220 = vmatprep.subr.bf16.mxu1 %v19715_v8 }
0x3043   : > { %17221 = vmatpush3.bf16.msra.mxu1 %v18393_v23 }
0x3044   : > { %17222 = vmatprep.subr.bf16.mxu1 %v19715_v8 }
0x3047   : > { %17223 = vmatpush3.bf16.msra.mxu1 %v18394_v38 }
0x3048   : > { %17224 = vmatprep.subr.bf16.mxu1 %v19715_v8 }
0x304b   : > { %17225 = vmatpush3.bf16.msra.mxu1 %v18395_v40 }
0x304c   : > { %17248 = vmatprep.subr.mxu1 %v19715_v8 }
0x3074   : > { %v8671_v27 = vpop.xlane.xlu0 %8670 }
0x3075   : > { %v8672_v49 = vmul.f32 0.03125, %v8671_v27 }
0x3077   : > { %v8673_v42 = vsub.f32 %v21252_v28, %v8672_v49 }
0x3079   : > { %v8674_v2 = vmul.f32 %v8673_v42, %v8673_v42 }
0x3111   : > { %v8403_v11 = vpop.f32.mrb[80].mxu1 }
0x3112   : > { %v8404_v58 = vadd.f32 %v16064_v48, %v8403_v11  ;;  %v17208_v60 = vpop.f32.mrb[81].mxu1 }
0x3113   : > { %v8406_v61 = vpop.f32.mrb[82].mxu1 }
0x3114   : > { %v21257_v45 = vadd.f32 %v8404_v58, %v21010_v57  ;;  %v17209_v62 = vpop.f32.mrb[83].mxu1  ;;  %v8675_v57 = vsel %vm2005_vm0, %v8674_v2, 0.0 }
0x3116   : > { %v8410_v63 = vsel %vm2005_vm0, %v21257_v45, 0.0 }
0x3117   : > { %8411 = vadd.xlane.f32.xlu1 %v8410_v63 }
0x31a4   : > { %v8412_v13 = vpop.xlane.xlu1 %8411 }
0x31a5   : > { %v8413_v12 = vmul.f32 0.03125, %v8412_v13 }
0x31a7   : > { %v8414_v1 = vsub.f32 %v21257_v45, %v8413_v12 }
0x31a9   : > { %v8415_v0 = vmul.f32 %v8414_v1, %v8414_v1 }
0x31ab   : > { %v8416_v4 = vsel %vm2005_vm0, %v8415_v0, 0.0 }
0x31ac   : > { %8417 = vadd.xlane.f32.xlu1 %v8416_v4 }
0x31b0   : > { %8676 = vadd.xlane.f32.xlu1 %v8675_v57 }
0x3239   : > { %v8418_v26 = vpop.xlane.xlu1 %8417 }
0x323a   : > { %v8419_v51 = vmul.f32 0.03125, %v8418_v26 }
0x323c   : > { %v8420_v56 = vadd.f32 1e-05, %v8419_v51 }
0x323d   : > { %v8677_v6 = vpop.xlane.xlu1 %8676 }
0x323e   : > { %18550 = vrsqrt.f32 %v8420_v56  ;;  %v8678_v19 = vmul.f32 0.03125, %v8677_v6 }
0x3240   : > { %v8679_v20 = vadd.f32 1e-05, %v8678_v19 }
0x3242   : > { %18552 = vrsqrt.f32 %v8679_v20 }
0x3248   : > { %v18551_v52 = vpop.eup %18550 }
0x3249   : > { %v8422_v17 = vmul.f32 %v18551_v52, %v8414_v1 }
0x324b   : > { %v8429_v31 = vmul.f32 %v16068_v10, %v8422_v17 }
0x324c   : > { %v18553_v59 = vpop.eup %18552 }
0x324d   : > { %v8681_v9 = vmul.f32 %v18553_v59, %v8673_v42  ;;  %v8436_v25 = vadd.f32 %v16069_v30, %v8429_v31 }
0x324f   : > { %v8437_v35 = vpack.c.bf16 %v8436_v25, %v8436_v25  ;;  %v8688_v24 = vmul.f32 %v16083_v21, %v8681_v9 }
0x3251   : > { %17215 = vmatmul.mubr.msk.bf16.vlgmr.msra.gmra.mrb[84].mxu0 %vm2005_vm0, %v8437_v35  ;;  %v8695_v36 = vadd.f32 %v16084_v50, %v8688_v24 }
0x3252   : > { %17231 = vmatpush3.bf16.msra.mxu0 %v18390_v34  ;;  %17234 = vmatprep.mubr.msk.bf16.mxu0 %vm19716_vm1, %v19715_v8 }
0x3253   : > { %17232 = vmatprep.subr.bf16.mxu0 %v19715_v8  ;;  %v8696_v37 = vpack.c.bf16 %v8695_v36, %v8695_v36 }
0x3256   : > { %17233 = vmatpush3.bf16.msra.mxu0 %v18391_v16 }
0x3257   : > { %17238 = vmatprep.subr.mxu0 %v19715_v8 }
0x3259   : > { %17235 = vmatmul.mubr.msk.bf16.vlgmr.msra.gmra.mrb[88].mxu0 %vm2005_vm0, %v8696_v37 }
0x325a   : > { %17240 = vmatprep.mubr.msk.f32.mxu0 %vm19716_vm1, %v19715_v8 }
0x3324   : > { %v8493_v43 = vpop.f32.mrb[84].mxu0 }
0x3325   : > { %v8494_v44 = vadd.f32 %v16070_v15, %v8493_v43  ;;  %v17216_v47 = vpop.f32.mrb[85].mxu0 }
0x3326   : > { %v8496_v18 = vpop.f32.mrb[86].mxu0 }
0x3327   : > { %8507 = vrot.lane.b32.xlu1 %v8494_v44, %s22353_s21  ;;  %v17217_v14 = vpop.f32.mrb[87].mxu0  ;;  %v16074_v11 = vmul.f32 -1.442695, %v8494_v44 }
0x3329   : > { %18554 = vpow2.f32 %v16074_v11 }
0x332c   : > { %v8752_v3 = vpop.f32.mrb[88].mxu0 }
0x332d   : > { %v21287_v54 = vadd.f32 %v16085_v39, %v8752_v3  ;;  %v17236_v22 = vpop.f32.mrb[89].mxu0 }
0x332e   : > { %v8755_v46 = vpop.f32.mrb[90].mxu0 }
0x332f   : > { %8926 = vrot.lane.b32.xlu1 %v21287_v54, %s22355_s10  ;;  %8759 = vrot.lane.b32.xlu0 %v21287_v54, %s22341_s0  ;;  %v17237_v48 = vpop.f32.mrb[91].mxu0 }
0x3333   : > { %8924 = vrot.lane.b32.xlu1 %v21287_v54, %s22356_s4  ;;  %9091 = vrot.lane.b32.xlu0 %v21287_v54, %s22346_s2  ;;  %v18555_v58 = vpop.eup %18554 }
0x3334   : > { %v8502_v60 = vadd.f32 1.0, %v18555_v58 }
0x3336   : > { %18556 = vrcp.f32 %v8502_v60 }
0x3337   : > { %9093 = vrot.lane.b32.xlu1 %v21287_v54, %s22344_s26  ;;  %9258 = vrot.lane.b32.xlu0 %v21287_v54, %s22358_s25 }
0x333b   : > { %9260 = vrot.lane.b32.xlu1 %v21287_v54, %s22357_s7 }
0x3340   : > { %v18557_v61 = vpop.eup %18556 }
0x3341   : > { %v8505_v62 = vmul.f32 %v18557_v61, %v8494_v44 }
0x3399   : > { %v8508_v63 = vpop.permute.xlu1 %8507 }
0x339a   : > { %v8510_v27 = vmul.f32 %v8508_v63, %v8505_v62 }
0x339c   : > { %v8511_v49 = vpack.c.bf16 %v8510_v27, %v8510_v27 }
0x339e   : > { %17227 = vmatmul.mubr.msk.bf16.vlgmr.msra.gmra.mrb[84].mxu1 %vm5218_vm11, %v8511_v49 }
0x339f   : > { %17250 = vmatprep.mubr.msk.f32.mxu1 %vm19716_vm1, %v19715_v8 }
0x33a1   : > { %v8927_v13 = vpop.permute.xlu1 %8926  ;;  %v8760_v12 = vpop.permute.xlu0 %8759 }
0x33a2   : > { %17239 = vmatpush3.xpose.msk.msra.mxu0 %vm2099_vm2, %v8760_v12  ;;  %17249 = vmatpush3.xpose.msk.msra.mxu1 %vm2099_vm2, %v8927_v13 }
0x33a3   : > { %17258 = vmatprep.subr.mxu1 %v19715_v8  ;;  %17243 = vmatprep.subr.mxu0 %v19715_v8 }
0x33a5   : > { %v8925_v42 = vpop.permute.xlu1 %8924  ;;  %17241 = vmatmul.mubr.msk.f32.vlgmr.msra.gmra.mrb[92].mxu0 %vm2099_vm2, %v21287_v54  ;;  %v9092_v0 = vpop.permute.xlu0 %9091 }
0x33a6   : > { %17251 = vmatmul.mubr.msk.f32.vlgmr.msra.gmra.mrb[88].mxu1 %vm2099_vm2, %v8925_v42  ;;  %17245 = vmatprep.mubr.msk.f32.mxu0 %vm19716_vm1, %v19715_v8 }
0x33a7   : > { %17260 = vmatprep.mubr.msk.f32.mxu1 %vm19716_vm1, %v19715_v8 }
0x33a9   : > { %v9094_v1 = vpop.permute.xlu1 %9093  ;;  %v9259_v4 = vpop.permute.xlu0 %9258 }
0x33aa   : > { %17259 = vmatpush3.xpose.msk.msra.mxu1 %vm2099_vm2, %v9094_v1 }
0x33ab   : > { %17268 = vmatprep.subr.mxu1 %v19715_v8 }
0x33ad   : > { %v9261_v2 = vpop.permute.xlu1 %9260  ;;  %17261 = vmatmul.mubr.msk.f32.vlgmr.msra.gmra.mrb[90].mxu1 %vm2099_vm2, %v9092_v0 }
0x33ae   : > { %17269 = vmatpush3.xpose.msk.msra.mxu1 %vm2099_vm2, %v9261_v2  ;;  %17270 = vmatprep.mubr.msk.f32.mxu1 %vm19716_vm1, %v19715_v8 }
0x33af   : > { %17278 = vmatprep.subr.bf16.mxu1 %v19715_v8 }
0x33b1   : > { %17271 = vmatmul.mubr.msk.f32.vlgmr.msra.gmra.mrb[92].mxu1 %vm2099_vm2, %v9259_v4 }
0x33b2   : > { %17282 = vmatprep.mubr.msk.bf16.mxu1 %vm19716_vm1, %v19715_v8 }
0x3471   : > { %v21327_v57 = vpop.f32.mrb[84].mxu1 }
0x3472   : > { %v17228_v55 = vpop.f32.mrb[85].mxu1 }
0x3473   : > { %v8582_v5 = vpop.f32.mrb[86].mxu1 }
0x3474   : > { %v17229_v26 = vpop.f32.mrb[87].mxu1 }
0x3478   : > { %v8831_v51 = vpop.f32.mrb[92].mxu0 }
0x3479   : > { %v8835_v56 = vmul.f32 0.35355338, %v8831_v51  ;;  %v17242_v6 = vpop.f32.mrb[93].mxu0  ;;  %v8998_v19 = vpop.f32.mrb[88].mxu1 }
0x347a   : > { %v9002_v20 = vmul.f32 0.35355338, %v8998_v19  ;;  %v17252_v52 = vpop.f32.mrb[89].mxu1  ;;  %v18397_v19 = vld [vmem:[#allocation23 + $0x8] sm:$0xff]  }
0x347b   : > { %v8836_v10 = vsel %vm20548_vm5, %v8835_v56, -1e+30  ;;  %v18396_v56 = vld [vmem:[#allocation23] sm:$0xff]  }
0x347c   : > { %v9003_v17 = vsel %vm20548_vm5, %v9002_v20, -1e+30  ;;  %v8837_v30 = vsel %vm2099_vm2, %v8836_v10, -inf  ;;  %17279 = vmatpush3.bf16.msra.mxu1 %v18396_v56  ;;  %v21404_v56 = vld [vmem:[%s22365_s9 + $0x8] sm:$0xff] }
0x347d   : > { %8838 = vmax.xlane.f32.xlu1 %v8837_v30  ;;  %v9004_v31 = vsel %vm2099_vm2, %v9003_v17, -inf  ;;  %17280 = vmatprep.subr.bf16.mxu1 %v19715_v8 }
0x347e   : > { %9005 = vmax.xlane.f32.xlu0 %v9004_v31 }
0x3480   : > { %v9165_v59 = vpop.f32.mrb[90].mxu1  ;;  %17281 = vmatpush3.bf16.msra.mxu1 %v18397_v19 }
0x3481   : > { %v9169_v21 = vmul.f32 0.35355338, %v9165_v59  ;;  %v17262_v9 = vpop.f32.mrb[91].mxu1  ;;  %17846 = vmatprep.subr.bf16.mxu1 %v19731_v29 }
0x3483   : > { %v9170_v25 = vsel %vm20548_vm5, %v9169_v21, -1e+30 }
0x3484   : > { %v9332_v34 = vpop.f32.mrb[92].mxu1  ;;  %v9171_v35 = vsel %vm2099_vm2, %v9170_v25, -inf }
0x3485   : > { %v9336_v24 = vmul.f32 0.35355338, %v9332_v34  ;;  %9172 = vmax.xlane.f32.xlu0 %v9171_v35  ;;  %v17272_v50 = vpop.f32.mrb[93].mxu1 }
0x3487   : > { %v9337_v16 = vsel %vm20548_vm5, %v9336_v24, -1e+30 }
0x3488   : > { %v9338_v36 = vsel %vm2099_vm2, %v9337_v16, -inf }
0x3489   : > { %9339 = vmax.xlane.f32.xlu0 %v9338_v36 }
0x348e   : > { %8848 = vrot.lane.b32.xlu1 %v21287_v54, %s22353_s21 }
0x350a   : > { %v8839_v37 = vpop.xlane.xlu1 %8838 }
0x350b   : > { %v8840_v53 = vsub.f32 %v8836_v10, %v8839_v37  ;;  %v9006_v23 = vpop.xlane.xlu0 %9005 }
0x350c   : > { %v9007_v38 = vsub.f32 %v9003_v17, %v9006_v23 }
0x350d   : > { %v8841_v40 = vmul.f32 1.442695, %v8840_v53 }
0x350e   : > { %v9008_v15 = vmul.f32 1.442695, %v9007_v38  ;;  %v8849_v43 = vpop.permute.xlu1 %8848 }
0x350f   : > { %18558 = vpow2.f32 %v8841_v40  ;;  %17244 = vmatpush3.msra.mxu0 %v8849_v43 }
0x3510   : > { %18560 = vpow2.f32 %v9008_v15  ;;  %17253 = vmatprep.subr.mxu0 %v19715_v8 }
0x3512   : > { %v9173_v44 = vpop.xlane.xlu0 %9172 }
0x3513   : > { %v9174_v47 = vsub.f32 %v9170_v25, %v9173_v44 }
0x3515   : > { %v9175_v18 = vmul.f32 1.442695, %v9174_v47 }
0x3516   : > { %v9340_v14 = vpop.xlane.xlu0 %9339 }
0x3517   : > { %18562 = vpow2.f32 %v9175_v18  ;;  %v9341_v39 = vsub.f32 %v9337_v16, %v9340_v14  ;;  %v16101_v16 = vld [vmem:[#allocation25] ss:$0 sm:$0xff] }
0x3519   : > { %v18559_v3 = vpop.eup %18558  ;;  %v9342_v22 = vmul.f32 1.442695, %v9341_v39  ;;  %v18398_v39 = vld [vmem:[#allocation29] sm:$0xff]  }
0x351a   : > { %v18561_v46 = vpop.eup %18560  ;;  %v8843_v48 = vsel %vm2099_vm2, %v18559_v3, 0.0 }
0x351b   : > { %18564 = vpow2.f32 %v9342_v22  ;;  %8844 = vadd.xlane.f32.xlu1 %v8843_v48  ;;  %v9010_v11 = vsel %vm2099_vm2, %v18561_v46, 0.0 }
0x351c   : > { %9011 = vadd.xlane.f32.xlu0 %v9010_v11  ;;  %v16105_v11 = vld [vmem:[#allocation26] ss:$0 sm:$0xff] }
0x3521   : > { %v18563_v58 = vpop.eup %18562 }
0x3522   : > { %v9177_v60 = vsel %vm2099_vm2, %v18563_v58, 0.0 }
0x3523   : > { %9178 = vadd.xlane.f32.xlu1 %v9177_v60  ;;  %v16106_v60 = vld [vmem:[#allocation28] ss:$0 sm:$0xff] }
0x3525   : > { %v18565_v61 = vpop.eup %18564 }
0x3526   : > { %v9344_v62 = vsel %vm2099_vm2, %v18565_v61, 0.0 }
0x3527   : > { %9345 = vadd.xlane.f32.xlu0 %v9344_v62 }
0x3534   : > { %9182 = vrot.lane.b32.xlu1 %v21287_v54, %s22345_s23 }
0x3538   : > { %9349 = vrot.lane.b32.xlu1 %v21287_v54, %s22359_s27 }
0x353d   : > { %9015 = vrot.lane.b32.xlu0 %v21287_v54, %s22360_s29 }
0x35a8   : > { %v8845_v63 = vpop.xlane.xlu1 %8844 }
0x35a9   : > { %18566 = vrcp.f32 %v8845_v63  ;;  %v9012_v27 = vpop.xlane.xlu0 %9011 }
0x35aa   : > { %18568 = vrcp.f32 %v9012_v27  ;;  %v16107_v27 = vld [vmem:[#allocation31] ss:$0 sm:$0xff] }
0x35b0   : > { %v9179_v49 = vpop.xlane.xlu1 %9178 }
0x35b1   : > { %18570 = vrcp.f32 %v9179_v49 }
0x35b3   : > { %v18567_v13 = vpop.eup %18566 }
0x35b4   : > { %v9346_v12 = vpop.xlane.xlu0 %9345  ;;  %v8847_v42 = vmul.f32 %v18567_v13, %v18559_v3  ;;  %v18569_v1 = vpop.eup %18568  ;;  %v18399_v3 = vld [vmem:[#allocation29 + $0x8] sm:$0xff]  }
0x35b5   : > { %18572 = vrcp.f32 %v9346_v12  ;;  %v9014_v0 = vmul.f32 %v18569_v1, %v18561_v46  ;;  %v9183_v2 = vpop.permute.xlu1 %9182 }
0x35b6   : > { %17246 = vmatmul.mubr.msk.f32.vlgmr.msra.gmra.mrb[94].mxu0 %vm2099_vm2, %v8847_v42 }
0x35b7   : > { %17255 = vmatprep.mubr.msk.f32.mxu0 %vm19716_vm1, %v19715_v8 }
0x35b8   : > { %v9016_v4 = vpop.permute.xlu0 %9015 }
0x35b9   : > { %17254 = vmatpush3.msra.mxu0 %v9016_v4  ;;  %v9350_v5 = vpop.permute.xlu1 %9349 }
0x35ba   : > { %17256 = vmatmul.mubr.msk.f32.vlgmr.msra.gmra.mrb[96].mxu0 %vm2099_vm2, %v9014_v0  ;;  %17263 = vmatprep.subr.mxu0 %v19715_v8 }
0x35bb   : > { %v18571_v54 = vpop.eup %18570  ;;  %17264 = vmatpush3.msra.mxu0 %v9183_v2  ;;  %17265 = vmatprep.mubr.msk.f32.mxu0 %vm19716_vm1, %v19715_v8 }
0x35bc   : > { %17273 = vmatprep.subr.mxu0 %v19715_v8  ;;  %v9181_v55 = vmul.f32 %v18571_v54, %v18563_v58 }
0x35be   : > { %17266 = vmatmul.mubr.msk.f32.vlgmr.msra.gmra.mrb[98].mxu0 %vm2099_vm2, %v9181_v55 }
0x35bf   : > { %v18573_v26 = vpop.eup %18572  ;;  %17274 = vmatpush3.msra.mxu0 %v9350_v5  ;;  %17275 = vmatprep.mubr.msk.f32.mxu0 %vm19716_vm1, %v19715_v8 }
0x35c0   : > { %v9348_v51 = vmul.f32 %v18573_v26, %v18565_v61  ;;  %17286 = vmatprep.subr.bf16.mxu0 %v19715_v8 }
0x35c2   : > { %17276 = vmatmul.mubr.msk.f32.vlgmr.msra.gmra.mrb[100].mxu0 %vm2099_vm2, %v9348_v51  ;;  %v21401_v51 = vld [vmem:[%s22365_s9] sm:$0xff] }
0x35c3   : > { %17290 = vmatprep.mubr.msk.bf16.mxu0 %vm19716_vm1, %v19715_v8  ;;  %17287 = vmatpush3.bf16.msra.mxu0 %v18398_v39  ;;  %v17847_v19 = vpack.c.bf16 %v21404_v56, %v21401_v51 }
0x35c4   : > { %17288 = vmatprep.subr.bf16.mxu0 %v19715_v8 }
0x35c7   : > { %17289 = vmatpush3.bf16.msra.mxu0 %v18399_v3 }
0x35c8   : > { %17849 = vmatprep.subr.bf16.mxu0 %v19731_v29 }
0x3689   : > { %v8920_v6 = vpop.f32.mrb[94].mxu0 }
0x368a   : > { %v17247_v20 = vpop.f32.mrb[95].mxu0 }
0x368b   : > { %v21412_v20 = vld [vmem:[%s22366_s1 + $0x8] sm:$0xff] }
0x368d   : > { %v9087_v52 = vpop.f32.mrb[96].mxu0 }
0x368e   : > { %9426 = vrot.lane.b32.xlu1 %v9087_v52, %s22361_s30  ;;  %v17257_v10 = vpop.f32.mrb[97].mxu0 }
0x3691   : > { %v9254_v17 = vpop.f32.mrb[98].mxu0 }
0x3692   : > { %9430 = vrot.lane.b32.xlu0 %v9254_v17, %s22348_s11  ;;  %v17267_v30 = vpop.f32.mrb[99].mxu0 }
0x3695   : > { %v9421_v31 = vpop.f32.mrb[100].mxu0 }
0x3696   : > { %9434 = vrot.lane.b32.xlu1 %v9421_v31, %s22362_s20  ;;  %v17277_v59 = vpop.f32.mrb[101].mxu0 }
0x3700   : > { %v9427_v21 = vpop.permute.xlu1 %9426 }
0x3701   : > { %v9437_v25 = vsel %vm2099_vm2, %v8920_v6, %v9427_v21  ;;  %v21407_v6 = vld [vmem:[%s22366_s1] sm:$0xff] }
0x3702   : > { %v17850_v52 = vpack.c.bf16 %v21412_v20, %v21407_v6 }
0x3704   : > { %v9431_v9 = vpop.permute.xlu0 %9430 }
0x3705   : > { %v9438_v34 = vsel %vm2777_vm6, %v9437_v25, %v9431_v9 }
0x3708   : > { %v9435_v35 = vpop.permute.xlu1 %9434 }
0x3709   : > { %v9439_v24 = vsel %vm2779_vm7, %v9438_v34, %v9435_v35 }
0x370a   : > { %v9440_v50 = vpack.c.bf16 %v9439_v24, %v9439_v24 }
0x370c   : > { %17283 = vmatmul.mubr.msk.bf16.vlgmr.msra.gmra.mrb[96].mxu1 %vm2005_vm0, %v9440_v50 }
0x370d   : > { %17298 = vmatprep.mubr.msk.f32.mxu1 %vm19716_vm1, %v19715_v8  ;;  %17848 = vmatpush3.bf16.msra.mxu1 %v17847_v19 }
0x370e   : > { %17852 = vmatprep.subr.bf16.mxu1 %v19731_v29 }
0x37df   : > { %v9496_v36 = vpop.f32.mrb[96].mxu1 }
0x37e0   : > { %v9497_v37 = vadd.f32 %v16101_v16, %v9496_v36  ;;  %v17284_v53 = vpop.f32.mrb[97].mxu1 }
0x37e1   : > { %v9499_v23 = vpop.f32.mrb[98].mxu1 }
0x37e2   : > { %v21381_v38 = vadd.f32 %v9497_v37, %v21252_v28  ;;  %v17285_v40 = vpop.f32.mrb[99].mxu1  ;;  %v21437_v23 = vld [vmem:[%s22367_s3] sm:$0xff] }
0x37e3   : > { %v21440_v40 = vld [vmem:[%s22367_s3 + $0x8] sm:$0xff] }
0x37e4   : > { %v9503_v15 = vsel %vm2005_vm0, %v21381_v38, 0.0 }
0x37e5   : > { %9504 = vadd.xlane.f32.xlu0 %v9503_v15  ;;  %v17853_v15 = vpack.c.bf16 %v21440_v40, %v21437_v23 }
0x3872   : > { %v9505_v43 = vpop.xlane.xlu0 %9504 }
0x3873   : > { %v9506_v44 = vmul.f32 0.03125, %v9505_v43 }
0x3875   : > { %v9507_v47 = vsub.f32 %v21381_v38, %v9506_v44 }
0x3877   : > { %v9508_v18 = vmul.f32 %v9507_v47, %v9507_v47 }
0x3879   : > { %v9509_v14 = vsel %vm2005_vm0, %v9508_v18, 0.0 }
0x387a   : > { %9510 = vadd.xlane.f32.xlu1 %v9509_v14 }
0x3907   : > { %v9511_v28 = vpop.xlane.xlu1 %9510 }
0x3908   : > { %v9512_v22 = vmul.f32 0.03125, %v9511_v28 }
0x390a   : > { %v9513_v46 = vadd.f32 1e-05, %v9512_v22 }
0x390c   : > { %18574 = vrsqrt.f32 %v9513_v46 }
0x3916   : > { %v18575_v48 = vpop.eup %18574 }
0x3917   : > { %v9515_v58 = vmul.f32 %v18575_v48, %v9507_v47 }
0x3919   : > { %v9522_v61 = vmul.f32 %v16105_v11, %v9515_v58 }
0x391b   : > { %v9529_v62 = vadd.f32 %v16106_v60, %v9522_v61 }
0x391d   : > { %v9530_v63 = vpack.c.bf16 %v9529_v62, %v9529_v62 }
0x391f   : > { %17291 = vmatmul.mubr.msk.bf16.vlgmr.msra.gmra.mrb[104].mxu0 %vm2005_vm0, %v9530_v63 }
0x3920   : > { %17305 = vmatprep.mubr.msk.f32.mxu0 %vm19716_vm1, %v19715_v8  ;;  %17851 = vmatpush3.bf16.msra.mxu0 %v17850_v52 }
0x3921   : > { %17855 = vmatprep.subr.bf16.mxu0 %v19731_v29 }
0x39f2   : > { %v9586_v49 = vpop.f32.mrb[104].mxu0 }
0x39f3   : > { %v9587_v13 = vadd.f32 %v16107_v27, %v9586_v49  ;;  %v17292_v12 = vpop.f32.mrb[105].mxu0 }
0x39f4   : > { %v9589_v42 = vpop.f32.mrb[106].mxu0 }
0x39f5   : > { %v16111_v1 = vmul.f32 -1.442695, %v9587_v13  ;;  %v17293_v0 = vpop.f32.mrb[107].mxu0  ;;  %v9593_v10 = vand.u32 2147483647, %v9587_v13  ;;  %v9592_v36 = vmax.f32 %v9587_v13, 0.0 }
0x39f7   : > { %18576 = vpow2.f32 %v16111_v1  ;;  %v9594_v17 = vsub.f32 0.0, %v9593_v10 }
0x39f9   : > { %v9595_v30 = vmul.f32 1.442695, %v9594_v17 }
0x3a01   : > { %v18577_v2 = vpop.eup %18576 }
0x3a02   : > { %v9605_v4 = vadd.f32 1.0, %v18577_v2 }
0x3a04   : > { %18578 = vrcp.f32 %v9605_v4 }
0x3a05   : > { %18580 = vpow2.f32 %v9595_v30 }
0x3a0e   : > { %v18579_v54 = vpop.eup %18578 }
0x3a0f   : > { %v21392_v55 = vmul.f32 %v18579_v54, %v9587_v13  ;;  %v18581_v31 = vpop.eup %18580 }
0x3a10   : > { %v9597_v59 = vadd.f32 1.0, %v18581_v31 }
0x3a11   : > { %v21396_v5 = vmul.f32 %v21392_v55, %v21392_v55 }
0x3a12   : > { %18582 = vlog2.f32 %v9597_v59 }
0x3a13   : > { %v9610_v26 = vsel %vm2777_vm6, %v21396_v5, 0.0 }
0x3a14   : > { %9611 = vadd.xlane.f32.xlu0 %v9610_v26 }
0x3a1c   : > { %v18583_v35 = vpop.eup %18582 }
0x3a1d   : > { %v9599_v50 = vmul.f32 0.6931472, %v18583_v35 }
0x3a1f   : > { %v9600_v37 = vadd.f32 %v9599_v50, %v9592_v36 }
0x3a21   : > { %v21433_v53 = vmul.f32 0.01, %v9600_v37 }
0x3a2a   : > { %9617 = vrot.lane.b32.xlu0 %v21396_v5, %s22341_s0 }
0x3aa1   : > { %v9612_v21 = vpop.xlane.xlu0 %9611 }
0x3aa2   : > { %v9613_v9 = vadd.f32 1e-06, %v9612_v21 }
0x3aa4   : > { %18584 = vrsqrt.f32 %v9613_v9 }
0x3aa5   : > { %v9618_v25 = vpop.permute.xlu0 %9617 }
0x3aa6   : > { %v9620_v34 = vsel %vm2777_vm6, %v9618_v25, 0.0 }
0x3aa7   : > { %9621 = vadd.xlane.f32.xlu1 %v9620_v34 }
0x3aae   : > { %v18585_v24 = vpop.eup %18584 }
0x3aaf   : > { %v21422_v16 = vmul.f32 %v18585_v24, %v21392_v55 }
0x3ab1   : > { %17299 = vmatmul.mubr.msk.f32.vlgmr.msra.gmra.mrb[94].mxu1 %vm2777_vm6, %v21422_v16  ;;  %17306 = vmatmul.mubr.msk.f32.vlgmr.msra.gmra.mrb[102].mxu0 %vm2777_vm6, %v21422_v16 }
0x3ab2   : > { %17312 = vmatprep.mubr.msk.f32.mxu1 %vm19716_vm1, %v19715_v8  ;;  %17857 = vmatpush3.bf16.msra.mxu0 %v17847_v19 }
0x3ab3   : > { %17319 = vmatprep.mubr.msk.f32.mxu0 %vm19716_vm1, %v19715_v8  ;;  %17861 = vmatprep.subr.bf16.mxu0 %v19731_v29 }
0x3ab4   : > { %17854 = vmatpush3.bf16.msra.mxu1 %v17853_v15 }
0x3ab5   : > { %17858 = vmatprep.subr.bf16.mxu1 %v19731_v29 }
0x3ab8   : > { %9628 = vperm.xlu1 %18361, %v21433_v53  }
0x3b34   : > { %v9622_v43 = vpop.xlane.xlu1 %9621 }
0x3b35   : > { %v9623_v44 = vadd.f32 1e-06, %v9622_v43 }
0x3b37   : > { %18586 = vrsqrt.f32 %v9623_v44 }
0x3b38   : > { %v9629_v47 = vpop.permute.xlu1 %9628 }
0x3b39   : > { %v9631_v18 = vmul.f32 %v9629_v47, %v21392_v55 }
0x3b3b   : > { %10010 = vrot.lane.b32.xlu1 %v9631_v18, %s22353_s21 }
0x3b41   : > { %v18587_v14 = vpop.eup %18586 }
0x3b42   : > { %v9625_v39 = vmul.f32 %v18587_v14, %v21392_v55  ;;  %v10412_v14 = vrot.slane %v21422_v16, 4 }
0x3b44   : > { %9857 = vrot.lane.b32.xlu0 %v9625_v39, %s22341_s0  ;;  %v21492_v39 = vld [vmem:[%s22365_s9 + $0x10] sm:$0xff] }
0x3b84   : > { %v9701_v3 = vpop.f32.mrb[94].mxu1  ;;  %v9771_v28 = vpop.f32.mrb[102].mxu0 }
0x3b85   : > { %v16114_v22 = vmul.f32 -1.442695, %v9701_v3  ;;  %v17300_v46 = vpop.f32.mrb[95].mxu1  ;;  %v17307_v48 = vpop.f32.mrb[103].mxu0 }
0x3b87   : > { %18588 = vpow2.f32 %v16114_v22 }
0x3b91   : > { %v18589_v11 = vpop.eup %18588 }
0x3b92   : > { %v9778_v58 = vadd.f32 1.0, %v18589_v11 }
0x3b94   : > { %18590 = vrcp.f32 %v9778_v58 }
0x3b9e   : > { %v18591_v60 = vpop.eup %18590 }
0x3b9f   : > { %v9781_v61 = vmul.f32 %v18591_v60, %v9701_v3 }
0x3ba1   : > { %v9782_v62 = vmul.f32 %v9781_v61, %v9771_v28 }
0x3ba3   : > { %17313 = vmatmul.mubr.msk.f32.vlgmr.msra.gmra.mrb[100].mxu1 %vm2777_vm6, %v9782_v62 }
0x3ba4   : > { %17860 = vmatpush3.bf16.msra.mxu1 %v17850_v52  ;;  %17326 = vmatprep.mubr.msk.f32.mxu1 %vm19716_vm1, %v19715_v8 }
0x3bad   : > { %v10011_v63 = vpop.permute.xlu1 %10010 }
0x3bae   : > { %17336 = vmatprep.subr.msk.mxu1 %vm3509_vm8, %v10011_v63 }
0x3bb6   : > { %v9858_v27 = vpop.permute.xlu0 %9857 }
0x3bb7   : > { %17320 = vmatmul.mubr.msk.f32.vlgmr.msra.gmra.mrb[108].mxu0 %vm2777_vm6, %v9858_v27  ;;  %10097 = vxpose.xlu1.b32.start.end [1/1] (short) (narrow) %v9858_v27, 16 }
0x3bb8   : > { %17864 = vmatpush3.bf16.xpose.msk.msra.mxu0 %vm20704_vm9, %v17853_v15  ;;  %17327 = vmatmul.mubr.msk.f32.vlgmr.msra.gmra.mrb[102].mxu1 %vm2777_vm6, %v9858_v27 }
0x3bb9   : > { %17337 = vmatpush3.msk.msra.mxu1 %vm3509_vm8, %v10011_v63  ;;  %17333 = vmatprep.mubr.msk.f32.mxu0 %vm19716_vm1, %v19715_v8 }
0x3bbf   : > { %17334 = vmatmul.mubr.msk.f32.vlgmr.msra.gmra.mrb[110].mxu0 %vm2777_vm6, %v10011_v63 }
0x3bd5   : > { %18362 = vset.pattern.permute.xlu1 %v19733_v41 }
0x3c37   : > { %v10113_v49 = vpop.trf.xlu1 }
0x3c38   : > { %17348 = vmatprep.mubr.msk.f32.mxu0 %vm3502_vm10, %v10113_v49 }
0x3c3b   : > { %v10114_v25 = vpop.trf.xlu1 }
0x3c76   : > { %v21463_v13 = vpop.f32.mrb[100].mxu1 }
0x3c77   : > { %v17314_v12 = vpop.f32.mrb[101].mxu1 }
0x3c8a   : > { %v9927_v42 = vpop.f32.mrb[108].mxu0 }
0x3c8b   : > { %v16118_v1 = vmul.f32 -1.442695, %v9927_v42  ;;  %v9997_v0 = vpop.f32.mrb[102].mxu1  ;;  %v17321_v2 = vpop.f32.mrb[109].mxu0 }
0x3c8c   : > { %v17328_v4 = vpop.f32.mrb[103].mxu1 }
0x3c8d   : > { %18592 = vpow2.f32 %v16118_v1  ;;  %v21524_v4 = vld [vmem:[%s22367_s3 + $0x10] sm:$0xff] }
0x3c92   : > { %v10086_v54 = vpop.f32.mrb[110].mxu0 }
0x3c93   : > { %v10090_v26 = vmul.f32 %v10086_v54, %v9997_v0  ;;  %v17335_v19 = vpop.f32.mrb[111].mxu0 }
0x3c97   : > { %v18593_v52 = vpop.eup %18592 }
0x3c98   : > { %v10004_v10 = vadd.f32 1.0, %v18593_v52 }
0x3c9a   : > { %18594 = vrcp.f32 %v10004_v10 }
0x3ca4   : > { %v18595_v17 = vpop.eup %18594 }
0x3ca5   : > { %v10007_v30 = vmul.f32 %v18595_v17, %v9927_v42  ;;  %v10091_v31 = vsub.f32 1.0, %v18595_v17 }
0x3ca7   : > { %v10092_v59 = vmul.f32 %v10091_v31, %v10007_v30  ;;  %v10008_v21 = vmul.f32 %v10007_v30, %v9997_v0  ;;  %v10095_v9 = vmul.f32 %v10086_v54, %v10007_v30  ;;  %v21527_v54 = vld [vmem:[%s22367_s3 + $0x18] sm:$0xff] }
0x3ca8   : > { %v17881_v19 = vpack.c.bf16 %v21527_v54, %v21524_v4  ;;  %v21537_v30 = vld [vmem:[%s22366_s1 + $0x18] sm:$0xff] }
0x3ca9   : > { %v10093_v34 = vadd.f32 %v18595_v17, %v10092_v59  ;;  %10129 = vxpose.xlu0.b32.start.end [1/1] (short) (narrow) %v10008_v21, 16  ;;  %17346 = vmatprep.subr.msk.mxu0 %vm3509_vm8, %v10095_v9  ;;  %v21534_v17 = vld [vmem:[%s22366_s1 + $0x10] sm:$0xff] }
0x3caa   : > { %17347 = vmatpush3.msk.msra.mxu0 %vm3509_vm8, %v10095_v9  ;;  %v17878_v9 = vpack.c.bf16 %v21537_v30, %v21534_v17 }
0x3cab   : > { %v10094_v35 = vmul.f32 %v10093_v34, %v10090_v26  ;;  %17349 = vmatmul.mubr.msk.f32.vlgmr.msra.gmra.mrb[112].mxu0 %vm3502_vm10, %v10114_v25  ;;  %17868 = vmatprep.subr.bf16.mxu0 %v19731_v29 }
0x3cac   : > { %17362 = vmatprep.mubr.msk.f32.mxu0 %vm19716_vm1, %v19715_v8 }
0x3cad   : > { %17341 = vmatprep.subr.msk.mxu1 %vm3509_vm8, %v10094_v35 }
0x3cd6   : > { %10640 = vrot.lane.b32.xlu0 %v21396_v5, %s22346_s2 }
0x3d29   : > { %v10145_v24 = vpop.trf.xlu0 }
0x3d2a   : > { %17338 = vmatprep.mubr.msk.f32.mxu1 %vm3502_vm10, %v10145_v24 }
0x3d2d   : > { %v10146_v50 = vpop.trf.xlu0 }
0x3d2e   : > { %17339 = vmatmul.mubr.msk.f32.vlgmr.msra.gmra.mrb[104].mxu1 %vm3502_vm10, %v10146_v50 }
0x3d2f   : > { %17342 = vmatpush3.msk.msra.mxu1 %vm3509_vm8, %v10094_v35  ;;  %17343 = vmatprep.mubr.msk.f32.mxu1 %vm3502_vm10, %v10113_v49 }
0x3d30   : > { %17865 = vmatprep.subr.bf16.mxu1 %v19731_v29 }
0x3d32   : > { %17344 = vmatmul.mubr.msk.f32.vlgmr.msra.gmra.mrb[106].mxu1 %vm3502_vm10, %v10114_v25 }
0x3d33   : > { %17355 = vmatprep.mubr.msk.f32.mxu1 %vm19716_vm1, %v19715_v8 }
0x3d48   : > { %v10641_v36 = vpop.permute.xlu0 %10640 }
0x3d49   : > { %v10643_v37 = vsel %vm2777_vm6, %v10641_v36, 0.0 }
0x3d4a   : > { %10644 = vadd.xlane.f32.xlu1 %v10643_v37 }
0x3d5b   : > { %10659 = vperm.xlu1 %18362, %v21433_v53   ;;  %v21495_v53 = vld [vmem:[%s22365_s9 + $0x18] sm:$0xff] }
0x3d7e   : > { %v17350_v15 = vpop.f32.mrb[112].mxu0 }
0x3d7f   : > { %v10411_v43 = vadd.f32 %v17350_v15, %v21412_v20  ;;  %v10397_v44 = vpop.f32.mrb[113].mxu0  ;;  %v21499_v20 = vpack.c.bf16 %v21495_v53, %v21492_v39 }
0x3d80   : > { %v10410_v47 = vadd.f32 %v10397_v44, %v21407_v6 }
0x3d82   : > { %v17869_v18 = vpack.c.bf16 %v10411_v43, %v10410_v47 }
0x3d84   : > { %17870 = vmatpush3.bf16.msra.mxu0 %v17869_v18 }
0x3d85   : > { %17874 = vmatprep.subr.bf16.mxu0 %v19731_v29 }
0x3d87   : > { %17363 = vmatmul.mubr.msk.f32.vlgmr.msra.gmra.mrb[114].mxu0 %vm2777_vm6, %v10412_v14 }
0x3d88   : > { %17376 = vmatprep.mubr.msk.f32.mxu0 %vm19716_vm1, %v19715_v8  ;;  %17876 = vmatpush3.bf16.msra.mxu0 %v21499_v20 }
0x3d89   : > { %17880 = vmatprep.subr.bf16.mxu0 %v19731_v29 }
0x3dd7   : > { %v10645_v6 = vpop.xlane.xlu1 %10644 }
0x3dd8   : > { %v10646_v16 = vadd.f32 1e-06, %v10645_v6 }
0x3dda   : > { %18596 = vrsqrt.f32 %v10646_v16 }
0x3ddb   : > { %v10660_v59 = vpop.permute.xlu1 %10659 }
0x3ddc   : > { %v10662_v25 = vmul.f32 %v10660_v59, %v21392_v55 }
0x3de4   : > { %v18597_v3 = vpop.eup %18596 }
0x3de5   : > { %v21504_v28 = vmul.f32 %v18597_v3, %v21392_v55 }
0x3de7   : > { %10664 = vrot.lane.b32.xlu0 %v21504_v28, %s22346_s2 }
0x3deb   : > { %10649 = vrot.lane.b32.xlu0 %v21396_v5, %s22344_s26 }
0x3e01   : > { %v17340_v22 = vpop.f32.mrb[104].mxu1 }
0x3e02   : > { %v10409_v46 = vadd.f32 %v17340_v22, %v21440_v40  ;;  %v10235_v48 = vpop.f32.mrb[105].mxu1 }
0x3e03   : > { %v10408_v11 = vadd.f32 %v10235_v48, %v21437_v23 }
0x3e05   : > { %v17872_v58 = vpack.c.bf16 %v10409_v46, %v10408_v11  ;;  %v17345_v60 = vpop.f32.mrb[106].mxu1 }
0x3e06   : > { %v10407_v61 = vadd.f32 %v17345_v60, %v21404_v56  ;;  %v10319_v62 = vpop.f32.mrb[107].mxu1 }
0x3e07   : > { %v10406_v63 = vadd.f32 %v10319_v62, %v21401_v51 }
0x3e09   : > { %v17866_v27 = vpack.c.bf16 %v10407_v61, %v10406_v63 }
0x3e0b   : > { %17867 = vmatpush3.bf16.msra.mxu1 %v17866_v27 }
0x3e0c   : > { %17871 = vmatprep.subr.bf16.mxu1 %v19731_v29 }
0x3e0e   : > { %17356 = vmatmul.mubr.msk.f32.vlgmr.msra.gmra.mrb[108].mxu1 %vm2777_vm6, %v10412_v14 }
0x3e0f   : > { %17873 = vmatpush3.bf16.msra.mxu1 %v17872_v58  ;;  %17369 = vmatprep.mubr.msk.f32.mxu1 %vm19716_vm1, %v19715_v8 }
0x3e10   : > { %17877 = vmatprep.subr.bf16.mxu1 %v19731_v29 }
0x3e59   : > { %v10665_v5 = vpop.permute.xlu0 %10664 }
0x3e5a   : > { %v10551_v23 = vpop.f32.mrb[114].mxu0  ;;  %17377 = vmatmul.mubr.msk.f32.vlgmr.msra.gmra.mrb[116].mxu0 %vm2777_vm6, %v10665_v5 }
0x3e5b   : > { %v17364_v56 = vpop.f32.mrb[115].mxu0  ;;  %17390 = vmatprep.mubr.msk.f32.mxu0 %vm19716_vm1, %v19715_v8  ;;  %17882 = vmatpush3.bf16.msra.mxu0 %v17881_v19 }
0x3e5c   : > { %17886 = vmatprep.subr.bf16.mxu0 %v19731_v29 }
0x3e5d   : > { %v10650_v51 = vpop.permute.xlu0 %10649 }
0x3e5e   : > { %v10652_v40 = vsel %vm2777_vm6, %v10650_v51, 0.0 }
0x3e5f   : > { %10653 = vadd.xlane.f32.xlu0 %v10652_v40 }
0x3ee1   : > { %v10481_v49 = vpop.f32.mrb[108].mxu1 }
0x3ee2   : > { %v16133_v12 = vmul.f32 -1.442695, %v10481_v49  ;;  %v17357_v42 = vpop.f32.mrb[109].mxu1 }
0x3ee4   : > { %18598 = vpow2.f32 %v16133_v12 }
0x3eec   : > { %v10654_v1 = vpop.xlane.xlu0 %10653 }
0x3eed   : > { %v10655_v0 = vadd.f32 1e-06, %v10654_v1 }
0x3eee   : > { %v18599_v2 = vpop.eup %18598 }
0x3eef   : > { %v10558_v26 = vadd.f32 1.0, %v18599_v2  ;;  %18600 = vrsqrt.f32 %v10655_v0 }
0x3ef1   : > { %18602 = vrcp.f32 %v10558_v26  ;;  %v11445_v26 = vrot.slane %v21504_v28, 4 }
0x3ef9   : > { %v18601_v52 = vpop.eup %18600 }
0x3efa   : > { %v10657_v10 = vmul.f32 %v18601_v52, %v21392_v55 }
0x3efb   : > { %v18603_v31 = vpop.eup %18602 }
0x3efc   : > { %v10561_v21 = vmul.f32 %v18603_v31, %v10481_v49  ;;  %10890 = vrot.lane.b32.xlu1 %v10657_v10, %s22344_s26 }
0x3efe   : > { %v10562_v34 = vmul.f32 %v10561_v21, %v10551_v23 }
0x3f00   : > { %11043 = vrot.lane.b32.xlu1 %v10662_v25, %s22345_s23  ;;  %17370 = vmatmul.mubr.msk.f32.vlgmr.msra.gmra.mrb[110].mxu1 %vm2777_vm6, %v10562_v34 }
0x3f01   : > { %17879 = vmatpush3.bf16.msra.mxu1 %v17878_v9  ;;  %17383 = vmatprep.mubr.msk.f32.mxu1 %vm19716_vm1, %v19715_v8 }
0x3f02   : > { %17883 = vmatprep.subr.bf16.mxu1 %v19731_v29 }
0x3f04   : > { %17384 = vmatmul.mubr.msk.f32.vlgmr.msra.gmra.mrb[112].mxu1 %vm2777_vm6, %v10665_v5 }
0x3f05   : > { %17885 = vmatpush3.bf16.msra.mxu1 %v21499_v20  ;;  %17397 = vmatprep.mubr.msk.f32.mxu1 %vm19716_vm1, %v19715_v8 }
0x3f06   : > { %17889 = vmatprep.subr.bf16.mxu1 %v19731_v29 }
0x3f2d   : > { %v10734_v55 = vpop.f32.mrb[116].mxu0 }
0x3f2e   : > { %v17378_v35 = vpop.f32.mrb[117].mxu0  ;;  %v16137_v36 = vmul.f32 -1.442695, %v10734_v55 }
0x3f30   : > { %18604 = vpow2.f32 %v16137_v36 }
0x3f3a   : > { %v18605_v37 = vpop.eup %18604 }
0x3f3b   : > { %v10811_v15 = vadd.f32 1.0, %v18605_v37 }
0x3f3d   : > { %18606 = vrcp.f32 %v10811_v15 }
0x3f47   : > { %v18607_v43 = vpop.eup %18606 }
0x3f48   : > { %v10814_v14 = vmul.f32 %v18607_v43, %v10734_v55 }
0x3f6e   : > { %v10891_v24 = vpop.permute.xlu1 %10890 }
0x3f6f   : > { %11130 = vxpose.xlu0.b32.start.end [1/1] (short) (narrow) %v10891_v24, 16  ;;  %17398 = vmatmul.mubr.msk.f32.vlgmr.msra.gmra.mrb[114].mxu1 %vm2777_vm6, %v10891_v24 }
0x3f70   : > { %17892 = vmatpush3.bf16.xpose.msk.msra.mxu1 %vm20704_vm9, %v17881_v19  ;;  %17411 = vmatprep.mubr.msk.f32.mxu1 %vm19716_vm1, %v19715_v8 }
0x3f72   : > { %v11044_v50 = vpop.permute.xlu1 %11043 }
0x3f77   : > { %17412 = vmatmul.mubr.msk.f32.vlgmr.msra.gmra.mrb[116].mxu1 %vm2777_vm6, %v11044_v50 }
0x3fd3   : > { %v10632_v44 = vpop.f32.mrb[110].mxu1 }
0x3fd4   : > { %v10637_v47 = vrot.slane %v10632_v44, 4  ;;  %v17371_v18 = vpop.f32.mrb[111].mxu1 }
0x3fd6   : > { %v21561_v20 = vsel %vm3509_vm8, %v21463_v13, %v10637_v47 }
0x3fd7   : > { %v10804_v6 = vpop.f32.mrb[112].mxu1 }
0x3fd8   : > { %v10815_v16 = vmul.f32 %v10814_v14, %v10804_v6  ;;  %v17385_v3 = vpop.f32.mrb[113].mxu1  ;;  %v18400_v14 = vld [vmem:[#allocation32] sm:$0xff]   ;;  %v18401_v6 = vld [vmem:[#allocation32 + $0x8] sm:$0xff]  }
0x3fda   : > { %17391 = vmatmul.mubr.msk.f32.vlgmr.msra.gmra.mrb[118].mxu0 %vm2777_vm6, %v10815_v16 }
0x3fdb   : > { %17888 = vmatpush3.bf16.msra.mxu0 %v17878_v9  ;;  %17404 = vmatprep.mubr.msk.f32.mxu0 %vm19716_vm1, %v19715_v8 }
0x3fdc   : > { %17414 = vmatprep.subr.msk.mxu0 %vm3509_vm8, %v11044_v50 }
0x3fde   : > { %17405 = vmatmul.mubr.msk.f32.vlgmr.msra.gmra.mrb[120].mxu0 %vm2777_vm6, %v10891_v24 }
0x3fdf   : > { %17415 = vmatpush3.msk.msra.mxu0 %vm3509_vm8, %v11044_v50 }
0x3fef   : > { %v11146_v22 = vpop.trf.xlu0 }
0x3ff0   : > { %17426 = vmatprep.mubr.msk.f32.mxu1 %vm3502_vm10, %v11146_v22 }
0x3ff3   : > { %v11147_v5 = vpop.trf.xlu0 }
0x4042   : > { %v10960_v13 = vpop.f32.mrb[114].mxu1 }
0x4043   : > { %v16141_v46 = vmul.f32 -1.442695, %v10960_v13  ;;  %v17399_v48 = vpop.f32.mrb[115].mxu1 }
0x4045   : > { %18608 = vpow2.f32 %v16141_v46 }
0x404a   : > { %v11119_v11 = vpop.f32.mrb[116].mxu1 }
0x404b   : > { %v17413_v58 = vpop.f32.mrb[117].mxu1 }
0x404c   : > { %v16158_v58 = vld [vmem:[#allocation34] ss:$0 sm:$0xff] }
0x404f   : > { %v18609_v60 = vpop.eup %18608 }
0x4050   : > { %v11037_v61 = vadd.f32 1.0, %v18609_v60 }
0x4052   : > { %18610 = vrcp.f32 %v11037_v61 }
0x405c   : > { %v18611_v62 = vpop.eup %18610 }
0x405d   : > { %v11040_v63 = vmul.f32 %v18611_v62, %v10960_v13  ;;  %v11124_v23 = vsub.f32 1.0, %v18611_v62 }
0x405f   : > { %v11128_v27 = vmul.f32 %v11119_v11, %v11040_v63  ;;  %v11125_v51 = vmul.f32 %v11124_v23, %v11040_v63 }
0x4061   : > { %17424 = vmatprep.subr.msk.mxu1 %vm3509_vm8, %v11128_v27  ;;  %v11126_v1 = vadd.f32 %v18611_v62, %v11125_v51 }
0x4062   : > { %17425 = vmatpush3.msk.msra.mxu1 %vm3509_vm8, %v11128_v27 }
0x4063   : > { %17427 = vmatmul.mubr.msk.f32.vlgmr.msra.gmra.mrb[118].mxu1 %vm3502_vm10, %v11147_v5  ;;  %17896 = vmatprep.subr.bf16.mxu1 %v19731_v29 }
0x4064   : > { %17440 = vmatprep.mubr.msk.f32.mxu1 %vm19716_vm1, %v19715_v8 }
0x40ad   : > { %v21576_v56 = vpop.f32.mrb[118].mxu0 }
0x40ae   : > { %v17392_v40 = vpop.f32.mrb[119].mxu0 }
0x40b1   : > { %v11030_v49 = vpop.f32.mrb[120].mxu0 }
0x40b2   : > { %v11041_v12 = vmul.f32 %v11040_v63, %v11030_v49  ;;  %v11123_v42 = vmul.f32 %v11119_v11, %v11030_v49  ;;  %v17406_v0 = vpop.f32.mrb[121].mxu0 }
0x40b4   : > { %v11127_v2 = vmul.f32 %v11126_v1, %v11123_v42  ;;  %11162 = vxpose.xlu1.b32.start.end [1/1] (short) (narrow) %v11041_v12, 16  ;;  %v18402_v12 = vld [vmem:[#allocation38] sm:$0xff]   ;;  %v18403_v42 = vld [vmem:[#allocation38 + $0x8] sm:$0xff]  }
0x40b6   : > { %17419 = vmatprep.subr.msk.mxu0 %vm3509_vm8, %v11127_v2 }
0x40d2   : > { %18363 = vset.pattern.permute.xlu1 %v19732_v32 }
0x40d6   : > { %11446 = vrot.lane.b32.xlu1 %v11445_v26, %s22346_s2  ;;  %v16162_v26 = vld [vmem:[#allocation35] ss:$0 sm:$0xff] }
0x4134   : > { %v11178_v19 = vpop.trf.xlu1 }
0x4135   : > { %17416 = vmatprep.mubr.msk.f32.mxu0 %vm3502_vm10, %v11178_v19 }
0x4136   : > { %v17428_v52 = vpop.f32.mrb[118].mxu1 }
0x4137   : > { %v11444_v10 = vadd.f32 %v17428_v52, %v21537_v30  ;;  %v11430_v31 = vpop.f32.mrb[119].mxu1  ;;  %v16163_v52 = vld [vmem:[#allocation37] ss:$0 sm:$0xff] }
0x4138   : > { %v11179_v59 = vpop.trf.xlu1  ;;  %v11443_v21 = vadd.f32 %v11430_v31, %v21534_v17 }
0x4139   : > { %17417 = vmatmul.mubr.msk.f32.vlgmr.msra.gmra.mrb[122].mxu0 %vm3502_vm10, %v11179_v59 }
0x413a   : > { %17420 = vmatpush3.msk.msra.mxu0 %vm3509_vm8, %v11127_v2  ;;  %17421 = vmatprep.mubr.msk.f32.mxu0 %vm3502_vm10, %v11146_v22  ;;  %v17897_v32 = vpack.c.bf16 %v11444_v10, %v11443_v21  ;;  %v18404_v21 = vld [vmem:[%s22368_s5] sm:$0xff]  }
0x413b   : > { %17893 = vmatprep.subr.bf16.mxu0 %v19731_v29 }
0x413c   : > { %17898 = vmatpush3.bf16.msra.mxu1 %v17897_v32  ;;  %v18405_v32 = vld [vmem:[%s22368_s5 + $0x8] sm:$0xff]  }
0x413d   : > { %17422 = vmatmul.mubr.msk.f32.vlgmr.msra.gmra.mrb[124].mxu0 %vm3502_vm10, %v11147_v5  ;;  %17450 = vmatprep.subr.bf16.mxu1 %v19715_v8 }
0x413e   : > { %17433 = vmatprep.mubr.msk.f32.mxu0 %vm19716_vm1, %v19715_v8 }
0x4148   : > { %v11447_v28 = vpop.permute.xlu1 %11446 }
0x4149   : > { %17441 = vmatmul.mubr.msk.f32.vlgmr.msra.gmra.mrb[120].mxu1 %vm2777_vm6, %v11447_v28 }
0x414a   : > { %17454 = vmatprep.mubr.msk.bf16.mxu1 %vm19716_vm1, %v19715_v8  ;;  %17451 = vmatpush3.bf16.msra.mxu1 %v18400_v14 }
0x414b   : > { %17452 = vmatprep.subr.bf16.mxu1 %v19715_v8 }
0x414e   : > { %17453 = vmatpush3.bf16.msra.mxu1 %v18401_v6 }
0x414f   : > { %17466 = vmatprep.subr.bf16.mxu1 %v19715_v8 }
0x420c   : > { %v17418_v17 = vpop.f32.mrb[122].mxu0 }
0x420d   : > { %v11442_v30 = vadd.f32 %v17418_v17, %v21527_v54  ;;  %v11268_v9 = vpop.f32.mrb[123].mxu0  ;;  %v18407_v17 = vld [vmem:[%s22368_s5 + $0x18] sm:$0xff]  }
0x420e   : > { %v11441_v25 = vadd.f32 %v11268_v9, %v21524_v4 }
0x4210   : > { %v17900_v34 = vpack.c.bf16 %v11442_v30, %v11441_v25  ;;  %v17423_v55 = vpop.f32.mrb[124].mxu0  ;;  %v16164_v30 = vld [vmem:[#allocation40] ss:$0 sm:$0xff] }
0x4211   : > { %v11440_v35 = vadd.f32 %v17423_v55, %v21495_v53  ;;  %v11352_v24 = vpop.f32.mrb[125].mxu0 }
0x4212   : > { %v11439_v50 = vadd.f32 %v11352_v24, %v21492_v39 }
0x4214   : > { %v17894_v36 = vpack.c.bf16 %v11440_v35, %v11439_v50 }
0x4216   : > { %17895 = vmatpush3.bf16.msra.mxu0 %v17894_v36 }
0x4217   : > { %17899 = vmatprep.subr.bf16.mxu0 %v19731_v29 }
0x4219   : > { %17434 = vmatmul.mubr.msk.f32.vlgmr.msra.gmra.mrb[126].mxu0 %vm2777_vm6, %v11447_v28  ;;  %v18406_v28 = vld [vmem:[%s22368_s5 + $0x10] sm:$0xff]  }
0x421a   : > { %17901 = vmatpush3.bf16.msra.mxu0 %v17900_v34  ;;  %17447 = vmatprep.mubr.msk.f32.mxu0 %vm19716_vm1, %v19715_v8 }
0x421b   : > { %17458 = vmatprep.subr.bf16.mxu0 %v19715_v8 }
0x421c   : > { %v11586_v4 = vpop.f32.mrb[120].mxu1 }
0x421d   : > { %v17442_v54 = vpop.f32.mrb[121].mxu1 }
0x42ec   : > { %v11516_v37 = vpop.f32.mrb[126].mxu0 }
0x42ed   : > { %v16156_v15 = vmul.f32 -1.442695, %v11516_v37  ;;  %v17435_v53 = vpop.f32.mrb[127].mxu0 }
0x42ef   : > { %18612 = vpow2.f32 %v16156_v15 }
0x42f9   : > { %v18613_v43 = vpop.eup %18612 }
0x42fa   : > { %v11593_v39 = vadd.f32 1.0, %v18613_v43  ;;  %v16169_v43 = vld [vmem:[#allocation41] ss:$0 sm:$0xff] }
0x42fc   : > { %18614 = vrcp.f32 %v11593_v39 }
0x4306   : > { %v18615_v44 = vpop.eup %18614 }
0x4307   : > { %v11596_v47 = vmul.f32 %v18615_v44, %v11516_v37 }
0x4309   : > { %v11597_v18 = vmul.f32 %v11596_v47, %v11586_v4 }
0x430b   : > { %17448 = vmatmul.mubr.msk.f32.vlgmr.msra.gmra.mrb[128].mxu0 %vm2777_vm6, %v11597_v18 }
0x430c   : > { %17462 = vmatprep.mubr.msk.bf16.mxu0 %vm19716_vm1, %v19715_v8  ;;  %17459 = vmatpush3.bf16.msra.mxu0 %v18402_v12 }
0x430d   : > { %17460 = vmatprep.subr.bf16.mxu0 %v19715_v8 }
0x4310   : > { %17461 = vmatpush3.bf16.msra.mxu0 %v18403_v42 }
0x4311   : > { %17478 = vmatprep.subr.bf16.mxu0 %v19715_v8 }
0x43de   : > { %v11667_v16 = vpop.f32.mrb[128].mxu0 }
0x43df   : > { %v11672_v3 = vrot.slane %v11667_v16, 4  ;;  %v17449_v22 = vpop.f32.mrb[129].mxu0 }
0x43e1   : > { %v11674_v13 = vsel %vm3509_vm8, %v21576_v56, %v11672_v3 }
0x43e2   : > { %11676 = vrot.lane.b32.xlu0 %v11674_v13, %s22348_s11 }
0x4454   : > { %v11677_v46 = vpop.permute.xlu0 %11676 }
0x4455   : > { %v11679_v48 = vsel %vm2777_vm6, %v21561_v20, %v11677_v46 }
0x4456   : > { %v11680_v11 = vpack.c.bf16 %v11679_v48, %v11679_v48 }
0x4458   : > { %17455 = vmatmul.mubr.msk.bf16.vlgmr.msra.gmra.mrb[124].mxu1 %vm2005_vm0, %v11680_v11  ;;  %v18408_v11 = vld [vmem:[#allocation20 + $0x10] sm:$0xff]  }
0x4459   : > { %17474 = vmatprep.mubr.msk.bf16.mxu1 %vm19716_vm1, %v19715_v8  ;;  %17467 = vmatpush3.bf16.msra.mxu1 %v18404_v21 }
0x445a   : > { %17468 = vmatprep.subr.bf16.mxu1 %v19715_v8 }
0x445d   : > { %17469 = vmatpush3.bf16.msra.mxu1 %v18405_v32 }
0x445e   : > { %17470 = vmatprep.subr.bf16.mxu1 %v19715_v8 }
0x4461   : > { %17471 = vmatpush3.bf16.msra.mxu1 %v18406_v28 }
0x4462   : > { %17472 = vmatprep.subr.bf16.mxu1 %v19715_v8 }
0x4465   : > { %17473 = vmatpush3.bf16.msra.mxu1 %v18407_v17 }
0x4466   : > { %17496 = vmatprep.subr.mxu1 %v19715_v8 }
0x452b   : > { %v11736_v60 = vpop.f32.mrb[124].mxu1 }
0x452c   : > { %v11737_v61 = vadd.f32 %v16158_v58, %v11736_v60  ;;  %v17456_v62 = vpop.f32.mrb[125].mxu1  ;;  %v18409_v58 = vld [vmem:[#allocation20 + $0x18] sm:$0xff]  }
0x452d   : > { %v11739_v63 = vpop.f32.mrb[126].mxu1 }
0x452e   : > { %v21619_v27 = vadd.f32 %v11737_v61, %v21381_v38  ;;  %v17457_v5 = vpop.f32.mrb[127].mxu1 }
0x4530   : > { %v11743_v23 = vsel %vm2005_vm0, %v21619_v27, 0.0 }
0x4531   : > { %11744 = vadd.xlane.f32.xlu1 %v11743_v23  ;;  %v16196_v23 = vld [vmem:[#allocation19 + $0x1] ss:$0 sm:$0xff] }
0x45be   : > { %v11745_v20 = vpop.xlane.xlu1 %11744 }
0x45bf   : > { %v11746_v56 = vmul.f32 0.03125, %v11745_v20 }
0x45c1   : > { %v11747_v51 = vsub.f32 %v21619_v27, %v11746_v56 }
0x45c3   : > { %v11748_v40 = vmul.f32 %v11747_v51, %v11747_v51 }
0x45c5   : > { %v11749_v49 = vsel %vm2005_vm0, %v11748_v40, 0.0  ;;  %v16197_v40 = vld [vmem:[#allocation22 + $0x1] ss:$0 sm:$0xff] }
0x45c6   : > { %11750 = vadd.xlane.f32.xlu0 %v11749_v49 }
0x4653   : > { %v11751_v38 = vpop.xlane.xlu0 %11750 }
0x4654   : > { %v11752_v1 = vmul.f32 0.03125, %v11751_v38 }
0x4656   : > { %v11753_v0 = vadd.f32 1e-05, %v11752_v1 }
0x4658   : > { %18616 = vrsqrt.f32 %v11753_v0 }
0x4662   : > { %v18617_v2 = vpop.eup %18616 }
0x4663   : > { %v11755_v19 = vmul.f32 %v18617_v2, %v11747_v51 }
0x4665   : > { %v11762_v10 = vmul.f32 %v16162_v26, %v11755_v19 }
0x4667   : > { %v11769_v31 = vadd.f32 %v16163_v52, %v11762_v10 }
0x4669   : > { %v11770_v59 = vpack.c.bf16 %v11769_v31, %v11769_v31 }
0x466b   : > { %17463 = vmatmul.mubr.msk.bf16.vlgmr.msra.gmra.mrb[132].mxu0 %vm2005_vm0, %v11770_v59 }
0x466c   : > { %17482 = vmatprep.mubr.msk.bf16.mxu0 %vm19716_vm1, %v19715_v8  ;;  %17479 = vmatpush3.bf16.msra.mxu0 %v18408_v11 }
0x466d   : > { %17480 = vmatprep.subr.bf16.mxu0 %v19715_v8 }
0x4670   : > { %17481 = vmatpush3.bf16.msra.mxu0 %v18409_v58 }
0x4671   : > { %17486 = vmatprep.subr.mxu0 %v19715_v8 }
0x473e   : > { %v11826_v9 = vpop.f32.mrb[132].mxu0 }
0x473f   : > { %v11827_v25 = vadd.f32 %v16164_v30, %v11826_v9  ;;  %v17464_v34 = vpop.f32.mrb[133].mxu0 }
0x4740   : > { %v11829_v55 = vpop.f32.mrb[134].mxu0 }
0x4741   : > { %11840 = vrot.lane.b32.xlu1 %v11827_v25, %s22353_s21  ;;  %v17465_v35 = vpop.f32.mrb[135].mxu0  ;;  %v16168_v24 = vmul.f32 -1.442695, %v11827_v25 }
0x4743   : > { %18618 = vpow2.f32 %v16168_v24 }
0x474d   : > { %v18619_v50 = vpop.eup %18618 }
0x474e   : > { %v11835_v36 = vadd.f32 1.0, %v18619_v50 }
0x4750   : > { %18620 = vrcp.f32 %v11835_v36 }
0x475a   : > { %v18621_v4 = vpop.eup %18620 }
0x475b   : > { %v11838_v54 = vmul.f32 %v18621_v4, %v11827_v25 }
0x47b3   : > { %v11841_v37 = vpop.permute.xlu1 %11840 }
0x47b4   : > { %v11843_v15 = vmul.f32 %v11841_v37, %v11838_v54 }
0x47b6   : > { %v11844_v53 = vpack.c.bf16 %v11843_v15, %v11843_v15 }
0x47b8   : > { %17475 = vmatmul.mubr.msk.bf16.vlgmr.msra.gmra.mrb[128].mxu1 %vm5218_vm11, %v11844_v53 }
0x47b9   : > { %17498 = vmatprep.mubr.msk.f32.mxu1 %vm19716_vm1, %v19715_v8 }
0x488b   : > { %v11912_v39 = vpop.f32.mrb[128].mxu1 }
0x488c   : > { %v11913_v44 = vadd.f32 %v16169_v43, %v11912_v39  ;;  %v17476_v47 = vpop.f32.mrb[129].mxu1 }
0x488d   : > { %v11915_v18 = vpop.f32.mrb[130].mxu1 }
0x488e   : > { %v21643_v14 = vadd.f32 %v11913_v44, %v21619_v27  ;;  %v17477_v6 = vpop.f32.mrb[131].mxu1  ;;  %v16195_v27 = vld [vmem:[#allocation17 + $0x1] ss:$0 sm:$0xff] }
0x4890   : > { %v11992_v16 = vsel %vm2005_vm0, %v21643_v14, 0.0 }
0x4891   : > { %11993 = vadd.xlane.f32.xlu0 %v11992_v16 }
0x491e   : > { %v11994_v3 = vpop.xlane.xlu0 %11993 }
0x491f   : > { %v11995_v22 = vmul.f32 0.03125, %v11994_v3 }
0x4921   : > { %v11996_v13 = vsub.f32 %v21643_v14, %v11995_v22 }
0x4923   : > { %v11997_v46 = vmul.f32 %v11996_v13, %v11996_v13 }
0x4925   : > { %v11998_v48 = vsel %vm2005_vm0, %v11997_v46, 0.0 }
0x4926   : > { %11999 = vadd.xlane.f32.xlu0 %v11998_v48 }
0x49b3   : > { %v12000_v60 = vpop.xlane.xlu0 %11999 }
0x49b4   : > { %v12001_v61 = vmul.f32 0.03125, %v12000_v60 }
0x49b6   : > { %v12002_v62 = vadd.f32 1e-05, %v12001_v61 }
0x49b8   : > { %18622 = vrsqrt.f32 %v12002_v62 }
0x49c2   : > { %v18623_v63 = vpop.eup %18622 }
0x49c3   : > { %v12004_v5 = vmul.f32 %v18623_v63, %v11996_v13 }
0x49c5   : > { %v12011_v20 = vmul.f32 %v16195_v27, %v12004_v5 }
0x49c7   : > { %v12018_v56 = vadd.f32 %v16196_v23, %v12011_v20 }
0x49c9   : > { %v12019_v51 = vpack.c.bf16 %v12018_v56, %v12018_v56 }
0x49cb   : > { %17483 = vmatmul.mubr.msk.bf16.vlgmr.msra.gmra.mrb[136].mxu0 %vm2005_vm0, %v12019_v51 }
0x49cc   : > { %17488 = vmatprep.mubr.msk.f32.mxu0 %vm19716_vm1, %v19715_v8 }
0x4a9e   : > { %v12075_v49 = vpop.f32.mrb[136].mxu0 }
0x4a9f   : > { %v21654_v12 = vadd.f32 %v16197_v40, %v12075_v49  ;;  %v17484_v42 = vpop.f32.mrb[137].mxu0 }
0x4aa0   : > { %v12078_v38 = vpop.f32.mrb[138].mxu0 }
0x4aa1   : > { %12249 = vrot.lane.b32.xlu0 %v21654_v12, %s22355_s10  ;;  %12082 = vrot.lane.b32.xlu1 %v21654_v12, %s22341_s0  ;;  %v17485_v1 = vpop.f32.mrb[139].mxu0 }
0x4aa5   : > { %12247 = vrot.lane.b32.xlu1 %v21654_v12, %s22356_s4 }
0x4aa9   : > { %12416 = vrot.lane.b32.xlu1 %v21654_v12, %s22344_s26 }
0x4aad   : > { %12414 = vrot.lane.b32.xlu1 %v21654_v12, %s22346_s2 }
0x4ab1   : > { %12583 = vrot.lane.b32.xlu1 %v21654_v12, %s22357_s7  ;;  %s19734_s7 = smov [#allocation46]  }
0x4ab2   : > { %s19480_s4 = sshll.u32 %s19734_s7, 4  ;;  %s19481_s4 = int_to_ptr.vmem [resolvable:$false] %s19480_s4 }
0x4ab5   : > { %12581 = vrot.lane.b32.xlu1 %v21654_v12, %s22358_s25  ;;  %s22013_s25 = sand.u32 1, %s19622_s22  }
0x4b13   : > { %v12250_v0 = vpop.permute.xlu0 %12249  ;;  %v12083_v2 = vpop.permute.xlu1 %12082 }
0x4b14   : > { %17487 = vmatpush3.xpose.msk.msra.mxu0 %vm2099_vm2, %v12083_v2  ;;  %17497 = vmatpush3.xpose.msk.msra.mxu1 %vm2099_vm2, %v12250_v0 }
0x4b15   : > { %17506 = vmatprep.subr.mxu1 %v19715_v8  ;;  %17491 = vmatprep.subr.mxu0 %v19715_v8 }
0x4b17   : > { %17489 = vmatmul.mubr.msk.f32.vlgmr.msra.gmra.mrb[130].mxu0 %vm2099_vm2, %v21654_v12  ;;  %v12248_v26 = vpop.permute.xlu1 %12247 }
0x4b18   : > { %17499 = vmatmul.mubr.msk.f32.vlgmr.msra.gmra.mrb[122].mxu1 %vm2099_vm2, %v12248_v26  ;;  %17493 = vmatprep.mubr.msk.f32.mxu0 %vm19716_vm1, %v19715_v8 }
0x4b19   : > { %17508 = vmatprep.mubr.msk.f32.mxu1 %vm19716_vm1, %v19715_v8 }
0x4b1b   : > { %v12417_v19 = vpop.permute.xlu1 %12416 }
0x4b1c   : > { %17507 = vmatpush3.xpose.msk.msra.mxu1 %vm2099_vm2, %v12417_v19 }
0x4b1d   : > { %17516 = vmatprep.subr.mxu1 %v19715_v8 }
0x4b1f   : > { %v12415_v52 = vpop.permute.xlu1 %12414 }
0x4b20   : > { %17509 = vmatmul.mubr.msk.f32.vlgmr.msra.gmra.mrb[132].mxu1 %vm2099_vm2, %v12415_v52 }
0x4b21   : > { %17518 = vmatprep.mubr.msk.f32.mxu1 %vm19716_vm1, %v19715_v8 }
0x4b23   : > { %v12584_v10 = vpop.permute.xlu1 %12583 }
0x4b24   : > { %17517 = vmatpush3.xpose.msk.msra.mxu1 %vm2099_vm2, %v12584_v10 }
0x4b25   : > { %17526 = vmatprep.subr.bf16.mxu1 %v19715_v8 }
0x4b27   : > { %v12582_v31 = vpop.permute.xlu1 %12581 }
0x4b28   : > { %17519 = vmatmul.mubr.msk.f32.vlgmr.msra.gmra.mrb[134].mxu1 %vm2099_vm2, %v12582_v31 }
0x4b29   : > { %17530 = vmatprep.mubr.msk.bf16.mxu1 %vm19716_vm1, %v19715_v8 }
0x4bea   : > { %v12154_v59 = vpop.f32.mrb[130].mxu0 }
0x4beb   : > { %v12158_v21 = vmul.f32 0.35355338, %v12154_v59  ;;  %v17490_v32 = vpop.f32.mrb[131].mxu0  ;;  %v12321_v28 = vpop.f32.mrb[122].mxu1 }
0x4bec   : > { %v12325_v17 = vmul.f32 0.35355338, %v12321_v28  ;;  %v17500_v30 = vpop.f32.mrb[123].mxu1  ;;  %v18411_v32 = vld [vmem:[#allocation23 + $0x18] sm:$0xff]  }
0x4bed   : > { %v12159_v9 = vsel %vm20548_vm5, %v12158_v21, -1e+30  ;;  %v18410_v21 = vld [vmem:[#allocation23 + $0x10] sm:$0xff]  }
0x4bee   : > { %v12326_v25 = vsel %vm20548_vm5, %v12325_v17, -1e+30  ;;  %v12160_v34 = vsel %vm2099_vm2, %v12159_v9, -inf  ;;  %17527 = vmatpush3.bf16.msra.mxu1 %v18410_v21 }
0x4bef   : > { %12161 = vmax.xlane.f32.xlu1 %v12160_v34  ;;  %v12327_v55 = vsel %vm2099_vm2, %v12326_v25, -inf  ;;  %17528 = vmatprep.subr.bf16.mxu1 %v19715_v8 }
0x4bf0   : > { %12328 = vmax.xlane.f32.xlu0 %v12327_v55 }
0x4bf2   : > { %17529 = vmatpush3.bf16.msra.mxu1 %v18411_v32 }
0x4bf3   : > { %v12488_v35 = vpop.f32.mrb[132].mxu1  ;;  %17902 = vmatprep.subr.bf16.mxu1 %v19731_v29 }
0x4bf4   : > { %v12492_v24 = vmul.f32 0.35355338, %v12488_v35  ;;  %v17510_v50 = vpop.f32.mrb[133].mxu1 }
0x4bf6   : > { %v12493_v36 = vsel %vm20548_vm5, %v12492_v24, -1e+30 }
0x4bf7   : > { %v12494_v4 = vsel %vm2099_vm2, %v12493_v36, -inf }
0x4bf8   : > { %12495 = vmax.xlane.f32.xlu0 %v12494_v4 }
0x4bfb   : > { %v12655_v54 = vpop.f32.mrb[134].mxu1 }
0x4bfc   : > { %v12659_v37 = vmul.f32 0.35355338, %v12655_v54  ;;  %v17520_v15 = vpop.f32.mrb[135].mxu1 }
0x4bfe   : > { %v12660_v53 = vsel %vm20548_vm5, %v12659_v37, -1e+30  ;;  %v16213_v37 = vld [vmem:[#allocation25 + $0x1] ss:$0 sm:$0xff] }
0x4bff   : > { %v12661_v43 = vsel %vm2099_vm2, %v12660_v53, -inf }
0x4c00   : > { %12662 = vmax.xlane.f32.xlu0 %v12661_v43  ;;  %12171 = vrot.lane.b32.xlu1 %v21654_v12, %s22353_s21 }
0x4c7c   : > { %v12162_v39 = vpop.xlane.xlu1 %12161 }
0x4c7d   : > { %v12163_v44 = vsub.f32 %v12159_v9, %v12162_v39  ;;  %v12329_v47 = vpop.xlane.xlu0 %12328 }
0x4c7e   : > { %v12330_v18 = vsub.f32 %v12326_v25, %v12329_v47 }
0x4c7f   : > { %v12164_v6 = vmul.f32 1.442695, %v12163_v44 }
0x4c80   : > { %v12331_v16 = vmul.f32 1.442695, %v12330_v18  ;;  %v12172_v3 = vpop.permute.xlu1 %12171 }
0x4c81   : > { %18624 = vpow2.f32 %v12164_v6  ;;  %17492 = vmatpush3.msra.mxu0 %v12172_v3 }
0x4c82   : > { %18626 = vpow2.f32 %v12331_v16  ;;  %17501 = vmatprep.subr.mxu0 %v19715_v8 }
0x4c85   : > { %v12496_v33 = vpop.xlane.xlu0 %12495 }
0x4c86   : > { %v12497_v22 = vsub.f32 %v12493_v36, %v12496_v33 }
0x4c88   : > { %v12498_v13 = vmul.f32 1.442695, %v12497_v22 }
0x4c8a   : > { %18628 = vpow2.f32 %v12498_v13  ;;  %v18412_v13 = vld [vmem:[#allocation29 + $0x10] sm:$0xff]  }
0x4c8b   : > { %v18625_v46 = vpop.eup %18624 }
0x4c8c   : > { %v18627_v48 = vpop.eup %18626  ;;  %v12166_v11 = vsel %vm2099_vm2, %v18625_v46, 0.0 }
0x4c8d   : > { %v12663_v58 = vpop.xlane.xlu0 %12662  ;;  %12167 = vadd.xlane.f32.xlu1 %v12166_v11  ;;  %v12333_v60 = vsel %vm2099_vm2, %v18627_v48, 0.0 }
0x4c8e   : > { %v12664_v61 = vsub.f32 %v12660_v53, %v12663_v58  ;;  %12334 = vadd.xlane.f32.xlu0 %v12333_v60  ;;  %v16217_v60 = vld [vmem:[#allocation26 + $0x1] ss:$0 sm:$0xff] }
0x4c90   : > { %v12665_v62 = vmul.f32 1.442695, %v12664_v61 }
0x4c92   : > { %18630 = vpow2.f32 %v12665_v62  ;;  %v16218_v62 = vld [vmem:[#allocation28 + $0x1] ss:$0 sm:$0xff] }
0x4c94   : > { %v18629_v63 = vpop.eup %18628 }
0x4c95   : > { %v12500_v27 = vsel %vm2099_vm2, %v18629_v63, 0.0 }
0x4c96   : > { %12501 = vadd.xlane.f32.xlu1 %v12500_v27 }
0x4c9c   : > { %v18631_v5 = vpop.eup %18630 }
0x4c9d   : > { %v12667_v23 = vsel %vm2099_vm2, %v18631_v5, 0.0 }
0x4c9e   : > { %12668 = vadd.xlane.f32.xlu0 %v12667_v23  ;;  %v16219_v23 = vld [vmem:[#allocation31 + $0x1] ss:$0 sm:$0xff] }
0x4ca7   : > { %12505 = vrot.lane.b32.xlu1 %v21654_v12, %s22345_s23 }
0x4cab   : > { %12672 = vrot.lane.b32.xlu1 %v21654_v12, %s22359_s27 }
0x4cb4   : > { %12338 = vrot.lane.b32.xlu0 %v21654_v12, %s22360_s29  ;;  %s15854_s29 = sshll.u32 %s22013_s25, 3 }
0x4d1a   : > { %v12168_v20 = vpop.xlane.xlu1 %12167 }
0x4d1b   : > { %18632 = vrcp.f32 %v12168_v20  ;;  %v12335_v56 = vpop.xlane.xlu0 %12334 }
0x4d1c   : > { %18634 = vrcp.f32 %v12335_v56 }
0x4d23   : > { %v12502_v51 = vpop.xlane.xlu1 %12501 }
0x4d24   : > { %18636 = vrcp.f32 %v12502_v51 }
0x4d25   : > { %v18633_v40 = vpop.eup %18632 }
0x4d26   : > { %v12170_v49 = vmul.f32 %v18633_v40, %v18625_v46  ;;  %v18635_v38 = vpop.eup %18634  ;;  %v18413_v46 = vld [vmem:[#allocation29 + $0x18] sm:$0xff]  }
0x4d27   : > { %v12337_v1 = vmul.f32 %v18635_v38, %v18627_v48  ;;  %v12506_v0 = vpop.permute.xlu1 %12505 }
0x4d28   : > { %17494 = vmatmul.mubr.msk.f32.vlgmr.msra.gmra.mrb[140].mxu0 %vm2099_vm2, %v12170_v49 }
0x4d29   : > { %17503 = vmatprep.mubr.msk.f32.mxu0 %vm19716_vm1, %v19715_v8 }
0x4d2b   : > { %v12669_v42 = vpop.xlane.xlu0 %12668  ;;  %v12673_v19 = vpop.permute.xlu1 %12672 }
0x4d2c   : > { %18638 = vrcp.f32 %v12669_v42 }
0x4d2e   : > { %v18637_v12 = vpop.eup %18636 }
0x4d2f   : > { %v12339_v2 = vpop.permute.xlu0 %12338  ;;  %v12504_v26 = vmul.f32 %v18637_v12, %v18629_v63 }
0x4d30   : > { %17502 = vmatpush3.msra.mxu0 %v12339_v2 }
0x4d31   : > { %17504 = vmatmul.mubr.msk.f32.vlgmr.msra.gmra.mrb[142].mxu0 %vm2099_vm2, %v12337_v1  ;;  %17511 = vmatprep.subr.mxu0 %v19715_v8 }
0x4d32   : > { %17512 = vmatpush3.msra.mxu0 %v12506_v0  ;;  %17513 = vmatprep.mubr.msk.f32.mxu0 %vm19716_vm1, %v19715_v8 }
0x4d33   : > { %17521 = vmatprep.subr.mxu0 %v19715_v8 }
0x4d35   : > { %17514 = vmatmul.mubr.msk.f32.vlgmr.msra.gmra.mrb[144].mxu0 %vm2099_vm2, %v12504_v26 }
0x4d36   : > { %v18639_v52 = vpop.eup %18638  ;;  %17522 = vmatpush3.msra.mxu0 %v12673_v19  ;;  %17523 = vmatprep.mubr.msk.f32.mxu0 %vm19716_vm1, %v19715_v8  ;;  %v21763_v19 = vld [vmem:[%s22365_s9 + $0x20] sm:$0xff] }
0x4d37   : > { %v12671_v10 = vmul.f32 %v18639_v52, %v18631_v5  ;;  %17534 = vmatprep.subr.bf16.mxu0 %v19715_v8  ;;  %v21766_v52 = vld [vmem:[%s22365_s9 + $0x28] sm:$0xff] }
0x4d39   : > { %17524 = vmatmul.mubr.msk.f32.vlgmr.msra.gmra.mrb[146].mxu0 %vm2099_vm2, %v12671_v10  ;;  %v21769_v10 = vld [vmem:[%s22366_s1 + $0x20] sm:$0xff] }
0x4d3a   : > { %17538 = vmatprep.mubr.msk.bf16.mxu0 %vm19716_vm1, %v19715_v8  ;;  %17535 = vmatpush3.bf16.msra.mxu0 %v18412_v13 }
0x4d3b   : > { %17536 = vmatprep.subr.bf16.mxu0 %v19715_v8 }
0x4d3e   : > { %17537 = vmatpush3.bf16.msra.mxu0 %v18413_v46 }
0x4d3f   : > { %17905 = vmatprep.subr.bf16.mxu0 %v19731_v29 }
0x4dfb   : > { %v12243_v31 = vpop.f32.mrb[140].mxu0 }
0x4dfc   : > { %v17495_v59 = vpop.f32.mrb[141].mxu0 }
0x4dfd   : > { %v21774_v59 = vld [vmem:[%s22366_s1 + $0x28] sm:$0xff] }
0x4dfe   : > { %v17906_v21 = vpack.c.bf16 %v21774_v59, %v21769_v10 }
0x4e04   : > { %v12410_v28 = vpop.f32.mrb[142].mxu0 }
0x4e05   : > { %12749 = vrot.lane.b32.xlu1 %v12410_v28, %s22361_s30  ;;  %v17505_v17 = vpop.f32.mrb[143].mxu0  ;;  %s1927_s30 = scalar_lea.vmem [#allocation46], %s15854_s29 }
0x4e08   : > { %v12577_v30 = vpop.f32.mrb[144].mxu0 }
0x4e09   : > { %12753 = vrot.lane.b32.xlu0 %v12577_v30, %s22348_s11  ;;  %v17515_v9 = vpop.f32.mrb[145].mxu0 }
0x4e0c   : > { %v12744_v25 = vpop.f32.mrb[146].mxu0 }
0x4e0d   : > { %12757 = vrot.lane.b32.xlu1 %v12744_v25, %s22362_s20  ;;  %v17525_v34 = vpop.f32.mrb[147].mxu0  ;;  %s16295_s20 = sshll.u32 %s20022_s28, 7 }
0x4e0e   : > { %s22025_s27 = scalar_lea.hbm %s19994_s19, %s16295_s20 }
0x4e77   : > { %v12750_v55 = vpop.permute.xlu1 %12749 }
0x4e78   : > { %v12760_v24 = vsel %vm2099_vm2, %v12243_v31, %v12750_v55  ;;  %v17903_v31 = vpack.c.bf16 %v21766_v52, %v21763_v19 }
0x4e7b   : > { %v12754_v35 = vpop.permute.xlu0 %12753 }
0x4e7c   : > { %v12761_v50 = vsel %vm2777_vm6, %v12760_v24, %v12754_v35 }
0x4e7f   : > { %v12758_v36 = vpop.permute.xlu1 %12757 }
0x4e80   : > { %v12762_v4 = vsel %vm2779_vm7, %v12761_v50, %v12758_v36 }
0x4e81   : > { %v12763_v54 = vpack.c.bf16 %v12762_v4, %v12762_v4 }
0x4e83   : > { %17531 = vmatmul.mubr.msk.bf16.vlgmr.msra.gmra.mrb[136].mxu1 %vm2005_vm0, %v12763_v54 }
0x4e84   : > { %17546 = vmatprep.mubr.msk.f32.mxu1 %vm19716_vm1, %v19715_v8  ;;  %17904 = vmatpush3.bf16.msra.mxu1 %v17903_v31 }
0x4e85   : > { %17908 = vmatprep.subr.bf16.mxu1 %v19731_v29 }
0x4f56   : > { %v12819_v15 = vpop.f32.mrb[136].mxu1 }
0x4f57   : > { %v12820_v53 = vadd.f32 %v16213_v37, %v12819_v15  ;;  %v17532_v43 = vpop.f32.mrb[137].mxu1 }
0x4f58   : > { %v12822_v39 = vpop.f32.mrb[138].mxu1  ;;  %v21802_v43 = vld [vmem:[%s22367_s3 + $0x28] sm:$0xff] }
0x4f59   : > { %v21743_v44 = vadd.f32 %v12820_v53, %v21643_v14  ;;  %v17533_v47 = vpop.f32.mrb[139].mxu1  ;;  %v21799_v53 = vld [vmem:[%s22367_s3 + $0x20] sm:$0xff] }
0x4f5a   : > { %v17909_v39 = vpack.c.bf16 %v21802_v43, %v21799_v53 }
0x4f5b   : > { %v12826_v18 = vsel %vm2005_vm0, %v21743_v44, 0.0 }
0x4f5c   : > { %12827 = vadd.xlane.f32.xlu0 %v12826_v18 }
0x4fe9   : > { %v12828_v6 = vpop.xlane.xlu0 %12827 }
0x4fea   : > { %v12829_v16 = vmul.f32 0.03125, %v12828_v6 }
0x4fec   : > { %v12830_v3 = vsub.f32 %v21743_v44, %v12829_v16 }
0x4fee   : > { %v12831_v33 = vmul.f32 %v12830_v3, %v12830_v3 }
0x4ff0   : > { %v12832_v22 = vsel %vm2005_vm0, %v12831_v33, 0.0 }
0x4ff1   : > { %12833 = vadd.xlane.f32.xlu1 %v12832_v22 }
0x507e   : > { %v12834_v14 = vpop.xlane.xlu1 %12833 }
0x507f   : > { %v12835_v48 = vmul.f32 0.03125, %v12834_v14 }
0x5081   : > { %v12836_v11 = vadd.f32 1e-05, %v12835_v48 }
0x5083   : > { %18640 = vrsqrt.f32 %v12836_v11 }
0x508d   : > { %v18641_v58 = vpop.eup %18640 }
0x508e   : > { %v12838_v61 = vmul.f32 %v18641_v58, %v12830_v3 }
0x5090   : > { %v12845_v63 = vmul.f32 %v16217_v60, %v12838_v61 }
0x5092   : > { %v12852_v27 = vadd.f32 %v16218_v62, %v12845_v63 }
0x5094   : > { %v12853_v5 = vpack.c.bf16 %v12852_v27, %v12852_v27 }
0x5096   : > { %17539 = vmatmul.mubr.msk.bf16.vlgmr.msra.gmra.mrb[148].mxu0 %vm2005_vm0, %v12853_v5 }
0x5097   : > { %17553 = vmatprep.mubr.msk.f32.mxu0 %vm19716_vm1, %v19715_v8  ;;  %17907 = vmatpush3.bf16.msra.mxu0 %v17906_v21 }
0x5098   : > { %17911 = vmatprep.subr.bf16.mxu0 %v19731_v29 }
0x5169   : > { %v12909_v20 = vpop.f32.mrb[148].mxu0 }
0x516a   : > { %v12910_v56 = vadd.f32 %v16219_v23, %v12909_v20  ;;  %v17540_v51 = vpop.f32.mrb[149].mxu0 }
0x516b   : > { %v12912_v40 = vpop.f32.mrb[150].mxu0 }
0x516c   : > { %v16223_v49 = vmul.f32 -1.442695, %v12910_v56  ;;  %v17541_v42 = vpop.f32.mrb[151].mxu0  ;;  %v12916_v32 = vand.u32 2147483647, %v12910_v56  ;;  %v12915_v54 = vmax.f32 %v12910_v56, 0.0 }
0x516e   : > { %18642 = vpow2.f32 %v16223_v49  ;;  %v12917_v28 = vsub.f32 0.0, %v12916_v32 }
0x5170   : > { %v12918_v17 = vmul.f32 1.442695, %v12917_v28 }
0x5178   : > { %v18643_v38 = vpop.eup %18642 }
0x5179   : > { %v12928_v1 = vadd.f32 1.0, %v18643_v38 }
0x517b   : > { %18644 = vrcp.f32 %v12928_v1 }
0x517c   : > { %18646 = vpow2.f32 %v12918_v17 }
0x5185   : > { %v18645_v0 = vpop.eup %18644 }
0x5186   : > { %v21754_v2 = vmul.f32 %v18645_v0, %v12910_v56  ;;  %v18647_v30 = vpop.eup %18646 }
0x5187   : > { %v12920_v9 = vadd.f32 1.0, %v18647_v30 }
0x5188   : > { %v21758_v12 = vmul.f32 %v21754_v2, %v21754_v2 }
0x5189   : > { %18648 = vlog2.f32 %v12920_v9 }
0x518a   : > { %v12933_v26 = vsel %vm2777_vm6, %v21758_v12, 0.0 }
0x518b   : > { %12934 = vadd.xlane.f32.xlu0 %v12933_v26 }
0x5193   : > { %v18649_v24 = vpop.eup %18648 }
0x5194   : > { %v12922_v36 = vmul.f32 0.6931472, %v18649_v24 }
0x5196   : > { %v12923_v37 = vadd.f32 %v12922_v36, %v12915_v54 }
0x5198   : > { %v21795_v15 = vmul.f32 0.01, %v12923_v37 }
0x51a1   : > { %12940 = vrot.lane.b32.xlu0 %v21758_v12, %s22341_s0 }
0x5218   : > { %v12935_v25 = vpop.xlane.xlu0 %12934 }
0x5219   : > { %v12936_v34 = vadd.f32 1e-06, %v12935_v25 }
0x521b   : > { %18650 = vrsqrt.f32 %v12936_v34 }
0x521c   : > { %v12941_v55 = vpop.permute.xlu0 %12940 }
0x521d   : > { %v12943_v35 = vsel %vm2777_vm6, %v12941_v55, 0.0 }
0x521e   : > { %12944 = vadd.xlane.f32.xlu1 %v12943_v35 }
0x5225   : > { %v18651_v50 = vpop.eup %18650 }
0x5226   : > { %v21784_v4 = vmul.f32 %v18651_v50, %v21754_v2 }
0x5228   : > { %17547 = vmatmul.mubr.msk.f32.vlgmr.msra.gmra.mrb[140].mxu1 %vm2777_vm6, %v21784_v4  ;;  %17554 = vmatmul.mubr.msk.f32.vlgmr.msra.gmra.mrb[152].mxu0 %vm2777_vm6, %v21784_v4 }
0x5229   : > { %17560 = vmatprep.mubr.msk.f32.mxu1 %vm19716_vm1, %v19715_v8  ;;  %17913 = vmatpush3.bf16.msra.mxu0 %v17903_v31 }
0x522a   : > { %17567 = vmatprep.mubr.msk.f32.mxu0 %vm19716_vm1, %v19715_v8  ;;  %17917 = vmatprep.subr.bf16.mxu0 %v19731_v29 }
0x522b   : > { %17910 = vmatpush3.bf16.msra.mxu1 %v17909_v39 }
0x522c   : > { %17914 = vmatprep.subr.bf16.mxu1 %v19731_v29 }
0x522f   : > { %12951 = vperm.xlu1 %18363, %v21795_v15  }
0x52ab   : > { %v12945_v47 = vpop.xlane.xlu1 %12944 }
0x52ac   : > { %v12946_v18 = vadd.f32 1e-06, %v12945_v47 }
0x52ae   : > { %18652 = vrsqrt.f32 %v12946_v18 }
0x52af   : > { %v12952_v6 = vpop.permute.xlu1 %12951 }
0x52b0   : > { %v12954_v16 = vmul.f32 %v12952_v6, %v21754_v2  ;;  %v13735_v6 = vrot.slane %v21784_v4, 4 }
0x52b2   : > { %13333 = vrot.lane.b32.xlu1 %v12954_v16, %s22353_s21  ;;  %v21854_v16 = vld [vmem:[%s22365_s9 + $0x30] sm:$0xff] }
0x52b8   : > { %v18653_v3 = vpop.eup %18652 }
0x52b9   : > { %v12948_v33 = vmul.f32 %v18653_v3, %v21754_v2 }
0x52bb   : > { %13180 = vrot.lane.b32.xlu0 %v12948_v33, %s22341_s0 }
0x52fb   : > { %v13024_v22 = vpop.f32.mrb[140].mxu1  ;;  %v13094_v13 = vpop.f32.mrb[152].mxu0 }
0x52fc   : > { %v16226_v46 = vmul.f32 -1.442695, %v13024_v22  ;;  %v17548_v14 = vpop.f32.mrb[141].mxu1  ;;  %v17555_v48 = vpop.f32.mrb[153].mxu0 }
0x52fe   : > { %18654 = vpow2.f32 %v16226_v46 }
0x5308   : > { %v18655_v11 = vpop.eup %18654 }
0x5309   : > { %v13101_v58 = vadd.f32 1.0, %v18655_v11 }
0x530b   : > { %18656 = vrcp.f32 %v13101_v58 }
0x5315   : > { %v18657_v60 = vpop.eup %18656 }
0x5316   : > { %v13104_v61 = vmul.f32 %v18657_v60, %v13024_v22 }
0x5318   : > { %v13105_v62 = vmul.f32 %v13104_v61, %v13094_v13 }
0x531a   : > { %17561 = vmatmul.mubr.msk.f32.vlgmr.msra.gmra.mrb[142].mxu1 %vm2777_vm6, %v13105_v62 }
0x531b   : > { %17916 = vmatpush3.bf16.msra.mxu1 %v17906_v21  ;;  %17574 = vmatprep.mubr.msk.f32.mxu1 %vm19716_vm1, %v19715_v8 }
0x5324   : > { %v13334_v63 = vpop.permute.xlu1 %13333 }
0x5325   : > { %17584 = vmatprep.subr.msk.mxu1 %vm3509_vm8, %v13334_v63 }
0x532d   : > { %v13181_v27 = vpop.permute.xlu0 %13180 }
0x532e   : > { %17568 = vmatmul.mubr.msk.f32.vlgmr.msra.gmra.mrb[154].mxu0 %vm2777_vm6, %v13181_v27  ;;  %13420 = vxpose.xlu1.b32.start.end [1/1] (short) (narrow) %v13181_v27, 16 }
0x532f   : > { %17920 = vmatpush3.bf16.xpose.msk.msra.mxu0 %vm20704_vm9, %v17909_v39  ;;  %17575 = vmatmul.mubr.msk.f32.vlgmr.msra.gmra.mrb[144].mxu1 %vm2777_vm6, %v13181_v27 }
0x5330   : > { %17585 = vmatpush3.msk.msra.mxu1 %vm3509_vm8, %v13334_v63  ;;  %17581 = vmatprep.mubr.msk.f32.mxu0 %vm19716_vm1, %v19715_v8 }
0x5336   : > { %17582 = vmatmul.mubr.msk.f32.vlgmr.msra.gmra.mrb[156].mxu0 %vm2777_vm6, %v13334_v63 }
0x534c   : > { %18364 = vset.pattern.permute.xlu1 %v19733_v41 }
0x53ae   : > { %v13436_v5 = vpop.trf.xlu1 }
0x53af   : > { %17596 = vmatprep.mubr.msk.f32.mxu0 %vm3502_vm10, %v13436_v5 }
0x53b2   : > { %v13437_v25 = vpop.trf.xlu1 }
0x53ed   : > { %v21825_v23 = vpop.f32.mrb[142].mxu1 }
0x53ee   : > { %v17562_v20 = vpop.f32.mrb[143].mxu1 }
0x5401   : > { %v13250_v56 = vpop.f32.mrb[154].mxu0 }
0x5402   : > { %v16230_v51 = vmul.f32 -1.442695, %v13250_v56  ;;  %v13320_v40 = vpop.f32.mrb[144].mxu1  ;;  %v17569_v49 = vpop.f32.mrb[155].mxu0 }
0x5403   : > { %v17576_v42 = vpop.f32.mrb[145].mxu1  ;;  %v21889_v49 = vld [vmem:[%s22367_s3 + $0x38] sm:$0xff] }
0x5404   : > { %18658 = vpow2.f32 %v16230_v51 }
0x5409   : > { %v13409_v38 = vpop.f32.mrb[156].mxu0 }
0x540a   : > { %v13413_v1 = vmul.f32 %v13409_v38, %v13320_v40  ;;  %v17583_v0 = vpop.f32.mrb[157].mxu0 }
0x540e   : > { %v18659_v26 = vpop.eup %18658 }
0x540f   : > { %v13327_v31 = vadd.f32 1.0, %v18659_v26  ;;  %v21896_v26 = vld [vmem:[%s22366_s1 + $0x30] sm:$0xff] }
0x5411   : > { %18660 = vrcp.f32 %v13327_v31  ;;  %v21899_v31 = vld [vmem:[%s22366_s1 + $0x38] sm:$0xff] }
0x541b   : > { %v18661_v21 = vpop.eup %18660 }
0x541c   : > { %v13330_v32 = vmul.f32 %v18661_v21, %v13250_v56  ;;  %v13414_v28 = vsub.f32 1.0, %v18661_v21 }
0x541e   : > { %v13415_v17 = vmul.f32 %v13414_v28, %v13330_v32  ;;  %v13331_v30 = vmul.f32 %v13330_v32, %v13320_v40  ;;  %v13418_v9 = vmul.f32 %v13409_v38, %v13330_v32  ;;  %v21886_v40 = vld [vmem:[%s22367_s3 + $0x30] sm:$0xff] }
0x541f   : > { %v17937_v38 = vpack.c.bf16 %v21889_v49, %v21886_v40 }
0x5420   : > { %v13416_v34 = vadd.f32 %v18661_v21, %v13415_v17  ;;  %13452 = vxpose.xlu0.b32.start.end [1/1] (short) (narrow) %v13331_v30, 16  ;;  %17594 = vmatprep.subr.msk.mxu0 %vm3509_vm8, %v13418_v9  ;;  %v17934_v17 = vpack.c.bf16 %v21899_v31, %v21896_v26 }
0x5421   : > { %17595 = vmatpush3.msk.msra.mxu0 %vm3509_vm8, %v13418_v9 }
0x5422   : > { %v13417_v55 = vmul.f32 %v13416_v34, %v13413_v1  ;;  %17597 = vmatmul.mubr.msk.f32.vlgmr.msra.gmra.mrb[158].mxu0 %vm3502_vm10, %v13437_v25  ;;  %17924 = vmatprep.subr.bf16.mxu0 %v19731_v29 }
0x5423   : > { %17610 = vmatprep.mubr.msk.f32.mxu0 %vm19716_vm1, %v19715_v8 }
0x5424   : > { %17589 = vmatprep.subr.msk.mxu1 %vm3509_vm8, %v13417_v55 }
0x544d   : > { %13963 = vrot.lane.b32.xlu0 %v21758_v12, %s22346_s2 }
0x54a0   : > { %v13468_v35 = vpop.trf.xlu0 }
0x54a1   : > { %17586 = vmatprep.mubr.msk.f32.mxu1 %vm3502_vm10, %v13468_v35 }
0x54a4   : > { %v13469_v24 = vpop.trf.xlu0 }
0x54a5   : > { %17587 = vmatmul.mubr.msk.f32.vlgmr.msra.gmra.mrb[146].mxu1 %vm3502_vm10, %v13469_v24 }
0x54a6   : > { %17590 = vmatpush3.msk.msra.mxu1 %vm3509_vm8, %v13417_v55  ;;  %17591 = vmatprep.mubr.msk.f32.mxu1 %vm3502_vm10, %v13436_v5 }
0x54a7   : > { %17921 = vmatprep.subr.bf16.mxu1 %v19731_v29 }
0x54a9   : > { %17592 = vmatmul.mubr.msk.f32.vlgmr.msra.gmra.mrb[148].mxu1 %vm3502_vm10, %v13437_v25 }
0x54aa   : > { %17603 = vmatprep.mubr.msk.f32.mxu1 %vm19716_vm1, %v19715_v8 }
0x54bf   : > { %v13964_v50 = vpop.permute.xlu0 %13963 }
0x54c0   : > { %v13966_v36 = vsel %vm2777_vm6, %v13964_v50, 0.0 }
0x54c1   : > { %13967 = vadd.xlane.f32.xlu1 %v13966_v36 }
0x54d2   : > { %13982 = vperm.xlu1 %18364, %v21795_v15   ;;  %v21857_v15 = vld [vmem:[%s22365_s9 + $0x38] sm:$0xff] }
0x54f5   : > { %v17598_v54 = vpop.f32.mrb[158].mxu0 }
0x54f6   : > { %v13734_v37 = vadd.f32 %v17598_v54, %v21774_v59  ;;  %v13720_v39 = vpop.f32.mrb[159].mxu0  ;;  %v21861_v59 = vpack.c.bf16 %v21857_v15, %v21854_v16 }
0x54f7   : > { %v13733_v47 = vadd.f32 %v21769_v10, %v13720_v39 }
0x54f9   : > { %v17925_v18 = vpack.c.bf16 %v13734_v37, %v13733_v47 }
0x54fb   : > { %17926 = vmatpush3.bf16.msra.mxu0 %v17925_v18 }
0x54fc   : > { %17930 = vmatprep.subr.bf16.mxu0 %v19731_v29 }
0x54fe   : > { %17611 = vmatmul.mubr.msk.f32.vlgmr.msra.gmra.mrb[160].mxu0 %vm2777_vm6, %v13735_v6 }
0x54ff   : > { %17624 = vmatprep.mubr.msk.f32.mxu0 %vm19716_vm1, %v19715_v8  ;;  %17932 = vmatpush3.bf16.msra.mxu0 %v21861_v59 }
0x5500   : > { %17936 = vmatprep.subr.bf16.mxu0 %v19731_v29 }
0x554e   : > { %v13968_v10 = vpop.xlane.xlu1 %13967 }
0x554f   : > { %v13969_v4 = vadd.f32 1e-06, %v13968_v10 }
0x5551   : > { %18662 = vrsqrt.f32 %v13969_v4 }
0x5552   : > { %v13983_v32 = vpop.permute.xlu1 %13982 }
0x5553   : > { %v13985_v30 = vmul.f32 %v13983_v32, %v21754_v2 }
0x555b   : > { %v18663_v3 = vpop.eup %18662 }
0x555c   : > { %v21866_v33 = vmul.f32 %v18663_v3, %v21754_v2 }
0x555e   : > { %13987 = vrot.lane.b32.xlu0 %v21866_v33, %s22346_s2 }
0x5562   : > { %13972 = vrot.lane.b32.xlu0 %v21758_v12, %s22344_s26 }
0x5578   : > { %v17588_v22 = vpop.f32.mrb[146].mxu1 }
0x5579   : > { %v13732_v13 = vadd.f32 %v17588_v22, %v21802_v43  ;;  %v13558_v46 = vpop.f32.mrb[147].mxu1 }
0x557a   : > { %v13731_v14 = vadd.f32 %v21799_v53, %v13558_v46 }
0x557c   : > { %v17928_v48 = vpack.c.bf16 %v13732_v13, %v13731_v14  ;;  %v17593_v11 = vpop.f32.mrb[148].mxu1 }
0x557d   : > { %v13730_v58 = vadd.f32 %v17593_v11, %v21766_v52  ;;  %v13642_v60 = vpop.f32.mrb[149].mxu1 }
0x557e   : > { %v13729_v61 = vadd.f32 %v21763_v19, %v13642_v60 }
0x5580   : > { %v17922_v62 = vpack.c.bf16 %v13730_v58, %v13729_v61 }
0x5582   : > { %17923 = vmatpush3.bf16.msra.mxu1 %v17922_v62 }
0x5583   : > { %17927 = vmatprep.subr.bf16.mxu1 %v19731_v29 }
0x5585   : > { %17604 = vmatmul.mubr.msk.f32.vlgmr.msra.gmra.mrb[150].mxu1 %vm2777_vm6, %v13735_v6 }
0x5586   : > { %17929 = vmatpush3.bf16.msra.mxu1 %v17928_v48  ;;  %17617 = vmatprep.mubr.msk.f32.mxu1 %vm19716_vm1, %v19715_v8 }
0x5587   : > { %17933 = vmatprep.subr.bf16.mxu1 %v19731_v29 }
0x55d0   : > { %v13988_v12 = vpop.permute.xlu0 %13987 }
0x55d1   : > { %v13874_v53 = vpop.f32.mrb[160].mxu0  ;;  %17625 = vmatmul.mubr.msk.f32.vlgmr.msra.gmra.mrb[162].mxu0 %vm2777_vm6, %v13988_v12 }
0x55d2   : > { %v17612_v52 = vpop.f32.mrb[161].mxu0  ;;  %17638 = vmatprep.mubr.msk.f32.mxu0 %vm19716_vm1, %v19715_v8  ;;  %17938 = vmatpush3.bf16.msra.mxu0 %v17937_v38 }
0x55d3   : > { %17942 = vmatprep.subr.bf16.mxu0 %v19731_v29 }
0x55d4   : > { %v13973_v19 = vpop.permute.xlu0 %13972 }
0x55d5   : > { %v13975_v43 = vsel %vm2777_vm6, %v13973_v19, 0.0 }
0x55d6   : > { %13976 = vadd.xlane.f32.xlu0 %v13975_v43 }
0x5658   : > { %v13804_v63 = vpop.f32.mrb[150].mxu1 }
0x5659   : > { %v16245_v27 = vmul.f32 -1.442695, %v13804_v63  ;;  %v17605_v5 = vpop.f32.mrb[151].mxu1 }
0x565a   : > { %v14768_v5 = vrot.slane %v21866_v33, 4 }
0x565b   : > { %18664 = vpow2.f32 %v16245_v27 }
0x5663   : > { %v13977_v20 = vpop.xlane.xlu0 %13976 }
0x5664   : > { %v13978_v56 = vadd.f32 1e-06, %v13977_v20 }
0x5665   : > { %v18665_v51 = vpop.eup %18664 }
0x5666   : > { %v13881_v42 = vadd.f32 1.0, %v18665_v51  ;;  %18666 = vrsqrt.f32 %v13978_v56 }
0x5668   : > { %18668 = vrcp.f32 %v13881_v42 }
0x5670   : > { %v18667_v1 = vpop.eup %18666 }
0x5671   : > { %v13980_v0 = vmul.f32 %v18667_v1, %v21754_v2 }
0x5672   : > { %v18669_v21 = vpop.eup %18668 }
0x5673   : > { %v13884_v28 = vmul.f32 %v18669_v21, %v13804_v63  ;;  %14213 = vrot.lane.b32.xlu1 %v13980_v0, %s22344_s26  ;;  %s19482_s26 = scalar_lea.vmem %s19481_s4, 256 }
0x5675   : > { %v13885_v9 = vmul.f32 %v13884_v28, %v13874_v53 }
0x5677   : > { %14366 = vrot.lane.b32.xlu1 %v13985_v30, %s22345_s23  ;;  %17618 = vmatmul.mubr.msk.f32.vlgmr.msra.gmra.mrb[152].mxu1 %vm2777_vm6, %v13885_v9 }
0x5678   : > { %17935 = vmatpush3.bf16.msra.mxu1 %v17934_v17  ;;  %17631 = vmatprep.mubr.msk.f32.mxu1 %vm19716_vm1, %v19715_v8 }
0x5679   : > { %17939 = vmatprep.subr.bf16.mxu1 %v19731_v29 }
0x567b   : > { %17632 = vmatmul.mubr.msk.f32.vlgmr.msra.gmra.mrb[154].mxu1 %vm2777_vm6, %v13988_v12 }
0x567c   : > { %17941 = vmatpush3.bf16.msra.mxu1 %v21861_v59  ;;  %17645 = vmatprep.mubr.msk.f32.mxu1 %vm19716_vm1, %v19715_v8 }
0x567d   : > { %17945 = vmatprep.subr.bf16.mxu1 %v19731_v29 }
0x56a4   : > { %v14057_v2 = vpop.f32.mrb[162].mxu0 }
0x56a5   : > { %v17626_v25 = vpop.f32.mrb[163].mxu0  ;;  %v16249_v35 = vmul.f32 -1.442695, %v14057_v2 }
0x56a7   : > { %18670 = vpow2.f32 %v16249_v35 }
0x56b1   : > { %v18671_v24 = vpop.eup %18670 }
0x56b2   : > { %v14134_v50 = vadd.f32 1.0, %v18671_v24 }
0x56b4   : > { %18672 = vrcp.f32 %v14134_v50 }
0x56be   : > { %v18673_v36 = vpop.eup %18672 }
0x56bf   : > { %v14137_v47 = vmul.f32 %v18673_v36, %v14057_v2  ;;  %v18414_v36 = vld [vmem:[#allocation32 + $0x10] sm:$0xff]  }
0x56e5   : > { %v14214_v34 = vpop.permute.xlu1 %14213 }
0x56e6   : > { %14453 = vxpose.xlu0.b32.start.end [1/1] (short) (narrow) %v14214_v34, 16  ;;  %17646 = vmatmul.mubr.msk.f32.vlgmr.msra.gmra.mrb[156].mxu1 %vm2777_vm6, %v14214_v34 }
0x56e7   : > { %17948 = vmatpush3.bf16.xpose.msk.msra.mxu1 %vm20704_vm9, %v17937_v38  ;;  %17659 = vmatprep.mubr.msk.f32.mxu1 %vm19716_vm1, %v19715_v8 }
0x56e9   : > { %v14367_v55 = vpop.permute.xlu1 %14366 }
0x56ee   : > { %17660 = vmatmul.mubr.msk.f32.vlgmr.msra.gmra.mrb[158].mxu1 %vm2777_vm6, %v14367_v55 }
0x570f   : > { %18365 = vset.pattern.permute.xlu0 %v19733_v41 }
0x574a   : > { %v13955_v54 = vpop.f32.mrb[152].mxu1 }
0x574b   : > { %v13960_v37 = vrot.slane %v13955_v54, 4  ;;  %v17619_v39 = vpop.f32.mrb[153].mxu1  ;;  %v18415_v54 = vld [vmem:[#allocation32 + $0x18] sm:$0xff]  }
0x574d   : > { %v21924_v7 = vsel %vm3509_vm8, %v21825_v23, %v13960_v37 }
0x574e   : > { %v14127_v18 = vpop.f32.mrb[154].mxu1 }
0x574f   : > { %v14138_v6 = vmul.f32 %v14137_v47, %v14127_v18  ;;  %v17633_v59 = vpop.f32.mrb[155].mxu1 }
0x5751   : > { %17639 = vmatmul.mubr.msk.f32.vlgmr.msra.gmra.mrb[164].mxu0 %vm2777_vm6, %v14138_v6 }
0x5752   : > { %17944 = vmatpush3.bf16.msra.mxu0 %v17934_v17  ;;  %17652 = vmatprep.mubr.msk.f32.mxu0 %vm19716_vm1, %v19715_v8 }
0x5753   : > { %17662 = vmatprep.subr.msk.mxu0 %vm3509_vm8, %v14367_v55 }
0x5755   : > { %17653 = vmatmul.mubr.msk.f32.vlgmr.msra.gmra.mrb[166].mxu0 %vm2777_vm6, %v14214_v34 }
0x5756   : > { %17663 = vmatpush3.msk.msra.mxu0 %vm3509_vm8, %v14367_v55 }
0x5766   : > { %v14469_v41 = vpop.trf.xlu0 }
0x5767   : > { %17674 = vmatprep.mubr.msk.f32.mxu1 %vm3502_vm10, %v14469_v41 }
0x576a   : > { %v14470_v58 = vpop.trf.xlu0 }
0x57b9   : > { %v14283_v23 = vpop.f32.mrb[156].mxu1 }
0x57ba   : > { %v16253_v10 = vmul.f32 -1.442695, %v14283_v23  ;;  %v17647_v4 = vpop.f32.mrb[157].mxu1 }
0x57bc   : > { %18674 = vpow2.f32 %v16253_v10 }
0x57c1   : > { %v14442_v3 = vpop.f32.mrb[158].mxu1 }
0x57c2   : > { %v17661_v22 = vpop.f32.mrb[159].mxu1 }
0x57c6   : > { %v18675_v13 = vpop.eup %18674 }
0x57c7   : > { %v14360_v46 = vadd.f32 1.0, %v18675_v13 }
0x57c9   : > { %18676 = vrcp.f32 %v14360_v46 }
0x57d3   : > { %v18677_v14 = vpop.eup %18676 }
0x57d4   : > { %v14363_v48 = vmul.f32 %v18677_v14, %v14283_v23  ;;  %v14447_v60 = vsub.f32 1.0, %v18677_v14  ;;  %v16270_v23 = vld [vmem:[#allocation34 + $0x1] ss:$0 sm:$0xff] }
0x57d6   : > { %v14451_v11 = vmul.f32 %v14442_v3, %v14363_v48  ;;  %v14448_v62 = vmul.f32 %v14447_v60, %v14363_v48 }
0x57d8   : > { %17672 = vmatprep.subr.msk.mxu1 %vm3509_vm8, %v14451_v11  ;;  %v14449_v43 = vadd.f32 %v18677_v14, %v14448_v62  ;;  %v18417_v62 = vld [vmem:[#allocation38 + $0x18] sm:$0xff]  }
0x57d9   : > { %17673 = vmatpush3.msk.msra.mxu1 %vm3509_vm8, %v14451_v11 }
0x57da   : > { %17675 = vmatmul.mubr.msk.f32.vlgmr.msra.gmra.mrb[160].mxu1 %vm3502_vm10, %v14470_v58  ;;  %17952 = vmatprep.subr.bf16.mxu1 %v19731_v29 }
0x57db   : > { %17688 = vmatprep.mubr.msk.f32.mxu1 %vm19716_vm1, %v19715_v8 }
0x5824   : > { %v21939_v61 = vpop.f32.mrb[164].mxu0 }
0x5825   : > { %v17640_v12 = vpop.f32.mrb[165].mxu0 }
0x5828   : > { %v14353_v53 = vpop.f32.mrb[166].mxu0 }
0x5829   : > { %v14364_v52 = vmul.f32 %v14363_v48, %v14353_v53  ;;  %v14446_v19 = vmul.f32 %v14442_v3, %v14353_v53  ;;  %v17654_v63 = vpop.f32.mrb[167].mxu0 }
0x582a   : > { %v16275_v63 = vld [vmem:[#allocation37 + $0x1] ss:$0 sm:$0xff] }
0x582b   : > { %v14450_v27 = vmul.f32 %v14449_v43, %v14446_v19  ;;  %14485 = vxpose.xlu1.b32.start.end [1/1] (short) (narrow) %v14364_v52, 16  ;;  %v16274_v19 = vld [vmem:[#allocation35 + $0x1] ss:$0 sm:$0xff] }
0x582d   : > { %17667 = vmatprep.subr.msk.mxu0 %vm3509_vm8, %v14450_v27 }
0x584d   : > { %14769 = vrot.lane.b32.xlu1 %v14768_v5, %s22346_s2  ;;  %s15358_s2 = sshll.u32 %s1927_s30, 4  ;;  %s15359_s2 = int_to_ptr.vmem [resolvable:$true] %s15358_s2 }
0x584e   : > { %s19476_s10 = scalar_lea.vmem %s15359_s2, 128  ;;  %p19483_p2 = scmp.lt.s32.totalorder %s15359_s2, %s19481_s4 }
0x584f   : > { %p19477_p9 = scmp.ne.s32.totalorder %s15359_s2, %s19476_s10  ;;  %p19484_p3 = scmp.lt.s32.totalorder %s19482_s26, %s19476_s10 }
0x5851   : > { %p19478_p12 = pnand %p19477_p9, %p22370_p10  ;;  %p19485_p4 = por %p19484_p3, %p19483_p2 }
0x5853   : > { %p19479_p1 = pneg %p19478_p12 }
0x5855   : > { %p19486_p7 = pnand %p19485_p4, %p19479_p1 }
0x58ab   : > { %v14501_v20 = vpop.trf.xlu1 }
0x58ac   : > { %17664 = vmatprep.mubr.msk.f32.mxu0 %vm3502_vm10, %v14501_v20 }
0x58ad   : > { %v17676_v56 = vpop.f32.mrb[160].mxu1 }
0x58ae   : > { %v14767_v51 = vadd.f32 %v17676_v56, %v21899_v31  ;;  %v14753_v42 = vpop.f32.mrb[161].mxu1  ;;  %v18418_v56 = vld [vmem:[%s22368_s5 + $0x20] sm:$0xff]  }
0x58af   : > { %v14502_v38 = vpop.trf.xlu1  ;;  %v14766_v1 = vadd.f32 %v21896_v26, %v14753_v42  ;;  %v18420_v42 = vld [vmem:[%s22368_s5 + $0x30] sm:$0xff]  }
0x58b0   : > { %17665 = vmatmul.mubr.msk.f32.vlgmr.msra.gmra.mrb[168].mxu0 %vm3502_vm10, %v14502_v38  ;;  %v18421_v38 = vld [vmem:[%s22368_s5 + $0x38] sm:$0xff]  }
0x58b1   : > { %17668 = vmatpush3.msk.msra.mxu0 %vm3509_vm8, %v14450_v27  ;;  %17669 = vmatprep.mubr.msk.f32.mxu0 %vm3502_vm10, %v14469_v41  ;;  %v17953_v0 = vpack.c.bf16 %v14767_v51, %v14766_v1  ;;  %v18419_v51 = vld [vmem:[%s22368_s5 + $0x28] sm:$0xff]   ;;  %v16276_v1 = vld [vmem:[#allocation40 + $0x1] ss:$0 sm:$0xff] }
0x58b2   : > { %17949 = vmatprep.subr.bf16.mxu0 %v19731_v29 }
0x58b3   : > { %17954 = vmatpush3.bf16.msra.mxu1 %v17953_v0 }
0x58b4   : > { %17670 = vmatmul.mubr.msk.f32.vlgmr.msra.gmra.mrb[170].mxu0 %vm3502_vm10, %v14470_v58  ;;  %17698 = vmatprep.subr.bf16.mxu1 %v19715_v8 }
0x58b5   : > { %17681 = vmatprep.mubr.msk.f32.mxu0 %vm19716_vm1, %v19715_v8 }
0x58bf   : > { %v14770_v33 = vpop.permute.xlu1 %14769 }
0x58c0   : > { %17689 = vmatmul.mubr.msk.f32.vlgmr.msra.gmra.mrb[162].mxu1 %vm2777_vm6, %v14770_v33 }
0x58c1   : > { %17702 = vmatprep.mubr.msk.bf16.mxu1 %vm19716_vm1, %v19715_v8  ;;  %17699 = vmatpush3.bf16.msra.mxu1 %v18414_v36 }
0x58c2   : > { %17700 = vmatprep.subr.bf16.mxu1 %v19715_v8 }
0x58c5   : > { %17701 = vmatpush3.bf16.msra.mxu1 %v18415_v54 }
0x58c6   : > { %17714 = vmatprep.subr.bf16.mxu1 %v19715_v8 }
0x5983   : > { %v17666_v26 = vpop.f32.mrb[168].mxu0 }
0x5984   : > { %v14765_v31 = vadd.f32 %v17666_v26, %v21889_v49  ;;  %v14591_v21 = vpop.f32.mrb[169].mxu0 }
0x5985   : > { %v14764_v32 = vadd.f32 %v21886_v40, %v14591_v21 }
0x5987   : > { %v17956_v28 = vpack.c.bf16 %v14765_v31, %v14764_v32  ;;  %v17671_v17 = vpop.f32.mrb[170].mxu0  ;;  %v16075_v32 = vld [vmem:[%s22354_s24 + $0x1] ss:$0 sm:$0xff] }
0x5988   : > { %v14763_v30 = vadd.f32 %v17671_v17, %v21857_v15  ;;  %v14675_v9 = vpop.f32.mrb[171].mxu0 }
0x5989   : > { %v14762_v2 = vadd.f32 %v21854_v16, %v14675_v9 }
0x598b   : > { %v17950_v25 = vpack.c.bf16 %v14763_v30, %v14762_v2 }
0x598d   : > { %17951 = vmatpush3.bf16.msra.mxu0 %v17950_v25 }
0x598e   : > { %17955 = vmatprep.subr.bf16.mxu0 %v19731_v29 }
0x5990   : > { %17682 = vmatmul.mubr.msk.f32.vlgmr.msra.gmra.mrb[172].mxu0 %vm2777_vm6, %v14770_v33 }
0x5991   : > { %17957 = vmatpush3.bf16.msra.mxu0 %v17956_v28  ;;  %17695 = vmatprep.mubr.msk.f32.mxu0 %vm19716_vm1, %v19715_v8  ;;  %v8580_v28 = vadd.f32 %v16075_v32, %v21327_v57 }
0x5992   : > { %17706 = vmatprep.subr.bf16.mxu0 %v19715_v8 }
0x5993   : > { %v14909_v40 = vpop.f32.mrb[162].mxu1  ;;  %v8585_v17 = vadd.f32 %v8580_v28, %v21257_v45 }
0x5994   : > { %v17690_v49 = vpop.f32.mrb[163].mxu1 }
0x5995   : > { %v8588_v30 = vsel %vm2005_vm0, %v8585_v17, 0.0 }
0x5a63   : > { %v14839_v34 = vpop.f32.mrb[172].mxu0 }
0x5a64   : > { %v16268_v55 = vmul.f32 -1.442695, %v14839_v34  ;;  %v17683_v15 = vpop.f32.mrb[173].mxu0 }
0x5a66   : > { %18678 = vpow2.f32 %v16268_v55 }
0x5a70   : > { %v18679_v35 = vpop.eup %18678 }
0x5a71   : > { %v14916_v16 = vadd.f32 1.0, %v18679_v35  ;;  %v16281_v35 = vld [vmem:[#allocation41 + $0x1] ss:$0 sm:$0xff] }
0x5a73   : > { %18680 = vrcp.f32 %v14916_v16 }
0x5a7d   : > { %v18681_v24 = vpop.eup %18680 }
0x5a7e   : > { %v14919_v50 = vmul.f32 %v18681_v24, %v14839_v34 }
0x5a80   : > { %v14920_v29 = vmul.f32 %v14919_v50, %v14909_v40 }
0x5a82   : > { %17696 = vmatmul.mubr.msk.f32.vlgmr.msra.gmra.mrb[174].mxu0 %vm2777_vm6, %v14920_v29 }
0x5a83   : > { %17710 = vmatprep.mubr.msk.bf16.mxu0 %vm19716_vm1, %v19715_v8 }
0x5b55   : > { %v14990_v37 = vpop.f32.mrb[174].mxu0 }
0x5b56   : > { %v14995_v39 = vrot.slane %v14990_v37, 4  ;;  %v17697_v47 = vpop.f32.mrb[175].mxu0 }
0x5b58   : > { %v14997_v18 = vsel %vm3509_vm8, %v21939_v61, %v14995_v39  ;;  %v18416_v61 = vld [vmem:[#allocation38 + $0x10] sm:$0xff]  }
0x5b59   : > { %14999 = vrot.lane.b32.xlu0 %v14997_v18, %s22348_s11  ;;  %17707 = vmatpush3.bf16.msra.mxu0 %v18416_v61  ;;  %v16288_v61 = vld [vmem:[#allocation44] ss:$0 sm:$0xff]  ;;  %s15340_s11 = scalar_lea.sflag [#allocation4], %s22013_s25 }
0x5b5a   : > { %17708 = vmatprep.subr.bf16.mxu0 %v19715_v8 }
0x5b5d   : > { %17709 = vmatpush3.bf16.msra.mxu0 %v18417_v62 }
0x5b5e   : > { %17726 = vmatprep.subr.bf16.mxu0 %v19715_v8 }
0x5bcb   : > { %v15000_v6 = vpop.permute.xlu0 %14999 }
0x5bcc   : > { %v15002_v59 = vsel %vm2777_vm6, %v21924_v7, %v15000_v6 }
0x5bcd   : > { %v15003_v41 = vpack.c.bf16 %v15002_v59, %v15002_v59 }
0x5bcf   : > { %17703 = vmatmul.mubr.msk.bf16.vlgmr.msra.gmra.mrb[164].mxu1 %vm2005_vm0, %v15003_v41 }
0x5bd0   : > { %17722 = vmatprep.mubr.msk.bf16.mxu1 %vm19716_vm1, %v19715_v8  ;;  %17715 = vmatpush3.bf16.msra.mxu1 %v18418_v56 }
0x5bd1   : > { %17716 = vmatprep.subr.bf16.mxu1 %v19715_v8 }
0x5bd4   : > { %17717 = vmatpush3.bf16.msra.mxu1 %v18419_v51 }
0x5bd5   : > { %17718 = vmatprep.subr.bf16.mxu1 %v19715_v8 }
0x5bd8   : > { %17719 = vmatpush3.bf16.msra.mxu1 %v18420_v42 }
0x5bd9   : > { %17720 = vmatprep.subr.bf16.mxu1 %v19715_v8 }
0x5bdc   : > { %17721 = vmatpush3.bf16.msra.mxu1 %v18421_v38 }
0x5ca2   : > { %v15059_v10 = vpop.f32.mrb[164].mxu1 }
0x5ca3   : > { %v15060_v4 = vadd.f32 %v16270_v23, %v15059_v10  ;;  %v17704_v3 = vpop.f32.mrb[165].mxu1 }
0x5ca4   : > { %v15062_v22 = vpop.f32.mrb[166].mxu1  ;;  %v18423_v3 = vld [vmem:[%s19984_s6 + $0x8] sm:$0xff]  }
0x5ca5   : > { %v21981_v13 = vadd.f32 %v15060_v4, %v21743_v44  ;;  %v17705_v46 = vpop.f32.mrb[167].mxu1  ;;  %v18422_v4 = vld [vmem:[%s19984_s6] sm:$0xff]  }
0x5ca7   : > { %v15066_v14 = vsel %vm2005_vm0, %v21981_v13, 0.0 }
0x5ca8   : > { %15067 = vadd.xlane.f32.xlu1 %v15066_v14 }
0x5d35   : > { %v15068_v7 = vpop.xlane.xlu1 %15067 }
0x5d36   : > { %v15069_v48 = vmul.f32 0.03125, %v15068_v7 }
0x5d38   : > { %v15070_v11 = vsub.f32 %v21981_v13, %v15069_v48 }
0x5d3a   : > { %v15071_v58 = vmul.f32 %v15070_v11, %v15070_v11 }
0x5d3c   : > { %v15072_v60 = vsel %vm2005_vm0, %v15071_v58, 0.0  ;;  %v16287_v58 = vld [vmem:[#allocation43] ss:$0 sm:$0xff] }
0x5d3d   : > { %15073 = vadd.xlane.f32.xlu0 %v15072_v60 }
0x5dca   : > { %v15074_v44 = vpop.xlane.xlu0 %15073 }
0x5dcb   : > { %v15075_v12 = vmul.f32 0.03125, %v15074_v44 }
0x5dcd   : > { %v15076_v53 = vadd.f32 1e-05, %v15075_v12 }
0x5dcf   : > { %18682 = vrsqrt.f32 %v15076_v53 }
0x5dd9   : > { %v18683_v52 = vpop.eup %18682 }
0x5dda   : > { %v15078_v43 = vmul.f32 %v18683_v52, %v15070_v11  ;;  %v16082_v52 = vld [vmem:[#allocation16] ss:$0 sm:$0xff] }
0x5ddc   : > { %v15085_v27 = vmul.f32 %v16274_v19, %v15078_v43 }
0x5dde   : > { %v15092_v5 = vadd.f32 %v16275_v63, %v15085_v27 }
0x5de0   : > { %v15093_v20 = vpack.c.bf16 %v15092_v5, %v15092_v5 }
0x5de2   : > { %17711 = vmatmul.mubr.msk.bf16.vlgmr.msra.gmra.mrb[176].mxu0 %vm2005_vm0, %v15093_v20 }
0x5de3   : > { %17730 = vmatprep.mubr.msk.bf16.mxu0 %vm19716_vm1, %v19715_v8  ;;  %17727 = vmatpush3.bf16.msra.mxu0 %v18422_v4 }
0x5de4   : > { %17728 = vmatprep.subr.bf16.mxu0 %v19715_v8 }
0x5de7   : > { %17729 = vmatpush3.bf16.msra.mxu0 %v18423_v3 }
0x5eb5   : > { %v15149_v0 = vpop.f32.mrb[176].mxu0 }
0x5eb6   : > { %v15150_v33 = vadd.f32 %v16276_v1, %v15149_v0  ;;  %v17712_v26 = vpop.f32.mrb[177].mxu0 }
0x5eb7   : > { %v15152_v31 = vpop.f32.mrb[178].mxu0 }
0x5eb8   : > { %15163 = vrot.lane.b32.xlu1 %v15150_v33, %s22353_s21  ;;  %v17713_v21 = vpop.f32.mrb[179].mxu0  ;;  %v16280_v9 = vmul.f32 -1.442695, %v15150_v33  ;;  %s22369_s21 = sld [smem:[#allocation89_spill]] }
0x5eba   : > { %18684 = vpow2.f32 %v16280_v9 }
0x5ebe   : > { %v16081_v44 = vld [vmem:[%s22369_s21] ss:$0 sm:$0xff] }
0x5ec4   : > { %v18685_v2 = vpop.eup %18684 }
0x5ec5   : > { %v15158_v25 = vadd.f32 1.0, %v18685_v2 }
0x5ec7   : > { %18686 = vrcp.f32 %v15158_v25 }
0x5ed1   : > { %v18687_v40 = vpop.eup %18686 }
0x5ed2   : > { %v15161_v49 = vmul.f32 %v18687_v40, %v15150_v33 }
0x5edc   : > { %8589 = vadd.xlane.f32.xlu1 %v8588_v30 }
0x5f2a   : > { %v15164_v34 = vpop.permute.xlu1 %15163 }
0x5f2b   : > { %v15166_v55 = vmul.f32 %v15164_v34, %v15161_v49 }
0x5f2d   : > { %v15167_v15 = vpack.c.bf16 %v15166_v55, %v15166_v55 }
0x5f2f   : > { %17723 = vmatmul.mubr.msk.bf16.vlgmr.msra.gmra.mrb[168].mxu1 %vm5218_vm11, %v15167_v15 }
0x5f69   : > { %v8590_v54 = vpop.xlane.xlu1 %8589 }
0x5f6a   : > { %v8591_v37 = vmul.f32 0.03125, %v8590_v54 }
0x5f6c   : > { %v8592_v18 = vsub.f32 %v8585_v17, %v8591_v37 }
0x5f6e   : > { %v8593_v23 = vmul.f32 %v8592_v18, %v8592_v18 }
0x5f70   : > { %v8594_v10 = vsel %vm2005_vm0, %v8593_v23, 0.0 }
0x6002   : > { %v15235_v16 = vpop.f32.mrb[168].mxu1 }
0x6003   : > { %v15236_v57 = vadd.f32 %v16281_v35, %v15235_v16  ;;  %v17724_v24 = vpop.f32.mrb[169].mxu1 }
0x6004   : > { %v15238_v45 = vpop.f32.mrb[170].mxu1 }
0x6005   : > { %v15241_v50 = vadd.f32 %v15236_v57, %v21981_v13  ;;  %v17725_v29 = vpop.f32.mrb[171].mxu1 }
0x6007   : > { %v15244_v36 = vsel %vm2005_vm0, %v15241_v50, 0.0 }
0x6008   : > { %15245 = vadd.xlane.f32.xlu0 %v15244_v36 }
0x6095   : > { %v15246_v39 = vpop.xlane.xlu0 %15245 }
0x6096   : > { %v15247_v47 = vmul.f32 0.03125, %v15246_v39 }
0x6098   : > { %v15248_v6 = vsub.f32 %v15241_v50, %v15247_v47 }
0x609a   : > { %v15249_v59 = vmul.f32 %v15248_v6, %v15248_v6 }
0x609c   : > { %v15250_v41 = vsel %vm2005_vm0, %v15249_v59, 0.0 }
0x609d   : > { %15251 = vadd.xlane.f32.xlu0 %v15250_v41 }
0x60a1   : > { %8595 = vadd.xlane.f32.xlu0 %v8594_v10 }
0x612a   : > { %v15252_v22 = vpop.xlane.xlu0 %15251 }
0x612b   : > { %v15253_v13 = vmul.f32 0.03125, %v15252_v22 }
0x612d   : > { %v15254_v46 = vadd.f32 1e-05, %v15253_v13 }
0x612e   : > { %v8596_v14 = vpop.xlane.xlu0 %8595 }
0x612f   : > { %18688 = vrsqrt.f32 %v15254_v46  ;;  %v8597_v7 = vmul.f32 0.03125, %v8596_v14 }
0x6131   : > { %v8598_v48 = vadd.f32 1e-05, %v8597_v7 }
0x6133   : > { %18690 = vrsqrt.f32 %v8598_v48 }
0x6139   : > { %v18689_v11 = vpop.eup %18688 }
0x613a   : > { %v15256_v60 = vmul.f32 %v18689_v11, %v15248_v6 }
0x613c   : > { %v15263_v8 = vmul.f32 %v16287_v58, %v15256_v60 }
0x613d   : > { %v18691_v62 = vpop.eup %18690 }
0x613e   : > { %v8600_v12 = vmul.f32 %v18691_v62, %v8592_v18  ;;  %v15270_v53 = vadd.f32 %v16288_v61, %v15263_v8 }
0x6140   : > { %v8607_v19 = vmul.f32 %v16081_v44, %v8600_v12  ;;  %v15276_v43 = vpack.c.bf16 %v15270_v53, %v15270_v53 }
0x6142   : > { %17731 = vmatmul.mubr.msk.bf16.vlgmr.msra.gmra.mrb[180].mxu0 %vm2005_vm0, %v15276_v43  ;;  %v8614_v63 = vadd.f32 %v16082_v52, %v8607_v19 }
0x6144   : > { %8615 = vst.msk [vmem:[%s1927_s30] sm:$0xff] %vm2005_vm0, %v8614_v63 }
0x6145   : > { %19489 = shalt.err (!%p19486_p7)
}
0x6146   : > { %s19490_s23 = scalar_lea.hbm %s22025_s27, 128  ;;  %s19494_s0 = scalar_lea.hbm %s19994_s19, 256 }
0x6147   : > { %p19491_p8 = scmp.ne.s32.totalorder %s22025_s27, %s19490_s23  ;;  %p19495_p6 = scmp.lt.u32.totalorder %s22025_s27, %s19994_s19 }
0x6148   : > { %p19496_p5 = scmp.lt.u32.totalorder %s19494_s0, %s19490_s23  ;;  %p19498_p9 = scmp.lt.u32.totalorder %s19490_s23, %s22025_s27 }
0x6149   : > { %p19492_p11 = pnand %p19491_p8, %p22370_p10 }
0x614a   : > { %p19497_p0 = por %p19496_p5, %p19495_p6 }
0x614b   : > { %p19493_p13 = pneg %p19492_p11 }
0x614c   : > { %p19499_p12 = por %p19498_p9, %p19497_p0 }
0x614e   : > { %p19500_p1 = pnand %p19499_p12, %p19493_p13 }
0x6150   : > { %19503 = shalt.err (!%p19500_p1)
}
0x6151   : > { %s22371_s21 = sld [smem:[#allocation114_spill]]  ;;  %v16289_v27 = vld [vmem:[%s19989_s8] ss:$0 sm:$0xff]  ;;  %s1934_s30 = scalar_lea.vmem [#allocation47], %s15854_s29 }
0x6152   : > { %18070 = dma.vmem_to_hbm [thread:$0]  (%p22370_p10), %s15359_s2, 128, %s22025_s27, %s15340_s11  }
0x6153   : > { %s15371_s10 = sshll.u32 %s1934_s30, 4  ;;  %s15345_s27 = scalar_lea.sflag [#allocation48], %s22013_s25  ;;  %s22049_s10 = int_to_ptr.vmem [resolvable:$true] %s15371_s10 }
0x6154   : > { %s19504_s2 = scalar_lea.vmem %s22049_s10, 128  ;;  %s19735_s29 = smov [#allocation47]  }
0x6155   : > { %p19505_p2 = scmp.ne.s32.totalorder %s22049_s10, %s19504_s2  ;;  %s19508_s11 = sshll.u32 %s19735_s29, 4  ;;  %s19509_s11 = int_to_ptr.vmem [resolvable:$false] %s19508_s11 }
0x6156   : > { %s19510_s28 = scalar_lea.vmem %s19509_s11, 256  ;;  %p19511_p7 = scmp.lt.s32.totalorder %s22049_s10, %s19509_s11 }
0x6157   : > { %s22047_s7 = scalar_lea.hbm %s22371_s21, %s16295_s20  ;;  %p19506_p3 = pnand %p19505_p2, %p22370_p10 }
0x6158   : > { %p19512_p8 = scmp.lt.s32.totalorder %s19510_s28, %s19504_s2 }
0x6159   : > { %p19507_p4 = pneg %p19506_p3 }
0x615a   : > { %p19513_p11 = por %p19512_p8, %p19511_p7 }
0x615c   : > { %p19514_p13 = pnand %p19513_p11, %p19507_p4 }
0x6215   : > { %v15332_v5 = vpop.f32.mrb[180].mxu0 }
0x6216   : > { %v15333_v20 = vadd.f32 %v16289_v27, %v15332_v5  ;;  %v17732_v56 = vpop.f32.mrb[181].mxu0 }
0x6217   : > { %v15335_v51 = vpop.f32.mrb[182].mxu0 }
0x6218   : > { %v17733_v42 = vpop.f32.mrb[183].mxu0  ;;  %15338 = vst.msk [vmem:[%s1934_s30] sm:$0xff] %vm5218_vm11, %v15333_v20 }
0x6219   : > { %19517 = shalt.err (!%p19514_p13)
}
0x621a   : > { %s19518_s25 = scalar_lea.hbm %s22047_s7, 128  ;;  %s19522_s20 = scalar_lea.hbm %s22371_s21, 256 }
0x621b   : > { %p19519_p6 = scmp.ne.s32.totalorder %s22047_s7, %s19518_s25  ;;  %p19523_p9 = scmp.lt.u32.totalorder %s22047_s7, %s22371_s21 }
0x621c   : > { %p19524_p12 = scmp.lt.u32.totalorder %s19522_s20, %s19518_s25  ;;  %p19526_p2 = scmp.lt.u32.totalorder %s19518_s25, %s22047_s7 }
0x621d   : > { %p19520_p5 = pnand %p19519_p6, %p22370_p10 }
0x621e   : > { %p19525_p1 = por %p19524_p12, %p19523_p9 }
0x621f   : > { %p19521_p0 = pneg %p19520_p5 }
0x6220   : > { %p19527_p3 = por %p19526_p2, %p19525_p1 }
0x6222   : > { %p19528_p4 = pnand %p19527_p3, %p19521_p0 }
0x6224   : > { %19531 = shalt.err (!%p19528_p4)
}
0x6225   : > { %18071 = dma.vmem_to_hbm [thread:$0]  (%p22370_p10), %s22049_s10, 128, %s22047_s7, %s15345_s27  }
0x6226 PF: > { %s22372_s4 = sld [smem:[#allocation117_spill]]  ;;  %s22373_s26 = sld [smem:[#allocation115_spill]] }
0x6227   : > { %s22374_s23 = sld [smem:[#allocation120_spill]] }
0x622c   : > { %p18222_p7 = scmp.ge.s32.totalorder %s22372_s4, 2  ;;  %s15383_s0 = sand.u32 1, %s22373_s26  }
0x622d   : > { %p22375_p8 = scmp.ne.s32.totalorder %s22374_s23, 0  ;;  %s15384_s30 = scalar_lea.sflag [#allocation4], %s15383_s0 }
0x622f   : > { %p18160_p11 = pnand %p18222_p7, %p22375_p8 }
0x6231   : > { %19609 = dma.done.wait (!%p18160_p11), %s15384_s30, 128  }
0x6232   : > { %19611 = vsyncadd (!%p18160_p11), %s15384_s30, 4294967168  ;;  %s15393_s2 = scalar_lea.sflag [#allocation48], %s15383_s0 }
0x6233   : > { %19613 = dma.done.wait (!%p18160_p11), %s15393_s2, 128  }
0x6234   : > { %19615 = vsyncadd (!%p18160_p11), %s15393_s2, 4294967168  ;;  %s22376_s26 = sld [smem:[#allocation118_spill]]  ;;  %s22377_s15 = sld [smem:[#allocation116_spill]] }
0x6235   : > { %s22378_s23 = sld [smem:[#allocation119_spill]]  ;;  %s22379_s0 = smov %s19622_s22 }
0x623a   : > { %p132_p10 = scmp.ge.s32.totalorder %s22376_s26, 4   ;;  %s22380_s22 = smov %s22377_s15 }
0x623c   :  { %134 = sbr.rel (!%p132_p10) target bundleno = 130 (0x82), region = 481 }
0x6243   :  { %15398 = vsyncpa [#allocation3], 1 }
0x6244   :  { %15400 = vsyncpa [#allocation3 + $0x1], 1 }
0x6245   :  { %15401 = vsyncpa [#allocation6], 1 }
0x6246   :  { %15402 = vsyncpa [#allocation9], 1 }
0x6247   :  { %15403 = vsyncpa [#allocation12], 1 }
0x6248   :  { %15404 = vsyncpa [#allocation15], 1 }
0x6249   :  { %15405 = vsyncpa [#allocation18], 1 }
0x624a   :  { %15406 = vsyncpa [#allocation21], 1 }
0x624b   :  { %15407 = vsyncpa [#allocation24], 1 }
0x624c   :  { %15408 = vsyncpa [#allocation27], 1 }
0x624d   :  { %15409 = vsyncpa [#allocation30], 1 }
0x624e   :  { %15410 = vsyncpa [#allocation33], 1 }
0x624f   :  { %15411 = vsyncpa [#allocation36], 1 }
0x6250   :  { %15412 = vsyncpa [#allocation39], 1 }
0x6251   :  { %15413 = vsyncpa [#allocation42], 1 }
0x6252   :  { %15414 = vsyncpa [#allocation45], 1 }
0x6253   :  { %15415 = vsyncpa [#allocation4], 1 }
0x6254   :  { %15417 = vsyncpa [#allocation4 + $0x1], 1 }
0x6255   :  { %15418 = vsyncpa [#allocation48], 1 }
0x6256   :  { %15420 = vsyncpa [#allocation48 + $0x1], 1 }

</bundles_post_ra>
